<compile_context>
chip_gen: v7x
topology: tpu7x:2x2x1
jax: 0.10.0
libtpu: 0.0.40
codegen_flags: <defaults>
</compile_context>

<pallas_src>
import functools
import math
from typing import NamedTuple

import jax
import jax.numpy as jnp
from jax.experimental import pallas as pl
from jax.experimental.pallas import tpu as pltpu

# NOTE: the original module literally defines euler_gamma = 0.6 (not the true
# Euler-Mascheroni 0.5772...); we keep 0.6 to match its forward-pass output.
EULER_GAMMA = 0.6


class Box(NamedTuple):
    z: jnp.ndarray   # (B, D) lower corner
    Z: jnp.ndarray   # (B, D) upper corner


def _round_up(x, m):
    return (x + m - 1) // m * m


def _tpu_defaults():
    """Per-TPU-generation defaults: (compute_dtype, B tile, vmem limit, is_v7)."""
    kind = ""
    try:
        dev = jax.devices()[0]
        if dev.platform == "tpu":
            kind = dev.device_kind.lower()
    except Exception:
        pass
    is_v7 = ("v7" in kind) or ("7x" in kind)
    is_v6_plus = is_v7 or ("v6" in kind)
    # bf16 corner transcendentals only where EUP/VPU support bf16 (v6e/v7x);
    # f32 on v5e and older (bf16 there just adds convert work for nothing).
    compute_dtype = jnp.bfloat16 if is_v6_plus else jnp.float32
    # v5e/v6e: 128 MiB physical VMEM -> bigger B tiles + higher scoped limit.
    # v7x: 64 MiB physical / 32 MiB scoped default -> stay conservative.
    tb_target = 32 if is_v7 else 64
    vmem_limit = (32 if is_v7 else 64) * 1024 * 1024
    return compute_dtype, tb_target, vmem_limit, is_v7


# --------------------------------------------------------------------------
# Pallas kernel: one (tb, tt) tile of  out[b, t] = min(0, vol1[b, t] - vol2[b])
# where vol1/vol2 are gumbel-box soft log-volumes (see BoxDecoder.forward /
# log_soft_volume in the reference PyTorch code).
# --------------------------------------------------------------------------
def _box_decoder_kernel(men_z_ref, men_Z_ref, type_zT_ref, type_ZT_ref,
                        type_den_ref, w_ref, b_ref, out_ref,
                        *, gumbel_beta, temp, compute_dtype):
    f32 = jnp.float32
    cdt = compute_dtype
    # clamp for softplus(u*temp): max(softplus(u*temp), eps*temp) so the
    # reference's clamp_min(eps) on softplus(u, beta=temp) is reproduced
    # exactly after the -log(temp) fold (which cancels between vol1 and vol2).
    eps_t = float(jnp.finfo(jnp.float32).tiny) * temp
    shift = 2.0 * EULER_GAMMA * gumbel_beta
    inv_beta = 1.0 / gumbel_beta

    tb, D = men_z_ref.shape
    tt = type_zT_ref.shape[1]

    men_z = men_z_ref[...].astype(f32)                            # (tb, D)
    men_Z = men_Z_ref[...].astype(f32)

    # ---- mention-side work: linear_density, mention density, self-volume ----
    # Recomputed every grid step (cheap (tb, D) work vs. the (tb, tt, D)
    # hot loop) so nothing is carried in scratch across the T sweep and both
    # grid axes can stay "parallel" (megacore-friendly, order-independent).
    w = w_ref[...].astype(f32)                                    # (1, D)
    bias = b_ref[0, 0].astype(f32)                                # SMEM scalar
    lz = jnp.sum(men_z * w, axis=-1, keepdims=True) + bias        # (tb, 1)
    lZ = jnp.sum(men_Z * w, axis=-1, keepdims=True) + bias        # (tb, 1)
    md = jax.nn.sigmoid(lz) + jax.nn.sigmoid(lZ) + 1.0            # (tb, 1)
    u2 = (men_Z - men_z - shift) * temp
    s2 = jnp.sum(jnp.log(jnp.maximum(jax.nn.softplus(u2), eps_t)),
                 axis=-1, keepdims=True)                          # (tb, 1)

    # ---- gumbel intersection log-volume, accumulated over D ------------------
    # Per-d intermediates are (tb, tt): the type axis (multiple of 128) is on
    # lanes, so every VPU/EUP op runs on fully dense vregs regardless of D.
    men_zc = men_z.astype(cdt)                                    # (tb, D)
    men_Zc = men_Z.astype(cdt)
    type_zc = type_zT_ref[...].astype(cdt)                        # (D, tt)
    type_Zc = type_ZT_ref[...].astype(cdt)

    s1 = jnp.zeros((tb, tt), f32)
    # TODO(synk): for very large D (>~1k) this static unroll should become a
    # lax.fori_loop / extra grid axis; typical box-embedding dims (tens to a
    # few hundred) are fine and keep LLO scheduling visibility.
    for d in range(D):
        zm = men_zc[:, d:d + 1]                                   # (tb, 1)
        Zm = men_Zc[:, d:d + 1]                                   # (tb, 1)
        zt = type_zc[d:d + 1, :]                                  # (1, tt)
        Zt = type_Zc[d:d + 1, :]                                  # (1, tt)
        # Fused gumbel corners (min_pt / max_pt are never materialized):
        #   min_pt = max(zm, zt) + beta*log1p(exp(-|zm - zt|/beta))
        #   max_pt = min(Zm, Zt) - beta*log1p(exp(-|Zm - Zt|/beta))
        # The reference's extra max/min clamps are redundant (log1p terms >= 0).
        adj = (jnp.log1p(jnp.exp(-jnp.abs(zm - zt) * inv_beta))
               + jnp.log1p(jnp.exp(-jnp.abs(Zm - Zt) * inv_beta)))        # cdt
        width = jnp.minimum(Zm, Zt) - jnp.maximum(zm, zt)                 # cdt
        # Cast to f32 BEFORE softplus / eps clamp / final log (bf16 numerics).
        gap = (width.astype(f32) - gumbel_beta * adj.astype(f32) - shift) * temp
        s1 = s1 + jnp.log(jnp.maximum(jax.nn.softplus(gap), eps_t))       # f32

    # log P = vol1 - vol2; the shared -D*log(temp) + log(scale) constants
    # cancel exactly, leaving  s1 - s2 + (type_density - mention_density)/2.
    td = type_den_ref[...].astype(f32)                                    # (1, tt)
    out_ref[...] = jnp.minimum(s1 - s2 + 0.5 * (td - md), 0.0)


def box_decoder_log_probs(men_z, men_Z, type_z, type_Z, type_den_sig,
                          w_row, bias, *, gumbel_beta, temp, scale,
                          compute_dtype=None):
    """Clipped gumbel-box log P(type | mention) for all (concatenated) types.

    men_z/men_Z: (B, D); type_z/type_Z: (T, D); type_den_sig: (1, T)
    w_row: (1, D); bias: (1, 1).  Returns (B, T) float32.

    `scale` (softplus_scale) enters the reference only as +log(scale) in both
    vol1 and vol2, so it cancels in vol1 - vol2 and is unused here.
    """
    assert gumbel_beta > 0.0, "only the gumbel (gumbel_beta > 0) branch is implemented"
    B, D = men_z.shape
    T = type_z.shape[0]

    auto_cdt, tb_target, vmem_limit, is_v7 = _tpu_defaults()
    if compute_dtype is None:
        compute_dtype = auto_cdt

    # ---- T tiles: pick tt minimizing padding (tie-break: larger tile) --------
    tt = min((128, 256, 384, 512), key=lambda c: (_round_up(T, c), -c))
    Tp = _round_up(T, tt)
    # Type boxes go in transposed (D, T) so the hot loop's lane axis is the
    # 128-dense type axis; padded columns are sliced off at the end.
    type_zT = type_z.T
    type_ZT = type_Z.T
    if Tp != T:
        pad = Tp - T
        type_zT = jnp.pad(type_zT, ((0, 0), (0, pad)))
        type_ZT = jnp.pad(type_ZT, ((0, 0), (0, pad)))
        type_den_sig = jnp.pad(type_den_sig, ((0, 0), (0, pad)))
    num_t_tiles = Tp // tt

    # ---- B tiles --------------------------------------------------------------
    if B <= tb_target:
        tb = B
        # v7x: with a single T tile, split B so both TensorCores get work.
        if is_v7 and num_t_tiles == 1 and B > 8:
            tb = _round_up((B + 1) // 2, 8)
    else:
        tb = tb_target
    Bp = _round_up(B, tb)
    if Bp != B:
        men_z = jnp.pad(men_z, ((0, Bp - B), (0, 0)))
        men_Z = jnp.pad(men_Z, ((0, Bp - B), (0, 0)))

    kernel = functools.partial(
        _box_decoder_kernel,
        gumbel_beta=float(gumbel_beta), temp=float(temp),
        compute_dtype=compute_dtype)

    out = pl.pallas_call(
        kernel,
        grid=(Bp // tb, Tp // tt),
        in_specs=[
            pl.BlockSpec((tb, D), lambda i, j: (i, 0)),     # mention z
            pl.BlockSpec((tb, D), lambda i, j: (i, 0)),     # mention Z
            pl.BlockSpec((D, tt), lambda i, j: (0, j)),     # type z  (transposed)
            pl.BlockSpec((D, tt), lambda i, j: (0, j)),     # type Z  (transposed)
            pl.BlockSpec((1, tt), lambda i, j: (0, j)),     # sigmoid(type_density)
            pl.BlockSpec((1, D), lambda i, j: (0, 0)),      # linear_density weight
            pl.BlockSpec(memory_space=pltpu.MemorySpace.SMEM),  # bias (1, 1)
        ],
        out_specs=pl.BlockSpec((tb, tt), lambda i, j: (i, j)),
        out_shape=jax.ShapeDtypeStruct((Bp, Tp), jnp.float32),
        compiler_params=pltpu.CompilerParams(
            # Both axes independent (no cross-step scratch) -> megacore may
            # split over whichever axis has >= 2 tiles.
            dimension_semantics=("parallel", "parallel"),
            vmem_limit_bytes=vmem_limit),
    )(men_z, men_Z, type_zT, type_ZT, type_den_sig, w_row, bias)

    return out[:B, :T]


# --------------------------------------------------------------------------
# BoxDecoder module (JAX side): parameter setup + glue, heavy math in kernel.
# --------------------------------------------------------------------------
class BoxDecoderJAX:
    def __init__(self, answer_num_l1, answer_num_l2, embedding_dim,
                 inv_softplus_temp=1.0, softplus_scale=1.0, gumbel_beta=1.0,
                 compute_dtype=None, key=None):
        if key is None:
            key = jax.random.PRNGKey(0)
        self.D = embedding_dim
        self.T1 = answer_num_l1
        self.T2 = answer_num_l2
        self.temp = inv_softplus_temp
        self.scale = softplus_scale
        self.gumbel_beta = gumbel_beta
        self.compute_dtype = compute_dtype   # None -> per-generation default

        ks = jax.random.split(key, 6)
        # nn.Embedding default init ~ N(0, 1)
        self.emb_l1 = jax.random.normal(ks[0], (self.T1, 2 * self.D), jnp.float32)
        self.emb_l2 = jax.random.normal(ks[1], (self.T2, 2 * self.D), jnp.float32)
        # type_density parameters ~ randn
        self.type_density_l1 = jax.random.normal(ks[2], (1, self.T1), jnp.float32)
        self.type_density_l2 = jax.random.normal(ks[3], (1, self.T2), jnp.float32)
        # linear_density: Linear(D, 1), default uniform(-1/sqrt(D), 1/sqrt(D))
        bound = 1.0 / math.sqrt(self.D)
        self.lin_w_row = jax.random.uniform(ks[4], (1, self.D), jnp.float32,
                                            -bound, bound)
        self.lin_b = jax.random.uniform(ks[5], (1, 1), jnp.float32, -bound, bound)

    @staticmethod
    def _from_split(emb, D):
        # BoxTensor.from_split: z = first half, Z = second half
        return emb[:, :D], emb[:, D:]

    def forward(self, mc_box: Box, targets_l1=None, targets_l2=None,
                is_training=True):
        tz1, tZ1 = self._from_split(self.emb_l1, self.D)
        tz2, tZ2 = self._from_split(self.emb_l2, self.D)
        # Merge both levels into one kernel launch (shared mention-side work,
        # one lane-dense T sweep).
        type_z = jnp.concatenate([tz1, tz2], axis=0)
        type_Z = jnp.concatenate([tZ1, tZ2], axis=0)
        type_den = jax.nn.sigmoid(
            jnp.concatenate([self.type_density_l1, self.type_density_l2], axis=-1))

        log_probs = box_decoder_log_probs(
            mc_box.z, mc_box.Z, type_z, type_Z, type_den,
            self.lin_w_row, self.lin_b,
            gumbel_beta=self.gumbel_beta, temp=self.temp, scale=self.scale,
            compute_dtype=self.compute_dtype)

        log_probs_l1 = log_probs[:, :self.T1]
        log_probs_l2 = log_probs[:, self.T1:self.T1 + self.T2]

        # TODO(synk): the original prints a clipping warning; clipping itself
        # is applied (min with 0) but the print is omitted.
        if is_training and targets_l1 is not None:
            return (log_probs_l1, None, targets_l1, targets_l2, log_probs_l2)
        return (log_probs_l1, None, None, None, log_probs_l2)


# --------------------------------------------------------------------------
# Pure-JAX reference (mirrors the PyTorch math) for a correctness check.
# --------------------------------------------------------------------------
def reference_level(men_z, men_Z, tz, tZ, td_sig, w_row, b, gumbel_beta, temp,
                    scale):
    eps = float(jnp.finfo(jnp.float32).tiny)
    B, D = men_z.shape
    T = tz.shape[0]

    def lin(x):
        return jnp.sum(x * w_row, axis=-1, keepdims=True) + b[0, 0]

    md = jax.nn.sigmoid(lin(men_z)) + jax.nn.sigmoid(lin(men_Z)) + 1.0   # (B, 1)
    shift = 2.0 * EULER_GAMMA * gumbel_beta
    log_s = math.log(scale)

    def sp(x):
        return jax.nn.softplus(x * temp) / temp

    vol2 = (jnp.sum(jnp.log(jnp.maximum(sp(men_Z - men_z - shift), eps)),
                    axis=-1, keepdims=True) + log_s + md)                # (B, 1)

    zs = jnp.stack([jnp.broadcast_to(men_z[:, None, :], (B, T, D)),
                    jnp.broadcast_to(tz[None, :, :], (B, T, D))])
    Zs = jnp.stack([jnp.broadcast_to(men_Z[:, None, :], (B, T, D)),
                    jnp.broadcast_to(tZ[None, :, :], (B, T, D))])
    min_pt = jnp.maximum(gumbel_beta * jax.nn.logsumexp(zs / gumbel_beta, axis=0),
                         jnp.max(zs, axis=0))
    max_pt = jnp.minimum(-gumbel_beta * jax.nn.logsumexp(-Zs / gumbel_beta, axis=0),
                         jnp.min(Zs, axis=0))
    vol1 = (jnp.sum(jnp.log(jnp.maximum(sp(max_pt - min_pt - shift), eps)), axis=-1)
            + log_s + (td_sig + md) / 2.0)                               # (B, T)
    return jnp.minimum(vol1 - vol2, 0.0)


if __name__ == "__main__":
    B, D = 2, 32
    T1, T2 = 16, 24

    key = jax.random.PRNGKey(0)
    k_mod, k_z, k_off = jax.random.split(key, 3)

    # f32 compute for the strict reference check (the bf16/auto path is
    # smoke-tested separately below).
    decoder = BoxDecoderJAX(answer_num_l1=T1, answer_num_l2=T2, embedding_dim=D,
                            compute_dtype=jnp.float32, key=k_mod)

    # mention box: z lower corner, Z = z + positive offset
    z = 0.1 * jax.random.normal(k_z, (B, D), jnp.float32)
    Z = z + jax.nn.softplus(jax.random.normal(k_off, (B, D), jnp.float32))
    mc_box = Box(z=z, Z=Z)

    out = decoder.forward(mc_box,
                          targets_l1=jnp.zeros((B, T1), jnp.float32),
                          targets_l2=jnp.zeros((B, T2), jnp.float32),
                          is_training=True)
    log_probs_l1, _, _, _, log_probs_l2 = out
    jax.block_until_ready((log_probs_l1, log_probs_l2))

    # ---- correctness check against pure-JAX reference (f32 path) -----------
    tz1, tZ1 = decoder._from_split(decoder.emb_l1, D)
    tz2, tZ2 = decoder._from_split(decoder.emb_l2, D)
    ref1 = reference_level(z, Z, tz1, tZ1, jax.nn.sigmoid(decoder.type_density_l1),
                           decoder.lin_w_row, decoder.lin_b,
                           decoder.gumbel_beta, decoder.temp, decoder.scale)
    ref2 = reference_level(z, Z, tz2, tZ2, jax.nn.sigmoid(decoder.type_density_l2),
                           decoder.lin_w_row, decoder.lin_b,
                           decoder.gumbel_beta, decoder.temp, decoder.scale)
    assert log_probs_l1.shape == (B, T1) and log_probs_l2.shape == (B, T2)
    assert jnp.allclose(log_probs_l1, ref1, atol=1e-4, rtol=1e-4)
    assert jnp.allclose(log_probs_l2, ref2, atol=1e-4, rtol=1e-4)

    # ---- auto (per-generation) compute-dtype path: bf16 corners on v6e/v7x,
    # f32 on v5e/older.  The gap is cast to f32 before softplus/log, so this
    # stays close to the f32 result.
    type_z_cat = jnp.concatenate([tz1, tz2], axis=0)
    type_Z_cat = jnp.concatenate([tZ1, tZ2], axis=0)
    td_cat = jax.nn.sigmoid(jnp.concatenate(
        [decoder.type_density_l1, decoder.type_density_l2], axis=-1))
    out_auto = box_decoder_log_probs(
        z, Z, type_z_cat, type_Z_cat, td_cat, decoder.lin_w_row, decoder.lin_b,
        gumbel_beta=decoder.gumbel_beta, temp=decoder.temp, scale=decoder.scale,
        compute_dtype=None)
    jax.block_until_ready(out_auto)
    out_f32 = jnp.concatenate([log_probs_l1, log_probs_l2], axis=-1)
    assert out_auto.shape == (B, T1 + T2)
    assert bool(jnp.all(jnp.isfinite(out_auto)))
    assert bool(jnp.all(out_auto <= 0.0))
    assert float(jnp.mean(jnp.abs(out_auto - out_f32))) < 0.5

    print("KERNEL_OK")
</pallas_src>

<mosaic_0001>
module attributes {stable_mosaic.version = 11 : i64} {
  func.func @_box_decoder_kernel(%arg0: i32, %arg1: i32, %arg2: memref<2x32xf32, #tpu.memory_space<vmem>>, %arg3: memref<2x32xf32, #tpu.memory_space<vmem>>, %arg4: memref<32x128xf32, #tpu.memory_space<vmem>>, %arg5: memref<32x128xf32, #tpu.memory_space<vmem>>, %arg6: memref<1x128xf32, #tpu.memory_space<vmem>>, %arg7: memref<1x32xf32, #tpu.memory_space<vmem>>, %arg8: memref<1x1xf32, #tpu.memory_space<smem>>, %arg9: memref<2x128xf32, #tpu.memory_space<vmem>>) attributes {dimension_semantics = [#tpu.dimension_semantics<parallel>, #tpu.dimension_semantics<parallel>], iteration_bounds = array<i64: 1, 1>, scalar_prefetch = 0 : i64, scratch_operands = 0 : i64, tpu.core_type = #tpu.core_type<tc>, window_params = [{transform_indices = @transform_0, window_bounds = array<i64: 2, 32>}, {transform_indices = @transform_1, window_bounds = array<i64: 2, 32>}, {transform_indices = @transform_2, window_bounds = array<i64: 32, 128>}, {transform_indices = @transform_3, window_bounds = array<i64: 32, 128>}, {transform_indices = @transform_4, window_bounds = array<i64: 1, 128>}, {pipeline_mode = #tpu.pipeline_mode<synchronous>, transform_indices = @transform_5, window_bounds = array<i64: 1, 32>}, {transform_indices = @transform_6, window_bounds = array<i64: 1, 1>}, {transform_indices = @transform_7, window_bounds = array<i64: 2, 128>}]} {
    %c0 = arith.constant 0 : index
    %c0_0 = arith.constant 0 : index
    %0 = vector.load %arg2[%c0, %c0_0] : memref<2x32xf32, #tpu.memory_space<vmem>>, vector<2x32xf32>
    %c0_1 = arith.constant 0 : index
    %c0_2 = arith.constant 0 : index
    %1 = vector.load %arg3[%c0_1, %c0_2] : memref<2x32xf32, #tpu.memory_space<vmem>>, vector<2x32xf32>
    %c0_3 = arith.constant 0 : index
    %c0_4 = arith.constant 0 : index
    %2 = vector.load %arg7[%c0_3, %c0_4] : memref<1x32xf32, #tpu.memory_space<vmem>>, vector<1x32xf32>
    %c0_5 = arith.constant 0 : index
    %c0_6 = arith.constant 0 : index
    %3 = memref.load %arg8[%c0_5, %c0_6] : memref<1x1xf32, #tpu.memory_space<smem>>
    %4 = vector.broadcast %2 : vector<1x32xf32> to vector<2x32xf32>
    %5 = arith.mulf %0, %4 : vector<2x32xf32>
    %cst = arith.constant dense<0.000000e+00> : vector<2xf32>
    %6 = vector.multi_reduction <add>, %5, %cst [1] : vector<2x32xf32> to vector<2xf32>
    %7 = vector.shape_cast %6 : vector<2xf32> to vector<2x1xf32>
    %8 = vector.broadcast %3 : f32 to vector<2x1xf32>
    %9 = arith.addf %7, %8 : vector<2x1xf32>
    %10 = vector.broadcast %2 : vector<1x32xf32> to vector<2x32xf32>
    %11 = arith.mulf %1, %10 : vector<2x32xf32>
    %cst_7 = arith.constant dense<0.000000e+00> : vector<2xf32>
    %12 = vector.multi_reduction <add>, %11, %cst_7 [1] : vector<2x32xf32> to vector<2xf32>
    %13 = vector.shape_cast %12 : vector<2xf32> to vector<2x1xf32>
    %14 = vector.broadcast %3 : f32 to vector<2x1xf32>
    %15 = arith.addf %13, %14 : vector<2x1xf32>
    %16 = arith.negf %9 : vector<2x1xf32>
    %17 = math.exp %16 : vector<2x1xf32>
    %cst_8 = arith.constant 1.000000e+00 : f32
    %18 = vector.broadcast %cst_8 : f32 to vector<2x1xf32>
    %19 = arith.addf %18, %17 : vector<2x1xf32>
    %20 = arith.divf %18, %19 : vector<2x1xf32>
    %21 = arith.negf %15 : vector<2x1xf32>
    %22 = math.exp %21 : vector<2x1xf32>
    %cst_9 = arith.constant 1.000000e+00 : f32
    %23 = vector.broadcast %cst_9 : f32 to vector<2x1xf32>
    %24 = arith.addf %23, %22 : vector<2x1xf32>
    %25 = arith.divf %23, %24 : vector<2x1xf32>
    %26 = arith.addf %20, %25 : vector<2x1xf32>
    %cst_10 = arith.constant 1.000000e+00 : f32
    %27 = vector.broadcast %cst_10 : f32 to vector<2x1xf32>
    %28 = arith.addf %26, %27 : vector<2x1xf32>
    %29 = arith.subf %1, %0 : vector<2x32xf32>
    %cst_11 = arith.constant 1.200000e+00 : f32
    %30 = vector.broadcast %cst_11 : f32 to vector<2x32xf32>
    %31 = arith.subf %29, %30 : vector<2x32xf32>
    %cst_12 = arith.constant 1.000000e+00 : f32
    %32 = vector.broadcast %cst_12 : f32 to vector<2x32xf32>
    %33 = arith.mulf %31, %32 : vector<2x32xf32>
    %cst_13 = arith.constant 0.000000e+00 : f32
    %34 = vector.broadcast %cst_13 : f32 to vector<2x32xf32>
    %35 = arith.maximumf %33, %34 : vector<2x32xf32>
    %36 = vector.broadcast %cst_13 : f32 to vector<2x32xf32>
    %37 = arith.subf %33, %36 : vector<2x32xf32>
    %38 = arith.cmpf one, %37, %37 : vector<2x32xf32>
    %39 = vector.broadcast %cst_13 : f32 to vector<2x32xf32>
    %40 = arith.addf %33, %39 : vector<2x32xf32>
    %41 = math.absf %37 : vector<2x32xf32>
    %cst_14 = arith.constant 0.000000e+00 : f32
    %42 = vector.broadcast %cst_14 : f32 to vector<2x32xf32>
    %43 = arith.subf %42, %41 : vector<2x32xf32>
    %44 = math.exp %43 : vector<2x32xf32>
    %45 = math.log1p %44 : vector<2x32xf32>
    %46 = arith.addf %35, %45 : vector<2x32xf32>
    %47 = arith.select %38, %40, %46 : vector<2x32xi1>, vector<2x32xf32>
    %cst_15 = arith.constant 1.17549435E-38 : f32
    %48 = vector.broadcast %cst_15 : f32 to vector<2x32xf32>
    %49 = arith.maximumf %47, %48 : vector<2x32xf32>
    %50 = math.log %49 : vector<2x32xf32>
    %cst_16 = arith.constant dense<0.000000e+00> : vector<2xf32>
    %51 = vector.multi_reduction <add>, %50, %cst_16 [1] : vector<2x32xf32> to vector<2xf32>
    %52 = vector.shape_cast %51 : vector<2xf32> to vector<2x1xf32>
    %c0_17 = arith.constant 0 : index
    %c0_18 = arith.constant 0 : index
    %53 = vector.load %arg4[%c0_17, %c0_18] : memref<32x128xf32, #tpu.memory_space<vmem>>, vector<32x128xf32>
    %c0_19 = arith.constant 0 : index
    %c0_20 = arith.constant 0 : index
    %54 = vector.load %arg5[%c0_19, %c0_20] : memref<32x128xf32, #tpu.memory_space<vmem>>, vector<32x128xf32>
    %cst_21 = arith.constant 0.000000e+00 : f32
    %55 = vector.broadcast %cst_21 : f32 to vector<2x128xf32>
    %56 = vector.extract_strided_slice %0 {offsets = [0, 0], sizes = [2, 1], strides = [1, 1]} : vector<2x32xf32> to vector<2x1xf32>
    %57 = vector.extract_strided_slice %1 {offsets = [0, 0], sizes = [2, 1], strides = [1, 1]} : vector<2x32xf32> to vector<2x1xf32>
    %58 = vector.extract_strided_slice %53 {offsets = [0, 0], sizes = [1, 128], strides = [1, 1]} : vector<32x128xf32> to vector<1x128xf32>
    %59 = vector.extract_strided_slice %54 {offsets = [0, 0], sizes = [1, 128], strides = [1, 1]} : vector<32x128xf32> to vector<1x128xf32>
    %60 = vector.broadcast %56 : vector<2x1xf32> to vector<2x128xf32>
    %61 = vector.broadcast %58 : vector<1x128xf32> to vector<2x128xf32>
    %62 = arith.subf %60, %61 : vector<2x128xf32>
    %63 = math.absf %62 : vector<2x128xf32>
    %cst_22 = arith.constant 0.000000e+00 : f32
    %64 = vector.broadcast %cst_22 : f32 to vector<2x128xf32>
    %65 = arith.subf %64, %63 : vector<2x128xf32>
    %cst_23 = arith.constant 1.000000e+00 : f32
    %66 = vector.broadcast %cst_23 : f32 to vector<2x128xf32>
    %67 = arith.mulf %65, %66 : vector<2x128xf32>
    %68 = math.exp %67 : vector<2x128xf32>
    %69 = math.log1p %68 : vector<2x128xf32>
    %70 = vector.broadcast %57 : vector<2x1xf32> to vector<2x128xf32>
    %71 = vector.broadcast %59 : vector<1x128xf32> to vector<2x128xf32>
    %72 = arith.subf %70, %71 : vector<2x128xf32>
    %73 = math.absf %72 : vector<2x128xf32>
    %cst_24 = arith.constant 0.000000e+00 : f32
    %74 = vector.broadcast %cst_24 : f32 to vector<2x128xf32>
    %75 = arith.subf %74, %73 : vector<2x128xf32>
    %cst_25 = arith.constant 1.000000e+00 : f32
    %76 = vector.broadcast %cst_25 : f32 to vector<2x128xf32>
    %77 = arith.mulf %75, %76 : vector<2x128xf32>
    %78 = math.exp %77 : vector<2x128xf32>
    %79 = math.log1p %78 : vector<2x128xf32>
    %80 = arith.addf %69, %79 : vector<2x128xf32>
    %81 = vector.broadcast %57 : vector<2x1xf32> to vector<2x128xf32>
    %82 = vector.broadcast %59 : vector<1x128xf32> to vector<2x128xf32>
    %83 = arith.minimumf %81, %82 : vector<2x128xf32>
    %84 = vector.broadcast %56 : vector<2x1xf32> to vector<2x128xf32>
    %85 = vector.broadcast %58 : vector<1x128xf32> to vector<2x128xf32>
    %86 = arith.maximumf %84, %85 : vector<2x128xf32>
    %87 = arith.subf %83, %86 : vector<2x128xf32>
    %cst_26 = arith.constant 1.000000e+00 : f32
    %88 = vector.broadcast %cst_26 : f32 to vector<2x128xf32>
    %89 = arith.mulf %88, %80 : vector<2x128xf32>
    %90 = arith.subf %87, %89 : vector<2x128xf32>
    %cst_27 = arith.constant 1.200000e+00 : f32
    %91 = vector.broadcast %cst_27 : f32 to vector<2x128xf32>
    %92 = arith.subf %90, %91 : vector<2x128xf32>
    %cst_28 = arith.constant 1.000000e+00 : f32
    %93 = vector.broadcast %cst_28 : f32 to vector<2x128xf32>
    %94 = arith.mulf %92, %93 : vector<2x128xf32>
    %cst_29 = arith.constant 0.000000e+00 : f32
    %95 = vector.broadcast %cst_29 : f32 to vector<2x128xf32>
    %96 = arith.maximumf %94, %95 : vector<2x128xf32>
    %97 = vector.broadcast %cst_29 : f32 to vector<2x128xf32>
    %98 = arith.subf %94, %97 : vector<2x128xf32>
    %99 = arith.cmpf one, %98, %98 : vector<2x128xf32>
    %100 = vector.broadcast %cst_29 : f32 to vector<2x128xf32>
    %101 = arith.addf %94, %100 : vector<2x128xf32>
    %102 = math.absf %98 : vector<2x128xf32>
    %cst_30 = arith.constant 0.000000e+00 : f32
    %103 = vector.broadcast %cst_30 : f32 to vector<2x128xf32>
    %104 = arith.subf %103, %102 : vector<2x128xf32>
    %105 = math.exp %104 : vector<2x128xf32>
    %106 = math.log1p %105 : vector<2x128xf32>
    %107 = arith.addf %96, %106 : vector<2x128xf32>
    %108 = arith.select %99, %101, %107 : vector<2x128xi1>, vector<2x128xf32>
    %cst_31 = arith.constant 1.17549435E-38 : f32
    %109 = vector.broadcast %cst_31 : f32 to vector<2x128xf32>
    %110 = arith.maximumf %108, %109 : vector<2x128xf32>
    %111 = math.log %110 : vector<2x128xf32>
    %112 = arith.addf %55, %111 : vector<2x128xf32>
    %113 = vector.extract_strided_slice %0 {offsets = [0, 1], sizes = [2, 1], strides = [1, 1]} : vector<2x32xf32> to vector<2x1xf32>
    %114 = vector.extract_strided_slice %1 {offsets = [0, 1], sizes = [2, 1], strides = [1, 1]} : vector<2x32xf32> to vector<2x1xf32>
    %115 = vector.extract_strided_slice %53 {offsets = [1, 0], sizes = [1, 128], strides = [1, 1]} : vector<32x128xf32> to vector<1x128xf32>
    %116 = vector.extract_strided_slice %54 {offsets = [1, 0], sizes = [1, 128], strides = [1, 1]} : vector<32x128xf32> to vector<1x128xf32>
    %117 = vector.broadcast %113 : vector<2x1xf32> to vector<2x128xf32>
    %118 = vector.broadcast %115 : vector<1x128xf32> to vector<2x128xf32>
    %119 = arith.subf %117, %118 : vector<2x128xf32>
    %120 = math.absf %119 : vector<2x128xf32>
    %cst_32 = arith.constant 0.000000e+00 : f32
    %121 = vector.broadcast %cst_32 : f32 to vector<2x128xf32>
    %122 = arith.subf %121, %120 : vector<2x128xf32>
    %cst_33 = arith.constant 1.000000e+00 : f32
    %123 = vector.broadcast %cst_33 : f32 to vector<2x128xf32>
    %124 = arith.mulf %122, %123 : vector<2x128xf32>
    %125 = math.exp %124 : vector<2x128xf32>
    %126 = math.log1p %125 : vector<2x128xf32>
    %127 = vector.broadcast %114 : vector<2x1xf32> to vector<2x128xf32>
    %128 = vector.broadcast %116 : vector<1x128xf32> to vector<2x128xf32>
    %129 = arith.subf %127, %128 : vector<2x128xf32>
    %130 = math.absf %129 : vector<2x128xf32>
    %cst_34 = arith.constant 0.000000e+00 : f32
    %131 = vector.broadcast %cst_34 : f32 to vector<2x128xf32>
    %132 = arith.subf %131, %130 : vector<2x128xf32>
    %cst_35 = arith.constant 1.000000e+00 : f32
    %133 = vector.broadcast %cst_35 : f32 to vector<2x128xf32>
    %134 = arith.mulf %132, %133 : vector<2x128xf32>
    %135 = math.exp %134 : vector<2x128xf32>
    %136 = math.log1p %135 : vector<2x128xf32>
    %137 = arith.addf %126, %136 : vector<2x128xf32>
    %138 = vector.broadcast %114 : vector<2x1xf32> to vector<2x128xf32>
    %139 = vector.broadcast %116 : vector<1x128xf32> to vector<2x128xf32>
    %140 = arith.minimumf %138, %139 : vector<2x128xf32>
    %141 = vector.broadcast %113 : vector<2x1xf32> to vector<2x128xf32>
    %142 = vector.broadcast %115 : vector<1x128xf32> to vector<2x128xf32>
    %143 = arith.maximumf %141, %142 : vector<2x128xf32>
    %144 = arith.subf %140, %143 : vector<2x128xf32>
    %cst_36 = arith.constant 1.000000e+00 : f32
    %145 = vector.broadcast %cst_36 : f32 to vector<2x128xf32>
    %146 = arith.mulf %145, %137 : vector<2x128xf32>
    %147 = arith.subf %144, %146 : vector<2x128xf32>
    %cst_37 = arith.constant 1.200000e+00 : f32
    %148 = vector.broadcast %cst_37 : f32 to vector<2x128xf32>
    %149 = arith.subf %147, %148 : vector<2x128xf32>
    %cst_38 = arith.constant 1.000000e+00 : f32
    %150 = vector.broadcast %cst_38 : f32 to vector<2x128xf32>
    %151 = arith.mulf %149, %150 : vector<2x128xf32>
    %cst_39 = arith.constant 0.000000e+00 : f32
    %152 = vector.broadcast %cst_39 : f32 to vector<2x128xf32>
    %153 = arith.maximumf %151, %152 : vector<2x128xf32>
    %154 = vector.broadcast %cst_39 : f32 to vector<2x128xf32>
    %155 = arith.subf %151, %154 : vector<2x128xf32>
    %156 = arith.cmpf one, %155, %155 : vector<2x128xf32>
    %157 = vector.broadcast %cst_39 : f32 to vector<2x128xf32>
    %158 = arith.addf %151, %157 : vector<2x128xf32>
    %159 = math.absf %155 : vector<2x128xf32>
    %cst_40 = arith.constant 0.000000e+00 : f32
    %160 = vector.broadcast %cst_40 : f32 to vector<2x128xf32>
    %161 = arith.subf %160, %159 : vector<2x128xf32>
    %162 = math.exp %161 : vector<2x128xf32>
    %163 = math.log1p %162 : vector<2x128xf32>
    %164 = arith.addf %153, %163 : vector<2x128xf32>
    %165 = arith.select %156, %158, %164 : vector<2x128xi1>, vector<2x128xf32>
    %cst_41 = arith.constant 1.17549435E-38 : f32
    %166 = vector.broadcast %cst_41 : f32 to vector<2x128xf32>
    %167 = arith.maximumf %165, %166 : vector<2x128xf32>
    %168 = math.log %167 : vector<2x128xf32>
    %169 = arith.addf %112, %168 : vector<2x128xf32>
    %170 = vector.extract_strided_slice %0 {offsets = [0, 2], sizes = [2, 1], strides = [1, 1]} : vector<2x32xf32> to vector<2x1xf32>
    %171 = vector.extract_strided_slice %1 {offsets = [0, 2], sizes = [2, 1], strides = [1, 1]} : vector<2x32xf32> to vector<2x1xf32>
    %172 = vector.extract_strided_slice %53 {offsets = [2, 0], sizes = [1, 128], strides = [1, 1]} : vector<32x128xf32> to vector<1x128xf32>
    %173 = vector.extract_strided_slice %54 {offsets = [2, 0], sizes = [1, 128], strides = [1, 1]} : vector<32x128xf32> to vector<1x128xf32>
    %174 = vector.broadcast %170 : vector<2x1xf32> to vector<2x128xf32>
    %175 = vector.broadcast %172 : vector<1x128xf32> to vector<2x128xf32>
    %176 = arith.subf %174, %175 : vector<2x128xf32>
    %177 = math.absf %176 : vector<2x128xf32>
    %cst_42 = arith.constant 0.000000e+00 : f32
    %178 = vector.broadcast %cst_42 : f32 to vector<2x128xf32>
    %179 = arith.subf %178, %177 : vector<2x128xf32>
    %cst_43 = arith.constant 1.000000e+00 : f32
    %180 = vector.broadcast %cst_43 : f32 to vector<2x128xf32>
    %181 = arith.mulf %179, %180 : vector<2x128xf32>
    %182 = math.exp %181 : vector<2x128xf32>
    %183 = math.log1p %182 : vector<2x128xf32>
    %184 = vector.broadcast %171 : vector<2x1xf32> to vector<2x128xf32>
    %185 = vector.broadcast %173 : vector<1x128xf32> to vector<2x128xf32>
    %186 = arith.subf %184, %185 : vector<2x128xf32>
    %187 = math.absf %186 : vector<2x128xf32>
    %cst_44 = arith.constant 0.000000e+00 : f32
    %188 = vector.broadcast %cst_44 : f32 to vector<2x128xf32>
    %189 = arith.subf %188, %187 : vector<2x128xf32>
    %cst_45 = arith.constant 1.000000e+00 : f32
    %190 = vector.broadcast %cst_45 : f32 to vector<2x128xf32>
    %191 = arith.mulf %189, %190 : vector<2x128xf32>
    %192 = math.exp %191 : vector<2x128xf32>
    %193 = math.log1p %192 : vector<2x128xf32>
    %194 = arith.addf %183, %193 : vector<2x128xf32>
    %195 = vector.broadcast %171 : vector<2x1xf32> to vector<2x128xf32>
    %196 = vector.broadcast %173 : vector<1x128xf32> to vector<2x128xf32>
    %197 = arith.minimumf %195, %196 : vector<2x128xf32>
    %198 = vector.broadcast %170 : vector<2x1xf32> to vector<2x128xf32>
    %199 = vector.broadcast %172 : vector<1x128xf32> to vector<2x128xf32>
    %200 = arith.maximumf %198, %199 : vector<2x128xf32>
    %201 = arith.subf %197, %200 : vector<2x128xf32>
    %cst_46 = arith.constant 1.000000e+00 : f32
    %202 = vector.broadcast %cst_46 : f32 to vector<2x128xf32>
    %203 = arith.mulf %202, %194 : vector<2x128xf32>
    %204 = arith.subf %201, %203 : vector<2x128xf32>
    %cst_47 = arith.constant 1.200000e+00 : f32
    %205 = vector.broadcast %cst_47 : f32 to vector<2x128xf32>
    %206 = arith.subf %204, %205 : vector<2x128xf32>
    %cst_48 = arith.constant 1.000000e+00 : f32
    %207 = vector.broadcast %cst_48 : f32 to vector<2x128xf32>
    %208 = arith.mulf %206, %207 : vector<2x128xf32>
    %cst_49 = arith.constant 0.000000e+00 : f32
    %209 = vector.broadcast %cst_49 : f32 to vector<2x128xf32>
    %210 = arith.maximumf %208, %209 : vector<2x128xf32>
    %211 = vector.broadcast %cst_49 : f32 to vector<2x128xf32>
    %212 = arith.subf %208, %211 : vector<2x128xf32>
    %213 = arith.cmpf one, %212, %212 : vector<2x128xf32>
    %214 = vector.broadcast %cst_49 : f32 to vector<2x128xf32>
    %215 = arith.addf %208, %214 : vector<2x128xf32>
    %216 = math.absf %212 : vector<2x128xf32>
    %cst_50 = arith.constant 0.000000e+00 : f32
    %217 = vector.broadcast %cst_50 : f32 to vector<2x128xf32>
    %218 = arith.subf %217, %216 : vector<2x128xf32>
    %219 = math.exp %218 : vector<2x128xf32>
    %220 = math.log1p %219 : vector<2x128xf32>
    %221 = arith.addf %210, %220 : vector<2x128xf32>
    %222 = arith.select %213, %215, %221 : vector<2x128xi1>, vector<2x128xf32>
    %cst_51 = arith.constant 1.17549435E-38 : f32
    %223 = vector.broadcast %cst_51 : f32 to vector<2x128xf32>
    %224 = arith.maximumf %222, %223 : vector<2x128xf32>
    %225 = math.log %224 : vector<2x128xf32>
    %226 = arith.addf %169, %225 : vector<2x128xf32>
    %227 = vector.extract_strided_slice %0 {offsets = [0, 3], sizes = [2, 1], strides = [1, 1]} : vector<2x32xf32> to vector<2x1xf32>
    %228 = vector.extract_strided_slice %1 {offsets = [0, 3], sizes = [2, 1], strides = [1, 1]} : vector<2x32xf32> to vector<2x1xf32>
    %229 = vector.extract_strided_slice %53 {offsets = [3, 0], sizes = [1, 128], strides = [1, 1]} : vector<32x128xf32> to vector<1x128xf32>
    %230 = vector.extract_strided_slice %54 {offsets = [3, 0], sizes = [1, 128], strides = [1, 1]} : vector<32x128xf32> to vector<1x128xf32>
    %231 = vector.broadcast %227 : vector<2x1xf32> to vector<2x128xf32>
    %232 = vector.broadcast %229 : vector<1x128xf32> to vector<2x128xf32>
    %233 = arith.subf %231, %232 : vector<2x128xf32>
    %234 = math.absf %233 : vector<2x128xf32>
    %cst_52 = arith.constant 0.000000e+00 : f32
    %235 = vector.broadcast %cst_52 : f32 to vector<2x128xf32>
    %236 = arith.subf %235, %234 : vector<2x128xf32>
    %cst_53 = arith.constant 1.000000e+00 : f32
    %237 = vector.broadcast %cst_53 : f32 to vector<2x128xf32>
    %238 = arith.mulf %236, %237 : vector<2x128xf32>
    %239 = math.exp %238 : vector<2x128xf32>
    %240 = math.log1p %239 : vector<2x128xf32>
    %241 = vector.broadcast %228 : vector<2x1xf32> to vector<2x128xf32>
    %242 = vector.broadcast %230 : vector<1x128xf32> to vector<2x128xf32>
    %243 = arith.subf %241, %242 : vector<2x128xf32>
    %244 = math.absf %243 : vector<2x128xf32>
    %cst_54 = arith.constant 0.000000e+00 : f32
    %245 = vector.broadcast %cst_54 : f32 to vector<2x128xf32>
    %246 = arith.subf %245, %244 : vector<2x128xf32>
    %cst_55 = arith.constant 1.000000e+00 : f32
    %247 = vector.broadcast %cst_55 : f32 to vector<2x128xf32>
    %248 = arith.mulf %246, %247 : vector<2x128xf32>
    %249 = math.exp %248 : vector<2x128xf32>
    %250 = math.log1p %249 : vector<2x128xf32>
    %251 = arith.addf %240, %250 : vector<2x128xf32>
    %252 = vector.broadcast %228 : vector<2x1xf32> to vector<2x128xf32>
    %253 = vector.broadcast %230 : vector<1x128xf32> to vector<2x128xf32>
    %254 = arith.minimumf %252, %253 : vector<2x128xf32>
    %255 = vector.broadcast %227 : vector<2x1xf32> to vector<2x128xf32>
    %256 = vector.broadcast %229 : vector<1x128xf32> to vector<2x128xf32>
    %257 = arith.maximumf %255, %256 : vector<2x128xf32>
    %258 = arith.subf %254, %257 : vector<2x128xf32>
    %cst_56 = arith.constant 1.000000e+00 : f32
    %259 = vector.broadcast %cst_56 : f32 to vector<2x128xf32>
    %260 = arith.mulf %259, %251 : vector<2x128xf32>
    %261 = arith.subf %258, %260 : vector<2x128xf32>
    %cst_57 = arith.constant 1.200000e+00 : f32
    %262 = vector.broadcast %cst_57 : f32 to vector<2x128xf32>
    %263 = arith.subf %261, %262 : vector<2x128xf32>
    %cst_58 = arith.constant 1.000000e+00 : f32
    %264 = vector.broadcast %cst_58 : f32 to vector<2x128xf32>
    %265 = arith.mulf %263, %264 : vector<2x128xf32>
    %cst_59 = arith.constant 0.000000e+00 : f32
    %266 = vector.broadcast %cst_59 : f32 to vector<2x128xf32>
    %267 = arith.maximumf %265, %266 : vector<2x128xf32>
    %268 = vector.broadcast %cst_59 : f32 to vector<2x128xf32>
    %269 = arith.subf %265, %268 : vector<2x128xf32>
    %270 = arith.cmpf one, %269, %269 : vector<2x128xf32>
    %271 = vector.broadcast %cst_59 : f32 to vector<2x128xf32>
    %272 = arith.addf %265, %271 : vector<2x128xf32>
    %273 = math.absf %269 : vector<2x128xf32>
    %cst_60 = arith.constant 0.000000e+00 : f32
    %274 = vector.broadcast %cst_60 : f32 to vector<2x128xf32>
    %275 = arith.subf %274, %273 : vector<2x128xf32>
    %276 = math.exp %275 : vector<2x128xf32>
    %277 = math.log1p %276 : vector<2x128xf32>
    %278 = arith.addf %267, %277 : vector<2x128xf32>
    %279 = arith.select %270, %272, %278 : vector<2x128xi1>, vector<2x128xf32>
    %cst_61 = arith.constant 1.17549435E-38 : f32
    %280 = vector.broadcast %cst_61 : f32 to vector<2x128xf32>
    %281 = arith.maximumf %279, %280 : vector<2x128xf32>
    %282 = math.log %281 : vector<2x128xf32>
    %283 = arith.addf %226, %282 : vector<2x128xf32>
    %284 = vector.extract_strided_slice %0 {offsets = [0, 4], sizes = [2, 1], strides = [1, 1]} : vector<2x32xf32> to vector<2x1xf32>
    %285 = vector.extract_strided_slice %1 {offsets = [0, 4], sizes = [2, 1], strides = [1, 1]} : vector<2x32xf32> to vector<2x1xf32>
    %286 = vector.extract_strided_slice %53 {offsets = [4, 0], sizes = [1, 128], strides = [1, 1]} : vector<32x128xf32> to vector<1x128xf32>
    %287 = vector.extract_strided_slice %54 {offsets = [4, 0], sizes = [1, 128], strides = [1, 1]} : vector<32x128xf32> to vector<1x128xf32>
    %288 = vector.broadcast %284 : vector<2x1xf32> to vector<2x128xf32>
    %289 = vector.broadcast %286 : vector<1x128xf32> to vector<2x128xf32>
    %290 = arith.subf %288, %289 : vector<2x128xf32>
    %291 = math.absf %290 : vector<2x128xf32>
    %cst_62 = arith.constant 0.000000e+00 : f32
    %292 = vector.broadcast %cst_62 : f32 to vector<2x128xf32>
    %293 = arith.subf %292, %291 : vector<2x128xf32>
    %cst_63 = arith.constant 1.000000e+00 : f32
    %294 = vector.broadcast %cst_63 : f32 to vector<2x128xf32>
    %295 = arith.mulf %293, %294 : vector<2x128xf32>
    %296 = math.exp %295 : vector<2x128xf32>
    %297 = math.log1p %296 : vector<2x128xf32>
    %298 = vector.broadcast %285 : vector<2x1xf32> to vector<2x128xf32>
    %299 = vector.broadcast %287 : vector<1x128xf32> to vector<2x128xf32>
    %300 = arith.subf %298, %299 : vector<2x128xf32>
    %301 = math.absf %300 : vector<2x128xf32>
    %cst_64 = arith.constant 0.000000e+00 : f32
    %302 = vector.broadcast %cst_64 : f32 to vector<2x128xf32>
    %303 = arith.subf %302, %301 : vector<2x128xf32>
    %cst_65 = arith.constant 1.000000e+00 : f32
    %304 = vector.broadcast %cst_65 : f32 to vector<2x128xf32>
    %305 = arith.mulf %303, %304 : vector<2x128xf32>
    %306 = math.exp %305 : vector<2x128xf32>
    %307 = math.log1p %306 : vector<2x128xf32>
    %308 = arith.addf %297, %307 : vector<2x128xf32>
    %309 = vector.broadcast %285 : vector<2x1xf32> to vector<2x128xf32>
    %310 = vector.broadcast %287 : vector<1x128xf32> to vector<2x128xf32>
    %311 = arith.minimumf %309, %310 : vector<2x128xf32>
    %312 = vector.broadcast %284 : vector<2x1xf32> to vector<2x128xf32>
    %313 = vector.broadcast %286 : vector<1x128xf32> to vector<2x128xf32>
    %314 = arith.maximumf %312, %313 : vector<2x128xf32>
    %315 = arith.subf %311, %314 : vector<2x128xf32>
    %cst_66 = arith.constant 1.000000e+00 : f32
    %316 = vector.broadcast %cst_66 : f32 to vector<2x128xf32>
    %317 = arith.mulf %316, %308 : vector<2x128xf32>
    %318 = arith.subf %315, %317 : vector<2x128xf32>
    %cst_67 = arith.constant 1.200000e+00 : f32
    %319 = vector.broadcast %cst_67 : f32 to vector<2x128xf32>
    %320 = arith.subf %318, %319 : vector<2x128xf32>
    %cst_68 = arith.constant 1.000000e+00 : f32
    %321 = vector.broadcast %cst_68 : f32 to vector<2x128xf32>
    %322 = arith.mulf %320, %321 : vector<2x128xf32>
    %cst_69 = arith.constant 0.000000e+00 : f32
    %323 = vector.broadcast %cst_69 : f32 to vector<2x128xf32>
    %324 = arith.maximumf %322, %323 : vector<2x128xf32>
    %325 = vector.broadcast %cst_69 : f32 to vector<2x128xf32>
    %326 = arith.subf %322, %325 : vector<2x128xf32>
    %327 = arith.cmpf one, %326, %326 : vector<2x128xf32>
    %328 = vector.broadcast %cst_69 : f32 to vector<2x128xf32>
    %329 = arith.addf %322, %328 : vector<2x128xf32>
    %330 = math.absf %326 : vector<2x128xf32>
    %cst_70 = arith.constant 0.000000e+00 : f32
    %331 = vector.broadcast %cst_70 : f32 to vector<2x128xf32>
    %332 = arith.subf %331, %330 : vector<2x128xf32>
    %333 = math.exp %332 : vector<2x128xf32>
    %334 = math.log1p %333 : vector<2x128xf32>
    %335 = arith.addf %324, %334 : vector<2x128xf32>
    %336 = arith.select %327, %329, %335 : vector<2x128xi1>, vector<2x128xf32>
    %cst_71 = arith.constant 1.17549435E-38 : f32
    %337 = vector.broadcast %cst_71 : f32 to vector<2x128xf32>
    %338 = arith.maximumf %336, %337 : vector<2x128xf32>
    %339 = math.log %338 : vector<2x128xf32>
    %340 = arith.addf %283, %339 : vector<2x128xf32>
    %341 = vector.extract_strided_slice %0 {offsets = [0, 5], sizes = [2, 1], strides = [1, 1]} : vector<2x32xf32> to vector<2x1xf32>
    %342 = vector.extract_strided_slice %1 {offsets = [0, 5], sizes = [2, 1], strides = [1, 1]} : vector<2x32xf32> to vector<2x1xf32>
    %343 = vector.extract_strided_slice %53 {offsets = [5, 0], sizes = [1, 128], strides = [1, 1]} : vector<32x128xf32> to vector<1x128xf32>
    %344 = vector.extract_strided_slice %54 {offsets = [5, 0], sizes = [1, 128], strides = [1, 1]} : vector<32x128xf32> to vector<1x128xf32>
    %345 = vector.broadcast %341 : vector<2x1xf32> to vector<2x128xf32>
    %346 = vector.broadcast %343 : vector<1x128xf32> to vector<2x128xf32>
    %347 = arith.subf %345, %346 : vector<2x128xf32>
    %348 = math.absf %347 : vector<2x128xf32>
    %cst_72 = arith.constant 0.000000e+00 : f32
    %349 = vector.broadcast %cst_72 : f32 to vector<2x128xf32>
    %350 = arith.subf %349, %348 : vector<2x128xf32>
    %cst_73 = arith.constant 1.000000e+00 : f32
    %351 = vector.broadcast %cst_73 : f32 to vector<2x128xf32>
    %352 = arith.mulf %350, %351 : vector<2x128xf32>
    %353 = math.exp %352 : vector<2x128xf32>
    %354 = math.log1p %353 : vector<2x128xf32>
    %355 = vector.broadcast %342 : vector<2x1xf32> to vector<2x128xf32>
    %356 = vector.broadcast %344 : vector<1x128xf32> to vector<2x128xf32>
    %357 = arith.subf %355, %356 : vector<2x128xf32>
    %358 = math.absf %357 : vector<2x128xf32>
    %cst_74 = arith.constant 0.000000e+00 : f32
    %359 = vector.broadcast %cst_74 : f32 to vector<2x128xf32>
    %360 = arith.subf %359, %358 : vector<2x128xf32>
    %cst_75 = arith.constant 1.000000e+00 : f32
    %361 = vector.broadcast %cst_75 : f32 to vector<2x128xf32>
    %362 = arith.mulf %360, %361 : vector<2x128xf32>
    %363 = math.exp %362 : vector<2x128xf32>
    %364 = math.log1p %363 : vector<2x128xf32>
    %365 = arith.addf %354, %364 : vector<2x128xf32>
    %366 = vector.broadcast %342 : vector<2x1xf32> to vector<2x128xf32>
    %367 = vector.broadcast %344 : vector<1x128xf32> to vector<2x128xf32>
    %368 = arith.minimumf %366, %367 : vector<2x128xf32>
    %369 = vector.broadcast %341 : vector<2x1xf32> to vector<2x128xf32>
    %370 = vector.broadcast %343 : vector<1x128xf32> to vector<2x128xf32>
    %371 = arith.maximumf %369, %370 : vector<2x128xf32>
    %372 = arith.subf %368, %371 : vector<2x128xf32>
    %cst_76 = arith.constant 1.000000e+00 : f32
    %373 = vector.broadcast %cst_76 : f32 to vector<2x128xf32>
    %374 = arith.mulf %373, %365 : vector<2x128xf32>
    %375 = arith.subf %372, %374 : vector<2x128xf32>
    %cst_77 = arith.constant 1.200000e+00 : f32
    %376 = vector.broadcast %cst_77 : f32 to vector<2x128xf32>
    %377 = arith.subf %375, %376 : vector<2x128xf32>
    %cst_78 = arith.constant 1.000000e+00 : f32
    %378 = vector.broadcast %cst_78 : f32 to vector<2x128xf32>
    %379 = arith.mulf %377, %378 : vector<2x128xf32>
    %cst_79 = arith.constant 0.000000e+00 : f32
    %380 = vector.broadcast %cst_79 : f32 to vector<2x128xf32>
    %381 = arith.maximumf %379, %380 : vector<2x128xf32>
    %382 = vector.broadcast %cst_79 : f32 to vector<2x128xf32>
    %383 = arith.subf %379, %382 : vector<2x128xf32>
    %384 = arith.cmpf one, %383, %383 : vector<2x128xf32>
    %385 = vector.broadcast %cst_79 : f32 to vector<2x128xf32>
    %386 = arith.addf %379, %385 : vector<2x128xf32>
    %387 = math.absf %383 : vector<2x128xf32>
    %cst_80 = arith.constant 0.000000e+00 : f32
    %388 = vector.broadcast %cst_80 : f32 to vector<2x128xf32>
    %389 = arith.subf %388, %387 : vector<2x128xf32>
    %390 = math.exp %389 : vector<2x128xf32>
    %391 = math.log1p %390 : vector<2x128xf32>
    %392 = arith.addf %381, %391 : vector<2x128xf32>
    %393 = arith.select %384, %386, %392 : vector<2x128xi1>, vector<2x128xf32>
    %cst_81 = arith.constant 1.17549435E-38 : f32
    %394 = vector.broadcast %cst_81 : f32 to vector<2x128xf32>
    %395 = arith.maximumf %393, %394 : vector<2x128xf32>
    %396 = math.log %395 : vector<2x128xf32>
    %397 = arith.addf %340, %396 : vector<2x128xf32>
    %398 = vector.extract_strided_slice %0 {offsets = [0, 6], sizes = [2, 1], strides = [1, 1]} : vector<2x32xf32> to vector<2x1xf32>
    %399 = vector.extract_strided_slice %1 {offsets = [0, 6], sizes = [2, 1], strides = [1, 1]} : vector<2x32xf32> to vector<2x1xf32>
    %400 = vector.extract_strided_slice %53 {offsets = [6, 0], sizes = [1, 128], strides = [1, 1]} : vector<32x128xf32> to vector<1x128xf32>
    %401 = vector.extract_strided_slice %54 {offsets = [6, 0], sizes = [1, 128], strides = [1, 1]} : vector<32x128xf32> to vector<1x128xf32>
    %402 = vector.broadcast %398 : vector<2x1xf32> to vector<2x128xf32>
    %403 = vector.broadcast %400 : vector<1x128xf32> to vector<2x128xf32>
    %404 = arith.subf %402, %403 : vector<2x128xf32>
    %405 = math.absf %404 : vector<2x128xf32>
    %cst_82 = arith.constant 0.000000e+00 : f32
    %406 = vector.broadcast %cst_82 : f32 to vector<2x128xf32>
    %407 = arith.subf %406, %405 : vector<2x128xf32>
    %cst_83 = arith.constant 1.000000e+00 : f32
    %408 = vector.broadcast %cst_83 : f32 to vector<2x128xf32>
    %409 = arith.mulf %407, %408 : vector<2x128xf32>
    %410 = math.exp %409 : vector<2x128xf32>
    %411 = math.log1p %410 : vector<2x128xf32>
    %412 = vector.broadcast %399 : vector<2x1xf32> to vector<2x128xf32>
    %413 = vector.broadcast %401 : vector<1x128xf32> to vector<2x128xf32>
    %414 = arith.subf %412, %413 : vector<2x128xf32>
    %415 = math.absf %414 : vector<2x128xf32>
    %cst_84 = arith.constant 0.000000e+00 : f32
    %416 = vector.broadcast %cst_84 : f32 to vector<2x128xf32>
    %417 = arith.subf %416, %415 : vector<2x128xf32>
    %cst_85 = arith.constant 1.000000e+00 : f32
    %418 = vector.broadcast %cst_85 : f32 to vector<2x128xf32>
    %419 = arith.mulf %417, %418 : vector<2x128xf32>
    %420 = math.exp %419 : vector<2x128xf32>
    %421 = math.log1p %420 : vector<2x128xf32>
    %422 = arith.addf %411, %421 : vector<2x128xf32>
    %423 = vector.broadcast %399 : vector<2x1xf32> to vector<2x128xf32>
    %424 = vector.broadcast %401 : vector<1x128xf32> to vector<2x128xf32>
    %425 = arith.minimumf %423, %424 : vector<2x128xf32>
    %426 = vector.broadcast %398 : vector<2x1xf32> to vector<2x128xf32>
    %427 = vector.broadcast %400 : vector<1x128xf32> to vector<2x128xf32>
    %428 = arith.maximumf %426, %427 : vector<2x128xf32>
    %429 = arith.subf %425, %428 : vector<2x128xf32>
    %cst_86 = arith.constant 1.000000e+00 : f32
    %430 = vector.broadcast %cst_86 : f32 to vector<2x128xf32>
    %431 = arith.mulf %430, %422 : vector<2x128xf32>
    %432 = arith.subf %429, %431 : vector<2x128xf32>
    %cst_87 = arith.constant 1.200000e+00 : f32
    %433 = vector.broadcast %cst_87 : f32 to vector<2x128xf32>
    %434 = arith.subf %432, %433 : vector<2x128xf32>
    %cst_88 = arith.constant 1.000000e+00 : f32
    %435 = vector.broadcast %cst_88 : f32 to vector<2x128xf32>
    %436 = arith.mulf %434, %435 : vector<2x128xf32>
    %cst_89 = arith.constant 0.000000e+00 : f32
    %437 = vector.broadcast %cst_89 : f32 to vector<2x128xf32>
    %438 = arith.maximumf %436, %437 : vector<2x128xf32>
    %439 = vector.broadcast %cst_89 : f32 to vector<2x128xf32>
    %440 = arith.subf %436, %439 : vector<2x128xf32>
    %441 = arith.cmpf one, %440, %440 : vector<2x128xf32>
    %442 = vector.broadcast %cst_89 : f32 to vector<2x128xf32>
    %443 = arith.addf %436, %442 : vector<2x128xf32>
    %444 = math.absf %440 : vector<2x128xf32>
    %cst_90 = arith.constant 0.000000e+00 : f32
    %445 = vector.broadcast %cst_90 : f32 to vector<2x128xf32>
    %446 = arith.subf %445, %444 : vector<2x128xf32>
    %447 = math.exp %446 : vector<2x128xf32>
    %448 = math.log1p %447 : vector<2x128xf32>
    %449 = arith.addf %438, %448 : vector<2x128xf32>
    %450 = arith.select %441, %443, %449 : vector<2x128xi1>, vector<2x128xf32>
    %cst_91 = arith.constant 1.17549435E-38 : f32
    %451 = vector.broadcast %cst_91 : f32 to vector<2x128xf32>
    %452 = arith.maximumf %450, %451 : vector<2x128xf32>
    %453 = math.log %452 : vector<2x128xf32>
    %454 = arith.addf %397, %453 : vector<2x128xf32>
    %455 = vector.extract_strided_slice %0 {offsets = [0, 7], sizes = [2, 1], strides = [1, 1]} : vector<2x32xf32> to vector<2x1xf32>
    %456 = vector.extract_strided_slice %1 {offsets = [0, 7], sizes = [2, 1], strides = [1, 1]} : vector<2x32xf32> to vector<2x1xf32>
    %457 = vector.extract_strided_slice %53 {offsets = [7, 0], sizes = [1, 128], strides = [1, 1]} : vector<32x128xf32> to vector<1x128xf32>
    %458 = vector.extract_strided_slice %54 {offsets = [7, 0], sizes = [1, 128], strides = [1, 1]} : vector<32x128xf32> to vector<1x128xf32>
    %459 = vector.broadcast %455 : vector<2x1xf32> to vector<2x128xf32>
    %460 = vector.broadcast %457 : vector<1x128xf32> to vector<2x128xf32>
    %461 = arith.subf %459, %460 : vector<2x128xf32>
    %462 = math.absf %461 : vector<2x128xf32>
    %cst_92 = arith.constant 0.000000e+00 : f32
    %463 = vector.broadcast %cst_92 : f32 to vector<2x128xf32>
    %464 = arith.subf %463, %462 : vector<2x128xf32>
    %cst_93 = arith.constant 1.000000e+00 : f32
    %465 = vector.broadcast %cst_93 : f32 to vector<2x128xf32>
    %466 = arith.mulf %464, %465 : vector<2x128xf32>
    %467 = math.exp %466 : vector<2x128xf32>
    %468 = math.log1p %467 : vector<2x128xf32>
    %469 = vector.broadcast %456 : vector<2x1xf32> to vector<2x128xf32>
    %470 = vector.broadcast %458 : vector<1x128xf32> to vector<2x128xf32>
    %471 = arith.subf %469, %470 : vector<2x128xf32>
    %472 = math.absf %471 : vector<2x128xf32>
    %cst_94 = arith.constant 0.000000e+00 : f32
    %473 = vector.broadcast %cst_94 : f32 to vector<2x128xf32>
    %474 = arith.subf %473, %472 : vector<2x128xf32>
    %cst_95 = arith.constant 1.000000e+00 : f32
    %475 = vector.broadcast %cst_95 : f32 to vector<2x128xf32>
    %476 = arith.mulf %474, %475 : vector<2x128xf32>
    %477 = math.exp %476 : vector<2x128xf32>
    %478 = math.log1p %477 : vector<2x128xf32>
    %479 = arith.addf %468, %478 : vector<2x128xf32>
    %480 = vector.broadcast %456 : vector<2x1xf32> to vector<2x128xf32>
    %481 = vector.broadcast %458 : vector<1x128xf32> to vector<2x128xf32>
    %482 = arith.minimumf %480, %481 : vector<2x128xf32>
    %483 = vector.broadcast %455 : vector<2x1xf32> to vector<2x128xf32>
    %484 = vector.broadcast %457 : vector<1x128xf32> to vector<2x128xf32>
    %485 = arith.maximumf %483, %484 : vector<2x128xf32>
    %486 = arith.subf %482, %485 : vector<2x128xf32>
    %cst_96 = arith.constant 1.000000e+00 : f32
    %487 = vector.broadcast %cst_96 : f32 to vector<2x128xf32>
    %488 = arith.mulf %487, %479 : vector<2x128xf32>
    %489 = arith.subf %486, %488 : vector<2x128xf32>
    %cst_97 = arith.constant 1.200000e+00 : f32
    %490 = vector.broadcast %cst_97 : f32 to vector<2x128xf32>
    %491 = arith.subf %489, %490 : vector<2x128xf32>
    %cst_98 = arith.constant 1.000000e+00 : f32
    %492 = vector.broadcast %cst_98 : f32 to vector<2x128xf32>
    %493 = arith.mulf %491, %492 : vector<2x128xf32>
    %cst_99 = arith.constant 0.000000e+00 : f32
    %494 = vector.broadcast %cst_99 : f32 to vector<2x128xf32>
    %495 = arith.maximumf %493, %494 : vector<2x128xf32>
    %496 = vector.broadcast %cst_99 : f32 to vector<2x128xf32>
    %497 = arith.subf %493, %496 : vector<2x128xf32>
    %498 = arith.cmpf one, %497, %497 : vector<2x128xf32>
    %499 = vector.broadcast %cst_99 : f32 to vector<2x128xf32>
    %500 = arith.addf %493, %499 : vector<2x128xf32>
    %501 = math.absf %497 : vector<2x128xf32>
    %cst_100 = arith.constant 0.000000e+00 : f32
    %502 = vector.broadcast %cst_100 : f32 to vector<2x128xf32>
    %503 = arith.subf %502, %501 : vector<2x128xf32>
    %504 = math.exp %503 : vector<2x128xf32>
    %505 = math.log1p %504 : vector<2x128xf32>
    %506 = arith.addf %495, %505 : vector<2x128xf32>
    %507 = arith.select %498, %500, %506 : vector<2x128xi1>, vector<2x128xf32>
    %cst_101 = arith.constant 1.17549435E-38 : f32
    %508 = vector.broadcast %cst_101 : f32 to vector<2x128xf32>
    %509 = arith.maximumf %507, %508 : vector<2x128xf32>
    %510 = math.log %509 : vector<2x128xf32>
    %511 = arith.addf %454, %510 : vector<2x128xf32>
    %512 = vector.extract_strided_slice %0 {offsets = [0, 8], sizes = [2, 1], strides = [1, 1]} : vector<2x32xf32> to vector<2x1xf32>
    %513 = vector.extract_strided_slice %1 {offsets = [0, 8], sizes = [2, 1], strides = [1, 1]} : vector<2x32xf32> to vector<2x1xf32>
    %514 = vector.extract_strided_slice %53 {offsets = [8, 0], sizes = [1, 128], strides = [1, 1]} : vector<32x128xf32> to vector<1x128xf32>
    %515 = vector.extract_strided_slice %54 {offsets = [8, 0], sizes = [1, 128], strides = [1, 1]} : vector<32x128xf32> to vector<1x128xf32>
    %516 = vector.broadcast %512 : vector<2x1xf32> to vector<2x128xf32>
    %517 = vector.broadcast %514 : vector<1x128xf32> to vector<2x128xf32>
    %518 = arith.subf %516, %517 : vector<2x128xf32>
    %519 = math.absf %518 : vector<2x128xf32>
    %cst_102 = arith.constant 0.000000e+00 : f32
    %520 = vector.broadcast %cst_102 : f32 to vector<2x128xf32>
    %521 = arith.subf %520, %519 : vector<2x128xf32>
    %cst_103 = arith.constant 1.000000e+00 : f32
    %522 = vector.broadcast %cst_103 : f32 to vector<2x128xf32>
    %523 = arith.mulf %521, %522 : vector<2x128xf32>
    %524 = math.exp %523 : vector<2x128xf32>
    %525 = math.log1p %524 : vector<2x128xf32>
    %526 = vector.broadcast %513 : vector<2x1xf32> to vector<2x128xf32>
    %527 = vector.broadcast %515 : vector<1x128xf32> to vector<2x128xf32>
    %528 = arith.subf %526, %527 : vector<2x128xf32>
    %529 = math.absf %528 : vector<2x128xf32>
    %cst_104 = arith.constant 0.000000e+00 : f32
    %530 = vector.broadcast %cst_104 : f32 to vector<2x128xf32>
    %531 = arith.subf %530, %529 : vector<2x128xf32>
    %cst_105 = arith.constant 1.000000e+00 : f32
    %532 = vector.broadcast %cst_105 : f32 to vector<2x128xf32>
    %533 = arith.mulf %531, %532 : vector<2x128xf32>
    %534 = math.exp %533 : vector<2x128xf32>
    %535 = math.log1p %534 : vector<2x128xf32>
    %536 = arith.addf %525, %535 : vector<2x128xf32>
    %537 = vector.broadcast %513 : vector<2x1xf32> to vector<2x128xf32>
    %538 = vector.broadcast %515 : vector<1x128xf32> to vector<2x128xf32>
    %539 = arith.minimumf %537, %538 : vector<2x128xf32>
    %540 = vector.broadcast %512 : vector<2x1xf32> to vector<2x128xf32>
    %541 = vector.broadcast %514 : vector<1x128xf32> to vector<2x128xf32>
    %542 = arith.maximumf %540, %541 : vector<2x128xf32>
    %543 = arith.subf %539, %542 : vector<2x128xf32>
    %cst_106 = arith.constant 1.000000e+00 : f32
    %544 = vector.broadcast %cst_106 : f32 to vector<2x128xf32>
    %545 = arith.mulf %544, %536 : vector<2x128xf32>
    %546 = arith.subf %543, %545 : vector<2x128xf32>
    %cst_107 = arith.constant 1.200000e+00 : f32
    %547 = vector.broadcast %cst_107 : f32 to vector<2x128xf32>
    %548 = arith.subf %546, %547 : vector<2x128xf32>
    %cst_108 = arith.constant 1.000000e+00 : f32
    %549 = vector.broadcast %cst_108 : f32 to vector<2x128xf32>
    %550 = arith.mulf %548, %549 : vector<2x128xf32>
    %cst_109 = arith.constant 0.000000e+00 : f32
    %551 = vector.broadcast %cst_109 : f32 to vector<2x128xf32>
    %552 = arith.maximumf %550, %551 : vector<2x128xf32>
    %553 = vector.broadcast %cst_109 : f32 to vector<2x128xf32>
    %554 = arith.subf %550, %553 : vector<2x128xf32>
    %555 = arith.cmpf one, %554, %554 : vector<2x128xf32>
    %556 = vector.broadcast %cst_109 : f32 to vector<2x128xf32>
    %557 = arith.addf %550, %556 : vector<2x128xf32>
    %558 = math.absf %554 : vector<2x128xf32>
    %cst_110 = arith.constant 0.000000e+00 : f32
    %559 = vector.broadcast %cst_110 : f32 to vector<2x128xf32>
    %560 = arith.subf %559, %558 : vector<2x128xf32>
    %561 = math.exp %560 : vector<2x128xf32>
    %562 = math.log1p %561 : vector<2x128xf32>
    %563 = arith.addf %552, %562 : vector<2x128xf32>
    %564 = arith.select %555, %557, %563 : vector<2x128xi1>, vector<2x128xf32>
    %cst_111 = arith.constant 1.17549435E-38 : f32
    %565 = vector.broadcast %cst_111 : f32 to vector<2x128xf32>
    %566 = arith.maximumf %564, %565 : vector<2x128xf32>
    %567 = math.log %566 : vector<2x128xf32>
    %568 = arith.addf %511, %567 : vector<2x128xf32>
    %569 = vector.extract_strided_slice %0 {offsets = [0, 9], sizes = [2, 1], strides = [1, 1]} : vector<2x32xf32> to vector<2x1xf32>
    %570 = vector.extract_strided_slice %1 {offsets = [0, 9], sizes = [2, 1], strides = [1, 1]} : vector<2x32xf32> to vector<2x1xf32>
    %571 = vector.extract_strided_slice %53 {offsets = [9, 0], sizes = [1, 128], strides = [1, 1]} : vector<32x128xf32> to vector<1x128xf32>
    %572 = vector.extract_strided_slice %54 {offsets = [9, 0], sizes = [1, 128], strides = [1, 1]} : vector<32x128xf32> to vector<1x128xf32>
    %573 = vector.broadcast %569 : vector<2x1xf32> to vector<2x128xf32>
    %574 = vector.broadcast %571 : vector<1x128xf32> to vector<2x128xf32>
    %575 = arith.subf %573, %574 : vector<2x128xf32>
    %576 = math.absf %575 : vector<2x128xf32>
    %cst_112 = arith.constant 0.000000e+00 : f32
    %577 = vector.broadcast %cst_112 : f32 to vector<2x128xf32>
    %578 = arith.subf %577, %576 : vector<2x128xf32>
    %cst_113 = arith.constant 1.000000e+00 : f32
    %579 = vector.broadcast %cst_113 : f32 to vector<2x128xf32>
    %580 = arith.mulf %578, %579 : vector<2x128xf32>
    %581 = math.exp %580 : vector<2x128xf32>
    %582 = math.log1p %581 : vector<2x128xf32>
    %583 = vector.broadcast %570 : vector<2x1xf32> to vector<2x128xf32>
    %584 = vector.broadcast %572 : vector<1x128xf32> to vector<2x128xf32>
    %585 = arith.subf %583, %584 : vector<2x128xf32>
    %586 = math.absf %585 : vector<2x128xf32>
    %cst_114 = arith.constant 0.000000e+00 : f32
    %587 = vector.broadcast %cst_114 : f32 to vector<2x128xf32>
    %588 = arith.subf %587, %586 : vector<2x128xf32>
    %cst_115 = arith.constant 1.000000e+00 : f32
    %589 = vector.broadcast %cst_115 : f32 to vector<2x128xf32>
    %590 = arith.mulf %588, %589 : vector<2x128xf32>
    %591 = math.exp %590 : vector<2x128xf32>
    %592 = math.log1p %591 : vector<2x128xf32>
    %593 = arith.addf %582, %592 : vector<2x128xf32>
    %594 = vector.broadcast %570 : vector<2x1xf32> to vector<2x128xf32>
    %595 = vector.broadcast %572 : vector<1x128xf32> to vector<2x128xf32>
    %596 = arith.minimumf %594, %595 : vector<2x128xf32>
    %597 = vector.broadcast %569 : vector<2x1xf32> to vector<2x128xf32>
    %598 = vector.broadcast %571 : vector<1x128xf32> to vector<2x128xf32>
    %599 = arith.maximumf %597, %598 : vector<2x128xf32>
    %600 = arith.subf %596, %599 : vector<2x128xf32>
    %cst_116 = arith.constant 1.000000e+00 : f32
    %601 = vector.broadcast %cst_116 : f32 to vector<2x128xf32>
    %602 = arith.mulf %601, %593 : vector<2x128xf32>
    %603 = arith.subf %600, %602 : vector<2x128xf32>
    %cst_117 = arith.constant 1.200000e+00 : f32
    %604 = vector.broadcast %cst_117 : f32 to vector<2x128xf32>
    %605 = arith.subf %603, %604 : vector<2x128xf32>
    %cst_118 = arith.constant 1.000000e+00 : f32
    %606 = vector.broadcast %cst_118 : f32 to vector<2x128xf32>
    %607 = arith.mulf %605, %606 : vector<2x128xf32>
    %cst_119 = arith.constant 0.000000e+00 : f32
    %608 = vector.broadcast %cst_119 : f32 to vector<2x128xf32>
    %609 = arith.maximumf %607, %608 : vector<2x128xf32>
    %610 = vector.broadcast %cst_119 : f32 to vector<2x128xf32>
    %611 = arith.subf %607, %610 : vector<2x128xf32>
    %612 = arith.cmpf one, %611, %611 : vector<2x128xf32>
    %613 = vector.broadcast %cst_119 : f32 to vector<2x128xf32>
    %614 = arith.addf %607, %613 : vector<2x128xf32>
    %615 = math.absf %611 : vector<2x128xf32>
    %cst_120 = arith.constant 0.000000e+00 : f32
    %616 = vector.broadcast %cst_120 : f32 to vector<2x128xf32>
    %617 = arith.subf %616, %615 : vector<2x128xf32>
    %618 = math.exp %617 : vector<2x128xf32>
    %619 = math.log1p %618 : vector<2x128xf32>
    %620 = arith.addf %609, %619 : vector<2x128xf32>
    %621 = arith.select %612, %614, %620 : vector<2x128xi1>, vector<2x128xf32>
    %cst_121 = arith.constant 1.17549435E-38 : f32
    %622 = vector.broadcast %cst_121 : f32 to vector<2x128xf32>
    %623 = arith.maximumf %621, %622 : vector<2x128xf32>
    %624 = math.log %623 : vector<2x128xf32>
    %625 = arith.addf %568, %624 : vector<2x128xf32>
    %626 = vector.extract_strided_slice %0 {offsets = [0, 10], sizes = [2, 1], strides = [1, 1]} : vector<2x32xf32> to vector<2x1xf32>
    %627 = vector.extract_strided_slice %1 {offsets = [0, 10], sizes = [2, 1], strides = [1, 1]} : vector<2x32xf32> to vector<2x1xf32>
    %628 = vector.extract_strided_slice %53 {offsets = [10, 0], sizes = [1, 128], strides = [1, 1]} : vector<32x128xf32> to vector<1x128xf32>
    %629 = vector.extract_strided_slice %54 {offsets = [10, 0], sizes = [1, 128], strides = [1, 1]} : vector<32x128xf32> to vector<1x128xf32>
    %630 = vector.broadcast %626 : vector<2x1xf32> to vector<2x128xf32>
    %631 = vector.broadcast %628 : vector<1x128xf32> to vector<2x128xf32>
    %632 = arith.subf %630, %631 : vector<2x128xf32>
    %633 = math.absf %632 : vector<2x128xf32>
    %cst_122 = arith.constant 0.000000e+00 : f32
    %634 = vector.broadcast %cst_122 : f32 to vector<2x128xf32>
    %635 = arith.subf %634, %633 : vector<2x128xf32>
    %cst_123 = arith.constant 1.000000e+00 : f32
    %636 = vector.broadcast %cst_123 : f32 to vector<2x128xf32>
    %637 = arith.mulf %635, %636 : vector<2x128xf32>
    %638 = math.exp %637 : vector<2x128xf32>
    %639 = math.log1p %638 : vector<2x128xf32>
    %640 = vector.broadcast %627 : vector<2x1xf32> to vector<2x128xf32>
    %641 = vector.broadcast %629 : vector<1x128xf32> to vector<2x128xf32>
    %642 = arith.subf %640, %641 : vector<2x128xf32>
    %643 = math.absf %642 : vector<2x128xf32>
    %cst_124 = arith.constant 0.000000e+00 : f32
    %644 = vector.broadcast %cst_124 : f32 to vector<2x128xf32>
    %645 = arith.subf %644, %643 : vector<2x128xf32>
    %cst_125 = arith.constant 1.000000e+00 : f32
    %646 = vector.broadcast %cst_125 : f32 to vector<2x128xf32>
    %647 = arith.mulf %645, %646 : vector<2x128xf32>
    %648 = math.exp %647 : vector<2x128xf32>
    %649 = math.log1p %648 : vector<2x128xf32>
    %650 = arith.addf %639, %649 : vector<2x128xf32>
    %651 = vector.broadcast %627 : vector<2x1xf32> to vector<2x128xf32>
    %652 = vector.broadcast %629 : vector<1x128xf32> to vector<2x128xf32>
    %653 = arith.minimumf %651, %652 : vector<2x128xf32>
    %654 = vector.broadcast %626 : vector<2x1xf32> to vector<2x128xf32>
    %655 = vector.broadcast %628 : vector<1x128xf32> to vector<2x128xf32>
    %656 = arith.maximumf %654, %655 : vector<2x128xf32>
    %657 = arith.subf %653, %656 : vector<2x128xf32>
    %cst_126 = arith.constant 1.000000e+00 : f32
    %658 = vector.broadcast %cst_126 : f32 to vector<2x128xf32>
    %659 = arith.mulf %658, %650 : vector<2x128xf32>
    %660 = arith.subf %657, %659 : vector<2x128xf32>
    %cst_127 = arith.constant 1.200000e+00 : f32
    %661 = vector.broadcast %cst_127 : f32 to vector<2x128xf32>
    %662 = arith.subf %660, %661 : vector<2x128xf32>
    %cst_128 = arith.constant 1.000000e+00 : f32
    %663 = vector.broadcast %cst_128 : f32 to vector<2x128xf32>
    %664 = arith.mulf %662, %663 : vector<2x128xf32>
    %cst_129 = arith.constant 0.000000e+00 : f32
    %665 = vector.broadcast %cst_129 : f32 to vector<2x128xf32>
    %666 = arith.maximumf %664, %665 : vector<2x128xf32>
    %667 = vector.broadcast %cst_129 : f32 to vector<2x128xf32>
    %668 = arith.subf %664, %667 : vector<2x128xf32>
    %669 = arith.cmpf one, %668, %668 : vector<2x128xf32>
    %670 = vector.broadcast %cst_129 : f32 to vector<2x128xf32>
    %671 = arith.addf %664, %670 : vector<2x128xf32>
    %672 = math.absf %668 : vector<2x128xf32>
    %cst_130 = arith.constant 0.000000e+00 : f32
    %673 = vector.broadcast %cst_130 : f32 to vector<2x128xf32>
    %674 = arith.subf %673, %672 : vector<2x128xf32>
    %675 = math.exp %674 : vector<2x128xf32>
    %676 = math.log1p %675 : vector<2x128xf32>
    %677 = arith.addf %666, %676 : vector<2x128xf32>
    %678 = arith.select %669, %671, %677 : vector<2x128xi1>, vector<2x128xf32>
    %cst_131 = arith.constant 1.17549435E-38 : f32
    %679 = vector.broadcast %cst_131 : f32 to vector<2x128xf32>
    %680 = arith.maximumf %678, %679 : vector<2x128xf32>
    %681 = math.log %680 : vector<2x128xf32>
    %682 = arith.addf %625, %681 : vector<2x128xf32>
    %683 = vector.extract_strided_slice %0 {offsets = [0, 11], sizes = [2, 1], strides = [1, 1]} : vector<2x32xf32> to vector<2x1xf32>
    %684 = vector.extract_strided_slice %1 {offsets = [0, 11], sizes = [2, 1], strides = [1, 1]} : vector<2x32xf32> to vector<2x1xf32>
    %685 = vector.extract_strided_slice %53 {offsets = [11, 0], sizes = [1, 128], strides = [1, 1]} : vector<32x128xf32> to vector<1x128xf32>
    %686 = vector.extract_strided_slice %54 {offsets = [11, 0], sizes = [1, 128], strides = [1, 1]} : vector<32x128xf32> to vector<1x128xf32>
    %687 = vector.broadcast %683 : vector<2x1xf32> to vector<2x128xf32>
    %688 = vector.broadcast %685 : vector<1x128xf32> to vector<2x128xf32>
    %689 = arith.subf %687, %688 : vector<2x128xf32>
    %690 = math.absf %689 : vector<2x128xf32>
    %cst_132 = arith.constant 0.000000e+00 : f32
    %691 = vector.broadcast %cst_132 : f32 to vector<2x128xf32>
    %692 = arith.subf %691, %690 : vector<2x128xf32>
    %cst_133 = arith.constant 1.000000e+00 : f32
    %693 = vector.broadcast %cst_133 : f32 to vector<2x128xf32>
    %694 = arith.mulf %692, %693 : vector<2x128xf32>
    %695 = math.exp %694 : vector<2x128xf32>
    %696 = math.log1p %695 : vector<2x128xf32>
    %697 = vector.broadcast %684 : vector<2x1xf32> to vector<2x128xf32>
    %698 = vector.broadcast %686 : vector<1x128xf32> to vector<2x128xf32>
    %699 = arith.subf %697, %698 : vector<2x128xf32>
    %700 = math.absf %699 : vector<2x128xf32>
    %cst_134 = arith.constant 0.000000e+00 : f32
    %701 = vector.broadcast %cst_134 : f32 to vector<2x128xf32>
    %702 = arith.subf %701, %700 : vector<2x128xf32>
    %cst_135 = arith.constant 1.000000e+00 : f32
    %703 = vector.broadcast %cst_135 : f32 to vector<2x128xf32>
    %704 = arith.mulf %702, %703 : vector<2x128xf32>
    %705 = math.exp %704 : vector<2x128xf32>
    %706 = math.log1p %705 : vector<2x128xf32>
    %707 = arith.addf %696, %706 : vector<2x128xf32>
    %708 = vector.broadcast %684 : vector<2x1xf32> to vector<2x128xf32>
    %709 = vector.broadcast %686 : vector<1x128xf32> to vector<2x128xf32>
    %710 = arith.minimumf %708, %709 : vector<2x128xf32>
    %711 = vector.broadcast %683 : vector<2x1xf32> to vector<2x128xf32>
    %712 = vector.broadcast %685 : vector<1x128xf32> to vector<2x128xf32>
    %713 = arith.maximumf %711, %712 : vector<2x128xf32>
    %714 = arith.subf %710, %713 : vector<2x128xf32>
    %cst_136 = arith.constant 1.000000e+00 : f32
    %715 = vector.broadcast %cst_136 : f32 to vector<2x128xf32>
    %716 = arith.mulf %715, %707 : vector<2x128xf32>
    %717 = arith.subf %714, %716 : vector<2x128xf32>
    %cst_137 = arith.constant 1.200000e+00 : f32
    %718 = vector.broadcast %cst_137 : f32 to vector<2x128xf32>
    %719 = arith.subf %717, %718 : vector<2x128xf32>
    %cst_138 = arith.constant 1.000000e+00 : f32
    %720 = vector.broadcast %cst_138 : f32 to vector<2x128xf32>
    %721 = arith.mulf %719, %720 : vector<2x128xf32>
    %cst_139 = arith.constant 0.000000e+00 : f32
    %722 = vector.broadcast %cst_139 : f32 to vector<2x128xf32>
    %723 = arith.maximumf %721, %722 : vector<2x128xf32>
    %724 = vector.broadcast %cst_139 : f32 to vector<2x128xf32>
    %725 = arith.subf %721, %724 : vector<2x128xf32>
    %726 = arith.cmpf one, %725, %725 : vector<2x128xf32>
    %727 = vector.broadcast %cst_139 : f32 to vector<2x128xf32>
    %728 = arith.addf %721, %727 : vector<2x128xf32>
    %729 = math.absf %725 : vector<2x128xf32>
    %cst_140 = arith.constant 0.000000e+00 : f32
    %730 = vector.broadcast %cst_140 : f32 to vector<2x128xf32>
    %731 = arith.subf %730, %729 : vector<2x128xf32>
    %732 = math.exp %731 : vector<2x128xf32>
    %733 = math.log1p %732 : vector<2x128xf32>
    %734 = arith.addf %723, %733 : vector<2x128xf32>
    %735 = arith.select %726, %728, %734 : vector<2x128xi1>, vector<2x128xf32>
    %cst_141 = arith.constant 1.17549435E-38 : f32
    %736 = vector.broadcast %cst_141 : f32 to vector<2x128xf32>
    %737 = arith.maximumf %735, %736 : vector<2x128xf32>
    %738 = math.log %737 : vector<2x128xf32>
    %739 = arith.addf %682, %738 : vector<2x128xf32>
    %740 = vector.extract_strided_slice %0 {offsets = [0, 12], sizes = [2, 1], strides = [1, 1]} : vector<2x32xf32> to vector<2x1xf32>
    %741 = vector.extract_strided_slice %1 {offsets = [0, 12], sizes = [2, 1], strides = [1, 1]} : vector<2x32xf32> to vector<2x1xf32>
    %742 = vector.extract_strided_slice %53 {offsets = [12, 0], sizes = [1, 128], strides = [1, 1]} : vector<32x128xf32> to vector<1x128xf32>
    %743 = vector.extract_strided_slice %54 {offsets = [12, 0], sizes = [1, 128], strides = [1, 1]} : vector<32x128xf32> to vector<1x128xf32>
    %744 = vector.broadcast %740 : vector<2x1xf32> to vector<2x128xf32>
    %745 = vector.broadcast %742 : vector<1x128xf32> to vector<2x128xf32>
    %746 = arith.subf %744, %745 : vector<2x128xf32>
    %747 = math.absf %746 : vector<2x128xf32>
    %cst_142 = arith.constant 0.000000e+00 : f32
    %748 = vector.broadcast %cst_142 : f32 to vector<2x128xf32>
    %749 = arith.subf %748, %747 : vector<2x128xf32>
    %cst_143 = arith.constant 1.000000e+00 : f32
    %750 = vector.broadcast %cst_143 : f32 to vector<2x128xf32>
    %751 = arith.mulf %749, %750 : vector<2x128xf32>
    %752 = math.exp %751 : vector<2x128xf32>
    %753 = math.log1p %752 : vector<2x128xf32>
    %754 = vector.broadcast %741 : vector<2x1xf32> to vector<2x128xf32>
    %755 = vector.broadcast %743 : vector<1x128xf32> to vector<2x128xf32>
    %756 = arith.subf %754, %755 : vector<2x128xf32>
    %757 = math.absf %756 : vector<2x128xf32>
    %cst_144 = arith.constant 0.000000e+00 : f32
    %758 = vector.broadcast %cst_144 : f32 to vector<2x128xf32>
    %759 = arith.subf %758, %757 : vector<2x128xf32>
    %cst_145 = arith.constant 1.000000e+00 : f32
    %760 = vector.broadcast %cst_145 : f32 to vector<2x128xf32>
    %761 = arith.mulf %759, %760 : vector<2x128xf32>
    %762 = math.exp %761 : vector<2x128xf32>
    %763 = math.log1p %762 : vector<2x128xf32>
    %764 = arith.addf %753, %763 : vector<2x128xf32>
    %765 = vector.broadcast %741 : vector<2x1xf32> to vector<2x128xf32>
    %766 = vector.broadcast %743 : vector<1x128xf32> to vector<2x128xf32>
    %767 = arith.minimumf %765, %766 : vector<2x128xf32>
    %768 = vector.broadcast %740 : vector<2x1xf32> to vector<2x128xf32>
    %769 = vector.broadcast %742 : vector<1x128xf32> to vector<2x128xf32>
    %770 = arith.maximumf %768, %769 : vector<2x128xf32>
    %771 = arith.subf %767, %770 : vector<2x128xf32>
    %cst_146 = arith.constant 1.000000e+00 : f32
    %772 = vector.broadcast %cst_146 : f32 to vector<2x128xf32>
    %773 = arith.mulf %772, %764 : vector<2x128xf32>
    %774 = arith.subf %771, %773 : vector<2x128xf32>
    %cst_147 = arith.constant 1.200000e+00 : f32
    %775 = vector.broadcast %cst_147 : f32 to vector<2x128xf32>
    %776 = arith.subf %774, %775 : vector<2x128xf32>
    %cst_148 = arith.constant 1.000000e+00 : f32
    %777 = vector.broadcast %cst_148 : f32 to vector<2x128xf32>
    %778 = arith.mulf %776, %777 : vector<2x128xf32>
    %cst_149 = arith.constant 0.000000e+00 : f32
    %779 = vector.broadcast %cst_149 : f32 to vector<2x128xf32>
    %780 = arith.maximumf %778, %779 : vector<2x128xf32>
    %781 = vector.broadcast %cst_149 : f32 to vector<2x128xf32>
    %782 = arith.subf %778, %781 : vector<2x128xf32>
    %783 = arith.cmpf one, %782, %782 : vector<2x128xf32>
    %784 = vector.broadcast %cst_149 : f32 to vector<2x128xf32>
    %785 = arith.addf %778, %784 : vector<2x128xf32>
    %786 = math.absf %782 : vector<2x128xf32>
    %cst_150 = arith.constant 0.000000e+00 : f32
    %787 = vector.broadcast %cst_150 : f32 to vector<2x128xf32>
    %788 = arith.subf %787, %786 : vector<2x128xf32>
    %789 = math.exp %788 : vector<2x128xf32>
    %790 = math.log1p %789 : vector<2x128xf32>
    %791 = arith.addf %780, %790 : vector<2x128xf32>
    %792 = arith.select %783, %785, %791 : vector<2x128xi1>, vector<2x128xf32>
    %cst_151 = arith.constant 1.17549435E-38 : f32
    %793 = vector.broadcast %cst_151 : f32 to vector<2x128xf32>
    %794 = arith.maximumf %792, %793 : vector<2x128xf32>
    %795 = math.log %794 : vector<2x128xf32>
    %796 = arith.addf %739, %795 : vector<2x128xf32>
    %797 = vector.extract_strided_slice %0 {offsets = [0, 13], sizes = [2, 1], strides = [1, 1]} : vector<2x32xf32> to vector<2x1xf32>
    %798 = vector.extract_strided_slice %1 {offsets = [0, 13], sizes = [2, 1], strides = [1, 1]} : vector<2x32xf32> to vector<2x1xf32>
    %799 = vector.extract_strided_slice %53 {offsets = [13, 0], sizes = [1, 128], strides = [1, 1]} : vector<32x128xf32> to vector<1x128xf32>
    %800 = vector.extract_strided_slice %54 {offsets = [13, 0], sizes = [1, 128], strides = [1, 1]} : vector<32x128xf32> to vector<1x128xf32>
    %801 = vector.broadcast %797 : vector<2x1xf32> to vector<2x128xf32>
    %802 = vector.broadcast %799 : vector<1x128xf32> to vector<2x128xf32>
    %803 = arith.subf %801, %802 : vector<2x128xf32>
    %804 = math.absf %803 : vector<2x128xf32>
    %cst_152 = arith.constant 0.000000e+00 : f32
    %805 = vector.broadcast %cst_152 : f32 to vector<2x128xf32>
    %806 = arith.subf %805, %804 : vector<2x128xf32>
    %cst_153 = arith.constant 1.000000e+00 : f32
    %807 = vector.broadcast %cst_153 : f32 to vector<2x128xf32>
    %808 = arith.mulf %806, %807 : vector<2x128xf32>
    %809 = math.exp %808 : vector<2x128xf32>
    %810 = math.log1p %809 : vector<2x128xf32>
    %811 = vector.broadcast %798 : vector<2x1xf32> to vector<2x128xf32>
    %812 = vector.broadcast %800 : vector<1x128xf32> to vector<2x128xf32>
    %813 = arith.subf %811, %812 : vector<2x128xf32>
    %814 = math.absf %813 : vector<2x128xf32>
    %cst_154 = arith.constant 0.000000e+00 : f32
    %815 = vector.broadcast %cst_154 : f32 to vector<2x128xf32>
    %816 = arith.subf %815, %814 : vector<2x128xf32>
    %cst_155 = arith.constant 1.000000e+00 : f32
    %817 = vector.broadcast %cst_155 : f32 to vector<2x128xf32>
    %818 = arith.mulf %816, %817 : vector<2x128xf32>
    %819 = math.exp %818 : vector<2x128xf32>
    %820 = math.log1p %819 : vector<2x128xf32>
    %821 = arith.addf %810, %820 : vector<2x128xf32>
    %822 = vector.broadcast %798 : vector<2x1xf32> to vector<2x128xf32>
    %823 = vector.broadcast %800 : vector<1x128xf32> to vector<2x128xf32>
    %824 = arith.minimumf %822, %823 : vector<2x128xf32>
    %825 = vector.broadcast %797 : vector<2x1xf32> to vector<2x128xf32>
    %826 = vector.broadcast %799 : vector<1x128xf32> to vector<2x128xf32>
    %827 = arith.maximumf %825, %826 : vector<2x128xf32>
    %828 = arith.subf %824, %827 : vector<2x128xf32>
    %cst_156 = arith.constant 1.000000e+00 : f32
    %829 = vector.broadcast %cst_156 : f32 to vector<2x128xf32>
    %830 = arith.mulf %829, %821 : vector<2x128xf32>
    %831 = arith.subf %828, %830 : vector<2x128xf32>
    %cst_157 = arith.constant 1.200000e+00 : f32
    %832 = vector.broadcast %cst_157 : f32 to vector<2x128xf32>
    %833 = arith.subf %831, %832 : vector<2x128xf32>
    %cst_158 = arith.constant 1.000000e+00 : f32
    %834 = vector.broadcast %cst_158 : f32 to vector<2x128xf32>
    %835 = arith.mulf %833, %834 : vector<2x128xf32>
    %cst_159 = arith.constant 0.000000e+00 : f32
    %836 = vector.broadcast %cst_159 : f32 to vector<2x128xf32>
    %837 = arith.maximumf %835, %836 : vector<2x128xf32>
    %838 = vector.broadcast %cst_159 : f32 to vector<2x128xf32>
    %839 = arith.subf %835, %838 : vector<2x128xf32>
    %840 = arith.cmpf one, %839, %839 : vector<2x128xf32>
    %841 = vector.broadcast %cst_159 : f32 to vector<2x128xf32>
    %842 = arith.addf %835, %841 : vector<2x128xf32>
    %843 = math.absf %839 : vector<2x128xf32>
    %cst_160 = arith.constant 0.000000e+00 : f32
    %844 = vector.broadcast %cst_160 : f32 to vector<2x128xf32>
    %845 = arith.subf %844, %843 : vector<2x128xf32>
    %846 = math.exp %845 : vector<2x128xf32>
    %847 = math.log1p %846 : vector<2x128xf32>
    %848 = arith.addf %837, %847 : vector<2x128xf32>
    %849 = arith.select %840, %842, %848 : vector<2x128xi1>, vector<2x128xf32>
    %cst_161 = arith.constant 1.17549435E-38 : f32
    %850 = vector.broadcast %cst_161 : f32 to vector<2x128xf32>
    %851 = arith.maximumf %849, %850 : vector<2x128xf32>
    %852 = math.log %851 : vector<2x128xf32>
    %853 = arith.addf %796, %852 : vector<2x128xf32>
    %854 = vector.extract_strided_slice %0 {offsets = [0, 14], sizes = [2, 1], strides = [1, 1]} : vector<2x32xf32> to vector<2x1xf32>
    %855 = vector.extract_strided_slice %1 {offsets = [0, 14], sizes = [2, 1], strides = [1, 1]} : vector<2x32xf32> to vector<2x1xf32>
    %856 = vector.extract_strided_slice %53 {offsets = [14, 0], sizes = [1, 128], strides = [1, 1]} : vector<32x128xf32> to vector<1x128xf32>
    %857 = vector.extract_strided_slice %54 {offsets = [14, 0], sizes = [1, 128], strides = [1, 1]} : vector<32x128xf32> to vector<1x128xf32>
    %858 = vector.broadcast %854 : vector<2x1xf32> to vector<2x128xf32>
    %859 = vector.broadcast %856 : vector<1x128xf32> to vector<2x128xf32>
    %860 = arith.subf %858, %859 : vector<2x128xf32>
    %861 = math.absf %860 : vector<2x128xf32>
    %cst_162 = arith.constant 0.000000e+00 : f32
    %862 = vector.broadcast %cst_162 : f32 to vector<2x128xf32>
    %863 = arith.subf %862, %861 : vector<2x128xf32>
    %cst_163 = arith.constant 1.000000e+00 : f32
    %864 = vector.broadcast %cst_163 : f32 to vector<2x128xf32>
    %865 = arith.mulf %863, %864 : vector<2x128xf32>
    %866 = math.exp %865 : vector<2x128xf32>
    %867 = math.log1p %866 : vector<2x128xf32>
    %868 = vector.broadcast %855 : vector<2x1xf32> to vector<2x128xf32>
    %869 = vector.broadcast %857 : vector<1x128xf32> to vector<2x128xf32>
    %870 = arith.subf %868, %869 : vector<2x128xf32>
    %871 = math.absf %870 : vector<2x128xf32>
    %cst_164 = arith.constant 0.000000e+00 : f32
    %872 = vector.broadcast %cst_164 : f32 to vector<2x128xf32>
    %873 = arith.subf %872, %871 : vector<2x128xf32>
    %cst_165 = arith.constant 1.000000e+00 : f32
    %874 = vector.broadcast %cst_165 : f32 to vector<2x128xf32>
    %875 = arith.mulf %873, %874 : vector<2x128xf32>
    %876 = math.exp %875 : vector<2x128xf32>
    %877 = math.log1p %876 : vector<2x128xf32>
    %878 = arith.addf %867, %877 : vector<2x128xf32>
    %879 = vector.broadcast %855 : vector<2x1xf32> to vector<2x128xf32>
    %880 = vector.broadcast %857 : vector<1x128xf32> to vector<2x128xf32>
    %881 = arith.minimumf %879, %880 : vector<2x128xf32>
    %882 = vector.broadcast %854 : vector<2x1xf32> to vector<2x128xf32>
    %883 = vector.broadcast %856 : vector<1x128xf32> to vector<2x128xf32>
    %884 = arith.maximumf %882, %883 : vector<2x128xf32>
    %885 = arith.subf %881, %884 : vector<2x128xf32>
    %cst_166 = arith.constant 1.000000e+00 : f32
    %886 = vector.broadcast %cst_166 : f32 to vector<2x128xf32>
    %887 = arith.mulf %886, %878 : vector<2x128xf32>
    %888 = arith.subf %885, %887 : vector<2x128xf32>
    %cst_167 = arith.constant 1.200000e+00 : f32
    %889 = vector.broadcast %cst_167 : f32 to vector<2x128xf32>
    %890 = arith.subf %888, %889 : vector<2x128xf32>
    %cst_168 = arith.constant 1.000000e+00 : f32
    %891 = vector.broadcast %cst_168 : f32 to vector<2x128xf32>
    %892 = arith.mulf %890, %891 : vector<2x128xf32>
    %cst_169 = arith.constant 0.000000e+00 : f32
    %893 = vector.broadcast %cst_169 : f32 to vector<2x128xf32>
    %894 = arith.maximumf %892, %893 : vector<2x128xf32>
    %895 = vector.broadcast %cst_169 : f32 to vector<2x128xf32>
    %896 = arith.subf %892, %895 : vector<2x128xf32>
    %897 = arith.cmpf one, %896, %896 : vector<2x128xf32>
    %898 = vector.broadcast %cst_169 : f32 to vector<2x128xf32>
    %899 = arith.addf %892, %898 : vector<2x128xf32>
    %900 = math.absf %896 : vector<2x128xf32>
    %cst_170 = arith.constant 0.000000e+00 : f32
    %901 = vector.broadcast %cst_170 : f32 to vector<2x128xf32>
    %902 = arith.subf %901, %900 : vector<2x128xf32>
    %903 = math.exp %902 : vector<2x128xf32>
    %904 = math.log1p %903 : vector<2x128xf32>
    %905 = arith.addf %894, %904 : vector<2x128xf32>
    %906 = arith.select %897, %899, %905 : vector<2x128xi1>, vector<2x128xf32>
    %cst_171 = arith.constant 1.17549435E-38 : f32
    %907 = vector.broadcast %cst_171 : f32 to vector<2x128xf32>
    %908 = arith.maximumf %906, %907 : vector<2x128xf32>
    %909 = math.log %908 : vector<2x128xf32>
    %910 = arith.addf %853, %909 : vector<2x128xf32>
    %911 = vector.extract_strided_slice %0 {offsets = [0, 15], sizes = [2, 1], strides = [1, 1]} : vector<2x32xf32> to vector<2x1xf32>
    %912 = vector.extract_strided_slice %1 {offsets = [0, 15], sizes = [2, 1], strides = [1, 1]} : vector<2x32xf32> to vector<2x1xf32>
    %913 = vector.extract_strided_slice %53 {offsets = [15, 0], sizes = [1, 128], strides = [1, 1]} : vector<32x128xf32> to vector<1x128xf32>
    %914 = vector.extract_strided_slice %54 {offsets = [15, 0], sizes = [1, 128], strides = [1, 1]} : vector<32x128xf32> to vector<1x128xf32>
    %915 = vector.broadcast %911 : vector<2x1xf32> to vector<2x128xf32>
    %916 = vector.broadcast %913 : vector<1x128xf32> to vector<2x128xf32>
    %917 = arith.subf %915, %916 : vector<2x128xf32>
    %918 = math.absf %917 : vector<2x128xf32>
    %cst_172 = arith.constant 0.000000e+00 : f32
    %919 = vector.broadcast %cst_172 : f32 to vector<2x128xf32>
    %920 = arith.subf %919, %918 : vector<2x128xf32>
    %cst_173 = arith.constant 1.000000e+00 : f32
    %921 = vector.broadcast %cst_173 : f32 to vector<2x128xf32>
    %922 = arith.mulf %920, %921 : vector<2x128xf32>
    %923 = math.exp %922 : vector<2x128xf32>
    %924 = math.log1p %923 : vector<2x128xf32>
    %925 = vector.broadcast %912 : vector<2x1xf32> to vector<2x128xf32>
    %926 = vector.broadcast %914 : vector<1x128xf32> to vector<2x128xf32>
    %927 = arith.subf %925, %926 : vector<2x128xf32>
    %928 = math.absf %927 : vector<2x128xf32>
    %cst_174 = arith.constant 0.000000e+00 : f32
    %929 = vector.broadcast %cst_174 : f32 to vector<2x128xf32>
    %930 = arith.subf %929, %928 : vector<2x128xf32>
    %cst_175 = arith.constant 1.000000e+00 : f32
    %931 = vector.broadcast %cst_175 : f32 to vector<2x128xf32>
    %932 = arith.mulf %930, %931 : vector<2x128xf32>
    %933 = math.exp %932 : vector<2x128xf32>
    %934 = math.log1p %933 : vector<2x128xf32>
    %935 = arith.addf %924, %934 : vector<2x128xf32>
    %936 = vector.broadcast %912 : vector<2x1xf32> to vector<2x128xf32>
    %937 = vector.broadcast %914 : vector<1x128xf32> to vector<2x128xf32>
    %938 = arith.minimumf %936, %937 : vector<2x128xf32>
    %939 = vector.broadcast %911 : vector<2x1xf32> to vector<2x128xf32>
    %940 = vector.broadcast %913 : vector<1x128xf32> to vector<2x128xf32>
    %941 = arith.maximumf %939, %940 : vector<2x128xf32>
    %942 = arith.subf %938, %941 : vector<2x128xf32>
    %cst_176 = arith.constant 1.000000e+00 : f32
    %943 = vector.broadcast %cst_176 : f32 to vector<2x128xf32>
    %944 = arith.mulf %943, %935 : vector<2x128xf32>
    %945 = arith.subf %942, %944 : vector<2x128xf32>
    %cst_177 = arith.constant 1.200000e+00 : f32
    %946 = vector.broadcast %cst_177 : f32 to vector<2x128xf32>
    %947 = arith.subf %945, %946 : vector<2x128xf32>
    %cst_178 = arith.constant 1.000000e+00 : f32
    %948 = vector.broadcast %cst_178 : f32 to vector<2x128xf32>
    %949 = arith.mulf %947, %948 : vector<2x128xf32>
    %cst_179 = arith.constant 0.000000e+00 : f32
    %950 = vector.broadcast %cst_179 : f32 to vector<2x128xf32>
    %951 = arith.maximumf %949, %950 : vector<2x128xf32>
    %952 = vector.broadcast %cst_179 : f32 to vector<2x128xf32>
    %953 = arith.subf %949, %952 : vector<2x128xf32>
    %954 = arith.cmpf one, %953, %953 : vector<2x128xf32>
    %955 = vector.broadcast %cst_179 : f32 to vector<2x128xf32>
    %956 = arith.addf %949, %955 : vector<2x128xf32>
    %957 = math.absf %953 : vector<2x128xf32>
    %cst_180 = arith.constant 0.000000e+00 : f32
    %958 = vector.broadcast %cst_180 : f32 to vector<2x128xf32>
    %959 = arith.subf %958, %957 : vector<2x128xf32>
    %960 = math.exp %959 : vector<2x128xf32>
    %961 = math.log1p %960 : vector<2x128xf32>
    %962 = arith.addf %951, %961 : vector<2x128xf32>
    %963 = arith.select %954, %956, %962 : vector<2x128xi1>, vector<2x128xf32>
    %cst_181 = arith.constant 1.17549435E-38 : f32
    %964 = vector.broadcast %cst_181 : f32 to vector<2x128xf32>
    %965 = arith.maximumf %963, %964 : vector<2x128xf32>
    %966 = math.log %965 : vector<2x128xf32>
    %967 = arith.addf %910, %966 : vector<2x128xf32>
    %968 = vector.extract_strided_slice %0 {offsets = [0, 16], sizes = [2, 1], strides = [1, 1]} : vector<2x32xf32> to vector<2x1xf32>
    %969 = vector.extract_strided_slice %1 {offsets = [0, 16], sizes = [2, 1], strides = [1, 1]} : vector<2x32xf32> to vector<2x1xf32>
    %970 = vector.extract_strided_slice %53 {offsets = [16, 0], sizes = [1, 128], strides = [1, 1]} : vector<32x128xf32> to vector<1x128xf32>
    %971 = vector.extract_strided_slice %54 {offsets = [16, 0], sizes = [1, 128], strides = [1, 1]} : vector<32x128xf32> to vector<1x128xf32>
    %972 = vector.broadcast %968 : vector<2x1xf32> to vector<2x128xf32>
    %973 = vector.broadcast %970 : vector<1x128xf32> to vector<2x128xf32>
    %974 = arith.subf %972, %973 : vector<2x128xf32>
    %975 = math.absf %974 : vector<2x128xf32>
    %cst_182 = arith.constant 0.000000e+00 : f32
    %976 = vector.broadcast %cst_182 : f32 to vector<2x128xf32>
    %977 = arith.subf %976, %975 : vector<2x128xf32>
    %cst_183 = arith.constant 1.000000e+00 : f32
    %978 = vector.broadcast %cst_183 : f32 to vector<2x128xf32>
    %979 = arith.mulf %977, %978 : vector<2x128xf32>
    %980 = math.exp %979 : vector<2x128xf32>
    %981 = math.log1p %980 : vector<2x128xf32>
    %982 = vector.broadcast %969 : vector<2x1xf32> to vector<2x128xf32>
    %983 = vector.broadcast %971 : vector<1x128xf32> to vector<2x128xf32>
    %984 = arith.subf %982, %983 : vector<2x128xf32>
    %985 = math.absf %984 : vector<2x128xf32>
    %cst_184 = arith.constant 0.000000e+00 : f32
    %986 = vector.broadcast %cst_184 : f32 to vector<2x128xf32>
    %987 = arith.subf %986, %985 : vector<2x128xf32>
    %cst_185 = arith.constant 1.000000e+00 : f32
    %988 = vector.broadcast %cst_185 : f32 to vector<2x128xf32>
    %989 = arith.mulf %987, %988 : vector<2x128xf32>
    %990 = math.exp %989 : vector<2x128xf32>
    %991 = math.log1p %990 : vector<2x128xf32>
    %992 = arith.addf %981, %991 : vector<2x128xf32>
    %993 = vector.broadcast %969 : vector<2x1xf32> to vector<2x128xf32>
    %994 = vector.broadcast %971 : vector<1x128xf32> to vector<2x128xf32>
    %995 = arith.minimumf %993, %994 : vector<2x128xf32>
    %996 = vector.broadcast %968 : vector<2x1xf32> to vector<2x128xf32>
    %997 = vector.broadcast %970 : vector<1x128xf32> to vector<2x128xf32>
    %998 = arith.maximumf %996, %997 : vector<2x128xf32>
    %999 = arith.subf %995, %998 : vector<2x128xf32>
    %cst_186 = arith.constant 1.000000e+00 : f32
    %1000 = vector.broadcast %cst_186 : f32 to vector<2x128xf32>
    %1001 = arith.mulf %1000, %992 : vector<2x128xf32>
    %1002 = arith.subf %999, %1001 : vector<2x128xf32>
    %cst_187 = arith.constant 1.200000e+00 : f32
    %1003 = vector.broadcast %cst_187 : f32 to vector<2x128xf32>
    %1004 = arith.subf %1002, %1003 : vector<2x128xf32>
    %cst_188 = arith.constant 1.000000e+00 : f32
    %1005 = vector.broadcast %cst_188 : f32 to vector<2x128xf32>
    %1006 = arith.mulf %1004, %1005 : vector<2x128xf32>
    %cst_189 = arith.constant 0.000000e+00 : f32
    %1007 = vector.broadcast %cst_189 : f32 to vector<2x128xf32>
    %1008 = arith.maximumf %1006, %1007 : vector<2x128xf32>
    %1009 = vector.broadcast %cst_189 : f32 to vector<2x128xf32>
    %1010 = arith.subf %1006, %1009 : vector<2x128xf32>
    %1011 = arith.cmpf one, %1010, %1010 : vector<2x128xf32>
    %1012 = vector.broadcast %cst_189 : f32 to vector<2x128xf32>
    %1013 = arith.addf %1006, %1012 : vector<2x128xf32>
    %1014 = math.absf %1010 : vector<2x128xf32>
    %cst_190 = arith.constant 0.000000e+00 : f32
    %1015 = vector.broadcast %cst_190 : f32 to vector<2x128xf32>
    %1016 = arith.subf %1015, %1014 : vector<2x128xf32>
    %1017 = math.exp %1016 : vector<2x128xf32>
    %1018 = math.log1p %1017 : vector<2x128xf32>
    %1019 = arith.addf %1008, %1018 : vector<2x128xf32>
    %1020 = arith.select %1011, %1013, %1019 : vector<2x128xi1>, vector<2x128xf32>
    %cst_191 = arith.constant 1.17549435E-38 : f32
    %1021 = vector.broadcast %cst_191 : f32 to vector<2x128xf32>
    %1022 = arith.maximumf %1020, %1021 : vector<2x128xf32>
    %1023 = math.log %1022 : vector<2x128xf32>
    %1024 = arith.addf %967, %1023 : vector<2x128xf32>
    %1025 = vector.extract_strided_slice %0 {offsets = [0, 17], sizes = [2, 1], strides = [1, 1]} : vector<2x32xf32> to vector<2x1xf32>
    %1026 = vector.extract_strided_slice %1 {offsets = [0, 17], sizes = [2, 1], strides = [1, 1]} : vector<2x32xf32> to vector<2x1xf32>
    %1027 = vector.extract_strided_slice %53 {offsets = [17, 0], sizes = [1, 128], strides = [1, 1]} : vector<32x128xf32> to vector<1x128xf32>
    %1028 = vector.extract_strided_slice %54 {offsets = [17, 0], sizes = [1, 128], strides = [1, 1]} : vector<32x128xf32> to vector<1x128xf32>
    %1029 = vector.broadcast %1025 : vector<2x1xf32> to vector<2x128xf32>
    %1030 = vector.broadcast %1027 : vector<1x128xf32> to vector<2x128xf32>
    %1031 = arith.subf %1029, %1030 : vector<2x128xf32>
    %1032 = math.absf %1031 : vector<2x128xf32>
    %cst_192 = arith.constant 0.000000e+00 : f32
    %1033 = vector.broadcast %cst_192 : f32 to vector<2x128xf32>
    %1034 = arith.subf %1033, %1032 : vector<2x128xf32>
    %cst_193 = arith.constant 1.000000e+00 : f32
    %1035 = vector.broadcast %cst_193 : f32 to vector<2x128xf32>
    %1036 = arith.mulf %1034, %1035 : vector<2x128xf32>
    %1037 = math.exp %1036 : vector<2x128xf32>
    %1038 = math.log1p %1037 : vector<2x128xf32>
    %1039 = vector.broadcast %1026 : vector<2x1xf32> to vector<2x128xf32>
    %1040 = vector.broadcast %1028 : vector<1x128xf32> to vector<2x128xf32>
    %1041 = arith.subf %1039, %1040 : vector<2x128xf32>
    %1042 = math.absf %1041 : vector<2x128xf32>
    %cst_194 = arith.constant 0.000000e+00 : f32
    %1043 = vector.broadcast %cst_194 : f32 to vector<2x128xf32>
    %1044 = arith.subf %1043, %1042 : vector<2x128xf32>
    %cst_195 = arith.constant 1.000000e+00 : f32
    %1045 = vector.broadcast %cst_195 : f32 to vector<2x128xf32>
    %1046 = arith.mulf %1044, %1045 : vector<2x128xf32>
    %1047 = math.exp %1046 : vector<2x128xf32>
    %1048 = math.log1p %1047 : vector<2x128xf32>
    %1049 = arith.addf %1038, %1048 : vector<2x128xf32>
    %1050 = vector.broadcast %1026 : vector<2x1xf32> to vector<2x128xf32>
    %1051 = vector.broadcast %1028 : vector<1x128xf32> to vector<2x128xf32>
    %1052 = arith.minimumf %1050, %1051 : vector<2x128xf32>
    %1053 = vector.broadcast %1025 : vector<2x1xf32> to vector<2x128xf32>
    %1054 = vector.broadcast %1027 : vector<1x128xf32> to vector<2x128xf32>
    %1055 = arith.maximumf %1053, %1054 : vector<2x128xf32>
    %1056 = arith.subf %1052, %1055 : vector<2x128xf32>
    %cst_196 = arith.constant 1.000000e+00 : f32
    %1057 = vector.broadcast %cst_196 : f32 to vector<2x128xf32>
    %1058 = arith.mulf %1057, %1049 : vector<2x128xf32>
    %1059 = arith.subf %1056, %1058 : vector<2x128xf32>
    %cst_197 = arith.constant 1.200000e+00 : f32
    %1060 = vector.broadcast %cst_197 : f32 to vector<2x128xf32>
    %1061 = arith.subf %1059, %1060 : vector<2x128xf32>
    %cst_198 = arith.constant 1.000000e+00 : f32
    %1062 = vector.broadcast %cst_198 : f32 to vector<2x128xf32>
    %1063 = arith.mulf %1061, %1062 : vector<2x128xf32>
    %cst_199 = arith.constant 0.000000e+00 : f32
    %1064 = vector.broadcast %cst_199 : f32 to vector<2x128xf32>
    %1065 = arith.maximumf %1063, %1064 : vector<2x128xf32>
    %1066 = vector.broadcast %cst_199 : f32 to vector<2x128xf32>
    %1067 = arith.subf %1063, %1066 : vector<2x128xf32>
    %1068 = arith.cmpf one, %1067, %1067 : vector<2x128xf32>
    %1069 = vector.broadcast %cst_199 : f32 to vector<2x128xf32>
    %1070 = arith.addf %1063, %1069 : vector<2x128xf32>
    %1071 = math.absf %1067 : vector<2x128xf32>
    %cst_200 = arith.constant 0.000000e+00 : f32
    %1072 = vector.broadcast %cst_200 : f32 to vector<2x128xf32>
    %1073 = arith.subf %1072, %1071 : vector<2x128xf32>
    %1074 = math.exp %1073 : vector<2x128xf32>
    %1075 = math.log1p %1074 : vector<2x128xf32>
    %1076 = arith.addf %1065, %1075 : vector<2x128xf32>
    %1077 = arith.select %1068, %1070, %1076 : vector<2x128xi1>, vector<2x128xf32>
    %cst_201 = arith.constant 1.17549435E-38 : f32
    %1078 = vector.broadcast %cst_201 : f32 to vector<2x128xf32>
    %1079 = arith.maximumf %1077, %1078 : vector<2x128xf32>
    %1080 = math.log %1079 : vector<2x128xf32>
    %1081 = arith.addf %1024, %1080 : vector<2x128xf32>
    %1082 = vector.extract_strided_slice %0 {offsets = [0, 18], sizes = [2, 1], strides = [1, 1]} : vector<2x32xf32> to vector<2x1xf32>
    %1083 = vector.extract_strided_slice %1 {offsets = [0, 18], sizes = [2, 1], strides = [1, 1]} : vector<2x32xf32> to vector<2x1xf32>
    %1084 = vector.extract_strided_slice %53 {offsets = [18, 0], sizes = [1, 128], strides = [1, 1]} : vector<32x128xf32> to vector<1x128xf32>
    %1085 = vector.extract_strided_slice %54 {offsets = [18, 0], sizes = [1, 128], strides = [1, 1]} : vector<32x128xf32> to vector<1x128xf32>
    %1086 = vector.broadcast %1082 : vector<2x1xf32> to vector<2x128xf32>
    %1087 = vector.broadcast %1084 : vector<1x128xf32> to vector<2x128xf32>
    %1088 = arith.subf %1086, %1087 : vector<2x128xf32>
    %1089 = math.absf %1088 : vector<2x128xf32>
    %cst_202 = arith.constant 0.000000e+00 : f32
    %1090 = vector.broadcast %cst_202 : f32 to vector<2x128xf32>
    %1091 = arith.subf %1090, %1089 : vector<2x128xf32>
    %cst_203 = arith.constant 1.000000e+00 : f32
    %1092 = vector.broadcast %cst_203 : f32 to vector<2x128xf32>
    %1093 = arith.mulf %1091, %1092 : vector<2x128xf32>
    %1094 = math.exp %1093 : vector<2x128xf32>
    %1095 = math.log1p %1094 : vector<2x128xf32>
    %1096 = vector.broadcast %1083 : vector<2x1xf32> to vector<2x128xf32>
    %1097 = vector.broadcast %1085 : vector<1x128xf32> to vector<2x128xf32>
    %1098 = arith.subf %1096, %1097 : vector<2x128xf32>
    %1099 = math.absf %1098 : vector<2x128xf32>
    %cst_204 = arith.constant 0.000000e+00 : f32
    %1100 = vector.broadcast %cst_204 : f32 to vector<2x128xf32>
    %1101 = arith.subf %1100, %1099 : vector<2x128xf32>
    %cst_205 = arith.constant 1.000000e+00 : f32
    %1102 = vector.broadcast %cst_205 : f32 to vector<2x128xf32>
    %1103 = arith.mulf %1101, %1102 : vector<2x128xf32>
    %1104 = math.exp %1103 : vector<2x128xf32>
    %1105 = math.log1p %1104 : vector<2x128xf32>
    %1106 = arith.addf %1095, %1105 : vector<2x128xf32>
    %1107 = vector.broadcast %1083 : vector<2x1xf32> to vector<2x128xf32>
    %1108 = vector.broadcast %1085 : vector<1x128xf32> to vector<2x128xf32>
    %1109 = arith.minimumf %1107, %1108 : vector<2x128xf32>
    %1110 = vector.broadcast %1082 : vector<2x1xf32> to vector<2x128xf32>
    %1111 = vector.broadcast %1084 : vector<1x128xf32> to vector<2x128xf32>
    %1112 = arith.maximumf %1110, %1111 : vector<2x128xf32>
    %1113 = arith.subf %1109, %1112 : vector<2x128xf32>
    %cst_206 = arith.constant 1.000000e+00 : f32
    %1114 = vector.broadcast %cst_206 : f32 to vector<2x128xf32>
    %1115 = arith.mulf %1114, %1106 : vector<2x128xf32>
    %1116 = arith.subf %1113, %1115 : vector<2x128xf32>
    %cst_207 = arith.constant 1.200000e+00 : f32
    %1117 = vector.broadcast %cst_207 : f32 to vector<2x128xf32>
    %1118 = arith.subf %1116, %1117 : vector<2x128xf32>
    %cst_208 = arith.constant 1.000000e+00 : f32
    %1119 = vector.broadcast %cst_208 : f32 to vector<2x128xf32>
    %1120 = arith.mulf %1118, %1119 : vector<2x128xf32>
    %cst_209 = arith.constant 0.000000e+00 : f32
    %1121 = vector.broadcast %cst_209 : f32 to vector<2x128xf32>
    %1122 = arith.maximumf %1120, %1121 : vector<2x128xf32>
    %1123 = vector.broadcast %cst_209 : f32 to vector<2x128xf32>
    %1124 = arith.subf %1120, %1123 : vector<2x128xf32>
    %1125 = arith.cmpf one, %1124, %1124 : vector<2x128xf32>
    %1126 = vector.broadcast %cst_209 : f32 to vector<2x128xf32>
    %1127 = arith.addf %1120, %1126 : vector<2x128xf32>
    %1128 = math.absf %1124 : vector<2x128xf32>
    %cst_210 = arith.constant 0.000000e+00 : f32
    %1129 = vector.broadcast %cst_210 : f32 to vector<2x128xf32>
    %1130 = arith.subf %1129, %1128 : vector<2x128xf32>
    %1131 = math.exp %1130 : vector<2x128xf32>
    %1132 = math.log1p %1131 : vector<2x128xf32>
    %1133 = arith.addf %1122, %1132 : vector<2x128xf32>
    %1134 = arith.select %1125, %1127, %1133 : vector<2x128xi1>, vector<2x128xf32>
    %cst_211 = arith.constant 1.17549435E-38 : f32
    %1135 = vector.broadcast %cst_211 : f32 to vector<2x128xf32>
    %1136 = arith.maximumf %1134, %1135 : vector<2x128xf32>
    %1137 = math.log %1136 : vector<2x128xf32>
    %1138 = arith.addf %1081, %1137 : vector<2x128xf32>
    %1139 = vector.extract_strided_slice %0 {offsets = [0, 19], sizes = [2, 1], strides = [1, 1]} : vector<2x32xf32> to vector<2x1xf32>
    %1140 = vector.extract_strided_slice %1 {offsets = [0, 19], sizes = [2, 1], strides = [1, 1]} : vector<2x32xf32> to vector<2x1xf32>
    %1141 = vector.extract_strided_slice %53 {offsets = [19, 0], sizes = [1, 128], strides = [1, 1]} : vector<32x128xf32> to vector<1x128xf32>
    %1142 = vector.extract_strided_slice %54 {offsets = [19, 0], sizes = [1, 128], strides = [1, 1]} : vector<32x128xf32> to vector<1x128xf32>
    %1143 = vector.broadcast %1139 : vector<2x1xf32> to vector<2x128xf32>
    %1144 = vector.broadcast %1141 : vector<1x128xf32> to vector<2x128xf32>
    %1145 = arith.subf %1143, %1144 : vector<2x128xf32>
    %1146 = math.absf %1145 : vector<2x128xf32>
    %cst_212 = arith.constant 0.000000e+00 : f32
    %1147 = vector.broadcast %cst_212 : f32 to vector<2x128xf32>
    %1148 = arith.subf %1147, %1146 : vector<2x128xf32>
    %cst_213 = arith.constant 1.000000e+00 : f32
    %1149 = vector.broadcast %cst_213 : f32 to vector<2x128xf32>
    %1150 = arith.mulf %1148, %1149 : vector<2x128xf32>
    %1151 = math.exp %1150 : vector<2x128xf32>
    %1152 = math.log1p %1151 : vector<2x128xf32>
    %1153 = vector.broadcast %1140 : vector<2x1xf32> to vector<2x128xf32>
    %1154 = vector.broadcast %1142 : vector<1x128xf32> to vector<2x128xf32>
    %1155 = arith.subf %1153, %1154 : vector<2x128xf32>
    %1156 = math.absf %1155 : vector<2x128xf32>
    %cst_214 = arith.constant 0.000000e+00 : f32
    %1157 = vector.broadcast %cst_214 : f32 to vector<2x128xf32>
    %1158 = arith.subf %1157, %1156 : vector<2x128xf32>
    %cst_215 = arith.constant 1.000000e+00 : f32
    %1159 = vector.broadcast %cst_215 : f32 to vector<2x128xf32>
    %1160 = arith.mulf %1158, %1159 : vector<2x128xf32>
    %1161 = math.exp %1160 : vector<2x128xf32>
    %1162 = math.log1p %1161 : vector<2x128xf32>
    %1163 = arith.addf %1152, %1162 : vector<2x128xf32>
    %1164 = vector.broadcast %1140 : vector<2x1xf32> to vector<2x128xf32>
    %1165 = vector.broadcast %1142 : vector<1x128xf32> to vector<2x128xf32>
    %1166 = arith.minimumf %1164, %1165 : vector<2x128xf32>
    %1167 = vector.broadcast %1139 : vector<2x1xf32> to vector<2x128xf32>
    %1168 = vector.broadcast %1141 : vector<1x128xf32> to vector<2x128xf32>
    %1169 = arith.maximumf %1167, %1168 : vector<2x128xf32>
    %1170 = arith.subf %1166, %1169 : vector<2x128xf32>
    %cst_216 = arith.constant 1.000000e+00 : f32
    %1171 = vector.broadcast %cst_216 : f32 to vector<2x128xf32>
    %1172 = arith.mulf %1171, %1163 : vector<2x128xf32>
    %1173 = arith.subf %1170, %1172 : vector<2x128xf32>
    %cst_217 = arith.constant 1.200000e+00 : f32
    %1174 = vector.broadcast %cst_217 : f32 to vector<2x128xf32>
    %1175 = arith.subf %1173, %1174 : vector<2x128xf32>
    %cst_218 = arith.constant 1.000000e+00 : f32
    %1176 = vector.broadcast %cst_218 : f32 to vector<2x128xf32>
    %1177 = arith.mulf %1175, %1176 : vector<2x128xf32>
    %cst_219 = arith.constant 0.000000e+00 : f32
    %1178 = vector.broadcast %cst_219 : f32 to vector<2x128xf32>
    %1179 = arith.maximumf %1177, %1178 : vector<2x128xf32>
    %1180 = vector.broadcast %cst_219 : f32 to vector<2x128xf32>
    %1181 = arith.subf %1177, %1180 : vector<2x128xf32>
    %1182 = arith.cmpf one, %1181, %1181 : vector<2x128xf32>
    %1183 = vector.broadcast %cst_219 : f32 to vector<2x128xf32>
    %1184 = arith.addf %1177, %1183 : vector<2x128xf32>
    %1185 = math.absf %1181 : vector<2x128xf32>
    %cst_220 = arith.constant 0.000000e+00 : f32
    %1186 = vector.broadcast %cst_220 : f32 to vector<2x128xf32>
    %1187 = arith.subf %1186, %1185 : vector<2x128xf32>
    %1188 = math.exp %1187 : vector<2x128xf32>
    %1189 = math.log1p %1188 : vector<2x128xf32>
    %1190 = arith.addf %1179, %1189 : vector<2x128xf32>
    %1191 = arith.select %1182, %1184, %1190 : vector<2x128xi1>, vector<2x128xf32>
    %cst_221 = arith.constant 1.17549435E-38 : f32
    %1192 = vector.broadcast %cst_221 : f32 to vector<2x128xf32>
    %1193 = arith.maximumf %1191, %1192 : vector<2x128xf32>
    %1194 = math.log %1193 : vector<2x128xf32>
    %1195 = arith.addf %1138, %1194 : vector<2x128xf32>
    %1196 = vector.extract_strided_slice %0 {offsets = [0, 20], sizes = [2, 1], strides = [1, 1]} : vector<2x32xf32> to vector<2x1xf32>
    %1197 = vector.extract_strided_slice %1 {offsets = [0, 20], sizes = [2, 1], strides = [1, 1]} : vector<2x32xf32> to vector<2x1xf32>
    %1198 = vector.extract_strided_slice %53 {offsets = [20, 0], sizes = [1, 128], strides = [1, 1]} : vector<32x128xf32> to vector<1x128xf32>
    %1199 = vector.extract_strided_slice %54 {offsets = [20, 0], sizes = [1, 128], strides = [1, 1]} : vector<32x128xf32> to vector<1x128xf32>
    %1200 = vector.broadcast %1196 : vector<2x1xf32> to vector<2x128xf32>
    %1201 = vector.broadcast %1198 : vector<1x128xf32> to vector<2x128xf32>
    %1202 = arith.subf %1200, %1201 : vector<2x128xf32>
    %1203 = math.absf %1202 : vector<2x128xf32>
    %cst_222 = arith.constant 0.000000e+00 : f32
    %1204 = vector.broadcast %cst_222 : f32 to vector<2x128xf32>
    %1205 = arith.subf %1204, %1203 : vector<2x128xf32>
    %cst_223 = arith.constant 1.000000e+00 : f32
    %1206 = vector.broadcast %cst_223 : f32 to vector<2x128xf32>
    %1207 = arith.mulf %1205, %1206 : vector<2x128xf32>
    %1208 = math.exp %1207 : vector<2x128xf32>
    %1209 = math.log1p %1208 : vector<2x128xf32>
    %1210 = vector.broadcast %1197 : vector<2x1xf32> to vector<2x128xf32>
    %1211 = vector.broadcast %1199 : vector<1x128xf32> to vector<2x128xf32>
    %1212 = arith.subf %1210, %1211 : vector<2x128xf32>
    %1213 = math.absf %1212 : vector<2x128xf32>
    %cst_224 = arith.constant 0.000000e+00 : f32
    %1214 = vector.broadcast %cst_224 : f32 to vector<2x128xf32>
    %1215 = arith.subf %1214, %1213 : vector<2x128xf32>
    %cst_225 = arith.constant 1.000000e+00 : f32
    %1216 = vector.broadcast %cst_225 : f32 to vector<2x128xf32>
    %1217 = arith.mulf %1215, %1216 : vector<2x128xf32>
    %1218 = math.exp %1217 : vector<2x128xf32>
    %1219 = math.log1p %1218 : vector<2x128xf32>
    %1220 = arith.addf %1209, %1219 : vector<2x128xf32>
    %1221 = vector.broadcast %1197 : vector<2x1xf32> to vector<2x128xf32>
    %1222 = vector.broadcast %1199 : vector<1x128xf32> to vector<2x128xf32>
    %1223 = arith.minimumf %1221, %1222 : vector<2x128xf32>
    %1224 = vector.broadcast %1196 : vector<2x1xf32> to vector<2x128xf32>
    %1225 = vector.broadcast %1198 : vector<1x128xf32> to vector<2x128xf32>
    %1226 = arith.maximumf %1224, %1225 : vector<2x128xf32>
    %1227 = arith.subf %1223, %1226 : vector<2x128xf32>
    %cst_226 = arith.constant 1.000000e+00 : f32
    %1228 = vector.broadcast %cst_226 : f32 to vector<2x128xf32>
    %1229 = arith.mulf %1228, %1220 : vector<2x128xf32>
    %1230 = arith.subf %1227, %1229 : vector<2x128xf32>
    %cst_227 = arith.constant 1.200000e+00 : f32
    %1231 = vector.broadcast %cst_227 : f32 to vector<2x128xf32>
    %1232 = arith.subf %1230, %1231 : vector<2x128xf32>
    %cst_228 = arith.constant 1.000000e+00 : f32
    %1233 = vector.broadcast %cst_228 : f32 to vector<2x128xf32>
    %1234 = arith.mulf %1232, %1233 : vector<2x128xf32>
    %cst_229 = arith.constant 0.000000e+00 : f32
    %1235 = vector.broadcast %cst_229 : f32 to vector<2x128xf32>
    %1236 = arith.maximumf %1234, %1235 : vector<2x128xf32>
    %1237 = vector.broadcast %cst_229 : f32 to vector<2x128xf32>
    %1238 = arith.subf %1234, %1237 : vector<2x128xf32>
    %1239 = arith.cmpf one, %1238, %1238 : vector<2x128xf32>
    %1240 = vector.broadcast %cst_229 : f32 to vector<2x128xf32>
    %1241 = arith.addf %1234, %1240 : vector<2x128xf32>
    %1242 = math.absf %1238 : vector<2x128xf32>
    %cst_230 = arith.constant 0.000000e+00 : f32
    %1243 = vector.broadcast %cst_230 : f32 to vector<2x128xf32>
    %1244 = arith.subf %1243, %1242 : vector<2x128xf32>
    %1245 = math.exp %1244 : vector<2x128xf32>
    %1246 = math.log1p %1245 : vector<2x128xf32>
    %1247 = arith.addf %1236, %1246 : vector<2x128xf32>
    %1248 = arith.select %1239, %1241, %1247 : vector<2x128xi1>, vector<2x128xf32>
    %cst_231 = arith.constant 1.17549435E-38 : f32
    %1249 = vector.broadcast %cst_231 : f32 to vector<2x128xf32>
    %1250 = arith.maximumf %1248, %1249 : vector<2x128xf32>
    %1251 = math.log %1250 : vector<2x128xf32>
    %1252 = arith.addf %1195, %1251 : vector<2x128xf32>
    %1253 = vector.extract_strided_slice %0 {offsets = [0, 21], sizes = [2, 1], strides = [1, 1]} : vector<2x32xf32> to vector<2x1xf32>
    %1254 = vector.extract_strided_slice %1 {offsets = [0, 21], sizes = [2, 1], strides = [1, 1]} : vector<2x32xf32> to vector<2x1xf32>
    %1255 = vector.extract_strided_slice %53 {offsets = [21, 0], sizes = [1, 128], strides = [1, 1]} : vector<32x128xf32> to vector<1x128xf32>
    %1256 = vector.extract_strided_slice %54 {offsets = [21, 0], sizes = [1, 128], strides = [1, 1]} : vector<32x128xf32> to vector<1x128xf32>
    %1257 = vector.broadcast %1253 : vector<2x1xf32> to vector<2x128xf32>
    %1258 = vector.broadcast %1255 : vector<1x128xf32> to vector<2x128xf32>
    %1259 = arith.subf %1257, %1258 : vector<2x128xf32>
    %1260 = math.absf %1259 : vector<2x128xf32>
    %cst_232 = arith.constant 0.000000e+00 : f32
    %1261 = vector.broadcast %cst_232 : f32 to vector<2x128xf32>
    %1262 = arith.subf %1261, %1260 : vector<2x128xf32>
    %cst_233 = arith.constant 1.000000e+00 : f32
    %1263 = vector.broadcast %cst_233 : f32 to vector<2x128xf32>
    %1264 = arith.mulf %1262, %1263 : vector<2x128xf32>
    %1265 = math.exp %1264 : vector<2x128xf32>
    %1266 = math.log1p %1265 : vector<2x128xf32>
    %1267 = vector.broadcast %1254 : vector<2x1xf32> to vector<2x128xf32>
    %1268 = vector.broadcast %1256 : vector<1x128xf32> to vector<2x128xf32>
    %1269 = arith.subf %1267, %1268 : vector<2x128xf32>
    %1270 = math.absf %1269 : vector<2x128xf32>
    %cst_234 = arith.constant 0.000000e+00 : f32
    %1271 = vector.broadcast %cst_234 : f32 to vector<2x128xf32>
    %1272 = arith.subf %1271, %1270 : vector<2x128xf32>
    %cst_235 = arith.constant 1.000000e+00 : f32
    %1273 = vector.broadcast %cst_235 : f32 to vector<2x128xf32>
    %1274 = arith.mulf %1272, %1273 : vector<2x128xf32>
    %1275 = math.exp %1274 : vector<2x128xf32>
    %1276 = math.log1p %1275 : vector<2x128xf32>
    %1277 = arith.addf %1266, %1276 : vector<2x128xf32>
    %1278 = vector.broadcast %1254 : vector<2x1xf32> to vector<2x128xf32>
    %1279 = vector.broadcast %1256 : vector<1x128xf32> to vector<2x128xf32>
    %1280 = arith.minimumf %1278, %1279 : vector<2x128xf32>
    %1281 = vector.broadcast %1253 : vector<2x1xf32> to vector<2x128xf32>
    %1282 = vector.broadcast %1255 : vector<1x128xf32> to vector<2x128xf32>
    %1283 = arith.maximumf %1281, %1282 : vector<2x128xf32>
    %1284 = arith.subf %1280, %1283 : vector<2x128xf32>
    %cst_236 = arith.constant 1.000000e+00 : f32
    %1285 = vector.broadcast %cst_236 : f32 to vector<2x128xf32>
    %1286 = arith.mulf %1285, %1277 : vector<2x128xf32>
    %1287 = arith.subf %1284, %1286 : vector<2x128xf32>
    %cst_237 = arith.constant 1.200000e+00 : f32
    %1288 = vector.broadcast %cst_237 : f32 to vector<2x128xf32>
    %1289 = arith.subf %1287, %1288 : vector<2x128xf32>
    %cst_238 = arith.constant 1.000000e+00 : f32
    %1290 = vector.broadcast %cst_238 : f32 to vector<2x128xf32>
    %1291 = arith.mulf %1289, %1290 : vector<2x128xf32>
    %cst_239 = arith.constant 0.000000e+00 : f32
    %1292 = vector.broadcast %cst_239 : f32 to vector<2x128xf32>
    %1293 = arith.maximumf %1291, %1292 : vector<2x128xf32>
    %1294 = vector.broadcast %cst_239 : f32 to vector<2x128xf32>
    %1295 = arith.subf %1291, %1294 : vector<2x128xf32>
    %1296 = arith.cmpf one, %1295, %1295 : vector<2x128xf32>
    %1297 = vector.broadcast %cst_239 : f32 to vector<2x128xf32>
    %1298 = arith.addf %1291, %1297 : vector<2x128xf32>
    %1299 = math.absf %1295 : vector<2x128xf32>
    %cst_240 = arith.constant 0.000000e+00 : f32
    %1300 = vector.broadcast %cst_240 : f32 to vector<2x128xf32>
    %1301 = arith.subf %1300, %1299 : vector<2x128xf32>
    %1302 = math.exp %1301 : vector<2x128xf32>
    %1303 = math.log1p %1302 : vector<2x128xf32>
    %1304 = arith.addf %1293, %1303 : vector<2x128xf32>
    %1305 = arith.select %1296, %1298, %1304 : vector<2x128xi1>, vector<2x128xf32>
    %cst_241 = arith.constant 1.17549435E-38 : f32
    %1306 = vector.broadcast %cst_241 : f32 to vector<2x128xf32>
    %1307 = arith.maximumf %1305, %1306 : vector<2x128xf32>
    %1308 = math.log %1307 : vector<2x128xf32>
    %1309 = arith.addf %1252, %1308 : vector<2x128xf32>
    %1310 = vector.extract_strided_slice %0 {offsets = [0, 22], sizes = [2, 1], strides = [1, 1]} : vector<2x32xf32> to vector<2x1xf32>
    %1311 = vector.extract_strided_slice %1 {offsets = [0, 22], sizes = [2, 1], strides = [1, 1]} : vector<2x32xf32> to vector<2x1xf32>
    %1312 = vector.extract_strided_slice %53 {offsets = [22, 0], sizes = [1, 128], strides = [1, 1]} : vector<32x128xf32> to vector<1x128xf32>
    %1313 = vector.extract_strided_slice %54 {offsets = [22, 0], sizes = [1, 128], strides = [1, 1]} : vector<32x128xf32> to vector<1x128xf32>
    %1314 = vector.broadcast %1310 : vector<2x1xf32> to vector<2x128xf32>
    %1315 = vector.broadcast %1312 : vector<1x128xf32> to vector<2x128xf32>
    %1316 = arith.subf %1314, %1315 : vector<2x128xf32>
    %1317 = math.absf %1316 : vector<2x128xf32>
    %cst_242 = arith.constant 0.000000e+00 : f32
    %1318 = vector.broadcast %cst_242 : f32 to vector<2x128xf32>
    %1319 = arith.subf %1318, %1317 : vector<2x128xf32>
    %cst_243 = arith.constant 1.000000e+00 : f32
    %1320 = vector.broadcast %cst_243 : f32 to vector<2x128xf32>
    %1321 = arith.mulf %1319, %1320 : vector<2x128xf32>
    %1322 = math.exp %1321 : vector<2x128xf32>
    %1323 = math.log1p %1322 : vector<2x128xf32>
    %1324 = vector.broadcast %1311 : vector<2x1xf32> to vector<2x128xf32>
    %1325 = vector.broadcast %1313 : vector<1x128xf32> to vector<2x128xf32>
    %1326 = arith.subf %1324, %1325 : vector<2x128xf32>
    %1327 = math.absf %1326 : vector<2x128xf32>
    %cst_244 = arith.constant 0.000000e+00 : f32
    %1328 = vector.broadcast %cst_244 : f32 to vector<2x128xf32>
    %1329 = arith.subf %1328, %1327 : vector<2x128xf32>
    %cst_245 = arith.constant 1.000000e+00 : f32
    %1330 = vector.broadcast %cst_245 : f32 to vector<2x128xf32>
    %1331 = arith.mulf %1329, %1330 : vector<2x128xf32>
    %1332 = math.exp %1331 : vector<2x128xf32>
    %1333 = math.log1p %1332 : vector<2x128xf32>
    %1334 = arith.addf %1323, %1333 : vector<2x128xf32>
    %1335 = vector.broadcast %1311 : vector<2x1xf32> to vector<2x128xf32>
    %1336 = vector.broadcast %1313 : vector<1x128xf32> to vector<2x128xf32>
    %1337 = arith.minimumf %1335, %1336 : vector<2x128xf32>
    %1338 = vector.broadcast %1310 : vector<2x1xf32> to vector<2x128xf32>
    %1339 = vector.broadcast %1312 : vector<1x128xf32> to vector<2x128xf32>
    %1340 = arith.maximumf %1338, %1339 : vector<2x128xf32>
    %1341 = arith.subf %1337, %1340 : vector<2x128xf32>
    %cst_246 = arith.constant 1.000000e+00 : f32
    %1342 = vector.broadcast %cst_246 : f32 to vector<2x128xf32>
    %1343 = arith.mulf %1342, %1334 : vector<2x128xf32>
    %1344 = arith.subf %1341, %1343 : vector<2x128xf32>
    %cst_247 = arith.constant 1.200000e+00 : f32
    %1345 = vector.broadcast %cst_247 : f32 to vector<2x128xf32>
    %1346 = arith.subf %1344, %1345 : vector<2x128xf32>
    %cst_248 = arith.constant 1.000000e+00 : f32
    %1347 = vector.broadcast %cst_248 : f32 to vector<2x128xf32>
    %1348 = arith.mulf %1346, %1347 : vector<2x128xf32>
    %cst_249 = arith.constant 0.000000e+00 : f32
    %1349 = vector.broadcast %cst_249 : f32 to vector<2x128xf32>
    %1350 = arith.maximumf %1348, %1349 : vector<2x128xf32>
    %1351 = vector.broadcast %cst_249 : f32 to vector<2x128xf32>
    %1352 = arith.subf %1348, %1351 : vector<2x128xf32>
    %1353 = arith.cmpf one, %1352, %1352 : vector<2x128xf32>
    %1354 = vector.broadcast %cst_249 : f32 to vector<2x128xf32>
    %1355 = arith.addf %1348, %1354 : vector<2x128xf32>
    %1356 = math.absf %1352 : vector<2x128xf32>
    %cst_250 = arith.constant 0.000000e+00 : f32
    %1357 = vector.broadcast %cst_250 : f32 to vector<2x128xf32>
    %1358 = arith.subf %1357, %1356 : vector<2x128xf32>
    %1359 = math.exp %1358 : vector<2x128xf32>
    %1360 = math.log1p %1359 : vector<2x128xf32>
    %1361 = arith.addf %1350, %1360 : vector<2x128xf32>
    %1362 = arith.select %1353, %1355, %1361 : vector<2x128xi1>, vector<2x128xf32>
    %cst_251 = arith.constant 1.17549435E-38 : f32
    %1363 = vector.broadcast %cst_251 : f32 to vector<2x128xf32>
    %1364 = arith.maximumf %1362, %1363 : vector<2x128xf32>
    %1365 = math.log %1364 : vector<2x128xf32>
    %1366 = arith.addf %1309, %1365 : vector<2x128xf32>
    %1367 = vector.extract_strided_slice %0 {offsets = [0, 23], sizes = [2, 1], strides = [1, 1]} : vector<2x32xf32> to vector<2x1xf32>
    %1368 = vector.extract_strided_slice %1 {offsets = [0, 23], sizes = [2, 1], strides = [1, 1]} : vector<2x32xf32> to vector<2x1xf32>
    %1369 = vector.extract_strided_slice %53 {offsets = [23, 0], sizes = [1, 128], strides = [1, 1]} : vector<32x128xf32> to vector<1x128xf32>
    %1370 = vector.extract_strided_slice %54 {offsets = [23, 0], sizes = [1, 128], strides = [1, 1]} : vector<32x128xf32> to vector<1x128xf32>
    %1371 = vector.broadcast %1367 : vector<2x1xf32> to vector<2x128xf32>
    %1372 = vector.broadcast %1369 : vector<1x128xf32> to vector<2x128xf32>
    %1373 = arith.subf %1371, %1372 : vector<2x128xf32>
    %1374 = math.absf %1373 : vector<2x128xf32>
    %cst_252 = arith.constant 0.000000e+00 : f32
    %1375 = vector.broadcast %cst_252 : f32 to vector<2x128xf32>
    %1376 = arith.subf %1375, %1374 : vector<2x128xf32>
    %cst_253 = arith.constant 1.000000e+00 : f32
    %1377 = vector.broadcast %cst_253 : f32 to vector<2x128xf32>
    %1378 = arith.mulf %1376, %1377 : vector<2x128xf32>
    %1379 = math.exp %1378 : vector<2x128xf32>
    %1380 = math.log1p %1379 : vector<2x128xf32>
    %1381 = vector.broadcast %1368 : vector<2x1xf32> to vector<2x128xf32>
    %1382 = vector.broadcast %1370 : vector<1x128xf32> to vector<2x128xf32>
    %1383 = arith.subf %1381, %1382 : vector<2x128xf32>
    %1384 = math.absf %1383 : vector<2x128xf32>
    %cst_254 = arith.constant 0.000000e+00 : f32
    %1385 = vector.broadcast %cst_254 : f32 to vector<2x128xf32>
    %1386 = arith.subf %1385, %1384 : vector<2x128xf32>
    %cst_255 = arith.constant 1.000000e+00 : f32
    %1387 = vector.broadcast %cst_255 : f32 to vector<2x128xf32>
    %1388 = arith.mulf %1386, %1387 : vector<2x128xf32>
    %1389 = math.exp %1388 : vector<2x128xf32>
    %1390 = math.log1p %1389 : vector<2x128xf32>
    %1391 = arith.addf %1380, %1390 : vector<2x128xf32>
    %1392 = vector.broadcast %1368 : vector<2x1xf32> to vector<2x128xf32>
    %1393 = vector.broadcast %1370 : vector<1x128xf32> to vector<2x128xf32>
    %1394 = arith.minimumf %1392, %1393 : vector<2x128xf32>
    %1395 = vector.broadcast %1367 : vector<2x1xf32> to vector<2x128xf32>
    %1396 = vector.broadcast %1369 : vector<1x128xf32> to vector<2x128xf32>
    %1397 = arith.maximumf %1395, %1396 : vector<2x128xf32>
    %1398 = arith.subf %1394, %1397 : vector<2x128xf32>
    %cst_256 = arith.constant 1.000000e+00 : f32
    %1399 = vector.broadcast %cst_256 : f32 to vector<2x128xf32>
    %1400 = arith.mulf %1399, %1391 : vector<2x128xf32>
    %1401 = arith.subf %1398, %1400 : vector<2x128xf32>
    %cst_257 = arith.constant 1.200000e+00 : f32
    %1402 = vector.broadcast %cst_257 : f32 to vector<2x128xf32>
    %1403 = arith.subf %1401, %1402 : vector<2x128xf32>
    %cst_258 = arith.constant 1.000000e+00 : f32
    %1404 = vector.broadcast %cst_258 : f32 to vector<2x128xf32>
    %1405 = arith.mulf %1403, %1404 : vector<2x128xf32>
    %cst_259 = arith.constant 0.000000e+00 : f32
    %1406 = vector.broadcast %cst_259 : f32 to vector<2x128xf32>
    %1407 = arith.maximumf %1405, %1406 : vector<2x128xf32>
    %1408 = vector.broadcast %cst_259 : f32 to vector<2x128xf32>
    %1409 = arith.subf %1405, %1408 : vector<2x128xf32>
    %1410 = arith.cmpf one, %1409, %1409 : vector<2x128xf32>
    %1411 = vector.broadcast %cst_259 : f32 to vector<2x128xf32>
    %1412 = arith.addf %1405, %1411 : vector<2x128xf32>
    %1413 = math.absf %1409 : vector<2x128xf32>
    %cst_260 = arith.constant 0.000000e+00 : f32
    %1414 = vector.broadcast %cst_260 : f32 to vector<2x128xf32>
    %1415 = arith.subf %1414, %1413 : vector<2x128xf32>
    %1416 = math.exp %1415 : vector<2x128xf32>
    %1417 = math.log1p %1416 : vector<2x128xf32>
    %1418 = arith.addf %1407, %1417 : vector<2x128xf32>
    %1419 = arith.select %1410, %1412, %1418 : vector<2x128xi1>, vector<2x128xf32>
    %cst_261 = arith.constant 1.17549435E-38 : f32
    %1420 = vector.broadcast %cst_261 : f32 to vector<2x128xf32>
    %1421 = arith.maximumf %1419, %1420 : vector<2x128xf32>
    %1422 = math.log %1421 : vector<2x128xf32>
    %1423 = arith.addf %1366, %1422 : vector<2x128xf32>
    %1424 = vector.extract_strided_slice %0 {offsets = [0, 24], sizes = [2, 1], strides = [1, 1]} : vector<2x32xf32> to vector<2x1xf32>
    %1425 = vector.extract_strided_slice %1 {offsets = [0, 24], sizes = [2, 1], strides = [1, 1]} : vector<2x32xf32> to vector<2x1xf32>
    %1426 = vector.extract_strided_slice %53 {offsets = [24, 0], sizes = [1, 128], strides = [1, 1]} : vector<32x128xf32> to vector<1x128xf32>
    %1427 = vector.extract_strided_slice %54 {offsets = [24, 0], sizes = [1, 128], strides = [1, 1]} : vector<32x128xf32> to vector<1x128xf32>
    %1428 = vector.broadcast %1424 : vector<2x1xf32> to vector<2x128xf32>
    %1429 = vector.broadcast %1426 : vector<1x128xf32> to vector<2x128xf32>
    %1430 = arith.subf %1428, %1429 : vector<2x128xf32>
    %1431 = math.absf %1430 : vector<2x128xf32>
    %cst_262 = arith.constant 0.000000e+00 : f32
    %1432 = vector.broadcast %cst_262 : f32 to vector<2x128xf32>
    %1433 = arith.subf %1432, %1431 : vector<2x128xf32>
    %cst_263 = arith.constant 1.000000e+00 : f32
    %1434 = vector.broadcast %cst_263 : f32 to vector<2x128xf32>
    %1435 = arith.mulf %1433, %1434 : vector<2x128xf32>
    %1436 = math.exp %1435 : vector<2x128xf32>
    %1437 = math.log1p %1436 : vector<2x128xf32>
    %1438 = vector.broadcast %1425 : vector<2x1xf32> to vector<2x128xf32>
    %1439 = vector.broadcast %1427 : vector<1x128xf32> to vector<2x128xf32>
    %1440 = arith.subf %1438, %1439 : vector<2x128xf32>
    %1441 = math.absf %1440 : vector<2x128xf32>
    %cst_264 = arith.constant 0.000000e+00 : f32
    %1442 = vector.broadcast %cst_264 : f32 to vector<2x128xf32>
    %1443 = arith.subf %1442, %1441 : vector<2x128xf32>
    %cst_265 = arith.constant 1.000000e+00 : f32
    %1444 = vector.broadcast %cst_265 : f32 to vector<2x128xf32>
    %1445 = arith.mulf %1443, %1444 : vector<2x128xf32>
    %1446 = math.exp %1445 : vector<2x128xf32>
    %1447 = math.log1p %1446 : vector<2x128xf32>
    %1448 = arith.addf %1437, %1447 : vector<2x128xf32>
    %1449 = vector.broadcast %1425 : vector<2x1xf32> to vector<2x128xf32>
    %1450 = vector.broadcast %1427 : vector<1x128xf32> to vector<2x128xf32>
    %1451 = arith.minimumf %1449, %1450 : vector<2x128xf32>
    %1452 = vector.broadcast %1424 : vector<2x1xf32> to vector<2x128xf32>
    %1453 = vector.broadcast %1426 : vector<1x128xf32> to vector<2x128xf32>
    %1454 = arith.maximumf %1452, %1453 : vector<2x128xf32>
    %1455 = arith.subf %1451, %1454 : vector<2x128xf32>
    %cst_266 = arith.constant 1.000000e+00 : f32
    %1456 = vector.broadcast %cst_266 : f32 to vector<2x128xf32>
    %1457 = arith.mulf %1456, %1448 : vector<2x128xf32>
    %1458 = arith.subf %1455, %1457 : vector<2x128xf32>
    %cst_267 = arith.constant 1.200000e+00 : f32
    %1459 = vector.broadcast %cst_267 : f32 to vector<2x128xf32>
    %1460 = arith.subf %1458, %1459 : vector<2x128xf32>
    %cst_268 = arith.constant 1.000000e+00 : f32
    %1461 = vector.broadcast %cst_268 : f32 to vector<2x128xf32>
    %1462 = arith.mulf %1460, %1461 : vector<2x128xf32>
    %cst_269 = arith.constant 0.000000e+00 : f32
    %1463 = vector.broadcast %cst_269 : f32 to vector<2x128xf32>
    %1464 = arith.maximumf %1462, %1463 : vector<2x128xf32>
    %1465 = vector.broadcast %cst_269 : f32 to vector<2x128xf32>
    %1466 = arith.subf %1462, %1465 : vector<2x128xf32>
    %1467 = arith.cmpf one, %1466, %1466 : vector<2x128xf32>
    %1468 = vector.broadcast %cst_269 : f32 to vector<2x128xf32>
    %1469 = arith.addf %1462, %1468 : vector<2x128xf32>
    %1470 = math.absf %1466 : vector<2x128xf32>
    %cst_270 = arith.constant 0.000000e+00 : f32
    %1471 = vector.broadcast %cst_270 : f32 to vector<2x128xf32>
    %1472 = arith.subf %1471, %1470 : vector<2x128xf32>
    %1473 = math.exp %1472 : vector<2x128xf32>
    %1474 = math.log1p %1473 : vector<2x128xf32>
    %1475 = arith.addf %1464, %1474 : vector<2x128xf32>
    %1476 = arith.select %1467, %1469, %1475 : vector<2x128xi1>, vector<2x128xf32>
    %cst_271 = arith.constant 1.17549435E-38 : f32
    %1477 = vector.broadcast %cst_271 : f32 to vector<2x128xf32>
    %1478 = arith.maximumf %1476, %1477 : vector<2x128xf32>
    %1479 = math.log %1478 : vector<2x128xf32>
    %1480 = arith.addf %1423, %1479 : vector<2x128xf32>
    %1481 = vector.extract_strided_slice %0 {offsets = [0, 25], sizes = [2, 1], strides = [1, 1]} : vector<2x32xf32> to vector<2x1xf32>
    %1482 = vector.extract_strided_slice %1 {offsets = [0, 25], sizes = [2, 1], strides = [1, 1]} : vector<2x32xf32> to vector<2x1xf32>
    %1483 = vector.extract_strided_slice %53 {offsets = [25, 0], sizes = [1, 128], strides = [1, 1]} : vector<32x128xf32> to vector<1x128xf32>
    %1484 = vector.extract_strided_slice %54 {offsets = [25, 0], sizes = [1, 128], strides = [1, 1]} : vector<32x128xf32> to vector<1x128xf32>
    %1485 = vector.broadcast %1481 : vector<2x1xf32> to vector<2x128xf32>
    %1486 = vector.broadcast %1483 : vector<1x128xf32> to vector<2x128xf32>
    %1487 = arith.subf %1485, %1486 : vector<2x128xf32>
    %1488 = math.absf %1487 : vector<2x128xf32>
    %cst_272 = arith.constant 0.000000e+00 : f32
    %1489 = vector.broadcast %cst_272 : f32 to vector<2x128xf32>
    %1490 = arith.subf %1489, %1488 : vector<2x128xf32>
    %cst_273 = arith.constant 1.000000e+00 : f32
    %1491 = vector.broadcast %cst_273 : f32 to vector<2x128xf32>
    %1492 = arith.mulf %1490, %1491 : vector<2x128xf32>
    %1493 = math.exp %1492 : vector<2x128xf32>
    %1494 = math.log1p %1493 : vector<2x128xf32>
    %1495 = vector.broadcast %1482 : vector<2x1xf32> to vector<2x128xf32>
    %1496 = vector.broadcast %1484 : vector<1x128xf32> to vector<2x128xf32>
    %1497 = arith.subf %1495, %1496 : vector<2x128xf32>
    %1498 = math.absf %1497 : vector<2x128xf32>
    %cst_274 = arith.constant 0.000000e+00 : f32
    %1499 = vector.broadcast %cst_274 : f32 to vector<2x128xf32>
    %1500 = arith.subf %1499, %1498 : vector<2x128xf32>
    %cst_275 = arith.constant 1.000000e+00 : f32
    %1501 = vector.broadcast %cst_275 : f32 to vector<2x128xf32>
    %1502 = arith.mulf %1500, %1501 : vector<2x128xf32>
    %1503 = math.exp %1502 : vector<2x128xf32>
    %1504 = math.log1p %1503 : vector<2x128xf32>
    %1505 = arith.addf %1494, %1504 : vector<2x128xf32>
    %1506 = vector.broadcast %1482 : vector<2x1xf32> to vector<2x128xf32>
    %1507 = vector.broadcast %1484 : vector<1x128xf32> to vector<2x128xf32>
    %1508 = arith.minimumf %1506, %1507 : vector<2x128xf32>
    %1509 = vector.broadcast %1481 : vector<2x1xf32> to vector<2x128xf32>
    %1510 = vector.broadcast %1483 : vector<1x128xf32> to vector<2x128xf32>
    %1511 = arith.maximumf %1509, %1510 : vector<2x128xf32>
    %1512 = arith.subf %1508, %1511 : vector<2x128xf32>
    %cst_276 = arith.constant 1.000000e+00 : f32
    %1513 = vector.broadcast %cst_276 : f32 to vector<2x128xf32>
    %1514 = arith.mulf %1513, %1505 : vector<2x128xf32>
    %1515 = arith.subf %1512, %1514 : vector<2x128xf32>
    %cst_277 = arith.constant 1.200000e+00 : f32
    %1516 = vector.broadcast %cst_277 : f32 to vector<2x128xf32>
    %1517 = arith.subf %1515, %1516 : vector<2x128xf32>
    %cst_278 = arith.constant 1.000000e+00 : f32
    %1518 = vector.broadcast %cst_278 : f32 to vector<2x128xf32>
    %1519 = arith.mulf %1517, %1518 : vector<2x128xf32>
    %cst_279 = arith.constant 0.000000e+00 : f32
    %1520 = vector.broadcast %cst_279 : f32 to vector<2x128xf32>
    %1521 = arith.maximumf %1519, %1520 : vector<2x128xf32>
    %1522 = vector.broadcast %cst_279 : f32 to vector<2x128xf32>
    %1523 = arith.subf %1519, %1522 : vector<2x128xf32>
    %1524 = arith.cmpf one, %1523, %1523 : vector<2x128xf32>
    %1525 = vector.broadcast %cst_279 : f32 to vector<2x128xf32>
    %1526 = arith.addf %1519, %1525 : vector<2x128xf32>
    %1527 = math.absf %1523 : vector<2x128xf32>
    %cst_280 = arith.constant 0.000000e+00 : f32
    %1528 = vector.broadcast %cst_280 : f32 to vector<2x128xf32>
    %1529 = arith.subf %1528, %1527 : vector<2x128xf32>
    %1530 = math.exp %1529 : vector<2x128xf32>
    %1531 = math.log1p %1530 : vector<2x128xf32>
    %1532 = arith.addf %1521, %1531 : vector<2x128xf32>
    %1533 = arith.select %1524, %1526, %1532 : vector<2x128xi1>, vector<2x128xf32>
    %cst_281 = arith.constant 1.17549435E-38 : f32
    %1534 = vector.broadcast %cst_281 : f32 to vector<2x128xf32>
    %1535 = arith.maximumf %1533, %1534 : vector<2x128xf32>
    %1536 = math.log %1535 : vector<2x128xf32>
    %1537 = arith.addf %1480, %1536 : vector<2x128xf32>
    %1538 = vector.extract_strided_slice %0 {offsets = [0, 26], sizes = [2, 1], strides = [1, 1]} : vector<2x32xf32> to vector<2x1xf32>
    %1539 = vector.extract_strided_slice %1 {offsets = [0, 26], sizes = [2, 1], strides = [1, 1]} : vector<2x32xf32> to vector<2x1xf32>
    %1540 = vector.extract_strided_slice %53 {offsets = [26, 0], sizes = [1, 128], strides = [1, 1]} : vector<32x128xf32> to vector<1x128xf32>
    %1541 = vector.extract_strided_slice %54 {offsets = [26, 0], sizes = [1, 128], strides = [1, 1]} : vector<32x128xf32> to vector<1x128xf32>
    %1542 = vector.broadcast %1538 : vector<2x1xf32> to vector<2x128xf32>
    %1543 = vector.broadcast %1540 : vector<1x128xf32> to vector<2x128xf32>
    %1544 = arith.subf %1542, %1543 : vector<2x128xf32>
    %1545 = math.absf %1544 : vector<2x128xf32>
    %cst_282 = arith.constant 0.000000e+00 : f32
    %1546 = vector.broadcast %cst_282 : f32 to vector<2x128xf32>
    %1547 = arith.subf %1546, %1545 : vector<2x128xf32>
    %cst_283 = arith.constant 1.000000e+00 : f32
    %1548 = vector.broadcast %cst_283 : f32 to vector<2x128xf32>
    %1549 = arith.mulf %1547, %1548 : vector<2x128xf32>
    %1550 = math.exp %1549 : vector<2x128xf32>
    %1551 = math.log1p %1550 : vector<2x128xf32>
    %1552 = vector.broadcast %1539 : vector<2x1xf32> to vector<2x128xf32>
    %1553 = vector.broadcast %1541 : vector<1x128xf32> to vector<2x128xf32>
    %1554 = arith.subf %1552, %1553 : vector<2x128xf32>
    %1555 = math.absf %1554 : vector<2x128xf32>
    %cst_284 = arith.constant 0.000000e+00 : f32
    %1556 = vector.broadcast %cst_284 : f32 to vector<2x128xf32>
    %1557 = arith.subf %1556, %1555 : vector<2x128xf32>
    %cst_285 = arith.constant 1.000000e+00 : f32
    %1558 = vector.broadcast %cst_285 : f32 to vector<2x128xf32>
    %1559 = arith.mulf %1557, %1558 : vector<2x128xf32>
    %1560 = math.exp %1559 : vector<2x128xf32>
    %1561 = math.log1p %1560 : vector<2x128xf32>
    %1562 = arith.addf %1551, %1561 : vector<2x128xf32>
    %1563 = vector.broadcast %1539 : vector<2x1xf32> to vector<2x128xf32>
    %1564 = vector.broadcast %1541 : vector<1x128xf32> to vector<2x128xf32>
    %1565 = arith.minimumf %1563, %1564 : vector<2x128xf32>
    %1566 = vector.broadcast %1538 : vector<2x1xf32> to vector<2x128xf32>
    %1567 = vector.broadcast %1540 : vector<1x128xf32> to vector<2x128xf32>
    %1568 = arith.maximumf %1566, %1567 : vector<2x128xf32>
    %1569 = arith.subf %1565, %1568 : vector<2x128xf32>
    %cst_286 = arith.constant 1.000000e+00 : f32
    %1570 = vector.broadcast %cst_286 : f32 to vector<2x128xf32>
    %1571 = arith.mulf %1570, %1562 : vector<2x128xf32>
    %1572 = arith.subf %1569, %1571 : vector<2x128xf32>
    %cst_287 = arith.constant 1.200000e+00 : f32
    %1573 = vector.broadcast %cst_287 : f32 to vector<2x128xf32>
    %1574 = arith.subf %1572, %1573 : vector<2x128xf32>
    %cst_288 = arith.constant 1.000000e+00 : f32
    %1575 = vector.broadcast %cst_288 : f32 to vector<2x128xf32>
    %1576 = arith.mulf %1574, %1575 : vector<2x128xf32>
    %cst_289 = arith.constant 0.000000e+00 : f32
    %1577 = vector.broadcast %cst_289 : f32 to vector<2x128xf32>
    %1578 = arith.maximumf %1576, %1577 : vector<2x128xf32>
    %1579 = vector.broadcast %cst_289 : f32 to vector<2x128xf32>
    %1580 = arith.subf %1576, %1579 : vector<2x128xf32>
    %1581 = arith.cmpf one, %1580, %1580 : vector<2x128xf32>
    %1582 = vector.broadcast %cst_289 : f32 to vector<2x128xf32>
    %1583 = arith.addf %1576, %1582 : vector<2x128xf32>
    %1584 = math.absf %1580 : vector<2x128xf32>
    %cst_290 = arith.constant 0.000000e+00 : f32
    %1585 = vector.broadcast %cst_290 : f32 to vector<2x128xf32>
    %1586 = arith.subf %1585, %1584 : vector<2x128xf32>
    %1587 = math.exp %1586 : vector<2x128xf32>
    %1588 = math.log1p %1587 : vector<2x128xf32>
    %1589 = arith.addf %1578, %1588 : vector<2x128xf32>
    %1590 = arith.select %1581, %1583, %1589 : vector<2x128xi1>, vector<2x128xf32>
    %cst_291 = arith.constant 1.17549435E-38 : f32
    %1591 = vector.broadcast %cst_291 : f32 to vector<2x128xf32>
    %1592 = arith.maximumf %1590, %1591 : vector<2x128xf32>
    %1593 = math.log %1592 : vector<2x128xf32>
    %1594 = arith.addf %1537, %1593 : vector<2x128xf32>
    %1595 = vector.extract_strided_slice %0 {offsets = [0, 27], sizes = [2, 1], strides = [1, 1]} : vector<2x32xf32> to vector<2x1xf32>
    %1596 = vector.extract_strided_slice %1 {offsets = [0, 27], sizes = [2, 1], strides = [1, 1]} : vector<2x32xf32> to vector<2x1xf32>
    %1597 = vector.extract_strided_slice %53 {offsets = [27, 0], sizes = [1, 128], strides = [1, 1]} : vector<32x128xf32> to vector<1x128xf32>
    %1598 = vector.extract_strided_slice %54 {offsets = [27, 0], sizes = [1, 128], strides = [1, 1]} : vector<32x128xf32> to vector<1x128xf32>
    %1599 = vector.broadcast %1595 : vector<2x1xf32> to vector<2x128xf32>
    %1600 = vector.broadcast %1597 : vector<1x128xf32> to vector<2x128xf32>
    %1601 = arith.subf %1599, %1600 : vector<2x128xf32>
    %1602 = math.absf %1601 : vector<2x128xf32>
    %cst_292 = arith.constant 0.000000e+00 : f32
    %1603 = vector.broadcast %cst_292 : f32 to vector<2x128xf32>
    %1604 = arith.subf %1603, %1602 : vector<2x128xf32>
    %cst_293 = arith.constant 1.000000e+00 : f32
    %1605 = vector.broadcast %cst_293 : f32 to vector<2x128xf32>
    %1606 = arith.mulf %1604, %1605 : vector<2x128xf32>
    %1607 = math.exp %1606 : vector<2x128xf32>
    %1608 = math.log1p %1607 : vector<2x128xf32>
    %1609 = vector.broadcast %1596 : vector<2x1xf32> to vector<2x128xf32>
    %1610 = vector.broadcast %1598 : vector<1x128xf32> to vector<2x128xf32>
    %1611 = arith.subf %1609, %1610 : vector<2x128xf32>
    %1612 = math.absf %1611 : vector<2x128xf32>
    %cst_294 = arith.constant 0.000000e+00 : f32
    %1613 = vector.broadcast %cst_294 : f32 to vector<2x128xf32>
    %1614 = arith.subf %1613, %1612 : vector<2x128xf32>
    %cst_295 = arith.constant 1.000000e+00 : f32
    %1615 = vector.broadcast %cst_295 : f32 to vector<2x128xf32>
    %1616 = arith.mulf %1614, %1615 : vector<2x128xf32>
    %1617 = math.exp %1616 : vector<2x128xf32>
    %1618 = math.log1p %1617 : vector<2x128xf32>
    %1619 = arith.addf %1608, %1618 : vector<2x128xf32>
    %1620 = vector.broadcast %1596 : vector<2x1xf32> to vector<2x128xf32>
    %1621 = vector.broadcast %1598 : vector<1x128xf32> to vector<2x128xf32>
    %1622 = arith.minimumf %1620, %1621 : vector<2x128xf32>
    %1623 = vector.broadcast %1595 : vector<2x1xf32> to vector<2x128xf32>
    %1624 = vector.broadcast %1597 : vector<1x128xf32> to vector<2x128xf32>
    %1625 = arith.maximumf %1623, %1624 : vector<2x128xf32>
    %1626 = arith.subf %1622, %1625 : vector<2x128xf32>
    %cst_296 = arith.constant 1.000000e+00 : f32
    %1627 = vector.broadcast %cst_296 : f32 to vector<2x128xf32>
    %1628 = arith.mulf %1627, %1619 : vector<2x128xf32>
    %1629 = arith.subf %1626, %1628 : vector<2x128xf32>
    %cst_297 = arith.constant 1.200000e+00 : f32
    %1630 = vector.broadcast %cst_297 : f32 to vector<2x128xf32>
    %1631 = arith.subf %1629, %1630 : vector<2x128xf32>
    %cst_298 = arith.constant 1.000000e+00 : f32
    %1632 = vector.broadcast %cst_298 : f32 to vector<2x128xf32>
    %1633 = arith.mulf %1631, %1632 : vector<2x128xf32>
    %cst_299 = arith.constant 0.000000e+00 : f32
    %1634 = vector.broadcast %cst_299 : f32 to vector<2x128xf32>
    %1635 = arith.maximumf %1633, %1634 : vector<2x128xf32>
    %1636 = vector.broadcast %cst_299 : f32 to vector<2x128xf32>
    %1637 = arith.subf %1633, %1636 : vector<2x128xf32>
    %1638 = arith.cmpf one, %1637, %1637 : vector<2x128xf32>
    %1639 = vector.broadcast %cst_299 : f32 to vector<2x128xf32>
    %1640 = arith.addf %1633, %1639 : vector<2x128xf32>
    %1641 = math.absf %1637 : vector<2x128xf32>
    %cst_300 = arith.constant 0.000000e+00 : f32
    %1642 = vector.broadcast %cst_300 : f32 to vector<2x128xf32>
    %1643 = arith.subf %1642, %1641 : vector<2x128xf32>
    %1644 = math.exp %1643 : vector<2x128xf32>
    %1645 = math.log1p %1644 : vector<2x128xf32>
    %1646 = arith.addf %1635, %1645 : vector<2x128xf32>
    %1647 = arith.select %1638, %1640, %1646 : vector<2x128xi1>, vector<2x128xf32>
    %cst_301 = arith.constant 1.17549435E-38 : f32
    %1648 = vector.broadcast %cst_301 : f32 to vector<2x128xf32>
    %1649 = arith.maximumf %1647, %1648 : vector<2x128xf32>
    %1650 = math.log %1649 : vector<2x128xf32>
    %1651 = arith.addf %1594, %1650 : vector<2x128xf32>
    %1652 = vector.extract_strided_slice %0 {offsets = [0, 28], sizes = [2, 1], strides = [1, 1]} : vector<2x32xf32> to vector<2x1xf32>
    %1653 = vector.extract_strided_slice %1 {offsets = [0, 28], sizes = [2, 1], strides = [1, 1]} : vector<2x32xf32> to vector<2x1xf32>
    %1654 = vector.extract_strided_slice %53 {offsets = [28, 0], sizes = [1, 128], strides = [1, 1]} : vector<32x128xf32> to vector<1x128xf32>
    %1655 = vector.extract_strided_slice %54 {offsets = [28, 0], sizes = [1, 128], strides = [1, 1]} : vector<32x128xf32> to vector<1x128xf32>
    %1656 = vector.broadcast %1652 : vector<2x1xf32> to vector<2x128xf32>
    %1657 = vector.broadcast %1654 : vector<1x128xf32> to vector<2x128xf32>
    %1658 = arith.subf %1656, %1657 : vector<2x128xf32>
    %1659 = math.absf %1658 : vector<2x128xf32>
    %cst_302 = arith.constant 0.000000e+00 : f32
    %1660 = vector.broadcast %cst_302 : f32 to vector<2x128xf32>
    %1661 = arith.subf %1660, %1659 : vector<2x128xf32>
    %cst_303 = arith.constant 1.000000e+00 : f32
    %1662 = vector.broadcast %cst_303 : f32 to vector<2x128xf32>
    %1663 = arith.mulf %1661, %1662 : vector<2x128xf32>
    %1664 = math.exp %1663 : vector<2x128xf32>
    %1665 = math.log1p %1664 : vector<2x128xf32>
    %1666 = vector.broadcast %1653 : vector<2x1xf32> to vector<2x128xf32>
    %1667 = vector.broadcast %1655 : vector<1x128xf32> to vector<2x128xf32>
    %1668 = arith.subf %1666, %1667 : vector<2x128xf32>
    %1669 = math.absf %1668 : vector<2x128xf32>
    %cst_304 = arith.constant 0.000000e+00 : f32
    %1670 = vector.broadcast %cst_304 : f32 to vector<2x128xf32>
    %1671 = arith.subf %1670, %1669 : vector<2x128xf32>
    %cst_305 = arith.constant 1.000000e+00 : f32
    %1672 = vector.broadcast %cst_305 : f32 to vector<2x128xf32>
    %1673 = arith.mulf %1671, %1672 : vector<2x128xf32>
    %1674 = math.exp %1673 : vector<2x128xf32>
    %1675 = math.log1p %1674 : vector<2x128xf32>
    %1676 = arith.addf %1665, %1675 : vector<2x128xf32>
    %1677 = vector.broadcast %1653 : vector<2x1xf32> to vector<2x128xf32>
    %1678 = vector.broadcast %1655 : vector<1x128xf32> to vector<2x128xf32>
    %1679 = arith.minimumf %1677, %1678 : vector<2x128xf32>
    %1680 = vector.broadcast %1652 : vector<2x1xf32> to vector<2x128xf32>
    %1681 = vector.broadcast %1654 : vector<1x128xf32> to vector<2x128xf32>
    %1682 = arith.maximumf %1680, %1681 : vector<2x128xf32>
    %1683 = arith.subf %1679, %1682 : vector<2x128xf32>
    %cst_306 = arith.constant 1.000000e+00 : f32
    %1684 = vector.broadcast %cst_306 : f32 to vector<2x128xf32>
    %1685 = arith.mulf %1684, %1676 : vector<2x128xf32>
    %1686 = arith.subf %1683, %1685 : vector<2x128xf32>
    %cst_307 = arith.constant 1.200000e+00 : f32
    %1687 = vector.broadcast %cst_307 : f32 to vector<2x128xf32>
    %1688 = arith.subf %1686, %1687 : vector<2x128xf32>
    %cst_308 = arith.constant 1.000000e+00 : f32
    %1689 = vector.broadcast %cst_308 : f32 to vector<2x128xf32>
    %1690 = arith.mulf %1688, %1689 : vector<2x128xf32>
    %cst_309 = arith.constant 0.000000e+00 : f32
    %1691 = vector.broadcast %cst_309 : f32 to vector<2x128xf32>
    %1692 = arith.maximumf %1690, %1691 : vector<2x128xf32>
    %1693 = vector.broadcast %cst_309 : f32 to vector<2x128xf32>
    %1694 = arith.subf %1690, %1693 : vector<2x128xf32>
    %1695 = arith.cmpf one, %1694, %1694 : vector<2x128xf32>
    %1696 = vector.broadcast %cst_309 : f32 to vector<2x128xf32>
    %1697 = arith.addf %1690, %1696 : vector<2x128xf32>
    %1698 = math.absf %1694 : vector<2x128xf32>
    %cst_310 = arith.constant 0.000000e+00 : f32
    %1699 = vector.broadcast %cst_310 : f32 to vector<2x128xf32>
    %1700 = arith.subf %1699, %1698 : vector<2x128xf32>
    %1701 = math.exp %1700 : vector<2x128xf32>
    %1702 = math.log1p %1701 : vector<2x128xf32>
    %1703 = arith.addf %1692, %1702 : vector<2x128xf32>
    %1704 = arith.select %1695, %1697, %1703 : vector<2x128xi1>, vector<2x128xf32>
    %cst_311 = arith.constant 1.17549435E-38 : f32
    %1705 = vector.broadcast %cst_311 : f32 to vector<2x128xf32>
    %1706 = arith.maximumf %1704, %1705 : vector<2x128xf32>
    %1707 = math.log %1706 : vector<2x128xf32>
    %1708 = arith.addf %1651, %1707 : vector<2x128xf32>
    %1709 = vector.extract_strided_slice %0 {offsets = [0, 29], sizes = [2, 1], strides = [1, 1]} : vector<2x32xf32> to vector<2x1xf32>
    %1710 = vector.extract_strided_slice %1 {offsets = [0, 29], sizes = [2, 1], strides = [1, 1]} : vector<2x32xf32> to vector<2x1xf32>
    %1711 = vector.extract_strided_slice %53 {offsets = [29, 0], sizes = [1, 128], strides = [1, 1]} : vector<32x128xf32> to vector<1x128xf32>
    %1712 = vector.extract_strided_slice %54 {offsets = [29, 0], sizes = [1, 128], strides = [1, 1]} : vector<32x128xf32> to vector<1x128xf32>
    %1713 = vector.broadcast %1709 : vector<2x1xf32> to vector<2x128xf32>
    %1714 = vector.broadcast %1711 : vector<1x128xf32> to vector<2x128xf32>
    %1715 = arith.subf %1713, %1714 : vector<2x128xf32>
    %1716 = math.absf %1715 : vector<2x128xf32>
    %cst_312 = arith.constant 0.000000e+00 : f32
    %1717 = vector.broadcast %cst_312 : f32 to vector<2x128xf32>
    %1718 = arith.subf %1717, %1716 : vector<2x128xf32>
    %cst_313 = arith.constant 1.000000e+00 : f32
    %1719 = vector.broadcast %cst_313 : f32 to vector<2x128xf32>
    %1720 = arith.mulf %1718, %1719 : vector<2x128xf32>
    %1721 = math.exp %1720 : vector<2x128xf32>
    %1722 = math.log1p %1721 : vector<2x128xf32>
    %1723 = vector.broadcast %1710 : vector<2x1xf32> to vector<2x128xf32>
    %1724 = vector.broadcast %1712 : vector<1x128xf32> to vector<2x128xf32>
    %1725 = arith.subf %1723, %1724 : vector<2x128xf32>
    %1726 = math.absf %1725 : vector<2x128xf32>
    %cst_314 = arith.constant 0.000000e+00 : f32
    %1727 = vector.broadcast %cst_314 : f32 to vector<2x128xf32>
    %1728 = arith.subf %1727, %1726 : vector<2x128xf32>
    %cst_315 = arith.constant 1.000000e+00 : f32
    %1729 = vector.broadcast %cst_315 : f32 to vector<2x128xf32>
    %1730 = arith.mulf %1728, %1729 : vector<2x128xf32>
    %1731 = math.exp %1730 : vector<2x128xf32>
    %1732 = math.log1p %1731 : vector<2x128xf32>
    %1733 = arith.addf %1722, %1732 : vector<2x128xf32>
    %1734 = vector.broadcast %1710 : vector<2x1xf32> to vector<2x128xf32>
    %1735 = vector.broadcast %1712 : vector<1x128xf32> to vector<2x128xf32>
    %1736 = arith.minimumf %1734, %1735 : vector<2x128xf32>
    %1737 = vector.broadcast %1709 : vector<2x1xf32> to vector<2x128xf32>
    %1738 = vector.broadcast %1711 : vector<1x128xf32> to vector<2x128xf32>
    %1739 = arith.maximumf %1737, %1738 : vector<2x128xf32>
    %1740 = arith.subf %1736, %1739 : vector<2x128xf32>
    %cst_316 = arith.constant 1.000000e+00 : f32
    %1741 = vector.broadcast %cst_316 : f32 to vector<2x128xf32>
    %1742 = arith.mulf %1741, %1733 : vector<2x128xf32>
    %1743 = arith.subf %1740, %1742 : vector<2x128xf32>
    %cst_317 = arith.constant 1.200000e+00 : f32
    %1744 = vector.broadcast %cst_317 : f32 to vector<2x128xf32>
    %1745 = arith.subf %1743, %1744 : vector<2x128xf32>
    %cst_318 = arith.constant 1.000000e+00 : f32
    %1746 = vector.broadcast %cst_318 : f32 to vector<2x128xf32>
    %1747 = arith.mulf %1745, %1746 : vector<2x128xf32>
    %cst_319 = arith.constant 0.000000e+00 : f32
    %1748 = vector.broadcast %cst_319 : f32 to vector<2x128xf32>
    %1749 = arith.maximumf %1747, %1748 : vector<2x128xf32>
    %1750 = vector.broadcast %cst_319 : f32 to vector<2x128xf32>
    %1751 = arith.subf %1747, %1750 : vector<2x128xf32>
    %1752 = arith.cmpf one, %1751, %1751 : vector<2x128xf32>
    %1753 = vector.broadcast %cst_319 : f32 to vector<2x128xf32>
    %1754 = arith.addf %1747, %1753 : vector<2x128xf32>
    %1755 = math.absf %1751 : vector<2x128xf32>
    %cst_320 = arith.constant 0.000000e+00 : f32
    %1756 = vector.broadcast %cst_320 : f32 to vector<2x128xf32>
    %1757 = arith.subf %1756, %1755 : vector<2x128xf32>
    %1758 = math.exp %1757 : vector<2x128xf32>
    %1759 = math.log1p %1758 : vector<2x128xf32>
    %1760 = arith.addf %1749, %1759 : vector<2x128xf32>
    %1761 = arith.select %1752, %1754, %1760 : vector<2x128xi1>, vector<2x128xf32>
    %cst_321 = arith.constant 1.17549435E-38 : f32
    %1762 = vector.broadcast %cst_321 : f32 to vector<2x128xf32>
    %1763 = arith.maximumf %1761, %1762 : vector<2x128xf32>
    %1764 = math.log %1763 : vector<2x128xf32>
    %1765 = arith.addf %1708, %1764 : vector<2x128xf32>
    %1766 = vector.extract_strided_slice %0 {offsets = [0, 30], sizes = [2, 1], strides = [1, 1]} : vector<2x32xf32> to vector<2x1xf32>
    %1767 = vector.extract_strided_slice %1 {offsets = [0, 30], sizes = [2, 1], strides = [1, 1]} : vector<2x32xf32> to vector<2x1xf32>
    %1768 = vector.extract_strided_slice %53 {offsets = [30, 0], sizes = [1, 128], strides = [1, 1]} : vector<32x128xf32> to vector<1x128xf32>
    %1769 = vector.extract_strided_slice %54 {offsets = [30, 0], sizes = [1, 128], strides = [1, 1]} : vector<32x128xf32> to vector<1x128xf32>
    %1770 = vector.broadcast %1766 : vector<2x1xf32> to vector<2x128xf32>
    %1771 = vector.broadcast %1768 : vector<1x128xf32> to vector<2x128xf32>
    %1772 = arith.subf %1770, %1771 : vector<2x128xf32>
    %1773 = math.absf %1772 : vector<2x128xf32>
    %cst_322 = arith.constant 0.000000e+00 : f32
    %1774 = vector.broadcast %cst_322 : f32 to vector<2x128xf32>
    %1775 = arith.subf %1774, %1773 : vector<2x128xf32>
    %cst_323 = arith.constant 1.000000e+00 : f32
    %1776 = vector.broadcast %cst_323 : f32 to vector<2x128xf32>
    %1777 = arith.mulf %1775, %1776 : vector<2x128xf32>
    %1778 = math.exp %1777 : vector<2x128xf32>
    %1779 = math.log1p %1778 : vector<2x128xf32>
    %1780 = vector.broadcast %1767 : vector<2x1xf32> to vector<2x128xf32>
    %1781 = vector.broadcast %1769 : vector<1x128xf32> to vector<2x128xf32>
    %1782 = arith.subf %1780, %1781 : vector<2x128xf32>
    %1783 = math.absf %1782 : vector<2x128xf32>
    %cst_324 = arith.constant 0.000000e+00 : f32
    %1784 = vector.broadcast %cst_324 : f32 to vector<2x128xf32>
    %1785 = arith.subf %1784, %1783 : vector<2x128xf32>
    %cst_325 = arith.constant 1.000000e+00 : f32
    %1786 = vector.broadcast %cst_325 : f32 to vector<2x128xf32>
    %1787 = arith.mulf %1785, %1786 : vector<2x128xf32>
    %1788 = math.exp %1787 : vector<2x128xf32>
    %1789 = math.log1p %1788 : vector<2x128xf32>
    %1790 = arith.addf %1779, %1789 : vector<2x128xf32>
    %1791 = vector.broadcast %1767 : vector<2x1xf32> to vector<2x128xf32>
    %1792 = vector.broadcast %1769 : vector<1x128xf32> to vector<2x128xf32>
    %1793 = arith.minimumf %1791, %1792 : vector<2x128xf32>
    %1794 = vector.broadcast %1766 : vector<2x1xf32> to vector<2x128xf32>
    %1795 = vector.broadcast %1768 : vector<1x128xf32> to vector<2x128xf32>
    %1796 = arith.maximumf %1794, %1795 : vector<2x128xf32>
    %1797 = arith.subf %1793, %1796 : vector<2x128xf32>
    %cst_326 = arith.constant 1.000000e+00 : f32
    %1798 = vector.broadcast %cst_326 : f32 to vector<2x128xf32>
    %1799 = arith.mulf %1798, %1790 : vector<2x128xf32>
    %1800 = arith.subf %1797, %1799 : vector<2x128xf32>
    %cst_327 = arith.constant 1.200000e+00 : f32
    %1801 = vector.broadcast %cst_327 : f32 to vector<2x128xf32>
    %1802 = arith.subf %1800, %1801 : vector<2x128xf32>
    %cst_328 = arith.constant 1.000000e+00 : f32
    %1803 = vector.broadcast %cst_328 : f32 to vector<2x128xf32>
    %1804 = arith.mulf %1802, %1803 : vector<2x128xf32>
    %cst_329 = arith.constant 0.000000e+00 : f32
    %1805 = vector.broadcast %cst_329 : f32 to vector<2x128xf32>
    %1806 = arith.maximumf %1804, %1805 : vector<2x128xf32>
    %1807 = vector.broadcast %cst_329 : f32 to vector<2x128xf32>
    %1808 = arith.subf %1804, %1807 : vector<2x128xf32>
    %1809 = arith.cmpf one, %1808, %1808 : vector<2x128xf32>
    %1810 = vector.broadcast %cst_329 : f32 to vector<2x128xf32>
    %1811 = arith.addf %1804, %1810 : vector<2x128xf32>
    %1812 = math.absf %1808 : vector<2x128xf32>
    %cst_330 = arith.constant 0.000000e+00 : f32
    %1813 = vector.broadcast %cst_330 : f32 to vector<2x128xf32>
    %1814 = arith.subf %1813, %1812 : vector<2x128xf32>
    %1815 = math.exp %1814 : vector<2x128xf32>
    %1816 = math.log1p %1815 : vector<2x128xf32>
    %1817 = arith.addf %1806, %1816 : vector<2x128xf32>
    %1818 = arith.select %1809, %1811, %1817 : vector<2x128xi1>, vector<2x128xf32>
    %cst_331 = arith.constant 1.17549435E-38 : f32
    %1819 = vector.broadcast %cst_331 : f32 to vector<2x128xf32>
    %1820 = arith.maximumf %1818, %1819 : vector<2x128xf32>
    %1821 = math.log %1820 : vector<2x128xf32>
    %1822 = arith.addf %1765, %1821 : vector<2x128xf32>
    %1823 = vector.extract_strided_slice %0 {offsets = [0, 31], sizes = [2, 1], strides = [1, 1]} : vector<2x32xf32> to vector<2x1xf32>
    %1824 = vector.extract_strided_slice %1 {offsets = [0, 31], sizes = [2, 1], strides = [1, 1]} : vector<2x32xf32> to vector<2x1xf32>
    %1825 = vector.extract_strided_slice %53 {offsets = [31, 0], sizes = [1, 128], strides = [1, 1]} : vector<32x128xf32> to vector<1x128xf32>
    %1826 = vector.extract_strided_slice %54 {offsets = [31, 0], sizes = [1, 128], strides = [1, 1]} : vector<32x128xf32> to vector<1x128xf32>
    %1827 = vector.broadcast %1823 : vector<2x1xf32> to vector<2x128xf32>
    %1828 = vector.broadcast %1825 : vector<1x128xf32> to vector<2x128xf32>
    %1829 = arith.subf %1827, %1828 : vector<2x128xf32>
    %1830 = math.absf %1829 : vector<2x128xf32>
    %cst_332 = arith.constant 0.000000e+00 : f32
    %1831 = vector.broadcast %cst_332 : f32 to vector<2x128xf32>
    %1832 = arith.subf %1831, %1830 : vector<2x128xf32>
    %cst_333 = arith.constant 1.000000e+00 : f32
    %1833 = vector.broadcast %cst_333 : f32 to vector<2x128xf32>
    %1834 = arith.mulf %1832, %1833 : vector<2x128xf32>
    %1835 = math.exp %1834 : vector<2x128xf32>
    %1836 = math.log1p %1835 : vector<2x128xf32>
    %1837 = vector.broadcast %1824 : vector<2x1xf32> to vector<2x128xf32>
    %1838 = vector.broadcast %1826 : vector<1x128xf32> to vector<2x128xf32>
    %1839 = arith.subf %1837, %1838 : vector<2x128xf32>
    %1840 = math.absf %1839 : vector<2x128xf32>
    %cst_334 = arith.constant 0.000000e+00 : f32
    %1841 = vector.broadcast %cst_334 : f32 to vector<2x128xf32>
    %1842 = arith.subf %1841, %1840 : vector<2x128xf32>
    %cst_335 = arith.constant 1.000000e+00 : f32
    %1843 = vector.broadcast %cst_335 : f32 to vector<2x128xf32>
    %1844 = arith.mulf %1842, %1843 : vector<2x128xf32>
    %1845 = math.exp %1844 : vector<2x128xf32>
    %1846 = math.log1p %1845 : vector<2x128xf32>
    %1847 = arith.addf %1836, %1846 : vector<2x128xf32>
    %1848 = vector.broadcast %1824 : vector<2x1xf32> to vector<2x128xf32>
    %1849 = vector.broadcast %1826 : vector<1x128xf32> to vector<2x128xf32>
    %1850 = arith.minimumf %1848, %1849 : vector<2x128xf32>
    %1851 = vector.broadcast %1823 : vector<2x1xf32> to vector<2x128xf32>
    %1852 = vector.broadcast %1825 : vector<1x128xf32> to vector<2x128xf32>
    %1853 = arith.maximumf %1851, %1852 : vector<2x128xf32>
    %1854 = arith.subf %1850, %1853 : vector<2x128xf32>
    %cst_336 = arith.constant 1.000000e+00 : f32
    %1855 = vector.broadcast %cst_336 : f32 to vector<2x128xf32>
    %1856 = arith.mulf %1855, %1847 : vector<2x128xf32>
    %1857 = arith.subf %1854, %1856 : vector<2x128xf32>
    %cst_337 = arith.constant 1.200000e+00 : f32
    %1858 = vector.broadcast %cst_337 : f32 to vector<2x128xf32>
    %1859 = arith.subf %1857, %1858 : vector<2x128xf32>
    %cst_338 = arith.constant 1.000000e+00 : f32
    %1860 = vector.broadcast %cst_338 : f32 to vector<2x128xf32>
    %1861 = arith.mulf %1859, %1860 : vector<2x128xf32>
    %cst_339 = arith.constant 0.000000e+00 : f32
    %1862 = vector.broadcast %cst_339 : f32 to vector<2x128xf32>
    %1863 = arith.maximumf %1861, %1862 : vector<2x128xf32>
    %1864 = vector.broadcast %cst_339 : f32 to vector<2x128xf32>
    %1865 = arith.subf %1861, %1864 : vector<2x128xf32>
    %1866 = arith.cmpf one, %1865, %1865 : vector<2x128xf32>
    %1867 = vector.broadcast %cst_339 : f32 to vector<2x128xf32>
    %1868 = arith.addf %1861, %1867 : vector<2x128xf32>
    %1869 = math.absf %1865 : vector<2x128xf32>
    %cst_340 = arith.constant 0.000000e+00 : f32
    %1870 = vector.broadcast %cst_340 : f32 to vector<2x128xf32>
    %1871 = arith.subf %1870, %1869 : vector<2x128xf32>
    %1872 = math.exp %1871 : vector<2x128xf32>
    %1873 = math.log1p %1872 : vector<2x128xf32>
    %1874 = arith.addf %1863, %1873 : vector<2x128xf32>
    %1875 = arith.select %1866, %1868, %1874 : vector<2x128xi1>, vector<2x128xf32>
    %cst_341 = arith.constant 1.17549435E-38 : f32
    %1876 = vector.broadcast %cst_341 : f32 to vector<2x128xf32>
    %1877 = arith.maximumf %1875, %1876 : vector<2x128xf32>
    %1878 = math.log %1877 : vector<2x128xf32>
    %1879 = arith.addf %1822, %1878 : vector<2x128xf32>
    %c0_342 = arith.constant 0 : index
    %c0_343 = arith.constant 0 : index
    %1880 = vector.load %arg6[%c0_342, %c0_343] : memref<1x128xf32, #tpu.memory_space<vmem>>, vector<1x128xf32>
    %1881 = vector.broadcast %52 : vector<2x1xf32> to vector<2x128xf32>
    %1882 = arith.subf %1879, %1881 : vector<2x128xf32>
    %1883 = vector.broadcast %1880 : vector<1x128xf32> to vector<2x128xf32>
    %1884 = vector.broadcast %28 : vector<2x1xf32> to vector<2x128xf32>
    %1885 = arith.subf %1883, %1884 : vector<2x128xf32>
    %cst_344 = arith.constant 5.000000e-01 : f32
    %1886 = vector.broadcast %cst_344 : f32 to vector<2x128xf32>
    %1887 = arith.mulf %1886, %1885 : vector<2x128xf32>
    %1888 = arith.addf %1882, %1887 : vector<2x128xf32>
    %cst_345 = arith.constant 0.000000e+00 : f32
    %1889 = vector.broadcast %cst_345 : f32 to vector<2x128xf32>
    %1890 = arith.minimumf %1888, %1889 : vector<2x128xf32>
    %c0_346 = arith.constant 0 : index
    %c0_347 = arith.constant 0 : index
    %1891 = vector.load %arg9[%c0_346, %c0_347] : memref<2x128xf32, #tpu.memory_space<vmem>>, vector<2x128xf32>
    tpu.vector_store %arg9[%c0_346, %c0_347], %1890 {strides = array<i32>} : memref<2x128xf32, #tpu.memory_space<vmem>>, vector<2x128xf32>,
    return
  }
  func.func @transform_0(%arg0: i32, %arg1: i32) -> (i32, i32) {
    %c0_i32 = arith.constant 0 : i32
    %c0_i32_0 = arith.constant 0 : i32
    return %arg0, %c0_i32 : i32, i32
  }
  func.func @transform_1(%arg0: i32, %arg1: i32) -> (i32, i32) {
    %c0_i32 = arith.constant 0 : i32
    %c0_i32_0 = arith.constant 0 : i32
    return %arg0, %c0_i32 : i32, i32
  }
  func.func @transform_2(%arg0: i32, %arg1: i32) -> (i32, i32) {
    %c0_i32 = arith.constant 0 : i32
    %c0_i32_0 = arith.constant 0 : i32
    return %c0_i32, %arg1 : i32, i32
  }
  func.func @transform_3(%arg0: i32, %arg1: i32) -> (i32, i32) {
    %c0_i32 = arith.constant 0 : i32
    %c0_i32_0 = arith.constant 0 : i32
    return %c0_i32, %arg1 : i32, i32
  }
  func.func @transform_4(%arg0: i32, %arg1: i32) -> (i32, i32) {
    %c0_i32 = arith.constant 0 : i32
    %c0_i32_0 = arith.constant 0 : i32
    return %c0_i32, %arg1 : i32, i32
  }
  func.func @transform_5(%arg0: i32, %arg1: i32) -> (i32, i32) {
    %c0_i32 = arith.constant 0 : i32
    %c0_i32_0 = arith.constant 0 : i32
    %c0_i32_1 = arith.constant 0 : i32
    return %c0_i32, %c0_i32_0 : i32, i32
  }
  func.func @transform_6(%arg0: i32, %arg1: i32) -> (i32, i32) {
    %c0_i32 = arith.constant 0 : i32
    %c0_i32_0 = arith.constant 0 : i32
    %c0_i32_1 = arith.constant 0 : i32
    return %c0_i32, %c0_i32_0 : i32, i32
  }
  func.func @transform_7(%arg0: i32, %arg1: i32) -> (i32, i32) {
    %c0_i32 = arith.constant 0 : i32
    return %arg0, %arg1 : i32, i32
  }
}

</mosaic_0001>

<bundles_post_ra>
// kernel: tpu_custom_call.1
= control target key start
LH: loop header
LB: loop body
LE: loop exit
PB: predicated region body
PF: predicated region fallthrough
CT: control target
= control target key end

     0   :  { %13 = vsyncpa [#allocation4], 0  ;;  %s5481_s0 = inlined_call_operand.hbm [shape: f32[2,32], index: 0, kind: input, shape index: {}]   ;;  %s5482_s1 = inlined_call_operand.hbm [shape: f32[2,32], index: 1, kind: input, shape index: {}]   ;;  %s5483_s2 = inlined_call_operand.hbm [shape: f32[32,128], index: 2, kind: input, shape index: {}]   ;;  %s5484_s3 = inlined_call_operand.hbm [shape: f32[32,128], index: 3, kind: input, shape index: {}]   ;;  %s5485_s4 = inlined_call_operand.hbm [shape: f32[1,128], index: 4, kind: input, shape index: {}]   ;;  %s5486_s5 = inlined_call_operand.hbm [shape: f32[1,32], index: 5, kind: input, shape index: {}]   ;;  %s5487_s6 = inlined_call_operand.<no memory space> [shape: f32[1,1], index: 6, kind: input, shape index: {}]   ;;  %s5488_s7 = inlined_call_operand.hbm [shape: f32[2,128], index: 7, kind: output, shape index: {}]  }
   0x1   :  { %14 = vsyncpa [#allocation7], 0 }
   0x2   :  { %15 = vsyncpa [#allocation10], 0 }
   0x3   :  { %16 = vsyncpa [#allocation13], 0 }
   0x4   :  { %17 = vsyncpa [#allocation5], 0  ;;  %s3271_s24 = smov [#allocation6]   ;;  %s3107_s28 = scalar_lea.hbm %s5482_s1, 32 }
   0x5   :  { %s34_s25 = sshll.u32 %s3271_s24, 4  ;;  %p3108_p0 = scmp.ne.s32.totalorder %s5482_s1, %s3107_s28  ;;  %s35_s25 = int_to_ptr.vmem [resolvable:$true] %s34_s25 }
   0x6   :  { %p3111_p1 = scmp.lt.u32.totalorder %s3107_s28, %s5482_s1 }
   0x8   :  { %p3113_p2 = pnand %p3111_p1, %p3108_p0 }
   0xa   :  { %3116 = shalt.err (!%p3113_p2)
}
   0xb   :  { %s3117_s10 = scalar_lea.vmem %s35_s25, 32  ;;  %p3122_p4 = scmp.lt.s32.totalorder %s35_s25, %s35_s25 }
   0xc   :  { %p3118_p3 = scmp.ne.s32.totalorder %s35_s25, %s3117_s10  ;;  %p3123_p5 = scmp.lt.s32.totalorder %s3117_s10, %s3117_s10 }
   0xe   :  { %p3124_p6 = por %p3123_p5, %p3122_p4 }
  0x10   :  { %p3125_p7 = pnand %p3124_p6, %p3118_p3 }
  0x12   :  { %3128 = shalt.err (!%p3125_p7)
}
  0x13   :  { %37 = dma.hbm_to_vmem [thread:$0]  %s5482_s1, 32, %s35_s25, [#allocation7]  }
  0x14   :  { %s3272_s13 = smov [#allocation9]   ;;  %s3273_s15 = smov [#allocation3]  }
  0x15   :  { %s55_s14 = sshll.u32 %s3272_s13, 4  ;;  %s24_s16 = sshll.u32 %s3273_s15, 4  ;;  %s56_s14 = int_to_ptr.vmem [resolvable:$true] %s55_s14  ;;  %s25_s16 = int_to_ptr.vmem [resolvable:$true] %s24_s16 }
  0x16   :  { %s3129_s19 = scalar_lea.hbm %s5484_s3, 512 }
  0x17   :  { %p3130_p8 = scmp.ne.s32.totalorder %s5484_s3, %s3129_s19  ;;  %p3133_p9 = scmp.lt.u32.totalorder %s3129_s19, %s5484_s3 }
  0x19   :  { %p3135_p10 = pnand %p3133_p9, %p3130_p8 }
  0x1b   :  { %3138 = shalt.err (!%p3135_p10)
}
  0x1c   :  { %s3139_s1 = scalar_lea.vmem %s56_s14, 512  ;;  %p3144_p12 = scmp.lt.s32.totalorder %s56_s14, %s56_s14 }
  0x1d   :  { %p3140_p11 = scmp.ne.s32.totalorder %s56_s14, %s3139_s1  ;;  %p3145_p13 = scmp.lt.s32.totalorder %s3139_s1, %s3139_s1 }
  0x1f   :  { %p3146_p0 = por %p3145_p13, %p3144_p12 }
  0x21   :  { %p3147_p1 = pnand %p3146_p0, %p3140_p11 }
  0x23   :  { %3150 = shalt.err (!%p3147_p1)
}
  0x24   :  { %s3274_s24 = smov 128   ;;  %s3275_s25 = smov 8  }
  0x25   :  { %61 = dma.hbm_to_vmem [thread:$0]  %s5484_s3, 512, %s56_s14, [#allocation10], %s3274_s24, %s3274_s24, %s3275_s25  }
  0x26   :  { %s3151_s30 = scalar_lea.hbm %s5481_s0, 32 }
  0x27   :  { %p3152_p2 = scmp.ne.s32.totalorder %s5481_s0, %s3151_s30  ;;  %p3155_p3 = scmp.lt.u32.totalorder %s3151_s30, %s5481_s0 }
  0x29   :  { %p3157_p4 = pnand %p3155_p3, %p3152_p2 }
  0x2b   :  { %3160 = shalt.err (!%p3157_p4)
}
  0x2c   :  { %s3161_s12 = scalar_lea.vmem %s25_s16, 32  ;;  %p3166_p6 = scmp.lt.s32.totalorder %s25_s16, %s25_s16 }
  0x2d   :  { %p3162_p5 = scmp.ne.s32.totalorder %s25_s16, %s3161_s12  ;;  %p3167_p7 = scmp.lt.s32.totalorder %s3161_s12, %s3161_s12 }
  0x2f   :  { %p3168_p8 = por %p3167_p7, %p3166_p6 }
  0x31   :  { %p3169_p9 = pnand %p3168_p8, %p3162_p5 }
  0x33   :  { %3172 = shalt.err (!%p3169_p9)
}
  0x34   :  { %27 = dma.hbm_to_vmem [thread:$0]  %s5481_s0, 32, %s25_s16, [#allocation4]  }
  0x35   :  { %s3276_s14 = smov [#allocation8]   ;;  %s3277_s17 = smov [#allocation11]  }
  0x36   :  { %s43_s15 = sshll.u32 %s3276_s14, 4  ;;  %s68_s18 = sshll.u32 %s3277_s17, 4  ;;  %s44_s15 = int_to_ptr.vmem [resolvable:$true] %s43_s15  ;;  %s69_s18 = int_to_ptr.vmem [resolvable:$true] %s68_s18 }
  0x37   :  { %s3173_s21 = scalar_lea.hbm %s5483_s2, 512 }
  0x38   :  { %p3174_p10 = scmp.ne.s32.totalorder %s5483_s2, %s3173_s21  ;;  %p3177_p11 = scmp.lt.u32.totalorder %s3173_s21, %s5483_s2 }
  0x3a   :  { %p3179_p12 = pnand %p3177_p11, %p3174_p10 }
  0x3c   :  { %3182 = shalt.err (!%p3179_p12)
}
  0x3d   :  { %s3183_s0 = scalar_lea.vmem %s44_s15, 512  ;;  %p3188_p0 = scmp.lt.s32.totalorder %s44_s15, %s44_s15 }
  0x3e   :  { %p3184_p13 = scmp.ne.s32.totalorder %s44_s15, %s3183_s0  ;;  %p3189_p1 = scmp.lt.s32.totalorder %s3183_s0, %s3183_s0 }
  0x40   :  { %p3190_p2 = por %p3189_p1, %p3188_p0 }
  0x42   :  { %p3191_p3 = pnand %p3190_p2, %p3184_p13 }
  0x44   :  { %3194 = shalt.err (!%p3191_p3)
}
  0x45   :  { %49 = dma.hbm_to_vmem [thread:$0]  %s5483_s2, 512, %s44_s15, [#allocation7], %s3274_s24, %s3274_s24, %s3275_s25  }
  0x46   :  { %s3195_s30 = scalar_lea.hbm %s5485_s4, 16 }
  0x47   :  { %p3196_p4 = scmp.ne.s32.totalorder %s5485_s4, %s3195_s30  ;;  %p3199_p5 = scmp.lt.u32.totalorder %s3195_s30, %s5485_s4 }
  0x49   :  { %p3201_p6 = pnand %p3199_p5, %p3196_p4 }
  0x4b   :  { %3204 = shalt.err (!%p3201_p6)
}
  0x4c   :  { %s3205_s12 = scalar_lea.vmem %s69_s18, 16  ;;  %s3209_s3 = scalar_lea.vmem %s69_s18, 32 }
  0x4d   :  { %p3206_p7 = scmp.ne.s32.totalorder %s69_s18, %s3205_s12  ;;  %p3210_p8 = scmp.lt.s32.totalorder %s69_s18, %s69_s18 }
  0x4e   :  { %p3211_p9 = scmp.lt.s32.totalorder %s3209_s3, %s3205_s12 }
  0x50   :  { %p3212_p10 = por %p3211_p9, %p3210_p8 }
  0x52   :  { %p3213_p11 = pnand %p3212_p10, %p3206_p7 }
  0x54   :  { %3216 = shalt.err (!%p3213_p11)
}
  0x55   :  { %71 = dma.hbm_to_vmem [thread:$0]  %s5485_s4, 16, %s69_s18, [#allocation10]  }
  0x56   :  { %s3278_s25 = smov [#allocation12]   ;;  %s3217_s17 = scalar_lea.hbm %s5486_s5, 16 }
  0x57   :  { %s78_s13 = sshll.u32 %s3278_s25, 4  ;;  %p3218_p12 = scmp.ne.s32.totalorder %s5486_s5, %s3217_s17  ;;  %s79_s13 = int_to_ptr.vmem [resolvable:$true] %s78_s13 }
  0x58   :  { %p3221_p13 = scmp.lt.u32.totalorder %s3217_s17, %s5486_s5 }
  0x5a   :  { %p3223_p0 = pnand %p3221_p13, %p3218_p12 }
  0x5c   :  { %3226 = shalt.err (!%p3223_p0)
}
  0x5d   :  { %s3227_s23 = scalar_lea.vmem %s79_s13, 16  ;;  %s3231_s4 = scalar_lea.vmem %s79_s13, 32 }
  0x5e   :  { %p3228_p1 = scmp.ne.s32.totalorder %s79_s13, %s3227_s23  ;;  %p3232_p2 = scmp.lt.s32.totalorder %s79_s13, %s79_s13 }
  0x5f   :  { %p3233_p3 = scmp.lt.s32.totalorder %s3231_s4, %s3227_s23 }
  0x61   :  { %p3234_p4 = por %p3233_p3, %p3232_p2 }
  0x63   :  { %p3235_p5 = pnand %p3234_p4, %p3228_p1 }
  0x65   :  { %3238 = shalt.err (!%p3235_p5)
}
  0x66   :  { %81 = dma.hbm_to_vmem [thread:$0]  %s5486_s5, 16, %s79_s13, [#allocation13]  }
  0x67   :  { %3261 = dma.done.wait [#allocation4], 32  }
  0x68   :  { %3262 = vsyncadd [#allocation4], 4294967264 }
  0x69   :  { %3263 = dma.done.wait [#allocation7], 544  }
  0x6a   :  { %3264 = vsyncadd [#allocation7], 4294966752 }
  0x6b   :  { %3265 = dma.done.wait [#allocation10], 528  }
  0x6c   :  { %3266 = vsyncadd [#allocation10], 4294966768 }
  0x6d   :  { %3267 = dma.done.wait [#allocation13], 16  }
  0x6e   :  { %3268 = vsyncadd [#allocation13], 4294967280  ;;  %v3279_v0 = vmov 0   ;;  %vm113_vm0 = vcmask 254976   ;;  %v3430_v1 = vld [vmem:[#allocation3] sm:$0x3]  ;;  %v177_v49 = vlaneseq }
  0x6f   :  { %2587 = vset.pattern.permute.xlu1 %v3279_v0  ;;  %2588 = vset.pattern.permute.xlu0 %v3279_v0  ;;  %v2509_v2 = vld [vmem:[#allocation12] ss:$0 sm:$0xff]  ;;  %v3432_v3 = vld [vmem:[#allocation6] sm:$0x3]  ;;  %v3280_v9 = vmov 1   ;;  %v3281_v13 = vmov 2  }
  0x70   :  { %174 = vperm.xlu1 %2587, %v3430_v1   ;;  %v112_v4 = vmul.f32 %v2509_v2, %v3430_v1  ;;  %v119_v5 = vmul.f32 %v2509_v2, %v3432_v3  ;;  %v138_v6 = vsub.f32 %v3432_v3, %v3430_v1  ;;  %v3282_v15 = vmov 3   ;;  %v3497_v54 = vld [vmem:[#allocation8] sm:$0xff] }
  0x71   :  { %v3283_v17 = vmov 4   ;;  %v3284_v19 = vmov 5   ;;  %v3285_v20 = vmov 6   ;;  %v3286_v22 = vmov 8   ;;  %v3507_v58 = vld [vmem:[#allocation9] sm:$0xff] }
  0x72   :  { %v114_v7 = vsel %vm113_vm0, %v112_v4, 0.0  ;;  %v3440_v8 = vadd.f32 -1.2, %v138_v6  ;;  %v120_v10 = vsel %vm113_vm0, %v119_v5, 0.0  ;;  %v3287_v26 = vmov 9  }
  0x73   :  { %115 = vadd.xlane.f32.xlu0 %v114_v7  ;;  %v3288_v29 = vmov 7   ;;  %v3289_v32 = vmov 11   ;;  %v3290_v34 = vmov 12   ;;  %v3291_v37 = vmov 14  }
  0x74   :  { %2589 = vset.pattern.permute.xlu1 %v3280_v9  ;;  %v143_v11 = vand.u32 2147483647, %v3440_v8  ;;  %v140_v30 = vmax.f32 %v3440_v8, 0.0  ;;  %vm141_vm2 = vcmp.ne.f32.partialorder %v3440_v8, %v3440_v8  ;;  %v3292_v38 = vmov 15  }
  0x75   :  { %247 = vperm.xlu1 %2589, %v3430_v1   ;;  %v3293_v39 = vmov 17   ;;  %v3294_v41 = vmov 18   ;;  %v5497_v44 = vmov 20   ;;  %v5496_v45 = vmov 21  }
  0x76   :  { %v144_v12 = vsub.f32 0.0, %v143_v11  ;;  %v5495_v46 = vmov 23   ;;  %v5494_v47 = vmov 24   ;;  %v3299_v48 = vmov 10  }
  0x77   :  { %121 = vadd.xlane.f32.xlu0 %v120_v10  ;;  %v3488_v50 = vshrl.u32 %v177_v49, 7  ;;  %v5493_v51 = vmov 26   ;;  %v5492_v56 = vmov 27   ;;  %v3302_v9 = vmov 13  }
  0x78   :  { %v145_v14 = vmul.f32 1.442695, %v144_v12  ;;  %v5491_v11 = vmov 29  }
  0x79   :  { %269 = vperm.xlu1 %2589, %v3432_v3   ;;  %v3493_v52 = vsub.s32 1, %v3488_v50  ;;  %v3500_v55 = vsub.s32 0, %v3488_v50  ;;  %v3517_v63 = vsub.s32 2, %v3488_v50 }
  0x7a   :  { %2639 = vpow2.f32 %v145_v14 }
  0x7b   :  { %v253_v57 = vrot.slane %v3497_v54, %v3493_v52  ;;  %v3511_v59 = vrot.slane %v3497_v54, %v3500_v55  ;;  %v275_v62 = vrot.slane %v3507_v58, %v3493_v52  ;;  %v325_v10 = vrot.slane %v3497_v54, %v3517_v63 }
  0x7d   :  { %2590 = vset.pattern.permute.xlu1 %v3281_v13 }
  0x7e   :  { %319 = vperm.xlu1 %2590, %v3430_v1  }
  0x82   :  { %341 = vperm.xlu1 %2590, %v3432_v3  }
  0x84   :  { %v2640_v16 = vpop.eup %2639 }
  0x85   :  { %v147_v18 = vadd.f32 1.0, %v2640_v16  ;;  %v150_v21 = vmul.f32 -0.5, %v2640_v16  ;;  %v153_v25 = vand.u32 2147483647, %v2640_v16 }
  0x86   :  { %2591 = vset.pattern.permute.xlu1 %v3282_v15 }
  0x87   :  { %391 = vperm.xlu1 %2591, %v3430_v1   ;;  %2641 = vlog2.f32 %v147_v18  ;;  %v151_v23 = vadd.f32 1.0, %v150_v21  ;;  %vm154_vm1 = vcmp.lt.f32.partialorder %v153_v25, 0.0004427343  ;;  %v3532_v21 = vsub.s32 3, %v3488_v50 }
  0x89   :  { %v152_v28 = vmul.f32 %v2640_v16, %v151_v23  ;;  %v419_v49 = vrot.slane %v3507_v58, %v3532_v21 }
  0x8b   :  { %413 = vperm.xlu1 %2591, %v3432_v3  }
  0x8d   :  { %197 = vperm.xlu0 %2588, %v3432_v3  }
  0x8f   :  { %2592 = vset.pattern.permute.xlu1 %v3283_v17 }
  0x90   :  { %463 = vperm.xlu1 %2592, %v3430_v1  }
  0x91   :  { %2593 = vset.pattern.permute.xlu0 %v3284_v19  ;;  %v2642_v24 = vpop.eup %2641 }
  0x92   :  { %535 = vperm.xlu0 %2593, %v3430_v1   ;;  %v149_v27 = vmul.f32 0.6931472, %v2642_v24 }
  0x94   :  { %485 = vperm.xlu1 %2592, %v3432_v3   ;;  %v155_v31 = vsel %vm154_vm1, %v152_v28, %v149_v27 }
  0x95   :  { %v156_v33 = vadd.f32 %v155_v31, %v140_v30  ;;  %v397_v31 = vrot.slane %v3497_v54, %v3532_v21 }
  0x96   :  { %2596 = vset.pattern.permute.xlu0 %v3285_v20 }
  0x97   :  { %629 = vperm.xlu0 %2596, %v3432_v3   ;;  %v157_v35 = vsel %vm141_vm2, %v3440_v8, %v156_v33 }
  0x98   :  { %2594 = vset.pattern.permute.xlu1 %v3284_v19  ;;  %v158_v36 = vmax.f32 %v157_v35, 1.1754944e-38  ;;  %v347_v19 = vrot.slane %v3507_v58, %v3517_v63 }
  0x99   :  { %557 = vperm.xlu1 %2594, %v3432_v3  }
  0x9a   :  { %2643 = vlog2.f32 %v158_v36  ;;  %v3545_v36 = vsub.s32 4, %v3488_v50 }
  0x9b   :  { %2598 = vset.pattern.permute.xlu0 %v3286_v22 }
  0x9c   :  { %751 = vperm.xlu0 %2598, %v3430_v1  }
  0x9d   :  { %2595 = vset.pattern.permute.xlu1 %v3285_v20 }
  0x9e   :  { %607 = vperm.xlu1 %2595, %v3430_v1  }
  0xa0   :  { %2601 = vset.pattern.permute.xlu0 %v3287_v26 }
  0xa1   :  { %845 = vperm.xlu0 %2601, %v3432_v3  }
  0xa2   :  { %2597 = vset.pattern.permute.xlu1 %v3288_v29 }
  0xa3   :  { %679 = vperm.xlu1 %2597, %v3430_v1  }
  0xa4   :  { %v2644_v40 = vpop.eup %2643 }
  0xa5   :  { %2603 = vset.pattern.permute.xlu0 %v3289_v32  ;;  %v160_v42 = vmul.f32 0.6931472, %v2644_v40 }
  0xa6   :  { %967 = vperm.xlu0 %2603, %v3430_v1  }
  0xa7   :  { %v161_v43 = vsel %vm113_vm0, %v160_v42, 0.0 }
  0xaa   :  { %2606 = vset.pattern.permute.xlu0 %v3290_v34 }
  0xab   :  { %1061 = vperm.xlu0 %2606, %v3432_v3  }
  0xaf   :  { %2608 = vset.pattern.permute.xlu0 %v3291_v37 }
  0xb0   :  { %1183 = vperm.xlu0 %2608, %v3430_v1  }
  0xb4   :  { %2611 = vset.pattern.permute.xlu0 %v3292_v38 }
  0xb5   :  { %1277 = vperm.xlu0 %2611, %v3432_v3  }
  0xb9   :  { %2613 = vset.pattern.permute.xlu0 %v3293_v39 }
  0xba   :  { %1399 = vperm.xlu0 %2613, %v3430_v1  }
  0xbe   :  { %2616 = vset.pattern.permute.xlu0 %v3294_v41 }
  0xbf   :  { %1493 = vperm.xlu0 %2616, %v3432_v3  }
  0xc3   :  { %2618 = vset.pattern.permute.xlu0 %v5497_v44 }
  0xc4   :  { %1615 = vperm.xlu0 %2618, %v3430_v1  }
  0xc7   :  { %162 = vadd.xlane.f32.xlu1 %v161_v43 }
  0xc8   :  { %2621 = vset.pattern.permute.xlu0 %v5496_v45 }
  0xc9   :  { %1709 = vperm.xlu0 %2621, %v3432_v3  }
  0xcd   :  { %2623 = vset.pattern.permute.xlu0 %v5495_v46 }
  0xce   :  { %1831 = vperm.xlu0 %2623, %v3430_v1  }
  0xd2   :  { %2626 = vset.pattern.permute.xlu0 %v5494_v47 }
  0xd3   :  { %1925 = vperm.xlu0 %2626, %v3432_v3  }
  0xd7   :  { %2628 = vset.pattern.permute.xlu0 %v5493_v51 }
  0xd8   :  { %701 = vperm.xlu1 %2597, %v3432_v3   ;;  %2047 = vperm.xlu0 %2628, %v3430_v1  }
  0xdc   :  { %2599 = vset.pattern.permute.xlu1 %v3286_v22  ;;  %2631 = vset.pattern.permute.xlu0 %v5492_v56  ;;  %v5490_v22 = vmov 30  }
  0xdd   :  { %773 = vperm.xlu1 %2599, %v3432_v3   ;;  %2141 = vperm.xlu0 %2631, %v3432_v3  }
  0xe1   :  { %2600 = vset.pattern.permute.xlu1 %v3287_v26  ;;  %2633 = vset.pattern.permute.xlu0 %v5491_v11 }
  0xe2   :  { %823 = vperm.xlu1 %2600, %v3430_v1   ;;  %2263 = vperm.xlu0 %2633, %v3430_v1  }
  0xe6   :  { %2602 = vset.pattern.permute.xlu1 %v3299_v48  ;;  %2636 = vset.pattern.permute.xlu0 %v5490_v22 }
  0xe7   :  { %895 = vperm.xlu1 %2602, %v3430_v1   ;;  %2357 = vperm.xlu0 %2636, %v3432_v3  }
  0xeb   :  { %917 = vperm.xlu1 %2602, %v3432_v3  }
  0xef   :  { %v3495_v53 = vpop.permute.xlu1 %174  ;;  %2604 = vset.pattern.permute.xlu1 %v3289_v32 }
  0xf0   :  { %989 = vperm.xlu1 %2604, %v3432_v3   ;;  %v181_v2 = vsub.f32 %v3495_v53, %v3511_v59 }
  0xf2   :  { %v182_v15 = vand.u32 2147483647, %v181_v2  ;;  %v3569_v2 = vrot.slane %v3507_v58, %v3545_v36 }
  0xf4   :  { %v248_v60 = vpop.permute.xlu1 %247  ;;  %2605 = vset.pattern.permute.xlu1 %v3290_v34  ;;  %v183_v23 = vsub.f32 0.0, %v182_v15  ;;  %v3306_v15 = vmov 16  }
  0xf5   :  { %v254_v61 = vsub.f32 %v248_v60, %v253_v57  ;;  %1039 = vperm.xlu1 %2605, %v3430_v1   ;;  %v292_v4 = vmax.f32 %v248_v60, %v253_v57 }
  0xf6   :  { %v184_v32 = vmul.f32 1.442695, %v183_v23 }
  0xf7   :  { %v255_v0 = vand.u32 2147483647, %v254_v61  ;;  %v3557_v61 = vsub.s32 5, %v3488_v50 }
  0xf8   :  { %v270_v5 = vpop.permute.xlu1 %269 }
  0xf9   :  { %v256_v6 = vsub.f32 0.0, %v255_v0  ;;  %v276_v7 = vsub.f32 %v270_v5, %v275_v62  ;;  %v291_v8 = vmin.f32 %v270_v5, %v275_v62  ;;  %2607 = vset.pattern.permute.xlu1 %v3302_v9  ;;  %v3561_v0 = vrot.slane %v3507_v58, %v3500_v55 }
  0xfa   :  { %1111 = vperm.xlu1 %2607, %v3430_v1  }
  0xfb   :  { %v257_v12 = vmul.f32 1.442695, %v256_v6  ;;  %v277_v13 = vand.u32 2147483647, %v276_v7  ;;  %v3525_v14 = vsub.f32 %v291_v8, %v292_v4  ;;  %v3572_v6 = vsub.s32 6, %v3488_v50 }
  0xfd   :  { %2645 = vpow2.f32 %v257_v12  ;;  %v278_v16 = vsub.f32 0.0, %v277_v13  ;;  %v320_v17 = vpop.permute.xlu1 %319  ;;  %v5489_v12 = vmov 31  }
  0xfe   :  { %v326_v18 = vsub.f32 %v320_v17, %v325_v10  ;;  %1133 = vperm.xlu1 %2607, %v3432_v3   ;;  %v364_v28 = vmax.f32 %v320_v17, %v325_v10  ;;  %2638 = vset.pattern.permute.xlu0 %v5489_v12  ;;  %v3582_v17 = vrot.slane %v3507_v58, %v3557_v61 }
  0xff   :  { %v279_v20 = vmul.f32 1.442695, %v278_v16 }
 0x100   :  { %v327_v24 = vand.u32 2147483647, %v326_v18  ;;  %v3535_v25 = vpop.xlane.xlu0 %115  ;;  %v3586_v18 = vrot.slane %v3497_v54, %v3557_v61 }
 0x101   :  { %5498 = vst [vmem:[#allocation20_spill] sm:$0xff] %v3535_v25  ;;  %2647 = vpow2.f32 %v279_v20  ;;  %v342_v26 = vpop.permute.xlu1 %341 }
 0x102   :  { %v328_v27 = vsub.f32 0.0, %v327_v24  ;;  %v348_v29 = vsub.f32 %v342_v26, %v347_v19  ;;  %v363_v30 = vmin.f32 %v342_v26, %v347_v19  ;;  %2609 = vset.pattern.permute.xlu1 %v3291_v37  ;;  %v3589_v19 = vsub.s32 7, %v3488_v50 }
 0x103   :  { %1205 = vperm.xlu1 %2609, %v3432_v3   ;;  %v3603_v50 = vrot.slane %v3507_v58, %v3572_v6 }
 0x104   :  { %v329_v33 = vmul.f32 1.442695, %v328_v27  ;;  %v349_v34 = vand.u32 2147483647, %v348_v29  ;;  %v3542_v35 = vsub.f32 %v363_v30, %v364_v28  ;;  %v3547_v43 = vpop.xlane.xlu0 %121  ;;  %v3599_v28 = vrot.slane %v3497_v54, %v3572_v6 }
 0x105   :  { %5499 = vst [vmem:[#allocation21_spill] sm:$0xff] %v3547_v43 }
 0x106   :  { %2649 = vpow2.f32 %v329_v33  ;;  %v350_v40 = vsub.f32 0.0, %v349_v34  ;;  %v392_v42 = vpop.permute.xlu1 %391 }
 0x107   :  { %v3549_v48 = vpop.eup %2645  ;;  %v398_v37 = vsub.f32 %v392_v42, %v397_v31  ;;  %2610 = vset.pattern.permute.xlu1 %v3292_v38  ;;  %2651 = vpow2.f32 %v184_v32  ;;  %v3565_v38 = vrot.slane %v3497_v54, %v3545_v36  ;;  %v436_v4 = vmax.f32 %v392_v42, %v397_v31 }
 0x108   :  { %v259_v57 = vadd.f32 1.0, %v3549_v48  ;;  %v351_v60 = vmul.f32 1.442695, %v350_v40  ;;  %1255 = vperm.xlu1 %2610, %v3430_v1   ;;  %v262_v27 = vmul.f32 -0.5, %v3549_v48  ;;  %v3611_v40 = vrot.slane %v3497_v54, %v3589_v19 }
 0x109   :  { %v399_v62 = vand.u32 2147483647, %v398_v37 }
 0x10a   :  { %2653 = vlog2.f32 %v259_v57  ;;  %v414_v5 = vpop.permute.xlu1 %413  ;;  %v3617_v57 = vld [vmem:[#allocation9 + $0x8] sm:$0xff] }
 0x10b   :  { %v3574_v7 = vpop.eup %2647  ;;  %2655 = vpow2.f32 %v351_v60  ;;  %v400_v8 = vsub.f32 0.0, %v399_v62  ;;  %v420_v9 = vsub.f32 %v414_v5, %v419_v49  ;;  %v435_v10 = vmin.f32 %v414_v5, %v419_v49 }
 0x10c   :  { %v281_v13 = vadd.f32 1.0, %v3574_v7  ;;  %2612 = vset.pattern.permute.xlu1 %v3306_v15  ;;  %v3578_v16 = vpop.permute.xlu0 %197  ;;  %v284_v33 = vmul.f32 -0.5, %v3574_v7  ;;  %v263_v62 = vadd.f32 1.0, %v262_v27  ;;  %v287_v54 = vand.u32 2147483647, %v3574_v7 }
 0x10d   :  { %v401_v20 = vmul.f32 1.442695, %v400_v8  ;;  %v421_v23 = vand.u32 2147483647, %v420_v9  ;;  %v3591_v24 = vsub.f32 %v435_v10, %v436_v4  ;;  %v204_v26 = vsub.f32 %v3578_v16, %v3561_v0  ;;  %1327 = vperm.xlu1 %2612, %v3430_v1  }
 0x10e   :  { %2657 = vlog2.f32 %v281_v13  ;;  %v265_v4 = vand.u32 2147483647, %v3549_v48  ;;  %v3625_v10 = vrot.slane %v3507_v58, %v3589_v19  ;;  %v285_v15 = vadd.f32 1.0, %v284_v33 }
 0x10f   :  { %2659 = vpow2.f32 %v401_v20  ;;  %v422_v29 = vsub.f32 0.0, %v421_v23  ;;  %v205_v30 = vand.u32 2147483647, %v204_v26  ;;  %v464_v31 = vpop.permute.xlu1 %463  ;;  %v3629_v23 = vrot.slane %v3617_v57, %v3500_v55 }
 0x110   :  { %v3605_v32 = vpop.eup %2649  ;;  %v470_v34 = vsub.f32 %v464_v31, %v3565_v38  ;;  %v264_v33 = vmul.f32 %v3549_v48, %v263_v62  ;;  %vm3638_vm3 = vcmp.lt.f32.partialorder %v265_v4, 0.0004427343  ;;  %vm3644_vm4 = vcmp.lt.f32.partialorder %v287_v54, 0.0004427343 }
 0x111   :  { %v331_v37 = vadd.f32 1.0, %v3605_v32  ;;  %v423_v49 = vmul.f32 1.442695, %v422_v29  ;;  %1349 = vperm.xlu1 %2612, %v3432_v3   ;;  %v3619_v60 = vpop.eup %2651  ;;  %v206_v5 = vsub.f32 0.0, %v205_v30  ;;  %v508_v48 = vmax.f32 %v464_v31, %v3565_v38 }
 0x112   :  { %v471_v8 = vand.u32 2147483647, %v470_v34  ;;  %v186_v27 = vadd.f32 1.0, %v3619_v60  ;;  %v189_v29 = vmul.f32 -0.5, %v3619_v60 }
 0x113   :  { %2661 = vlog2.f32 %v331_v37  ;;  %v486_v9 = vpop.permute.xlu1 %485  ;;  %v207_v20 = vmul.f32 1.442695, %v206_v5 }
 0x114   :  { %v2654_v13 = vpop.eup %2653  ;;  %2663 = vpow2.f32 %v423_v49  ;;  %v472_v30 = vsub.f32 0.0, %v471_v8  ;;  %v492_v34 = vsub.f32 %v486_v9, %v3569_v2  ;;  %v507_v62 = vmin.f32 %v486_v9, %v3569_v2 }
 0x115   :  { %v3631_v26 = vpop.eup %2655  ;;  %2614 = vset.pattern.permute.xlu1 %v3293_v39  ;;  %v261_v58 = vmul.f32 0.6931472, %v2654_v13  ;;  %2665 = vpow2.f32 %v207_v20  ;;  %v286_v39 = vmul.f32 %v3574_v7, %v285_v15  ;;  %v334_v15 = vmul.f32 -0.5, %v3605_v32 }
 0x116   :  { %v353_v49 = vadd.f32 1.0, %v3631_v26  ;;  %1421 = vperm.xlu1 %2614, %v3432_v3   ;;  %v473_v8 = vmul.f32 1.442695, %v472_v30  ;;  %v493_v12 = vand.u32 2147483647, %v492_v34  ;;  %v3657_v30 = vld [vmem:[#allocation8 + $0x8] sm:$0xff]  ;;  %v3667_v31 = vsub.f32 %v507_v62, %v508_v48  ;;  %v3687_v48 = vpop.permute.xlu0 %535 }
 0x117   :  { %v267_v7 = vsel %vm3638_vm3, %v264_v33, %v261_v58  ;;  %v356_v38 = vmul.f32 -0.5, %v3631_v26  ;;  %v190_v58 = vadd.f32 1.0, %v189_v29  ;;  %v3672_v33 = vrot.slane %v3657_v30, %v3500_v55 }
 0x118   :  { %v2658_v22 = vpop.eup %2657  ;;  %2667 = vlog2.f32 %v353_v49  ;;  %v3651_v4 = vpop.permute.xlu1 %557  ;;  %v494_v54 = vsub.f32 0.0, %v493_v12  ;;  %v337_v49 = vand.u32 2147483647, %v3605_v32 }
 0x119   :  { %v3653_v13 = vpop.eup %2659  ;;  %v283_v11 = vmul.f32 0.6931472, %v2658_v22  ;;  %2669 = vpow2.f32 %v473_v8  ;;  %v564_v20 = vsub.f32 %v3651_v4, %v3582_v17  ;;  %v335_v8 = vadd.f32 1.0, %v334_v15 }
 0x11a   :  { %v403_v2 = vadd.f32 1.0, %v3653_v13  ;;  %2615 = vset.pattern.permute.xlu1 %v3294_v41  ;;  %v495_v12 = vmul.f32 1.442695, %v494_v54  ;;  %v3677_v41 = vrot.slane %v3657_v30, %v3493_v52  ;;  %v357_v62 = vadd.f32 1.0, %v356_v38 }
 0x11b   :  { %v289_v22 = vsel %vm3644_vm4, %v286_v39, %v283_v11  ;;  %v565_v9 = vand.u32 2147483647, %v564_v20  ;;  %1471 = vperm.xlu1 %2615, %v3430_v1   ;;  %v3681_v11 = vrot.slane %v3617_v57, %v3493_v52  ;;  %v359_v39 = vand.u32 2147483647, %v3631_v26 }
 0x11c   :  { %v290_v34 = vadd.f32 %v289_v22, %v267_v7  ;;  %2671 = vlog2.f32 %v403_v2  ;;  %v192_v20 = vand.u32 2147483647, %v3619_v60  ;;  %v3307_v2 = vmov 19  }
 0x11d   :  { %v2662_v37 = vpop.eup %2661  ;;  %2673 = vpow2.f32 %v495_v12  ;;  %v566_v7 = vsub.f32 0.0, %v565_v9  ;;  %v3694_v12 = vmul.f32 %v3619_v60, %v190_v58  ;;  %vm3707_vm5 = vcmp.lt.f32.partialorder %v337_v49, 0.0004427343  ;;  %v3724_v46 = vpop.permute.xlu1 %607 }
 0x11e   :  { %v3683_v5 = vpop.eup %2663  ;;  %v294_v29 = vsub.f32 %v3525_v14, %v290_v34  ;;  %2675 = vlog2.f32 %v186_v27  ;;  %v3699_v14 = vrot.slane %v3657_v30, %v3517_v63  ;;  %v3703_v27 = vrot.slane %v3617_v57, %v3517_v63 }
 0x11f   :  { %v425_v54 = vadd.f32 1.0, %v3683_v5  ;;  %2617 = vset.pattern.permute.xlu1 %v3307_v2  ;;  %v3705_v15 = vpop.eup %2665  ;;  %v333_v38 = vmul.f32 0.6931472, %v2662_v37  ;;  %v542_v60 = vsub.f32 %v3687_v48, %v3586_v18  ;;  %vm3715_vm6 = vcmp.lt.f32.partialorder %v359_v39, 0.0004427343 }
 0x120   :  { %v3691_v22 = vadd.f32 -1.2, %v294_v29  ;;  %1543 = vperm.xlu1 %2617, %v3430_v1   ;;  %v336_v29 = vmul.f32 %v3605_v32, %v335_v8  ;;  %v209_v56 = vadd.f32 1.0, %v3705_v15  ;;  %v358_v51 = vmul.f32 %v3631_v26, %v357_v62 }
 0x121   :  { %2677 = vlog2.f32 %v425_v54  ;;  %v406_v54 = vmul.f32 -0.5, %v3653_v13  ;;  %v567_v47 = vmul.f32 1.442695, %v566_v7  ;;  %v428_v42 = vmul.f32 -0.5, %v3683_v5 }
 0x122   :  { %v2668_v34 = vpop.eup %2667  ;;  %v299_v58 = vand.u32 2147483647, %v3691_v22  ;;  %2679 = vlog2.f32 %v209_v56  ;;  %v339_v8 = vsel %vm3707_vm5, %v336_v29, %v333_v38  ;;  %v212_v26 = vmul.f32 -0.5, %v3705_v15 }
 0x123   :  { %v3720_v37 = vpop.eup %2669  ;;  %v355_v49 = vmul.f32 0.6931472, %v2668_v34  ;;  %v543_v62 = vand.u32 2147483647, %v542_v60  ;;  %v614_v56 = vsub.f32 %v3724_v46, %v3599_v28  ;;  %v407_v43 = vadd.f32 1.0, %v406_v54 }
 0x124   :  { %v300_v45 = vsub.f32 0.0, %v299_v58  ;;  %v475_v32 = vadd.f32 1.0, %v3720_v37  ;;  %1565 = vperm.xlu1 %2617, %v3432_v3   ;;  %v409_v25 = vand.u32 2147483647, %v3653_v13  ;;  %vm3739_vm7 = vcmp.lt.f32.partialorder %v192_v20, 0.0004427343 }
 0x125   :  { %v361_v39 = vsel %vm3715_vm6, %v358_v51, %v355_v49  ;;  %v219_v51 = vmin.f32 %v3578_v16, %v3561_v0  ;;  %v429_v60 = vadd.f32 1.0, %v428_v42  ;;  %v5510_v2 = vmov 20  }
 0x126   :  { %v2672_v7 = vpop.eup %2671  ;;  %v301_v34 = vmul.f32 1.442695, %v300_v45  ;;  %v362_v44 = vadd.f32 %v361_v39, %v339_v8  ;;  %2681 = vlog2.f32 %v475_v32  ;;  %v431_v49 = vand.u32 2147483647, %v3683_v5 }
 0x127   :  { %v3736_v58 = vpop.eup %2673  ;;  %2683 = vpow2.f32 %v567_v47  ;;  %v213_v54 = vadd.f32 1.0, %v212_v26  ;;  %v215_v20 = vand.u32 2147483647, %v3705_v15  ;;  %v544_v32 = vsub.f32 0.0, %v543_v62 }
 0x128   :  { %v2676_v9 = vpop.eup %2675  ;;  %2685 = vpow2.f32 %v301_v34  ;;  %v366_v45 = vsub.f32 %v3542_v35, %v362_v44  ;;  %v497_v29 = vadd.f32 1.0, %v3736_v58  ;;  %2619 = vset.pattern.permute.xlu1 %v5510_v2  ;;  %v405_v47 = vmul.f32 0.6931472, %v2672_v7 }
 0x129   :  { %1637 = vperm.xlu1 %2619, %v3432_v3   ;;  %v615_v0 = vand.u32 2147483647, %v614_v56  ;;  %vm3753_vm8 = vcmp.lt.f32.partialorder %v409_v25, 0.0004427343  ;;  %v188_v35 = vmul.f32 0.6931472, %v2676_v9  ;;  %v5513_v42 = vmax.f32 %v3495_v53, %v3511_v59 }
 0x12a   :  { %v3751_v8 = vadd.f32 -1.2, %v366_v45  ;;  %2687 = vlog2.f32 %v497_v29  ;;  %v545_v26 = vmul.f32 1.442695, %v544_v32  ;;  %v408_v34 = vmul.f32 %v3653_v13, %v407_v43  ;;  %v3771_v43 = vpop.permute.xlu0 %629 }
 0x12b   :  { %v2678_v16 = vpop.eup %2677  ;;  %v221_v39 = vsub.f32 %v219_v51, %v5513_v42  ;;  %v430_v7 = vmul.f32 %v3683_v5, %v429_v60  ;;  %vm432_vm9 = vcmp.lt.f32.partialorder %v431_v49, 0.0004427343  ;;  %v214_v56 = vmul.f32 %v3705_v15, %v213_v54 }
 0x12c   :  { %v371_v62 = vand.u32 2147483647, %v3751_v8  ;;  %v427_v45 = vmul.f32 0.6931472, %v2678_v16  ;;  %2689 = vpow2.f32 %v545_v26  ;;  %v616_v25 = vsub.f32 0.0, %v615_v0  ;;  %v2680_v9 = vpop.eup %2679 }
 0x12d   :  { %v5514_v29 = vmov 21   ;;  %v411_v53 = vsel %vm3753_vm8, %v408_v34, %v405_v47  ;;  %vm3767_vm10 = vcmp.lt.f32.partialorder %v215_v20, 0.0004427343  ;;  %v211_v5 = vmul.f32 0.6931472, %v2680_v9 }
 0x12e   :  { %2620 = vset.pattern.permute.xlu1 %v5514_v29  ;;  %v372_v2 = vsub.f32 0.0, %v371_v62  ;;  %v433_v59 = vsel %vm432_vm9, %v430_v7, %v427_v45  ;;  %v478_v15 = vmul.f32 -0.5, %v3720_v37  ;;  %v500_v60 = vmul.f32 -0.5, %v3736_v58 }
 0x12f   :  { %1687 = vperm.xlu1 %2620, %v3430_v1   ;;  %v434_v13 = vadd.f32 %v433_v59, %v411_v53  ;;  %v194_v32 = vsel %vm3739_vm7, %v3694_v12, %v188_v35  ;;  %v579_v20 = vmin.f32 %v3651_v4, %v3582_v17  ;;  %v617_v47 = vmul.f32 1.442695, %v616_v25 }
 0x130   :  { %v2682_v49 = vpop.eup %2681  ;;  %v373_v54 = vmul.f32 1.442695, %v372_v2  ;;  %v217_v44 = vsel %vm3767_vm10, %v214_v56, %v211_v5  ;;  %v580_v42 = vmax.f32 %v3687_v48, %v3586_v18  ;;  %v636_v26 = vsub.f32 %v3771_v43, %v3603_v50  ;;  %v3805_v2 = vpop.permute.xlu1 %679 }
 0x131   :  { %v3781_v0 = vpop.eup %2683  ;;  %v438_v16 = vsub.f32 %v3591_v24, %v434_v13  ;;  %v218_v12 = vadd.f32 %v217_v44, %v194_v32  ;;  %v481_v17 = vand.u32 2147483647, %v3720_v37  ;;  %v3308_v38 = vmov 22  }
 0x132   :  { %v3790_v62 = vpop.eup %2685  ;;  %2691 = vpow2.f32 %v373_v54  ;;  %v569_v4 = vadd.f32 1.0, %v3781_v0  ;;  %v479_v34 = vadd.f32 1.0, %v478_v15  ;;  %v501_v45 = vadd.f32 1.0, %v500_v60 }
 0x133   :  { %2622 = vset.pattern.permute.xlu1 %v3308_v38  ;;  %v303_v24 = vadd.f32 1.0, %v3790_v62  ;;  %v3795_v35 = vadd.f32 -1.2, %v438_v16  ;;  %v222_v48 = vsub.f32 %v221_v39, %v218_v12  ;;  %v503_v7 = vand.u32 2147483647, %v3736_v58 }
 0x134   :  { %1759 = vperm.xlu1 %2622, %v3430_v1   ;;  %v2688_v18 = vpop.eup %2687  ;;  %2693 = vpow2.f32 %v617_v47  ;;  %v3801_v56 = vrot.slane %v3617_v57, %v3532_v21  ;;  %v477_v25 = vmul.f32 0.6931472, %v2682_v49  ;;  %v3803_v29 = vsub.f32 %v579_v20, %v580_v42 }
 0x135   :  { %2695 = vlog2.f32 %v303_v24  ;;  %v637_v9 = vand.u32 2147483647, %v636_v26  ;;  %v443_v53 = vand.u32 2147483647, %v3795_v35  ;;  %v3808_v59 = vadd.f32 -1.2, %v222_v48 }
 0x136   :  { %v499_v51 = vmul.f32 0.6931472, %v2688_v18  ;;  %2697 = vlog2.f32 %v569_v4  ;;  %v3810_v39 = vpop.eup %2689  ;;  %v296_v13 = vmax.f32 %v3691_v22, 0.0  ;;  %v480_v5 = vmul.f32 %v3720_v37, %v479_v34 }
 0x137   :  { %vm482_vm11 = vcmp.lt.f32.partialorder %v481_v17, 0.0004427343  ;;  %v502_v15 = vmul.f32 %v3736_v58, %v501_v45  ;;  %v444_v60 = vsub.f32 0.0, %v443_v53  ;;  %v227_v49 = vand.u32 2147483647, %v3808_v59 }
 0x138   :  { %1781 = vperm.xlu1 %2622, %v3432_v3   ;;  %vm504_vm12 = vcmp.lt.f32.partialorder %v503_v7, 0.0004427343  ;;  %v686_v54 = vsub.f32 %v3805_v2, %v3611_v40  ;;  %v306_v32 = vmul.f32 -0.5, %v3790_v62  ;;  %v483_v20 = vsel %vm482_vm11, %v480_v5, %v477_v25 }
 0x139   :  { %v505_v47 = vsel %vm504_vm12, %v502_v15, %v499_v51  ;;  %v547_v16 = vadd.f32 1.0, %v3810_v39  ;;  %v445_v44 = vmul.f32 1.442695, %v444_v60  ;;  %v228_v37 = vsub.f32 0.0, %v227_v49 }
 0x13a   :  { %v506_v42 = vadd.f32 %v505_v47, %v483_v20  ;;  %v638_v26 = vsub.f32 0.0, %v637_v9  ;;  %v572_v58 = vmul.f32 -0.5, %v3781_v0  ;;  %v652_v12 = vmax.f32 %v3724_v46, %v3599_v28  ;;  %v3839_v9 = vpop.permute.xlu0 %751 }
 0x13b   :  { %2699 = vlog2.f32 %v547_v16  ;;  %v651_v17 = vmin.f32 %v3771_v43, %v3603_v50  ;;  %v5517_v4 = vmov 23   ;;  %v229_v24 = vmul.f32 1.442695, %v228_v37 }
 0x13c   :  { %2624 = vset.pattern.permute.xlu1 %v5517_v4  ;;  %v3827_v38 = vpop.eup %2691  ;;  %2701 = vpow2.f32 %v445_v44  ;;  %v510_v34 = vsub.f32 %v3667_v31, %v506_v42  ;;  %v550_v45 = vmul.f32 -0.5, %v3810_v39  ;;  %v307_v18 = vadd.f32 1.0, %v306_v32 }
 0x13d   :  { %1853 = vperm.xlu1 %2624, %v3432_v3   ;;  %v368_v48 = vmax.f32 %v3751_v8, 0.0  ;;  %v375_v46 = vadd.f32 1.0, %v3827_v38  ;;  %v687_v28 = vand.u32 2147483647, %v686_v54  ;;  %v309_v50 = vand.u32 2147483647, %v3790_v62 }
 0x13e   :  { %v3834_v7 = vpop.eup %2693  ;;  %2703 = vpow2.f32 %v229_v24  ;;  %v3837_v43 = vadd.f32 -1.2, %v510_v34  ;;  %v639_v25 = vmul.f32 1.442695, %v638_v26  ;;  %v573_v53 = vadd.f32 1.0, %v572_v58 }
 0x13f   :  { %v2696_v31 = vpop.eup %2695  ;;  %2705 = vlog2.f32 %v375_v46  ;;  %v3841_v3 = vsub.f32 %v651_v17, %v652_v12  ;;  %v724_v51 = vmax.f32 %v3805_v2, %v3611_v40  ;;  %v378_v60 = vmul.f32 -0.5, %v3827_v38 }
 0x140   :  { %v2698_v5 = vpop.eup %2697  ;;  %v305_v15 = vmul.f32 0.6931472, %v2696_v31  ;;  %v515_v49 = vand.u32 2147483647, %v3837_v43  ;;  %v551_v54 = vadd.f32 1.0, %v550_v45  ;;  %v5518_v32 = vmov 24  }
 0x141   :  { %2625 = vset.pattern.permute.xlu1 %v5518_v32  ;;  %vm297_vm13 = vcmp.ne.f32.partialorder %v3691_v22, %v3691_v22  ;;  %v308_v20 = vmul.f32 %v3790_v62, %v307_v18  ;;  %v575_v47 = vand.u32 2147483647, %v3781_v0  ;;  %v553_v16 = vand.u32 2147483647, %v3810_v39  ;;  %v3866_v18 = vpop.permute.xlu0 %845 }
 0x142   :  { %v619_v44 = vadd.f32 1.0, %v3834_v7  ;;  %1903 = vperm.xlu1 %2625, %v3430_v1   ;;  %vm3855_vm14 = vcmp.lt.f32.partialorder %v309_v50, 0.0004427343  ;;  %v516_v42 = vsub.f32 0.0, %v515_v49  ;;  %2707 = vpow2.f32 %v639_v25 }
 0x143   :  { %v688_v26 = vsub.f32 0.0, %v687_v28  ;;  %v311_v58 = vsel %vm3855_vm14, %v308_v20, %v305_v15  ;;  %v440_v62 = vmax.f32 %v3795_v35, 0.0  ;;  %v571_v12 = vmul.f32 0.6931472, %v2698_v5 }
 0x144   :  { %v574_v17 = vmul.f32 %v3781_v0, %v573_v53  ;;  %v379_v4 = vadd.f32 1.0, %v378_v60  ;;  %v517_v24 = vmul.f32 1.442695, %v516_v42  ;;  %v552_v34 = vmul.f32 %v3810_v39, %v551_v54 }
 0x145   :  { %v758_v45 = vsub.f32 %v3839_v9, %v3672_v33  ;;  %v2700_v46 = vpop.eup %2699  ;;  %vm3868_vm15 = vcmp.lt.f32.partialorder %v575_v47, 0.0004427343  ;;  %vm3872_vm0 = vcmp.lt.f32.partialorder %v553_v16, 0.0004427343  ;;  %2709 = vlog2.f32 %v619_v44 }
 0x146   :  { %v622_v0 = vmul.f32 -0.5, %v3834_v7  ;;  %v3309_v25 = vmov 25   ;;  %v3877_v39 = vpop.eup %2701  ;;  %v312_v31 = vadd.f32 %v311_v58, %v296_v13  ;;  %2711 = vpow2.f32 %v517_v24 }
 0x147   :  { %2627 = vset.pattern.permute.xlu1 %v3309_v25  ;;  %v549_v53 = vmul.f32 0.6931472, %v2700_v46  ;;  %v689_v5 = vmul.f32 1.442695, %v688_v26  ;;  %v381_v15 = vand.u32 2147483647, %v3827_v38  ;;  %v577_v49 = vsel %vm3868_vm15, %v574_v17, %v571_v12 }
 0x148   :  { %1975 = vperm.xlu1 %2627, %v3430_v1   ;;  %v447_v60 = vadd.f32 1.0, %v3877_v39  ;;  %v852_v54 = vsub.f32 %v3866_v18, %v3681_v11  ;;  %v3888_v32 = vpop.eup %2703  ;;  %v380_v20 = vmul.f32 %v3827_v38, %v379_v4  ;;  %v224_v13 = vmax.f32 %v3808_v59, 0.0  ;;  %v3902_v12 = vld [vmem:[#allocation6] sm:$0x3] }
 0x149   :  { %v555_v47 = vsel %vm3872_vm0, %v552_v34, %v549_v53  ;;  %v759_v1 = vand.u32 2147483647, %v758_v45  ;;  %v2706_v16 = vpop.eup %2705  ;;  %vm369_vm1 = vcmp.ne.f32.partialorder %v3751_v8, %v3751_v8  ;;  %v231_v44 = vadd.f32 1.0, %v3888_v32 }
 0x14a   :  { %2713 = vlog2.f32 %v447_v60  ;;  %v623_v37 = vadd.f32 1.0, %v622_v0  ;;  %v625_v42 = vand.u32 2147483647, %v3834_v7  ;;  %v313_v38 = vsel %vm297_vm13, %v3691_v22, %v312_v31 }
 0x14b   :  { %v377_v26 = vmul.f32 0.6931472, %v2706_v16  ;;  %v578_v58 = vadd.f32 %v577_v49, %v555_v47  ;;  %2715 = vpow2.f32 %v689_v5  ;;  %vm382_vm2 = vcmp.lt.f32.partialorder %v381_v15, 0.0004427343 }
 0x14c   :  { %1997 = vperm.xlu1 %2627, %v3902_v12   ;;  %2717 = vlog2.f32 %v231_v44  ;;  %v512_v17 = vmax.f32 %v3837_v43, 0.0  ;;  %v853_v4 = vand.u32 2147483647, %v852_v54  ;;  %v3906_v24 = vpop.eup %2707  ;;  %v450_v45 = vmul.f32 -0.5, %v3877_v39 }
 0x14d   :  { %v383_v34 = vsel %vm382_vm2, %v380_v20, %v377_v26  ;;  %v582_v46 = vsub.f32 %v3803_v29, %v578_v58  ;;  %v760_v22 = vsub.f32 0.0, %v759_v1  ;;  %v314_v28 = vmax.f32 %v313_v38, 1.1754944e-38 }
 0x14e   :  { %v234_v50 = vmul.f32 -0.5, %v3888_v32  ;;  %v3912_v0 = vmul.f32 %v3834_v7, %v623_v37  ;;  %v641_v25 = vadd.f32 1.0, %v3906_v24  ;;  %v384_v31 = vadd.f32 %v383_v34, %v368_v48  ;;  %v3952_v34 = vpop.permute.xlu0 %967  ;;  %v3959_v48 = vld [vmem:[#allocation3] sm:$0x3] }
 0x14f   :  { %v453_v53 = vand.u32 2147483647, %v3877_v39  ;;  %v3918_v5 = vadd.f32 -1.2, %v582_v46  ;;  %vm3920_vm3 = vcmp.lt.f32.partialorder %v625_v42, 0.0004427343  ;;  %v2710_v60 = vpop.eup %2709  ;;  %vm441_vm4 = vcmp.ne.f32.partialorder %v3795_v35, %v3795_v35 }
 0x150   :  { %v5527_v29 = vmov 26   ;;  %2719 = vlog2.f32 %v641_v25  ;;  %v854_v49 = vsub.f32 0.0, %v853_v4  ;;  %v3930_v54 = vpop.eup %2711  ;;  %v451_v20 = vadd.f32 1.0, %v450_v45 }
 0x151   :  { %2629 = vset.pattern.permute.xlu1 %v5527_v29  ;;  %v587_v47 = vand.u32 2147483647, %v3918_v5  ;;  %v644_v1 = vmul.f32 -0.5, %v3906_v24  ;;  %v761_v16 = vmul.f32 1.442695, %v760_v22  ;;  %2721 = vlog2.f32 %v314_v28 }
 0x152   :  { %2069 = vperm.xlu1 %2629, %v3902_v12   ;;  %v235_v44 = vadd.f32 1.0, %v234_v50  ;;  %v519_v37 = vadd.f32 1.0, %v3930_v54  ;;  %v3939_v42 = vrot.slane %v3657_v30, %v3532_v21  ;;  %v385_v38 = vsel %vm369_vm1, %v3751_v8, %v384_v31 }
 0x153   :  { %vm3945_vm5 = vcmp.lt.f32.partialorder %v453_v53, 0.0004427343  ;;  %vm225_vm6 = vcmp.ne.f32.partialorder %v3808_v59, %v3808_v59  ;;  %v237_v58 = vand.u32 2147483647, %v3888_v32  ;;  %v588_v4 = vsub.f32 0.0, %v587_v47 }
 0x154   :  { %v2714_v45 = vpop.eup %2713  ;;  %2723 = vlog2.f32 %v519_v37  ;;  %v621_v46 = vmul.f32 0.6931472, %v2710_v60  ;;  %v647_v22 = vand.u32 2147483647, %v3906_v24  ;;  %v5530_v28 = vmov 27   ;;  %v3962_v47 = vpop.xlane.xlu1 %162 }
 0x155   :  { %v855_v8 = vmul.f32 1.442695, %v854_v49  ;;  %v3956_v50 = vpop.eup %2715  ;;  %v449_v25 = vmul.f32 0.6931472, %v2714_v45  ;;  %v452_v31 = vmul.f32 %v3877_v39, %v451_v20  ;;  %v589_v53 = vmul.f32 1.442695, %v588_v4 }
 0x156   :  { %2630 = vset.pattern.permute.xlu1 %v5530_v28  ;;  %v645_v29 = vadd.f32 1.0, %v644_v1  ;;  %v2718_v37 = vpop.eup %2717  ;;  %v386_v60 = vmax.f32 %v385_v38, 1.1754944e-38  ;;  %v236_v7 = vmul.f32 %v3888_v32, %v235_v44  ;;  %2725 = vpow2.f32 %v761_v16 }
 0x157   :  { %2119 = vperm.xlu1 %2630, %v3959_v48   ;;  %v974_v49 = vsub.f32 %v3952_v34, %v3939_v42  ;;  %v455_v45 = vsel %vm3945_vm5, %v452_v31, %v449_v25  ;;  %v233_v39 = vmul.f32 0.6931472, %v2718_v37  ;;  %v522_v20 = vmul.f32 -0.5, %v3930_v54 }
 0x158   :  { %2727 = vpow2.f32 %v589_v53  ;;  %v456_v1 = vadd.f32 %v455_v45, %v440_v62  ;;  %vm238_vm7 = vcmp.lt.f32.partialorder %v237_v58, 0.0004427343  ;;  %v525_v4 = vand.u32 2147483647, %v3930_v54  ;;  %v702_v25 = vpop.permute.xlu1 %701 }
 0x159   :  { %v627_v32 = vsel %vm3920_vm3, %v3912_v0, %v621_v46  ;;  %v239_v16 = vsel %vm238_vm7, %v236_v7, %v233_v39  ;;  %v646_v44 = vmul.f32 %v3906_v24, %v645_v29  ;;  %vm3977_vm8 = vcmp.lt.f32.partialorder %v647_v22, 0.0004427343 }
 0x15a   :  { %v3310_v26 = vmov 28   ;;  %v691_v28 = vadd.f32 1.0, %v3956_v50  ;;  %v2720_v62 = vpop.eup %2719  ;;  %v457_v58 = vsel %vm441_vm4, %v3795_v35, %v456_v1  ;;  %v240_v0 = vadd.f32 %v239_v16, %v224_v13 }
 0x15b   :  { %2632 = vset.pattern.permute.xlu1 %v3310_v26  ;;  %v708_v24 = vsub.f32 %v702_v25, %v3625_v10  ;;  %v723_v15 = vmin.f32 %v702_v25, %v3625_v10  ;;  %2729 = vlog2.f32 %v386_v60  ;;  %vm513_vm9 = vcmp.ne.f32.partialorder %v3837_v43, %v3837_v43  ;;  %v2722_v31 = vpop.eup %2721 }
 0x15c   :  { %2191 = vperm.xlu1 %2632, %v3959_v48   ;;  %v523_v7 = vadd.f32 1.0, %v522_v20  ;;  %v643_v46 = vmul.f32 0.6931472, %v2720_v62  ;;  %v694_v22 = vmul.f32 -0.5, %v3956_v50  ;;  %v241_v35 = vsel %vm225_vm6, %v3808_v59, %v240_v0  ;;  %v4009_v45 = vpop.permute.xlu1 %773 }
 0x15d   :  { %v709_v13 = vand.u32 2147483647, %v708_v24  ;;  %v4001_v10 = vsub.f32 %v723_v15, %v724_v51  ;;  %2731 = vpow2.f32 %v855_v8  ;;  %v458_v53 = vmax.f32 %v457_v58, 1.1754944e-38 }
 0x15e   :  { %v242_v29 = vmax.f32 %v241_v35, 1.1754944e-38  ;;  %vm4003_vm10 = vcmp.lt.f32.partialorder %v525_v4, 0.0004427343  ;;  %v649_v60 = vsel %vm3977_vm8, %v646_v44, %v643_v46  ;;  %v2724_v39 = vpop.eup %2723  ;;  %2733 = vlog2.f32 %v691_v28 }
 0x15f   :  { %v650_v59 = vadd.f32 %v649_v60, %v627_v32  ;;  %v710_v20 = vsub.f32 0.0, %v709_v13  ;;  %v780_v40 = vsub.f32 %v4009_v45, %v3629_v23  ;;  %v521_v2 = vmul.f32 0.6931472, %v2724_v39 }
 0x160   :  { %2213 = vperm.xlu1 %2632, %v3902_v12   ;;  %2735 = vlog2.f32 %v242_v29  ;;  %v524_v51 = vmul.f32 %v3930_v54, %v523_v7  ;;  %v4015_v8 = vand.u32 2147483647, %v974_v49  ;;  %v4017_v1 = vpop.eup %2725  ;;  %v695_v16 = vadd.f32 1.0, %v694_v22 }
 0x161   :  { %v654_v4 = vsub.f32 %v3841_v3, %v650_v59  ;;  %v711_v44 = vmul.f32 1.442695, %v710_v20  ;;  %v781_v32 = vand.u32 2147483647, %v780_v40  ;;  %2737 = vlog2.f32 %v458_v53  ;;  %v4031_v0 = vpop.permute.xlu1 %823 }
 0x162   :  { %v4020_v38 = vpop.eup %2727  ;;  %v527_v26 = vsel %vm4003_vm10, %v524_v51, %v521_v2  ;;  %v584_v28 = vmax.f32 %v3918_v5, 0.0  ;;  %v766_v25 = vmul.f32 -0.5, %v4017_v1  ;;  %v316_v54 = vmul.f32 0.6931472, %v2722_v31 }
 0x163   :  { %v528_v49 = vadd.f32 %v527_v26, %v512_v17  ;;  %v591_v62 = vadd.f32 1.0, %v4020_v38  ;;  %v697_v3 = vand.u32 2147483647, %v3956_v50  ;;  %v5535_v58 = vmov 29  }
 0x164   :  { %2634 = vset.pattern.permute.xlu1 %v5535_v58  ;;  %v4033_v24 = vadd.f32 -1.2, %v654_v4  ;;  %2739 = vpow2.f32 %v711_v44  ;;  %v782_v15 = vsub.f32 0.0, %v781_v32  ;;  %v976_v7 = vsub.f32 0.0, %v4015_v8 }
 0x165   :  { %2285 = vperm.xlu1 %2634, %v3902_v12   ;;  %v529_v17 = vsel %vm513_vm9, %v3837_v43, %v528_v49  ;;  %2741 = vlog2.f32 %v591_v62  ;;  %v4042_v46 = vmul.f32 %v3956_v50, %v695_v16  ;;  %v1012_v22 = vmax.f32 %v3952_v34, %v3939_v42  ;;  %v2730_v31 = vpop.eup %2729 }
 0x166   :  { %v530_v35 = vmax.f32 %v529_v17, 1.1754944e-38  ;;  %v594_v13 = vmul.f32 -0.5, %v4020_v38  ;;  %v659_v53 = vand.u32 2147483647, %v4033_v24  ;;  %v767_v29 = vadd.f32 1.0, %v766_v25  ;;  %v896_v2 = vpop.permute.xlu1 %895 }
 0x167   :  { %v4048_v37 = vpop.eup %2731  ;;  %v783_v60 = vmul.f32 1.442695, %v782_v15  ;;  %v763_v39 = vadd.f32 1.0, %v4017_v1  ;;  %v830_v43 = vsub.f32 %v4031_v0, %v3677_v41  ;;  %v4055_v50 = vrot.slane %v3657_v30, %v3545_v36 }
 0x168   :  { %2743 = vlog2.f32 %v530_v35  ;;  %v660_v59 = vsub.f32 0.0, %v659_v53  ;;  %v795_v20 = vmin.f32 %v4009_v45, %v3629_v23  ;;  %v5536_v40 = vmov 30   ;;  %v2734_v8 = vpop.eup %2733 }
 0x169   :  { %2635 = vset.pattern.permute.xlu1 %v5536_v40  ;;  %v4062_v51 = vrot.slane %v3617_v57, %v3545_v36  ;;  %v388_v4 = vmul.f32 0.6931472, %v2730_v31  ;;  %2745 = vpow2.f32 %v783_v60  ;;  %v769_v16 = vand.u32 2147483647, %v4017_v1 }
 0x16a   :  { %v831_v44 = vand.u32 2147483647, %v830_v43  ;;  %2335 = vperm.xlu1 %2635, %v3959_v48   ;;  %v2736_v30 = vpop.eup %2735  ;;  %v595_v32 = vadd.f32 1.0, %v594_v13  ;;  %v661_v26 = vmul.f32 1.442695, %v660_v59  ;;  %v4067_v23 = vmul.f32 %v4017_v1, %v767_v29  ;;  %v918_v1 = vpop.permute.xlu1 %917 }
 0x16b   :  { %v857_v45 = vadd.f32 1.0, %v4048_v37  ;;  %v244_v25 = vmul.f32 0.6931472, %v2736_v30  ;;  %2747 = vlog2.f32 %v763_v39  ;;  %v902_v49 = vsub.f32 %v896_v2, %v3699_v14  ;;  %v2738_v62 = vpop.eup %2737 }
 0x16c   :  { %v832_v57 = vsub.f32 0.0, %v831_v44  ;;  %vm585_vm11 = vcmp.ne.f32.partialorder %v3918_v5, %v3918_v5  ;;  %2749 = vpow2.f32 %v661_v26  ;;  %v4073_v58 = vmul.f32 0.6931472, %v2734_v8 }
 0x16d   :  { %v5537_v15 = vmax.f32 %v3839_v9, %v3672_v33  ;;  %v977_v31 = vmul.f32 1.442695, %v976_v7  ;;  %v317_v35 = vadd.f32 %v316_v54, %v244_v25  ;;  %v597_v13 = vand.u32 2147483647, %v4020_v38 }
 0x16e   :  { %vm4081_vm12 = vcmp.lt.f32.partialorder %v697_v3, 0.0004427343  ;;  %v833_v29 = vmul.f32 1.442695, %v832_v57  ;;  %v903_v60 = vand.u32 2147483647, %v902_v49  ;;  %v4086_v43 = vpop.eup %2739  ;;  %v596_v59 = vmul.f32 %v4020_v38, %v595_v32 }
 0x16f   :  { %v4078_v17 = vsub.f32 %v795_v20, %v5537_v15  ;;  %v5540_v39 = vmov 31   ;;  %2751 = vlog2.f32 %v857_v45  ;;  %v924_v33 = vsub.f32 %v918_v1, %v3703_v27  ;;  %v2742_v54 = vpop.eup %2741  ;;  %v4095_v32 = vpop.permute.xlu1 %989 }
 0x170   :  { %2637 = vset.pattern.permute.xlu1 %v5540_v39  ;;  %v939_v9 = vmin.f32 %v918_v1, %v3703_v27  ;;  %v460_v3 = vmul.f32 0.6931472, %v2738_v62  ;;  %v389_v7 = vadd.f32 %v388_v4, %v317_v35  ;;  %v713_v20 = vadd.f32 1.0, %v4086_v43 }
 0x171   :  { %2407 = vperm.xlu1 %2637, %v3959_v48   ;;  %2753 = vpow2.f32 %v977_v31  ;;  %v593_v40 = vmul.f32 0.6931472, %v2742_v54  ;;  %v904_v8 = vsub.f32 0.0, %v903_v60  ;;  %v940_v44 = vmax.f32 %v896_v2, %v3699_v14  ;;  %v4136_v54 = vpop.permute.xlu0 %1061 }
 0x172   :  { %2755 = vpow2.f32 %v833_v29  ;;  %v461_v30 = vadd.f32 %v460_v3, %v389_v7  ;;  %vm598_vm13 = vcmp.lt.f32.partialorder %v597_v13, 0.0004427343  ;;  %v860_v38 = vmul.f32 -0.5, %v4048_v37  ;;  %v2744_v27 = vpop.eup %2743 }
 0x173   :  { %2757 = vlog2.f32 %v713_v20  ;;  %v599_v48 = vsel %vm598_vm13, %v596_v59, %v593_v40  ;;  %v905_v26 = vmul.f32 1.442695, %v904_v8  ;;  %v925_v45 = vand.u32 2147483647, %v924_v33  ;;  %v4100_v25 = vpop.eup %2745 }
 0x174   :  { %v4097_v4 = vsub.f32 %v939_v9, %v940_v44  ;;  %v532_v57 = vmul.f32 0.6931472, %v2744_v27  ;;  %v600_v14 = vadd.f32 %v599_v48, %v584_v28  ;;  %v868_v2 = vmax.f32 %v4031_v0, %v3677_v41 }
 0x175   :  { %2429 = vperm.xlu1 %2637, %v3902_v12   ;;  %v863_v49 = vand.u32 2147483647, %v4048_v37  ;;  %v716_v62 = vmul.f32 -0.5, %v4086_v43  ;;  %v785_v15 = vadd.f32 1.0, %v4100_v25  ;;  %vm4109_vm14 = vcmp.lt.f32.partialorder %v769_v16, 0.0004427343  ;;  %v2748_v31 = vpop.eup %2747 }
 0x176   :  { %2759 = vpow2.f32 %v905_v26  ;;  %v996_v12 = vsub.f32 %v4095_v32, %v3801_v56  ;;  %v4115_v35 = vadd.f32 %v532_v57, %v461_v30  ;;  %v601_v41 = vsel %vm585_vm11, %v3918_v5, %v600_v14  ;;  %v2750_v13 = vpop.eup %2749 }
 0x177   :  { %v861_v28 = vadd.f32 1.0, %v860_v38  ;;  %v926_v0 = vsub.f32 0.0, %v925_v45  ;;  %v602_v29 = vmax.f32 %v601_v41, 1.1754944e-38  ;;  %v656_v16 = vmax.f32 %v4033_v24, 0.0 }
 0x178   :  { %v699_v60 = vsel %vm4081_vm12, %v4042_v46, %v4073_v58  ;;  %2761 = vlog2.f32 %v785_v15  ;;  %v663_v39 = vadd.f32 1.0, %v2750_v13  ;;  %v788_v59 = vmul.f32 -0.5, %v4100_v25 }
 0x179   :  { %vm4127_vm15 = vcmp.lt.f32.partialorder %v863_v49, 0.0004427343  ;;  %v5545_v5 = vmin.f32 %v3866_v18, %v3681_v11  ;;  %v2752_v3 = vpop.eup %2751  ;;  %2763 = vlog2.f32 %v602_v29  ;;  %v717_v7 = vadd.f32 1.0, %v716_v62 }
 0x17a   :  { %v927_v53 = vmul.f32 1.442695, %v926_v0  ;;  %v997_v46 = vand.u32 2147483647, %v996_v12  ;;  %2765 = vlog2.f32 %v663_v39  ;;  %v666_v20 = vmul.f32 -0.5, %v2750_v13  ;;  %v4166_v39 = vpop.permute.xlu1 %1039 }
 0x17b   :  { %v4134_v9 = vsub.f32 %v5545_v5, %v868_v2  ;;  %v4138_v58 = vpop.eup %2753  ;;  %v719_v40 = vand.u32 2147483647, %v4086_v43  ;;  %v4142_v8 = vmul.f32 %v4048_v37, %v861_v28  ;;  %v765_v11 = vmul.f32 0.6931472, %v2748_v31 }
 0x17c   :  { %v4144_v44 = vpop.eup %2755  ;;  %2767 = vpow2.f32 %v927_v53  ;;  %v998_v18 = vsub.f32 0.0, %v997_v46  ;;  %v1068_v30 = vsub.f32 %v4136_v54, %v4062_v51  ;;  %v789_v27 = vadd.f32 1.0, %v788_v59 }
 0x17d   :  { %v2758_v38 = vpop.eup %2757  ;;  %v791_v48 = vand.u32 2147483647, %v4100_v25  ;;  %v835_v26 = vadd.f32 1.0, %v4144_v44  ;;  %v4150_v45 = vmul.f32 0.6931472, %v2752_v3  ;;  %v718_v37 = vmul.f32 %v4086_v43, %v717_v7 }
 0x17e   :  { %v669_v57 = vand.u32 2147483647, %v2750_v13  ;;  %v715_v14 = vmul.f32 0.6931472, %v2758_v38  ;;  %v999_v2 = vmul.f32 1.442695, %v998_v18  ;;  %v771_v43 = vsel %vm4109_vm14, %v4067_v23, %v765_v11 }
 0x17f   :  { %v667_v49 = vadd.f32 1.0, %v666_v20  ;;  %vm720_vm0 = vcmp.lt.f32.partialorder %v719_v40, 0.0004427343  ;;  %2769 = vlog2.f32 %v835_v26  ;;  %v982_v62 = vmul.f32 -0.5, %v4138_v58 }
 0x180   :  { %v4154_v15 = vpop.eup %2759  ;;  %v721_v12 = vsel %vm720_vm0, %v718_v37, %v715_v14  ;;  %v838_v31 = vmul.f32 -0.5, %v4144_v44  ;;  %2771 = vpow2.f32 %v999_v2  ;;  %v979_v41 = vadd.f32 1.0, %v4138_v58 }
 0x181   :  { %v722_v28 = vadd.f32 %v721_v12, %v699_v60  ;;  %vm4158_vm1 = vcmp.lt.f32.partialorder %v791_v48, 0.0004427343  ;;  %v907_v29 = vadd.f32 1.0, %v4154_v15  ;;  %vm657_vm2 = vcmp.ne.f32.partialorder %v4033_v24, %v4033_v24 }
 0x182   :  { %v2762_v59 = vpop.eup %2761  ;;  %vm4170_vm3 = vcmp.lt.f32.partialorder %v669_v57, 0.0004427343  ;;  %v790_v60 = vmul.f32 %v4100_v25, %v789_v27  ;;  %v841_v3 = vand.u32 2147483647, %v4144_v44  ;;  %v865_v23 = vsel %vm4127_vm15, %v4142_v8, %v4150_v45 }
 0x183   :  { %v726_v1 = vsub.f32 %v4001_v10, %v722_v28  ;;  %v787_v7 = vmul.f32 0.6931472, %v2762_v59  ;;  %v1011_v53 = vmin.f32 %v4095_v32, %v3801_v56  ;;  %v983_v46 = vadd.f32 1.0, %v982_v62  ;;  %v2764_v20 = vpop.eup %2763 }
 0x184   :  { %v668_v40 = vmul.f32 %v2750_v13, %v667_v49  ;;  %v839_v11 = vadd.f32 1.0, %v838_v31  ;;  %2773 = vlog2.f32 %v979_v41  ;;  %v1046_v25 = vsub.f32 %v4166_v39, %v4055_v50  ;;  %v2766_v18 = vpop.eup %2765 }
 0x185   :  { %v604_v38 = vmul.f32 0.6931472, %v2764_v20  ;;  %v4185_v27 = vadd.f32 -1.2, %v726_v1  ;;  %v793_v33 = vsel %vm4158_vm1, %v790_v60, %v787_v7  ;;  %2775 = vlog2.f32 %v907_v29 }
 0x186   :  { %v4189_v10 = vpop.eup %2767  ;;  %v665_v8 = vmul.f32 0.6931472, %v2766_v18  ;;  %v794_v56 = vadd.f32 %v793_v33, %v771_v43  ;;  %vm4191_vm4 = vcmp.lt.f32.partialorder %v841_v3, 0.0004427343  ;;  %v985_v13 = vand.u32 2147483647, %v4138_v58 }
 0x187   :  { %v4197_v48 = vadd.f32 %v604_v38, %v4115_v35  ;;  %v731_v26 = vand.u32 2147483647, %v4185_v27  ;;  %v4201_v45 = vmul.f32 %v4138_v58, %v983_v46  ;;  %v4206_v57 = vsub.f32 %v1011_v53, %v1012_v22  ;;  %v4236_v53 = vpop.permute.xlu1 %1111 }
 0x188   :  { %v671_v14 = vsel %vm4170_vm3, %v668_v40, %v665_v8  ;;  %v798_v37 = vsub.f32 %v4078_v17, %v794_v56  ;;  %v929_v2 = vadd.f32 1.0, %v4189_v10  ;;  %v1047_v49 = vand.u32 2147483647, %v1046_v25 }
 0x189   :  { %v2770_v35 = vpop.eup %2769  ;;  %v672_v62 = vadd.f32 %v671_v14, %v656_v16  ;;  %v732_v12 = vsub.f32 0.0, %v731_v26  ;;  %v840_v58 = vmul.f32 %v4144_v44, %v839_v11  ;;  %v1069_v31 = vand.u32 2147483647, %v1068_v30 }
 0x18a   :  { %v4215_v41 = vpop.eup %2771  ;;  %v4217_v42 = vadd.f32 -1.2, %v798_v37  ;;  %v837_v34 = vmul.f32 0.6931472, %v2770_v35  ;;  %v910_v22 = vmul.f32 -0.5, %v4154_v15  ;;  %2777 = vlog2.f32 %v929_v2  ;;  %v4253_v37 = vld [vmem:[#allocation9 + $0x8] sm:$0xff] }
 0x18b   :  { %v673_v17 = vsel %vm657_vm2, %v4033_v24, %v672_v62  ;;  %v733_v28 = vmul.f32 1.442695, %v732_v12  ;;  %v913_v16 = vand.u32 2147483647, %v4154_v15  ;;  %v1001_v0 = vadd.f32 1.0, %v4215_v41  ;;  %v1134_v62 = vpop.permute.xlu1 %1133 }
 0x18c   :  { %v674_v44 = vmax.f32 %v673_v17, 1.1754944e-38  ;;  %v803_v30 = vand.u32 2147483647, %v4217_v42  ;;  %vm4227_vm5 = vcmp.lt.f32.partialorder %v985_v13, 0.0004427343  ;;  %v1048_v29 = vsub.f32 0.0, %v1047_v49 }
 0x18d   :  { %2779 = vpow2.f32 %v733_v28  ;;  %v843_v59 = vsel %vm4191_vm4, %v840_v58, %v837_v34  ;;  %v932_v5 = vmul.f32 -0.5, %v4189_v10  ;;  %v1070_v24 = vsub.f32 0.0, %v1069_v31  ;;  %v3103_v13 = vld [vmem:[#allocation8 + $0x8] sm:$0xff] }
 0x18e   :  { %v2774_v60 = vpop.eup %2773  ;;  %2781 = vlog2.f32 %v674_v44  ;;  %v804_v3 = vsub.f32 0.0, %v803_v30  ;;  %v866_v1 = vadd.f32 %v865_v23, %v843_v59  ;;  %v1084_v7 = vmax.f32 %v4166_v39, %v4055_v50 }
 0x18f   :  { %v2776_v46 = vpop.eup %2775  ;;  %v911_v20 = vadd.f32 1.0, %v910_v22  ;;  %vm4238_vm6 = vcmp.lt.f32.partialorder %v913_v16, 0.0004427343  ;;  %2783 = vlog2.f32 %v1001_v0  ;;  %v1004_v11 = vmul.f32 -0.5, %v4215_v41 }
 0x190   :  { %v805_v25 = vmul.f32 1.442695, %v804_v3  ;;  %v870_v18 = vsub.f32 %v4134_v9, %v866_v1  ;;  %v935_v38 = vand.u32 2147483647, %v4189_v10  ;;  %v1049_v23 = vmul.f32 1.442695, %v1048_v29 }
 0x191   :  { %v933_v33 = vadd.f32 1.0, %v932_v5  ;;  %v4245_v8 = vmul.f32 0.6931472, %v2774_v60  ;;  %v1071_v50 = vmul.f32 1.442695, %v1070_v24  ;;  %v1083_v39 = vmin.f32 %v4136_v54, %v4062_v51 }
 0x192   :  { %2785 = vpow2.f32 %v805_v25  ;;  %v4249_v56 = vadd.f32 -1.2, %v870_v18  ;;  %v909_v32 = vmul.f32 0.6931472, %v2776_v46  ;;  %v1117_v26 = vrot.slane %v3103_v13, %v3557_v61 }
 0x193   :  { %v1005_v14 = vadd.f32 1.0, %v1004_v11  ;;  %v1007_v9 = vand.u32 2147483647, %v4215_v41  ;;  %2787 = vpow2.f32 %v1049_v23  ;;  %v1139_v2 = vrot.slane %v4253_v37, %v3557_v61 }
 0x194   :  { %v2778_v49 = vpop.eup %2777  ;;  %v728_v35 = vmax.f32 %v4185_v27, 0.0  ;;  %v875_v51 = vand.u32 2147483647, %v4249_v56  ;;  %v912_v54 = vmul.f32 %v4154_v15, %v911_v20  ;;  %2789 = vpow2.f32 %v1071_v50 }
 0x195   :  { %v931_v12 = vmul.f32 0.6931472, %v2778_v49  ;;  %v934_v58 = vmul.f32 %v4189_v10, %v933_v33  ;;  %vm4261_vm7 = vcmp.lt.f32.partialorder %v935_v38, 0.0004427343  ;;  %v1118_v34 = vsub.f32 %v4236_v53, %v1117_v26 }
 0x196   :  { %v800_v22 = vmax.f32 %v4217_v42, 0.0  ;;  %v876_v17 = vsub.f32 0.0, %v875_v51  ;;  %v915_v28 = vsel %vm4238_vm6, %v912_v54, %v909_v32  ;;  %v987_v15 = vsel %vm4227_vm5, %v4201_v45, %v4245_v8  ;;  %v4298_v8 = vpop.permute.xlu1 %1205  ;;  %v4311_v51 = vpop.permute.xlu0 %1183 }
 0x197   :  { %v2780_v16 = vpop.eup %2779  ;;  %v937_v10 = vsel %vm4261_vm7, %v934_v58, %v931_v12  ;;  %v1006_v0 = vmul.f32 %v4215_v41, %v1005_v14  ;;  %vm4276_vm8 = vcmp.lt.f32.partialorder %v1007_v9, 0.0004427343  ;;  %v1140_v30 = vsub.f32 %v1134_v62, %v1139_v2 }
 0x198   :  { %v2782_v29 = vpop.eup %2781  ;;  %v735_v59 = vadd.f32 1.0, %v2780_v16  ;;  %v877_v5 = vmul.f32 1.442695, %v876_v17  ;;  %v4280_v24 = vsub.f32 %v1083_v39, %v1084_v7  ;;  %v1155_v60 = vmin.f32 %v1134_v62, %v1139_v2 }
 0x199   :  { %v2784_v3 = vpop.eup %2783  ;;  %v676_v43 = vmul.f32 0.6931472, %v2782_v29  ;;  %v938_v45 = vadd.f32 %v937_v10, %v915_v28  ;;  %v1119_v1 = vand.u32 2147483647, %v1118_v34  ;;  %v4284_v46 = vrot.slane %v4253_v37, %v3572_v6 }
 0x19a   :  { %2791 = vlog2.f32 %v735_v59  ;;  %v1003_v41 = vmul.f32 0.6931472, %v2784_v3  ;;  %v1156_v20 = vmax.f32 %v4236_v53, %v1117_v26  ;;  %v4288_v40 = vrot.slane %v3103_v13, %v3572_v6 }
 0x19b   :  { %v4291_v11 = vadd.f32 %v676_v43, %v4197_v48  ;;  %2793 = vpow2.f32 %v877_v5  ;;  %v942_v7 = vsub.f32 %v4097_v4, %v938_v45  ;;  %v1141_v25 = vand.u32 2147483647, %v1140_v30 }
 0x19c   :  { %v2786_v18 = vpop.eup %2785  ;;  %v738_v38 = vmul.f32 -0.5, %v2780_v16  ;;  %v1009_v23 = vsel %vm4276_vm8, %v1006_v0, %v1003_v41  ;;  %v4296_v33 = vsub.f32 %v1155_v60, %v1156_v20  ;;  %v4301_v53 = vrot.slane %v3103_v13, %v3589_v19 }
 0x19d   :  { %v4303_v50 = vpop.eup %2787  ;;  %v741_v48 = vand.u32 2147483647, %v2780_v16  ;;  %v807_v39 = vadd.f32 1.0, %v2786_v18  ;;  %v4305_v32 = vadd.f32 -1.2, %v942_v7  ;;  %v1120_v4 = vsub.f32 0.0, %v1119_v1 }
 0x19e   :  { %v4307_v26 = vpop.eup %2789  ;;  %v810_v14 = vmul.f32 -0.5, %v2786_v18  ;;  %v872_v9 = vmax.f32 %v4249_v56, 0.0  ;;  %v1010_v2 = vadd.f32 %v1009_v23, %v987_v15  ;;  %v1051_v49 = vadd.f32 1.0, %v4303_v50 }
 0x19f   :  { %2795 = vlog2.f32 %v807_v39  ;;  %v1142_v13 = vsub.f32 0.0, %v1141_v25  ;;  %v1212_v54 = vsub.f32 %v4298_v8, %v4284_v46  ;;  %v1227_v62 = vmin.f32 %v4298_v8, %v4284_v46 }
 0x1a0   :  { %v739_v12 = vadd.f32 1.0, %v738_v38  ;;  %v947_v58 = vand.u32 2147483647, %v4305_v32  ;;  %v1014_v31 = vsub.f32 %v4206_v57, %v1010_v2  ;;  %2797 = vlog2.f32 %v1051_v49 }
 0x1a1   :  { %vm729_vm9 = vcmp.ne.f32.partialorder %v4185_v27, %v4185_v27  ;;  %vm4321_vm10 = vcmp.lt.f32.partialorder %v741_v48, 0.0004427343  ;;  %v1073_v17 = vadd.f32 1.0, %v4307_v26  ;;  %v1121_v28 = vmul.f32 1.442695, %v1120_v4  ;;  %v4345_v4 = vpop.permute.xlu1 %1255 }
 0x1a2   :  { %v1190_v15 = vsub.f32 %v4311_v51, %v4288_v40  ;;  %v811_v10 = vadd.f32 1.0, %v810_v14  ;;  %v813_v0 = vand.u32 2147483647, %v2786_v18  ;;  %v948_v44 = vsub.f32 0.0, %v947_v58 }
 0x1a3   :  { %v4328_v30 = vadd.f32 -1.2, %v1014_v31  ;;  %v1054_v57 = vmul.f32 -0.5, %v4303_v50  ;;  %v1057_v29 = vand.u32 2147483647, %v4303_v50  ;;  %2799 = vlog2.f32 %v1073_v17 }
 0x1a4   :  { %v1143_v59 = vmul.f32 1.442695, %v1142_v13  ;;  %v2792_v5 = vpop.eup %2791  ;;  %v740_v60 = vmul.f32 %v2780_v16, %v739_v12  ;;  %v949_v3 = vmul.f32 1.442695, %v948_v44  ;;  %v1076_v45 = vmul.f32 -0.5, %v4307_v26 }
 0x1a5   :  { %v1019_v43 = vand.u32 2147483647, %v4328_v30  ;;  %v4334_v1 = vpop.eup %2793  ;;  %v737_v41 = vmul.f32 0.6931472, %v2792_v5  ;;  %2801 = vpow2.f32 %v1121_v28  ;;  %v1213_v20 = vand.u32 2147483647, %v1212_v54 }
 0x1a6   :  { %v1191_v7 = vand.u32 2147483647, %v1190_v15  ;;  %vm801_vm11 = vcmp.ne.f32.partialorder %v4217_v42, %v4217_v42  ;;  %v812_v25 = vmul.f32 %v2786_v18, %v811_v10  ;;  %vm4338_vm12 = vcmp.lt.f32.partialorder %v813_v0, 0.0004427343 }
 0x1a7   :  { %v879_v16 = vadd.f32 1.0, %v4334_v1  ;;  %2803 = vpow2.f32 %v949_v3  ;;  %v743_v23 = vsel %vm4321_vm10, %v740_v60, %v737_v41  ;;  %v1020_v48 = vsub.f32 0.0, %v1019_v43 }
 0x1a8   :  { %v1055_v39 = vadd.f32 1.0, %v1054_v57  ;;  %2805 = vpow2.f32 %v1143_v59  ;;  %v744_v14 = vadd.f32 %v743_v23, %v728_v35  ;;  %vm4349_vm13 = vcmp.lt.f32.partialorder %v1057_v29, 0.0004427343 }
 0x1a9   :  { %2807 = vlog2.f32 %v879_v16  ;;  %v1077_v2 = vadd.f32 1.0, %v1076_v45  ;;  %v2796_v49 = vpop.eup %2795  ;;  %v1021_v13 = vmul.f32 1.442695, %v1020_v48  ;;  %v1079_v54 = vand.u32 2147483647, %v4307_v26 }
 0x1aa   :  { %v1214_v12 = vsub.f32 0.0, %v1213_v20  ;;  %v1192_v58 = vsub.f32 0.0, %v1191_v7  ;;  %v2798_v31 = vpop.eup %2797  ;;  %v745_v34 = vsel %vm729_vm9, %v4185_v27, %v744_v14  ;;  %v809_v17 = vmul.f32 0.6931472, %v2796_v49 }
 0x1ab   :  { %v882_v35 = vmul.f32 -0.5, %v4334_v1  ;;  %v1262_v28 = vsub.f32 %v4345_v4, %v4301_v53  ;;  %v746_v15 = vmax.f32 %v745_v34, 1.1754944e-38  ;;  %2809 = vpow2.f32 %v1021_v13 }
 0x1ac   :  { %v1053_v10 = vmul.f32 0.6931472, %v2798_v31  ;;  %v1215_v0 = vmul.f32 1.442695, %v1214_v12  ;;  %v815_v44 = vsel %vm4338_vm12, %v812_v25, %v809_v17  ;;  %v1056_v57 = vmul.f32 %v4303_v50, %v1055_v39 }
 0x1ad   :  { %v1078_v29 = vmul.f32 %v4307_v26, %v1077_v2  ;;  %v1193_v59 = vmul.f32 1.442695, %v1192_v58  ;;  %v2800_v5 = vpop.eup %2799  ;;  %2811 = vlog2.f32 %v746_v15  ;;  %v816_v27 = vadd.f32 %v815_v44, %v800_v22 }
 0x1ae   :  { %v885_v60 = vand.u32 2147483647, %v4334_v1  ;;  %vm4368_vm14 = vcmp.lt.f32.partialorder %v1079_v54, 0.0004427343  ;;  %v883_v43 = vadd.f32 1.0, %v882_v35  ;;  %v1059_v45 = vsel %vm4349_vm13, %v1056_v57, %v1053_v10 }
 0x1af   :  { %v1075_v41 = vmul.f32 0.6931472, %v2800_v5  ;;  %2813 = vpow2.f32 %v1215_v0  ;;  %v2802_v50 = vpop.eup %2801  ;;  %v817_v26 = vsel %vm801_vm11, %v4217_v42, %v816_v27  ;;  %vm873_vm15 = vcmp.ne.f32.partialorder %v4249_v56, %v4249_v56 }
 0x1b0   :  { %v944_v22 = vmax.f32 %v4305_v32, 0.0  ;;  %2815 = vpow2.f32 %v1193_v59  ;;  %v4381_v20 = vand.u32 2147483647, %v1262_v28  ;;  %v818_v25 = vmax.f32 %v817_v26, 1.1754944e-38  ;;  %v4402_v28 = vld [vmem:[#allocation9 + $0x10] sm:$0xff]  ;;  %v4429_v26 = vpop.permute.xlu0 %1277 }
 0x1b1   :  { %v2804_v7 = vpop.eup %2803  ;;  %v1081_v38 = vsel %vm4368_vm14, %v1078_v29, %v1075_v41  ;;  %v1123_v16 = vadd.f32 1.0, %v2802_v50  ;;  %v1126_v23 = vmul.f32 -0.5, %v2802_v50  ;;  %v1016_v42 = vmax.f32 %v4328_v30, 0.0 }
 0x1b2   :  { %v4385_v48 = vpop.eup %2805  ;;  %v951_v39 = vadd.f32 1.0, %v2804_v7  ;;  %v954_v14 = vmul.f32 -0.5, %v2804_v7  ;;  %v1082_v18 = vadd.f32 %v1081_v38, %v1059_v45  ;;  %2817 = vlog2.f32 %v818_v25 }
 0x1b3   :  { %v2808_v2 = vpop.eup %2807  ;;  %v884_v49 = vmul.f32 %v4334_v1, %v883_v43  ;;  %vm4389_vm0 = vcmp.lt.f32.partialorder %v885_v60, 0.0004427343  ;;  %v1145_v54 = vadd.f32 1.0, %v4385_v48  ;;  %v957_v58 = vand.u32 2147483647, %v2804_v7  ;;  %v4400_v1 = vld [vmem:[#allocation8 + $0x10] sm:$0xff] }
 0x1b4   :  { %v881_v12 = vmul.f32 0.6931472, %v2808_v2  ;;  %2819 = vlog2.f32 %v951_v39  ;;  %v1264_v31 = vsub.f32 0.0, %v4381_v20  ;;  %v1086_v34 = vsub.f32 %v4280_v24, %v1082_v18 }
 0x1b5   :  { %2821 = vlog2.f32 %v1123_v16  ;;  %v1127_v17 = vadd.f32 1.0, %v1126_v23  ;;  %v4398_v35 = vrot.slane %v4253_v37, %v3589_v19  ;;  %v2810_v15 = vpop.eup %2809  ;;  %v955_v0 = vadd.f32 1.0, %v954_v14 }
 0x1b6   :  { %v887_v10 = vsel %vm4389_vm0, %v884_v49, %v881_v12  ;;  %v1129_v44 = vand.u32 2147483647, %v2802_v50  ;;  %2823 = vlog2.f32 %v1145_v54  ;;  %v1023_v57 = vadd.f32 1.0, %v2810_v15 }
 0x1b7   :  { %v888_v24 = vadd.f32 %v887_v10, %v872_v9  ;;  %v1026_v29 = vmul.f32 -0.5, %v2810_v15  ;;  %v1148_v59 = vmul.f32 -0.5, %v4385_v48  ;;  %v2812_v37 = vpop.eup %2811  ;;  %vm4409_vm1 = vcmp.lt.f32.partialorder %v957_v58, 0.0004427343 }
 0x1b8   :  { %v4413_v27 = vadd.f32 -1.2, %v1086_v34  ;;  %v4417_v60 = vrot.slane %v4400_v1, %v3500_v55  ;;  %v4421_v3 = vrot.slane %v4402_v28, %v3500_v55  ;;  %v748_v43 = vmul.f32 0.6931472, %v2812_v37  ;;  %v4451_v34 = vpop.permute.xlu1 %1327 }
 0x1b9   :  { %v4423_v9 = vpop.eup %2813  ;;  %v889_v45 = vsel %vm873_vm15, %v4249_v56, %v888_v24  ;;  %2825 = vlog2.f32 %v1023_v57  ;;  %v1029_v41 = vand.u32 2147483647, %v2810_v15  ;;  %v1027_v16 = vadd.f32 1.0, %v1026_v29 }
 0x1ba   :  { %v4431_v25 = vpop.eup %2815  ;;  %v890_v38 = vmax.f32 %v889_v45, 1.1754944e-38  ;;  %v1128_v23 = vmul.f32 %v2802_v50, %v1127_v17  ;;  %vm4433_vm2 = vcmp.lt.f32.partialorder %v1129_v44, 0.0004427343  ;;  %v749_v14 = vadd.f32 %v748_v43, %v4291_v11 }
 0x1bb   :  { %vm945_vm3 = vcmp.ne.f32.partialorder %v4305_v32, %v4305_v32  ;;  %v956_v18 = vmul.f32 %v2804_v7, %v955_v0  ;;  %v1091_v56 = vand.u32 2147483647, %v4413_v27  ;;  %v1149_v2 = vadd.f32 1.0, %v1148_v59 }
 0x1bc   :  { %2827 = vlog2.f32 %v890_v38  ;;  %v1151_v49 = vand.u32 2147483647, %v4385_v48  ;;  %v1217_v13 = vadd.f32 1.0, %v4423_v9  ;;  %v1284_v50 = vsub.f32 %v4429_v26, %v4398_v35  ;;  %v2818_v54 = vpop.eup %2817 }
 0x1bd   :  { %vm4445_vm4 = vcmp.lt.f32.partialorder %v1029_v41, 0.0004427343  ;;  %v1092_v11 = vsub.f32 0.0, %v1091_v56  ;;  %v1220_v58 = vmul.f32 -0.5, %v4423_v9  ;;  %v1195_v7 = vadd.f32 1.0, %v4431_v25 }
 0x1be   :  { %v2820_v17 = vpop.eup %2819  ;;  %v820_v10 = vmul.f32 0.6931472, %v2818_v54  ;;  %v1028_v0 = vmul.f32 %v2810_v15, %v1027_v16  ;;  %2829 = vlog2.f32 %v1217_v13  ;;  %v1198_v44 = vmul.f32 -0.5, %v4431_v25 }
 0x1bf   :  { %v2822_v24 = vpop.eup %2821  ;;  %v953_v57 = vmul.f32 0.6931472, %v2820_v17  ;;  %v1093_v29 = vmul.f32 1.442695, %v1092_v11  ;;  %v1150_v59 = vmul.f32 %v4385_v48, %v1149_v2  ;;  %2831 = vlog2.f32 %v1195_v7 }
 0x1c0   :  { %v2824_v37 = vpop.eup %2823  ;;  %v821_v43 = vadd.f32 %v820_v10, %v749_v14  ;;  %vm1017_vm5 = vcmp.ne.f32.partialorder %v4328_v30, %v4328_v30  ;;  %v1125_v45 = vmul.f32 0.6931472, %v2822_v24  ;;  %vm4457_vm6 = vcmp.lt.f32.partialorder %v1151_v49, 0.0004427343 }
 0x1c1   :  { %v1223_v15 = vand.u32 2147483647, %v4423_v9  ;;  %v959_v38 = vsel %vm4409_vm1, %v956_v18, %v953_v57  ;;  %2833 = vpow2.f32 %v1093_v29  ;;  %v1147_v16 = vmul.f32 0.6931472, %v2824_v37 }
 0x1c2   :  { %v1221_v56 = vadd.f32 1.0, %v1220_v58  ;;  %v960_v48 = vadd.f32 %v959_v38, %v944_v22  ;;  %v1199_v14 = vadd.f32 1.0, %v1198_v44  ;;  %v1201_v2 = vand.u32 2147483647, %v4431_v25  ;;  %v1350_v58 = vpop.permute.xlu1 %1349 }
 0x1c3   :  { %v1265_v49 = vmul.f32 1.442695, %v1264_v31  ;;  %v2826_v13 = vpop.eup %2825  ;;  %v1131_v54 = vsel %vm4433_vm2, %v1128_v23, %v1125_v45  ;;  %v1153_v5 = vsel %vm4457_vm6, %v1150_v59, %v1147_v16  ;;  %v1285_v18 = vand.u32 2147483647, %v1284_v50 }
 0x1c4   :  { %v1334_v11 = vsub.f32 %v4451_v34, %v4417_v60  ;;  %v961_v22 = vsel %vm945_vm3, %v4305_v32, %v960_v48  ;;  %v1025_v7 = vmul.f32 0.6931472, %v2826_v13  ;;  %v1154_v20 = vadd.f32 %v1153_v5, %v1131_v54 }
 0x1c5   :  { %2835 = vpow2.f32 %v1265_v49  ;;  %v962_v31 = vmax.f32 %v961_v22, 1.1754944e-38  ;;  %vm4479_vm7 = vcmp.lt.f32.partialorder %v1223_v15, 0.0004427343  ;;  %v1286_v23 = vsub.f32 0.0, %v1285_v18 }
 0x1c6   :  { %v1335_v17 = vand.u32 2147483647, %v1334_v11  ;;  %v2828_v50 = vpop.eup %2827  ;;  %v1031_v10 = vsel %vm4445_vm4, %v1028_v0, %v1025_v7  ;;  %v1158_v44 = vsub.f32 %v4296_v33, %v1154_v20  ;;  %v1222_v24 = vmul.f32 %v4423_v9, %v1221_v56 }
 0x1c7   :  { %v1356_v32 = vsub.f32 %v1350_v58, %v4421_v3  ;;  %v892_v57 = vmul.f32 0.6931472, %v2828_v50  ;;  %2837 = vlog2.f32 %v962_v31  ;;  %v1032_v29 = vadd.f32 %v1031_v10, %v1016_v42 }
 0x1c8   :  { %v1287_v59 = vmul.f32 1.442695, %v1286_v23  ;;  %v2830_v37 = vpop.eup %2829  ;;  %v4490_v45 = vadd.f32 -1.2, %v1158_v44  ;;  %v1200_v41 = vmul.f32 %v4431_v25, %v1199_v14  ;;  %v1336_v15 = vsub.f32 0.0, %v1335_v17  ;;  %v4523_v17 = vpop.permute.xlu1 %1421 }
 0x1c9   :  { %v1357_v12 = vand.u32 2147483647, %v1356_v32  ;;  %v2832_v0 = vpop.eup %2831  ;;  %v893_v38 = vadd.f32 %v892_v57, %v821_v43  ;;  %v1033_v33 = vsel %vm1017_vm5, %v4328_v30, %v1032_v29  ;;  %v1219_v9 = vmul.f32 0.6931472, %v2830_v37 }
 0x1ca   :  { %2839 = vpow2.f32 %v1287_v59  ;;  %v1034_v16 = vmax.f32 %v1033_v33, 1.1754944e-38  ;;  %v1163_v42 = vand.u32 2147483647, %v4490_v45  ;;  %vm4498_vm8 = vcmp.lt.f32.partialorder %v1201_v2, 0.0004427343  ;;  %v4539_v59 = vpop.permute.xlu0 %1399 }
 0x1cb   :  { %v1228_v25 = vmax.f32 %v4311_v51, %v4288_v40  ;;  %v2834_v48 = vpop.eup %2833  ;;  %v1225_v43 = vsel %vm4479_vm7, %v1222_v24, %v1219_v9  ;;  %v1197_v14 = vmul.f32 0.6931472, %v2832_v0  ;;  %v1337_v49 = vmul.f32 1.442695, %v1336_v15 }
 0x1cc   :  { %v1358_v13 = vsub.f32 0.0, %v1357_v12  ;;  %2841 = vlog2.f32 %v1034_v16  ;;  %v1095_v30 = vadd.f32 1.0, %v2834_v48  ;;  %v1371_v54 = vmin.f32 %v1350_v58, %v4421_v3 }
 0x1cd   :  { %v1164_v5 = vsub.f32 0.0, %v1163_v42  ;;  %v1203_v2 = vsel %vm4498_vm8, %v1200_v41, %v1197_v14  ;;  %2843 = vpow2.f32 %v1337_v49  ;;  %v1229_v51 = vsub.f32 %v1227_v62, %v1228_v25 }
 0x1ce   :  { %v1359_v18 = vmul.f32 1.442695, %v1358_v13  ;;  %2845 = vlog2.f32 %v1095_v30  ;;  %v1226_v40 = vadd.f32 %v1225_v43, %v1203_v2  ;;  %v1372_v22 = vmax.f32 %v4451_v34, %v4417_v60 }
 0x1cf   :  { %v4509_v11 = vpop.eup %2835  ;;  %v1165_v7 = vmul.f32 1.442695, %v1164_v5  ;;  %v1098_v39 = vmul.f32 -0.5, %v2834_v48  ;;  %v4521_v23 = vrot.slane %v4402_v28, %v3493_v52  ;;  %v1101_v60 = vand.u32 2147483647, %v2834_v48  ;;  %v4562_v5 = vpop.permute.xlu1 %1471 }
 0x1d0   :  { %v1267_v3 = vadd.f32 1.0, %v4509_v11  ;;  %v1230_v58 = vsub.f32 %v1229_v51, %v1226_v40  ;;  %2847 = vpow2.f32 %v1359_v18  ;;  %v4517_v20 = vsub.f32 %v1371_v54, %v1372_v22 }
 0x1d1   :  { %v2838_v31 = vpop.eup %2837  ;;  %2849 = vpow2.f32 %v1165_v7  ;;  %v1300_v34 = vmax.f32 %v4345_v4, %v4301_v53  ;;  %v1428_v44 = vsub.f32 %v4523_v17, %v4521_v23  ;;  %v4534_v24 = vrot.slane %v4400_v1, %v3493_v52 }
 0x1d2   :  { %v964_v46 = vmul.f32 0.6931472, %v2838_v31  ;;  %v4525_v8 = vadd.f32 -1.2, %v1230_v58  ;;  %2851 = vlog2.f32 %v1267_v3  ;;  %v1088_v32 = vmax.f32 %v4413_v27, 0.0 }
 0x1d3   :  { %vm1089_vm9 = vcmp.ne.f32.partialorder %v4413_v27, %v4413_v27  ;;  %v1099_v57 = vadd.f32 1.0, %v1098_v39  ;;  %v1270_v37 = vmul.f32 -0.5, %v4509_v11  ;;  %v1299_v15 = vmin.f32 %v4429_v26, %v4398_v35 }
 0x1d4   :  { %v2840_v62 = vpop.eup %2839  ;;  %v965_v50 = vadd.f32 %v964_v46, %v893_v38  ;;  %v1235_v10 = vand.u32 2147483647, %v4525_v8  ;;  %vm4546_vm10 = vcmp.lt.f32.partialorder %v1101_v60, 0.0004427343  ;;  %v1273_v33 = vand.u32 2147483647, %v4509_v11 }
 0x1d5   :  { %v1289_v29 = vadd.f32 1.0, %v2840_v62  ;;  %v1292_v41 = vmul.f32 -0.5, %v2840_v62  ;;  %v1429_v56 = vand.u32 2147483647, %v1428_v44  ;;  %v1406_v25 = vsub.f32 %v4539_v59, %v4534_v24 }
 0x1d6   :  { %v2842_v53 = vpop.eup %2841  ;;  %v1236_v4 = vsub.f32 0.0, %v1235_v10  ;;  %v1100_v26 = vmul.f32 %v2834_v48, %v1099_v57  ;;  %v4558_v14 = vrot.slane %v4400_v1, %v3517_v63  ;;  %v1271_v13 = vadd.f32 1.0, %v1270_v37 }
 0x1d7   :  { %v4544_v12 = vpop.eup %2843  ;;  %v1036_v0 = vmul.f32 0.6931472, %v2842_v53  ;;  %2853 = vlog2.f32 %v1289_v29  ;;  %v1293_v30 = vadd.f32 1.0, %v1292_v41  ;;  %v1295_v54 = vand.u32 2147483647, %v2840_v62 }
 0x1d8   :  { %v2846_v9 = vpop.eup %2845  ;;  %v1237_v16 = vmul.f32 1.442695, %v1236_v4  ;;  %v1339_v42 = vadd.f32 1.0, %v4544_v12  ;;  %v1342_v48 = vmul.f32 -0.5, %v4544_v12  ;;  %v1430_v3 = vsub.f32 0.0, %v1429_v56 }
 0x1d9   :  { %v4554_v43 = vadd.f32 %v1036_v0, %v965_v50  ;;  %v1097_v35 = vmul.f32 0.6931472, %v2846_v9  ;;  %v1407_v58 = vand.u32 2147483647, %v1406_v25  ;;  %v1301_v39 = vsub.f32 %v1299_v15, %v1300_v34  ;;  %v4591_v0 = vpop.permute.xlu0 %1493 }
 0x1da   :  { %v4560_v49 = vpop.eup %2847  ;;  %2855 = vpow2.f32 %v1237_v16  ;;  %v1478_v46 = vsub.f32 %v4562_v5, %v4558_v14  ;;  %v1272_v50 = vmul.f32 %v4509_v11, %v1271_v13  ;;  %vm4578_vm11 = vcmp.lt.f32.partialorder %v1273_v33, 0.0004427343 }
 0x1db   :  { %v4564_v2 = vpop.eup %2849  ;;  %v1103_v18 = vsel %vm4546_vm10, %v1100_v26, %v1097_v35  ;;  %2857 = vlog2.f32 %v1339_v42  ;;  %v1361_v40 = vadd.f32 1.0, %v4560_v49  ;;  %vm4582_vm12 = vcmp.lt.f32.partialorder %v1295_v54, 0.0004427343 }
 0x1dc   :  { %v2852_v51 = vpop.eup %2851  ;;  %v1104_v22 = vadd.f32 %v1103_v18, %v1088_v32  ;;  %v1167_v7 = vadd.f32 1.0, %v4564_v2  ;;  %v1345_v34 = vand.u32 2147483647, %v4544_v12  ;;  %v1364_v57 = vmul.f32 -0.5, %v4560_v49 }
 0x1dd   :  { %v1269_v31 = vmul.f32 0.6931472, %v2852_v51  ;;  %2859 = vlog2.f32 %v1361_v40  ;;  %v1294_v29 = vmul.f32 %v2840_v62, %v1293_v30  ;;  %v1343_v53 = vadd.f32 1.0, %v1342_v48 }
 0x1de   :  { %v1105_v60 = vsel %vm1089_vm9, %v4413_v27, %v1104_v22  ;;  %2861 = vlog2.f32 %v1167_v7  ;;  %v1431_v4 = vmul.f32 1.442695, %v1430_v3  ;;  %v1408_v27 = vsub.f32 0.0, %v1407_v58 }
 0x1df   :  { %v1106_v44 = vmax.f32 %v1105_v60, 1.1754944e-38  ;;  %v1170_v11 = vmul.f32 -0.5, %v4564_v2  ;;  %v1275_v41 = vsel %vm4578_vm11, %v1272_v50, %v1269_v31  ;;  %v1479_v15 = vand.u32 2147483647, %v1478_v46  ;;  %v4617_v50 = vpop.permute.xlu1 %1543 }
 0x1e0   :  { %v1409_v33 = vmul.f32 1.442695, %v1408_v27  ;;  %v4595_v9 = vrot.slane %v4402_v28, %v3517_v63  ;;  %v1160_v62 = vmax.f32 %v4490_v45, 0.0  ;;  %vm4598_vm13 = vcmp.lt.f32.partialorder %v1345_v34, 0.0004427343 }
 0x1e1   :  { %v2854_v37 = vpop.eup %2853  ;;  %2863 = vlog2.f32 %v1106_v44  ;;  %v1365_v42 = vadd.f32 1.0, %v1364_v57  ;;  %v1480_v56 = vsub.f32 0.0, %v1479_v15  ;;  %v1367_v26 = vand.u32 2147483647, %v4560_v49 }
 0x1e2   :  { %v1291_v38 = vmul.f32 0.6931472, %v2854_v37  ;;  %2865 = vpow2.f32 %v1431_v4  ;;  %v1500_v13 = vsub.f32 %v4591_v0, %v4595_v9  ;;  %v1171_v54 = vadd.f32 1.0, %v1170_v11 }
 0x1e3   :  { %2867 = vpow2.f32 %v1409_v33  ;;  %v1173_v18 = vand.u32 2147483647, %v4564_v2  ;;  %v1344_v51 = vmul.f32 %v4544_v12, %v1343_v53  ;;  %v1481_v22 = vmul.f32 1.442695, %v1480_v56 }
 0x1e4   :  { %v4602_v25 = vpop.eup %2855  ;;  %v1297_v35 = vsel %vm4582_vm12, %v1294_v29, %v1291_v38  ;;  %v1501_v7 = vand.u32 2147483647, %v1500_v13  ;;  %v4614_v3 = vrot.slane %v4400_v1, %v3532_v21  ;;  %v1366_v60 = vmul.f32 %v4560_v49, %v1365_v42 }
 0x1e5   :  { %v2858_v30 = vpop.eup %2857  ;;  %v1239_v48 = vadd.f32 1.0, %v4602_v25  ;;  %v1298_v40 = vadd.f32 %v1297_v35, %v1275_v41  ;;  %vm4619_vm14 = vcmp.lt.f32.partialorder %v1367_v26, 0.0004427343  ;;  %v1172_v57 = vmul.f32 %v4564_v2, %v1171_v54 }
 0x1e6   :  { %v1341_v46 = vmul.f32 0.6931472, %v2858_v30  ;;  %v1502_v12 = vsub.f32 0.0, %v1501_v7  ;;  %v1242_v29 = vmul.f32 -0.5, %v4602_v25  ;;  %vm1174_vm15 = vcmp.lt.f32.partialorder %v1173_v18, 0.0004427343 }
 0x1e7   :  { %v2860_v58 = vpop.eup %2859  ;;  %2869 = vlog2.f32 %v1239_v48  ;;  %v1302_v31 = vsub.f32 %v1301_v39, %v1298_v40  ;;  %v1550_v4 = vsub.f32 %v4617_v50, %v4614_v3  ;;  %vm1161_vm0 = vcmp.ne.f32.partialorder %v4490_v45, %v4490_v45 }
 0x1e8   :  { %v2862_v10 = vpop.eup %2861  ;;  %v1363_v44 = vmul.f32 0.6931472, %v2860_v58  ;;  %2871 = vpow2.f32 %v1481_v22  ;;  %v1503_v39 = vmul.f32 1.442695, %v1502_v12  ;;  %v1347_v2 = vsel %vm4598_vm13, %v1344_v51, %v1341_v46  ;;  %v4651_v51 = vpop.permute.xlu1 %1565 }
 0x1e9   :  { %v1169_v34 = vmul.f32 0.6931472, %v2862_v10  ;;  %v4625_v53 = vadd.f32 -1.2, %v1302_v31  ;;  %v1243_v42 = vadd.f32 1.0, %v1242_v29  ;;  %v4641_v26 = vrot.slane %v4402_v28, %v3532_v21 }
 0x1ea   :  { %v1369_v49 = vsel %vm4619_vm14, %v1366_v60, %v1363_v44  ;;  %2873 = vpow2.f32 %v1503_v39  ;;  %v1245_v48 = vand.u32 2147483647, %v4602_v25  ;;  %vm1233_vm2 = vcmp.ne.f32.partialorder %v4525_v8, %v4525_v8 }
 0x1eb   :  { %v2864_v27 = vpop.eup %2863  ;;  %v1175_v37 = vsel %vm1174_vm15, %v1172_v57, %v1169_v34  ;;  %v1307_v11 = vand.u32 2147483647, %v4625_v53  ;;  %v1370_v33 = vadd.f32 %v1369_v49, %v1347_v2  ;;  %v1244_v46 = vmul.f32 %v4602_v25, %v1243_v42 }
 0x1ec   :  { %v4636_v41 = vpop.eup %2865  ;;  %v1108_v15 = vmul.f32 0.6931472, %v2864_v27  ;;  %v1176_v38 = vadd.f32 %v1175_v37, %v1160_v62  ;;  %v1551_v62 = vand.u32 2147483647, %v1550_v4  ;;  %v1572_v60 = vsub.f32 %v4651_v51, %v4641_v26 }
 0x1ed   :  { %v1308_v56 = vsub.f32 0.0, %v1307_v11  ;;  %v1433_v35 = vadd.f32 1.0, %v4636_v41  ;;  %v4643_v13 = vpop.eup %2867  ;;  %v1374_v54 = vsub.f32 %v4517_v20, %v1370_v33  ;;  %vm1246_vm1 = vcmp.lt.f32.partialorder %v1245_v48, 0.0004427343 }
 0x1ee   :  { %v4646_v30 = vadd.f32 %v1108_v15, %v4554_v43  ;;  %v1177_v16 = vsel %vm1161_vm0, %v4490_v45, %v1176_v38  ;;  %v1411_v7 = vadd.f32 1.0, %v4643_v13  ;;  %v1232_v43 = vmax.f32 %v4525_v8, 0.0  ;;  %v4677_v38 = vpop.permute.xlu1 %1637 }
 0x1ef   :  { %v1178_v18 = vmax.f32 %v1177_v16, 1.1754944e-38  ;;  %v1309_v40 = vmul.f32 1.442695, %v1308_v56  ;;  %2875 = vlog2.f32 %v1433_v35  ;;  %v4653_v22 = vadd.f32 -1.2, %v1374_v54 }
 0x1f0   :  { %v1552_v31 = vsub.f32 0.0, %v1551_v62  ;;  %v1436_v44 = vmul.f32 -0.5, %v4636_v41  ;;  %v1414_v12 = vmul.f32 -0.5, %v4643_v13  ;;  %v1439_v39 = vand.u32 2147483647, %v4636_v41 }
 0x1f1   :  { %v2870_v58 = vpop.eup %2869  ;;  %2877 = vlog2.f32 %v1178_v18  ;;  %v1379_v10 = vand.u32 2147483647, %v4653_v22  ;;  %v1573_v4 = vand.u32 2147483647, %v1572_v60  ;;  %v4673_v27 = vrot.slane %v4402_v28, %v3545_v36 }
 0x1f2   :  { %v4657_v45 = vpop.eup %2871  ;;  %v1241_v20 = vmul.f32 0.6931472, %v2870_v58  ;;  %2879 = vpow2.f32 %v1309_v40  ;;  %v1553_v29 = vmul.f32 1.442695, %v1552_v31  ;;  %v1437_v2 = vadd.f32 1.0, %v1436_v44 }
 0x1f3   :  { %2881 = vlog2.f32 %v1411_v7  ;;  %v1483_v34 = vadd.f32 1.0, %v4657_v45  ;;  %v1380_v25 = vsub.f32 0.0, %v1379_v10  ;;  %v1443_v42 = vmin.f32 %v4523_v17, %v4521_v23 }
 0x1f4   :  { %v1247_v32 = vsel %vm1246_vm1, %v1244_v46, %v1241_v20  ;;  %v4668_v49 = vpop.eup %2873  ;;  %v1415_v56 = vadd.f32 1.0, %v1414_v12  ;;  %v1417_v16 = vand.u32 2147483647, %v4643_v13  ;;  %v1444_v54 = vmax.f32 %v4539_v59, %v4534_v24 }
 0x1f5   :  { %v1248_v57 = vadd.f32 %v1247_v32, %v1232_v43  ;;  %2883 = vlog2.f32 %v1483_v34  ;;  %v1381_v11 = vmul.f32 1.442695, %v1380_v25  ;;  %v1505_v15 = vadd.f32 1.0, %v4668_v49 }
 0x1f6   :  { %2885 = vpow2.f32 %v1553_v29  ;;  %vm4684_vm3 = vcmp.lt.f32.partialorder %v1439_v39, 0.0004427343  ;;  %v1644_v48 = vsub.f32 %v4677_v38, %v4673_v27  ;;  %v1438_v17 = vmul.f32 %v4636_v41, %v1437_v2 }
 0x1f7   :  { %v1249_v37 = vsel %vm1233_vm2, %v4525_v8, %v1248_v57  ;;  %2887 = vpow2.f32 %v1381_v11  ;;  %v1574_v8 = vsub.f32 0.0, %v1573_v4  ;;  %v1486_v40 = vmul.f32 -0.5, %v4657_v45  ;;  %v4709_v57 = vpop.permute.xlu0 %1615 }
 0x1f8   :  { %v1250_v33 = vmax.f32 %v1249_v37, 1.1754944e-38  ;;  %v1416_v59 = vmul.f32 %v4643_v13, %v1415_v56  ;;  %v1508_v43 = vmul.f32 -0.5, %v4668_v49  ;;  %v1645_v31 = vand.u32 2147483647, %v1644_v48 }
 0x1f9   :  { %v2876_v35 = vpop.eup %2875  ;;  %v1575_v7 = vmul.f32 1.442695, %v1574_v8  ;;  %vm4699_vm4 = vcmp.lt.f32.partialorder %v1417_v16, 0.0004427343  ;;  %v4706_v13 = vrot.slane %v4400_v1, %v3545_v36  ;;  %v1487_v12 = vadd.f32 1.0, %v1486_v40 }
 0x1fa   :  { %2889 = vlog2.f32 %v1250_v33  ;;  %v1435_v62 = vmul.f32 0.6931472, %v2876_v35  ;;  %v1646_v32 = vsub.f32 0.0, %v1645_v31  ;;  %v1489_v34 = vand.u32 2147483647, %v4657_v45 }
 0x1fb   :  { %v2878_v23 = vpop.eup %2877  ;;  %2891 = vlog2.f32 %v1505_v15  ;;  %v1509_v39 = vadd.f32 1.0, %v1508_v43  ;;  %v1511_v4 = vand.u32 2147483647, %v4668_v49  ;;  %v1445_v2 = vsub.f32 %v1443_v42, %v1444_v54  ;;  %v4775_v48 = vpop.permute.xlu0 %1709 }
 0x1fc   :  { %v4692_v58 = vpop.eup %2879  ;;  %v1180_v24 = vmul.f32 0.6931472, %v2878_v23  ;;  %v1441_v60 = vsel %vm4684_vm3, %v1438_v17, %v1435_v62  ;;  %2893 = vpow2.f32 %v1575_v7  ;;  %v1516_v33 = vmax.f32 %v4562_v5, %v4558_v14 }
 0x1fd   :  { %v2882_v20 = vpop.eup %2881  ;;  %v1311_v46 = vadd.f32 1.0, %v4692_v58  ;;  %v1314_v37 = vmul.f32 -0.5, %v4692_v58  ;;  %v1622_v35 = vsub.f32 %v4709_v57, %v4706_v13  ;;  %vm4723_vm5 = vcmp.lt.f32.partialorder %v1489_v34, 0.0004427343 }
 0x1fe   :  { %v1181_v10 = vadd.f32 %v1180_v24, %v4646_v30  ;;  %v1413_v44 = vmul.f32 0.6931472, %v2882_v20  ;;  %v1647_v30 = vmul.f32 1.442695, %v1646_v32  ;;  %v1515_v18 = vmin.f32 %v4591_v0, %v4595_v9 }
 0x1ff   :  { %2895 = vlog2.f32 %v1311_v46  ;;  %v2884_v25 = vpop.eup %2883  ;;  %v1488_v14 = vmul.f32 %v4657_v45, %v1487_v12  ;;  %v1510_v5 = vmul.f32 %v4668_v49, %v1509_v39  ;;  %vm4732_vm6 = vcmp.lt.f32.partialorder %v1511_v4, 0.0004427343  ;;  %v4744_v49 = vpop.permute.xlu1 %1687 }
 0x200   :  { %v1419_v29 = vsel %vm4699_vm4, %v1416_v59, %v1413_v44  ;;  %v4715_v15 = vpop.eup %2885  ;;  %v1485_v56 = vmul.f32 0.6931472, %v2884_v25  ;;  %2897 = vpow2.f32 %v1647_v30  ;;  %v1315_v40 = vadd.f32 1.0, %v1314_v37 }
 0x201   :  { %v1442_v11 = vadd.f32 %v1441_v60, %v1419_v29  ;;  %v4721_v16 = vpop.eup %2887  ;;  %v4740_v0 = vrot.slane %v4400_v1, %v3557_v61  ;;  %v1623_v24 = vand.u32 2147483647, %v1622_v35  ;;  %v1317_v31 = vand.u32 2147483647, %v4692_v58 }
 0x202   :  { %v1383_v54 = vadd.f32 1.0, %v4721_v16  ;;  %v1491_v9 = vsel %vm4723_vm5, %v1488_v14, %v1485_v56  ;;  %v1386_v46 = vmul.f32 -0.5, %v4721_v16  ;;  %v1517_v41 = vsub.f32 %v1515_v18, %v1516_v33 }
 0x203   :  { %v1446_v8 = vsub.f32 %v1445_v2, %v1442_v11  ;;  %v1555_v44 = vadd.f32 1.0, %v4715_v15  ;;  %v1304_v29 = vmax.f32 %v4625_v53, 0.0  ;;  %v1316_v4 = vmul.f32 %v4692_v58, %v1315_v40 }
 0x204   :  { %v2890_v42 = vpop.eup %2889  ;;  %2899 = vlog2.f32 %v1383_v54  ;;  %v1624_v30 = vsub.f32 0.0, %v1623_v24  ;;  %vm1318_vm7 = vcmp.lt.f32.partialorder %v1317_v31, 0.0004427343  ;;  %v1387_v33 = vadd.f32 1.0, %v1386_v46  ;;  %v4780_v46 = vpop.permute.xlu1 %1759 }
 0x205   :  { %v2892_v23 = vpop.eup %2891  ;;  %v1252_v17 = vmul.f32 0.6931472, %v2890_v42  ;;  %v4736_v7 = vadd.f32 -1.2, %v1446_v8  ;;  %vm1305_vm8 = vcmp.ne.f32.partialorder %v4625_v53, %v4625_v53  ;;  %v1389_v58 = vand.u32 2147483647, %v4721_v16 }
 0x206   :  { %v1507_v45 = vmul.f32 0.6931472, %v2892_v23  ;;  %v4746_v59 = vpop.eup %2893  ;;  %v1625_v56 = vmul.f32 1.442695, %v1624_v30  ;;  %v4770_v42 = vrot.slane %v4402_v28, %v3557_v61  ;;  %v1388_v40 = vmul.f32 %v4721_v16, %v1387_v33 }
 0x207   :  { %v4748_v43 = vadd.f32 %v1252_v17, %v1181_v10  ;;  %v1451_v20 = vand.u32 2147483647, %v4736_v7  ;;  %v1577_v25 = vadd.f32 1.0, %v4746_v59  ;;  %v1694_v10 = vsub.f32 %v4744_v49, %v4740_v0 }
 0x208   :  { %v1513_v60 = vsel %vm4732_vm6, %v1510_v5, %v1507_v45  ;;  %v1558_v5 = vmul.f32 -0.5, %v4715_v15  ;;  %v1580_v31 = vmul.f32 -0.5, %v4746_v59  ;;  %vm1390_vm9 = vcmp.lt.f32.partialorder %v1389_v58, 0.0004427343 }
 0x209   :  { %v2896_v32 = vpop.eup %2895  ;;  %v1452_v12 = vsub.f32 0.0, %v1451_v20  ;;  %v1514_v34 = vadd.f32 %v1513_v60, %v1491_v9  ;;  %2901 = vlog2.f32 %v1577_v25  ;;  %v1695_v18 = vand.u32 2147483647, %v1694_v10 }
 0x20a   :  { %v1313_v39 = vmul.f32 0.6931472, %v2896_v32  ;;  %2903 = vlog2.f32 %v1555_v44  ;;  %v4761_v35 = vpop.eup %2897  ;;  %v1716_v60 = vsub.f32 %v4775_v48, %v4770_v42  ;;  %v1559_v32 = vadd.f32 1.0, %v1558_v5 }
 0x20b   :  { %v1453_v37 = vmul.f32 1.442695, %v1452_v12  ;;  %v1518_v11 = vsub.f32 %v1517_v41, %v1514_v34  ;;  %v1649_v9 = vadd.f32 1.0, %v4761_v35  ;;  %v1696_v20 = vsub.f32 0.0, %v1695_v18  ;;  %v4802_v18 = vpop.permute.xlu1 %1781 }
 0x20c   :  { %v1319_v2 = vsel %vm1318_vm7, %v1316_v4, %v1313_v39  ;;  %v1717_v34 = vand.u32 2147483647, %v1716_v60  ;;  %v4787_v25 = vrot.slane %v4400_v1, %v3572_v6  ;;  %vm1377_vm10 = vcmp.ne.f32.partialorder %v4653_v22, %v4653_v22 }
 0x20d   :  { %v1320_v8 = vadd.f32 %v1319_v2, %v1304_v29  ;;  %2905 = vpow2.f32 %v1453_v37  ;;  %v4763_v62 = vadd.f32 -1.2, %v1518_v11  ;;  %v1697_v16 = vmul.f32 1.442695, %v1696_v20 }
 0x20e   :  { %2907 = vpow2.f32 %v1625_v56  ;;  %v2900_v23 = vpop.eup %2899  ;;  %v1561_v29 = vand.u32 2147483647, %v4715_v15  ;;  %v1581_v39 = vadd.f32 1.0, %v1580_v31  ;;  %v1583_v37 = vand.u32 2147483647, %v4746_v59 }
 0x20f   :  { %v1321_v54 = vsel %vm1305_vm8, %v4625_v53, %v1320_v8  ;;  %v1523_v14 = vand.u32 2147483647, %v4763_v62  ;;  %v1385_v45 = vmul.f32 0.6931472, %v2900_v23  ;;  %v1376_v53 = vmax.f32 %v4653_v22, 0.0 }
 0x210   :  { %v1322_v17 = vmax.f32 %v1321_v54, 1.1754944e-38  ;;  %v4796_v11 = vrot.slane %v4402_v28, %v3572_v6  ;;  %v1588_v33 = vmax.f32 %v4617_v50, %v4614_v3  ;;  %v1587_v8 = vmin.f32 %v4651_v51, %v4641_v26 }
 0x211   :  { %v1524_v24 = vsub.f32 0.0, %v1523_v14  ;;  %v1391_v41 = vsel %vm1390_vm9, %v1388_v40, %v1385_v45  ;;  %v1560_v54 = vmul.f32 %v4715_v15, %v1559_v32  ;;  %v1718_v14 = vsub.f32 0.0, %v1717_v34 }
 0x212   :  { %2909 = vlog2.f32 %v1322_v17  ;;  %v1392_v12 = vadd.f32 %v1391_v41, %v1376_v53  ;;  %v1766_v28 = vsub.f32 %v4780_v46, %v4787_v25  ;;  %v1582_v23 = vmul.f32 %v4746_v59, %v1581_v39 }
 0x213   :  { %v1525_v44 = vmul.f32 1.442695, %v1524_v24  ;;  %2911 = vlog2.f32 %v1649_v9  ;;  %v2902_v10 = vpop.eup %2901  ;;  %vm4808_vm11 = vcmp.lt.f32.partialorder %v1561_v29, 0.0004427343  ;;  %vm1584_vm12 = vcmp.lt.f32.partialorder %v1583_v37, 0.0004427343 }
 0x214   :  { %v2904_v4 = vpop.eup %2903  ;;  %v1393_v30 = vsel %vm1377_vm10, %v4653_v22, %v1392_v12  ;;  %v1579_v56 = vmul.f32 0.6931472, %v2902_v10  ;;  %v1788_v50 = vsub.f32 %v4802_v18, %v4796_v11  ;;  %v1652_v15 = vmul.f32 -0.5, %v4761_v35 }
 0x215   :  { %2913 = vpow2.f32 %v1525_v44  ;;  %v1394_v2 = vmax.f32 %v1393_v30, 1.1754944e-38  ;;  %v1557_v5 = vmul.f32 0.6931472, %v2904_v4  ;;  %v1719_v45 = vmul.f32 1.442695, %v1718_v14 }
 0x216   :  { %2915 = vpow2.f32 %v1697_v16  ;;  %v1585_v51 = vsel %vm1584_vm12, %v1582_v23, %v1579_v56  ;;  %v1767_v24 = vand.u32 2147483647, %v1766_v28  ;;  %v1589_v20 = vsub.f32 %v1587_v8, %v1588_v33 }
 0x217   :  { %v2906_v1 = vpop.eup %2905  ;;  %2917 = vlog2.f32 %v1394_v2  ;;  %v1563_v31 = vsel %vm4808_vm11, %v1560_v54, %v1557_v5  ;;  %v1655_v53 = vand.u32 2147483647, %v4761_v35  ;;  %v1789_v32 = vand.u32 2147483647, %v1788_v50 }
 0x218   :  { %v2908_v58 = vpop.eup %2907  ;;  %v1455_v22 = vadd.f32 1.0, %v2906_v1  ;;  %v1458_v26 = vmul.f32 -0.5, %v2906_v1  ;;  %v1586_v41 = vadd.f32 %v1585_v51, %v1563_v31  ;;  %v1768_v44 = vsub.f32 0.0, %v1767_v24 }
 0x219   :  { %v1627_v17 = vadd.f32 1.0, %v2908_v58  ;;  %v1630_v9 = vmul.f32 -0.5, %v2908_v58  ;;  %v1461_v10 = vand.u32 2147483647, %v2906_v1  ;;  %v1653_v29 = vadd.f32 1.0, %v1652_v15 }
 0x21a   :  { %2919 = vlog2.f32 %v1455_v22  ;;  %v1459_v34 = vadd.f32 1.0, %v1458_v26  ;;  %v1659_v30 = vmin.f32 %v4677_v38, %v4673_v27  ;;  %v1769_v2 = vmul.f32 1.442695, %v1768_v44 }
 0x21b   :  { %2921 = vlog2.f32 %v1627_v17  ;;  %v1631_v37 = vadd.f32 1.0, %v1630_v9  ;;  %v1448_v33 = vmax.f32 %v4736_v7, 0.0  ;;  %v1633_v56 = vand.u32 2147483647, %v2908_v58 }
 0x21c   :  { %v2910_v40 = vpop.eup %2909  ;;  %2923 = vpow2.f32 %v1719_v45  ;;  %v1660_v8 = vmax.f32 %v4709_v57, %v4706_v13  ;;  %v1790_v14 = vsub.f32 0.0, %v1789_v32  ;;  %v1460_v5 = vmul.f32 %v2906_v1, %v1459_v34 }
 0x21d   :  { %v1324_v59 = vmul.f32 0.6931472, %v2910_v40  ;;  %v2912_v60 = vpop.eup %2911  ;;  %vm4827_vm13 = vcmp.lt.f32.partialorder %v1461_v10, 0.0004427343  ;;  %v1654_v27 = vmul.f32 %v4761_v35, %v1653_v29  ;;  %vm4832_vm14 = vcmp.lt.f32.partialorder %v1655_v53, 0.0004427343 }
 0x21e   :  { %v1651_v54 = vmul.f32 0.6931472, %v2912_v60  ;;  %v1632_v57 = vmul.f32 %v2908_v58, %v1631_v37  ;;  %v1791_v3 = vmul.f32 1.442695, %v1790_v14  ;;  %vm1634_vm15 = vcmp.lt.f32.partialorder %v1633_v56, 0.0004427343 }
 0x21f   :  { %v2914_v16 = vpop.eup %2913  ;;  %v1325_v12 = vadd.f32 %v1324_v59, %v4748_v43  ;;  %v1590_v43 = vsub.f32 %v1589_v20, %v1586_v41  ;;  %v1661_v59 = vsub.f32 %v1659_v30, %v1660_v8  ;;  %vm1449_vm0 = vcmp.ne.f32.partialorder %v4736_v7, %v4736_v7 }
 0x220   :  { %v4819_v39 = vpop.eup %2915  ;;  %v1527_v4 = vadd.f32 1.0, %v2914_v16  ;;  %v1530_v51 = vmul.f32 -0.5, %v2914_v16  ;;  %v1657_v35 = vsel %vm4832_vm14, %v1654_v27, %v1651_v54  ;;  %v1533_v41 = vand.u32 2147483647, %v2914_v16 }
 0x221   :  { %v1699_v22 = vadd.f32 1.0, %v4819_v39  ;;  %v2918_v28 = vpop.eup %2917  ;;  %v4838_v15 = vadd.f32 -1.2, %v1590_v43  ;;  %v1702_v10 = vmul.f32 -0.5, %v4819_v39  ;;  %vm1521_vm2 = vcmp.ne.f32.partialorder %v4763_v62, %v4763_v62 }
 0x222   :  { %2925 = vlog2.f32 %v1527_v4  ;;  %v1396_v13 = vmul.f32 0.6931472, %v2918_v28  ;;  %v1531_v31 = vadd.f32 1.0, %v1530_v51  ;;  %vm1534_vm1 = vcmp.lt.f32.partialorder %v1533_v41, 0.0004427343 }
 0x223   :  { %2927 = vpow2.f32 %v1769_v2  ;;  %v1595_v44 = vand.u32 2147483647, %v4838_v15  ;;  %v1703_v54 = vadd.f32 1.0, %v1702_v10  ;;  %v4883_v10 = vpop.permute.xlu0 %1831  ;;  %vm1593_vm8 = vcmp.ne.f32.partialorder %v4838_v15, %v4838_v15 }
 0x224   :  { %v2920_v17 = vpop.eup %2919  ;;  %2929 = vlog2.f32 %v1699_v22  ;;  %v4836_v1 = vadd.f32 %v1396_v13, %v1325_v12  ;;  %v1532_v30 = vmul.f32 %v2914_v16, %v1531_v31  ;;  %v1705_v16 = vand.u32 2147483647, %v4819_v39  ;;  %v3105_v31 = vld [vmem:[#allocation9 + $0x10] sm:$0xff] }
 0x225   :  { %v2922_v50 = vpop.eup %2921  ;;  %v1457_v26 = vmul.f32 0.6931472, %v2920_v17  ;;  %2931 = vpow2.f32 %v1791_v3  ;;  %v1732_v3 = vmax.f32 %v4744_v49, %v4740_v0  ;;  %v117_v49 = vstv %s5487_s6  ;;  %s3311_s6 = smov [#allocation14]  }
 0x226   :  { %v1629_v40 = vmul.f32 0.6931472, %v2922_v50  ;;  %v2924_v58 = vpop.eup %2923  ;;  %v1704_v50 = vmul.f32 %v4819_v39, %v1703_v54  ;;  %vm1706_vm3 = vcmp.lt.f32.partialorder %v1705_v16, 0.0004427343  ;;  %s2497_s0 = sshll.u32 %s3311_s6, 4  ;;  %s2498_s0 = int_to_ptr.vmem [resolvable:$true] %s2497_s0 }
 0x227   :  { %v1463_v9 = vsel %vm4827_vm13, %v1460_v5, %v1457_v26  ;;  %v1721_v53 = vadd.f32 1.0, %v2924_v58  ;;  %v1724_v29 = vmul.f32 -0.5, %v2924_v58  ;;  %v1727_v5 = vand.u32 2147483647, %v2924_v58  ;;  %s3239_s16 = scalar_lea.vmem %s2498_s0, 32  ;;  %p3244_p7 = scmp.lt.s32.totalorder %s2498_s0, %s2498_s0 }
 0x228   :  { %v1464_v45 = vadd.f32 %v1463_v9, %v1448_v33  ;;  %v1635_v24 = vsel %vm1634_vm15, %v1632_v57, %v1629_v40  ;;  %v1520_v33 = vmax.f32 %v4763_v62, 0.0  ;;  %p3240_p6 = scmp.ne.s32.totalorder %s2498_s0, %s3239_s16  ;;  %p3245_p8 = scmp.lt.s32.totalorder %s3239_s16, %s3239_s16 }
 0x229   :  { %v1658_v20 = vadd.f32 %v1657_v35, %v1635_v24  ;;  %2933 = vlog2.f32 %v1721_v53  ;;  %v1725_v14 = vadd.f32 1.0, %v1724_v29  ;;  %vm1728_vm4 = vcmp.lt.f32.partialorder %v1727_v5, 0.0004427343 }
 0x22a   :  { %v1465_v60 = vsel %vm1449_vm0, %v4736_v7, %v1464_v45  ;;  %v1596_v7 = vsub.f32 0.0, %v1595_v44  ;;  %v3106_v44 = vld [vmem:[#allocation8 + $0x10] sm:$0xff]  ;;  %p3246_p9 = por %p3245_p8, %p3244_p7 }
 0x22b   :  { %v1466_v32 = vmax.f32 %v1465_v60, 1.1754944e-38  ;;  %v1662_v12 = vsub.f32 %v1661_v59, %v1658_v20  ;;  %v1726_v26 = vmul.f32 %v2924_v58, %v1725_v14  ;;  %v4872_v20 = vrot.slane %v3105_v31, %v3589_v19  ;;  %v4877_v60 = vpop.permute.xlu1 %1853 }
 0x22c   :  { %v2926_v34 = vpop.eup %2925  ;;  %v1597_v38 = vmul.f32 1.442695, %v1596_v7  ;;  %p3247_p10 = pnand %p3246_p9, %p3240_p6 }
 0x22d   :  { %2935 = vlog2.f32 %v1466_v32  ;;  %v1529_v4 = vmul.f32 0.6931472, %v2926_v34  ;;  %v4849_v37 = vadd.f32 -1.2, %v1662_v12  ;;  %v4851_v2 = vpop.eup %2927  ;;  %v4880_v32 = vrot.slane %v3106_v44, %v3589_v19  ;;  %v5606_v12 = vld [vmem:[#allocation20_spill] sm:$0xff] }
 0x22e   :  { %v2930_v56 = vpop.eup %2929  ;;  %v1771_v23 = vadd.f32 1.0, %v4851_v2  ;;  %v118_v34 = vadd.f32 %v117_v49, %v5606_v12 }
 0x22f   :  { %v1535_v8 = vsel %vm1534_vm1, %v1532_v30, %v1529_v4  ;;  %v1667_v22 = vand.u32 2147483647, %v4849_v37  ;;  %v4855_v28 = vpop.eup %2931  ;;  %v1701_v13 = vmul.f32 0.6931472, %v2930_v56  ;;  %v4917_v31 = vpop.permute.xlu1 %1903  ;;  %vm1665_vm11 = vcmp.ne.f32.partialorder %v4849_v37, %v4849_v37 }
 0x230   :  { %v1536_v43 = vadd.f32 %v1535_v8, %v1520_v33  ;;  %2937 = vlog2.f32 %v1771_v23  ;;  %v1793_v51 = vadd.f32 1.0, %v4855_v28  ;;  %v1796_v53 = vmul.f32 -0.5, %v4855_v28 }
 0x231   :  { %v1668_v17 = vsub.f32 0.0, %v1667_v22  ;;  %v1707_v9 = vsel %vm1706_vm3, %v1704_v50, %v1701_v13  ;;  %v1777_v8 = vand.u32 2147483647, %v4851_v2  ;;  %v1799_v22 = vand.u32 2147483647, %v4855_v28 }
 0x232   :  { %v1537_v27 = vsel %vm1521_vm2, %v4763_v62, %v1536_v43  ;;  %v1731_v62 = vmin.f32 %v4775_v48, %v4770_v42  ;;  %v1774_v48 = vmul.f32 -0.5, %v4851_v2  ;;  %v1797_v33 = vadd.f32 1.0, %v1796_v53  ;;  %v4920_v53 = vld [vmem:[#allocation9 + $0x18] sm:$0xff] }
 0x233   :  { %v1538_v57 = vmax.f32 %v1537_v27, 1.1754944e-38  ;;  %v2934_v35 = vpop.eup %2933  ;;  %v1669_v40 = vmul.f32 1.442695, %v1668_v17  ;;  %v1838_v43 = vsub.f32 %v4883_v10, %v4880_v32  ;;  %v2510_v14 = vmul.f32 -1.442695, %v118_v34  ;;  %v5607_v27 = vld [vmem:[#allocation21_spill] sm:$0xff] }
 0x234   :  { %v1723_v45 = vmul.f32 0.6931472, %v2934_v35  ;;  %v1733_v58 = vsub.f32 %v1731_v62, %v1732_v3  ;;  %v1775_v30 = vadd.f32 1.0, %v1774_v48  ;;  %v1803_v13 = vmin.f32 %v4802_v18, %v4796_v11 }
 0x235   :  { %2939 = vlog2.f32 %v1538_v57  ;;  %v1804_v35 = vmax.f32 %v4780_v46, %v4787_v25  ;;  %vm1778_vm5 = vcmp.lt.f32.partialorder %v1777_v8, 0.0004427343  ;;  %vm1800_vm6 = vcmp.lt.f32.partialorder %v1799_v22, 0.0004427343 }
 0x236   :  { %2941 = vpow2.f32 %v1597_v38  ;;  %v1729_v0 = vsel %vm1728_vm4, %v1726_v26, %v1723_v45  ;;  %v123_v38 = vadd.f32 %v5607_v27, %v117_v49  ;;  %v1776_v50 = vmul.f32 %v4851_v2, %v1775_v30  ;;  %v4929_v30 = vpop.permute.xlu0 %1925 }
 0x237   :  { %v2936_v24 = vpop.eup %2935  ;;  %2943 = vlog2.f32 %v1793_v51  ;;  %v1730_v39 = vadd.f32 %v1729_v0, %v1707_v9  ;;  %v1798_v51 = vmul.f32 %v4855_v28, %v1797_v33  ;;  %v1839_v62 = vand.u32 2147483647, %v1838_v43  ;;  %v4908_v0 = vld [vmem:[#allocation8 + $0x18] sm:$0xff] }
 0x238   :  { %v1468_v59 = vmul.f32 0.6931472, %v2936_v24  ;;  %2945 = vpow2.f32 %v1669_v40  ;;  %v2511_v25 = vmul.f32 -1.442695, %v123_v38  ;;  %v4926_v34 = vrot.slane %v4920_v53, %v3500_v55 }
 0x239   :  { %v1734_v41 = vsub.f32 %v1733_v58, %v1730_v39  ;;  %v1840_v49 = vsub.f32 0.0, %v1839_v62  ;;  %v4913_v39 = vrot.slane %v4908_v0, %v3500_v55  ;;  %v4934_v55 = vpop.permute.xlu1 %1975 }
 0x23a   :  { %v1469_v42 = vadd.f32 %v1468_v59, %v4836_v1  ;;  %v2938_v29 = vpop.eup %2937  ;;  %v1860_v1 = vsub.f32 %v4877_v60, %v4872_v20  ;;  %v1805_v59 = vsub.f32 %v1803_v13, %v1804_v35  ;;  %v4939_v13 = vrot.slane %v4908_v0, %v3493_v52 }
 0x23b   :  { %v4885_v4 = vadd.f32 -1.2, %v1734_v41  ;;  %v1773_v5 = vmul.f32 0.6931472, %v2938_v29  ;;  %v1841_v41 = vmul.f32 1.442695, %v1840_v49  ;;  %v1910_v44 = vsub.f32 %v4917_v31, %v4913_v39 }
 0x23c   :  { %v1861_v57 = vand.u32 2147483647, %v1860_v1 }
 0x23d   :  { %v1739_v56 = vand.u32 2147483647, %v4885_v4  ;;  %v1779_v11 = vsel %vm1778_vm5, %v1776_v50, %v1773_v5  ;;  %vm1737_vm12 = vcmp.ne.f32.partialorder %v4885_v4, %v4885_v4 }
 0x23e   :  { %v1862_v46 = vsub.f32 0.0, %v1861_v57 }
 0x23f   :  { %v2940_v7 = vpop.eup %2939  ;;  %v1740_v17 = vsub.f32 0.0, %v1739_v56 }
 0x240   :  { %v4894_v54 = vpop.eup %2941  ;;  %v1540_v16 = vmul.f32 0.6931472, %v2940_v7  ;;  %v1863_v48 = vmul.f32 1.442695, %v1862_v46  ;;  %v1911_v7 = vand.u32 2147483647, %v1910_v44  ;;  %v1875_v44 = vmin.f32 %v4877_v60, %v4872_v20 }
 0x241   :  { %v2944_v23 = vpop.eup %2943  ;;  %v1599_v9 = vadd.f32 1.0, %v4894_v54  ;;  %v1741_v45 = vmul.f32 1.442695, %v1740_v17  ;;  %v1602_v29 = vmul.f32 -0.5, %v4894_v54  ;;  %v2020_v20 = vmax.f32 %v4934_v55, %v4939_v13 }
 0x242   :  { %v4899_v3 = vadd.f32 %v1540_v16, %v1469_v42  ;;  %v1795_v26 = vmul.f32 0.6931472, %v2944_v23  ;;  %v4905_v40 = vpop.eup %2945  ;;  %v1605_v23 = vand.u32 2147483647, %v4894_v54  ;;  %v1912_v27 = vsub.f32 0.0, %v1911_v7 }
 0x243   :  { %2947 = vpow2.f32 %v1741_v45  ;;  %v1671_v2 = vadd.f32 1.0, %v4905_v40  ;;  %v1674_v43 = vmul.f32 -0.5, %v4905_v40  ;;  %v1603_v16 = vadd.f32 1.0, %v1602_v29 }
 0x244   :  { %v1801_v18 = vsel %vm1800_vm6, %v1798_v51, %v1795_v26  ;;  %2949 = vpow2.f32 %v2510_v14  ;;  %v1932_v14 = vsub.f32 %v4929_v30, %v4926_v34  ;;  %v1677_v62 = vand.u32 2147483647, %v4905_v40 }
 0x245   :  { %v1802_v24 = vadd.f32 %v1801_v18, %v1779_v11  ;;  %2951 = vlog2.f32 %v1599_v9  ;;  %v1675_v50 = vadd.f32 1.0, %v1674_v43  ;;  %v1604_v35 = vmul.f32 %v4894_v54, %v1603_v16  ;;  %v4947_v18 = vpop.permute.xlu1 %1997  ;;  %v5001_v9 = vpop.permute.xlu0 %2047 }
 0x246   :  { %2953 = vlog2.f32 %v1671_v2  ;;  %v1933_v51 = vand.u32 2147483647, %v1932_v14  ;;  %vm4943_vm7 = vcmp.lt.f32.partialorder %v1605_v23, 0.0004427343  ;;  %v1913_v11 = vmul.f32 1.442695, %v1912_v27 }
 0x247   :  { %v1806_v28 = vsub.f32 %v1805_v59, %v1802_v24  ;;  %2955 = vpow2.f32 %v2511_v25  ;;  %v1592_v2 = vmax.f32 %v4838_v15, 0.0  ;;  %v1982_v54 = vsub.f32 %v4934_v55, %v4939_v13 }
 0x248   :  { %2957 = vpow2.f32 %v1863_v48  ;;  %v1676_v25 = vmul.f32 %v4905_v40, %v1675_v50  ;;  %v4961_v48 = vrot.slane %v4920_v53, %v3493_v52  ;;  %vm4966_vm9 = vcmp.lt.f32.partialorder %v1677_v62, 0.0004427343 }
 0x249   :  { %v4915_v58 = vadd.f32 -1.2, %v1806_v28  ;;  %2959 = vpow2.f32 %v1841_v41  ;;  %v1664_v41 = vmax.f32 %v4849_v37, 0.0  ;;  %v4979_v43 = vrot.slane %v4920_v53, %v3517_v63  ;;  %v4983_v27 = vpop.permute.xlu1 %2069 }
 0x24a   :  { %v2004_v23 = vsub.f32 %v4947_v18, %v4961_v48 }
 0x24b   :  { %v1811_v42 = vand.u32 2147483647, %v4915_v58  ;;  %vm1809_vm14 = vcmp.ne.f32.partialorder %v4915_v58, %v4915_v58 }
 0x24d   :  { %v1812_v12 = vsub.f32 0.0, %v1811_v42  ;;  %v2948_v33 = vpop.eup %2947  ;;  %v1934_v42 = vsub.f32 0.0, %v1933_v51  ;;  %v4994_v51 = vrot.slane %v4908_v0, %v3517_v63 }
 0x24e   :  { %v2950_v56 = vpop.eup %2949  ;;  %v1743_v8 = vadd.f32 1.0, %v2948_v33  ;;  %v1746_v26 = vmul.f32 -0.5, %v2948_v33 }
 0x24f   :  { %v1813_v1 = vmul.f32 1.442695, %v1812_v12  ;;  %v2952_v22 = vpop.eup %2951  ;;  %v127_v5 = vadd.f32 1.0, %v2950_v56  ;;  %v1749_v12 = vand.u32 2147483647, %v2948_v33 }
 0x250   :  { %v2954_v38 = vpop.eup %2953  ;;  %v1601_v17 = vmul.f32 0.6931472, %v2952_v22  ;;  %v1747_v49 = vadd.f32 1.0, %v1746_v26  ;;  %v1983_v22 = vand.u32 2147483647, %v1982_v54 }
 0x251   :  { %2961 = vpow2.f32 %v1813_v1  ;;  %v2956_v57 = vpop.eup %2955  ;;  %v1673_v45 = vmul.f32 0.6931472, %v2954_v38  ;;  %vm1750_vm10 = vcmp.lt.f32.partialorder %v1749_v12, 0.0004427343 }
 0x252   :  { %2963 = vlog2.f32 %v1743_v8  ;;  %v4949_v24 = vpop.eup %2957  ;;  %v133_v59 = vadd.f32 1.0, %v2956_v57  ;;  %v1607_v28 = vsel %vm4943_vm7, %v1604_v35, %v1601_v17  ;;  %v1748_v16 = vmul.f32 %v2948_v33, %v1747_v49 }
 0x253   :  { %2965 = vrcp.f32 %v127_v5  ;;  %v4956_v46 = vpop.eup %2959  ;;  %v1608_v1 = vadd.f32 %v1607_v28, %v1592_v2  ;;  %v1679_v40 = vsel %vm4966_vm9, %v1676_v25, %v1673_v45  ;;  %v1865_v7 = vadd.f32 1.0, %v4949_v24 }
 0x254   :  { %2967 = vpow2.f32 %v1913_v11  ;;  %v1843_v8 = vadd.f32 1.0, %v4956_v46  ;;  %v1935_v5 = vmul.f32 1.442695, %v1934_v42  ;;  %v1680_v38 = vadd.f32 %v1679_v40, %v1664_v41 }
 0x255   :  { %v1736_v17 = vmax.f32 %v4885_v4, 0.0  ;;  %v1609_v57 = vsel %vm1593_vm8, %v4838_v15, %v1608_v1  ;;  %v2076_v33 = vsub.f32 %v4983_v27, %v4979_v43  ;;  %v2005_v15 = vand.u32 2147483647, %v2004_v23  ;;  %v5019_v1 = vpop.permute.xlu1 %2119 }
 0x256   :  { %v1681_v45 = vsel %vm1665_vm11, %v4849_v37, %v1680_v38  ;;  %v1984_v11 = vsub.f32 0.0, %v1983_v22  ;;  %v1610_v2 = vmax.f32 %v1609_v57, 1.1754944e-38  ;;  %v1868_v63 = vmul.f32 -0.5, %v4949_v24 }
 0x257   :  { %v1846_v28 = vmul.f32 -0.5, %v4956_v46  ;;  %v2077_v25 = vand.u32 2147483647, %v2076_v33  ;;  %v2054_v49 = vsub.f32 %v5001_v9, %v4994_v51  ;;  %v1682_v42 = vmax.f32 %v1681_v45, 1.1754944e-38 }
 0x258   :  { %v2006_v12 = vsub.f32 0.0, %v2005_v15  ;;  %v1871_v40 = vand.u32 2147483647, %v4949_v24  ;;  %v1849_v22 = vand.u32 2147483647, %v4956_v46 }
 0x259   :  { %v2078_v23 = vsub.f32 0.0, %v2077_v25  ;;  %v2055_v38 = vand.u32 2147483647, %v2054_v49 }
 0x25a   :  { %vm5052_vm15 = vcmp.lt.f32.partialorder %v1849_v22, 0.0004427343  ;;  %vm5061_vm0 = vcmp.lt.f32.partialorder %v1871_v40, 0.0004427343 }
 0x25b   :  { %v4970_v29 = vpop.eup %2961  ;;  %v2079_v25 = vmul.f32 1.442695, %v2078_v23  ;;  %v2056_v49 = vsub.f32 0.0, %v2055_v38 }
 0x25c   :  { %v2964_v52 = vpop.eup %2963  ;;  %v1815_v56 = vadd.f32 1.0, %v4970_v29  ;;  %v1818_v62 = vmul.f32 -0.5, %v4970_v29 }
 0x25d   :  { %v1745_v14 = vmul.f32 0.6931472, %v2964_v52  ;;  %v4996_v35 = vpop.eup %2965  ;;  %v5025_v52 = vrot.slane %v4920_v53, %v3532_v21 }
 0x25e   :  { %2969 = vlog2.f32 %v1815_v56  ;;  %v5015_v37 = vpop.eup %2967  ;;  %v1819_v41 = vadd.f32 1.0, %v1818_v62  ;;  %v1808_v62 = vmax.f32 %v4915_v58, 0.0 }
 0x25f   :  { %v1751_v50 = vsel %vm1750_vm10, %v1748_v16, %v1745_v14  ;;  %2971 = vlog2.f32 %v1865_v7  ;;  %v1985_v7 = vmul.f32 1.442695, %v1984_v11  ;;  %v5028_v14 = vpop.permute.xlu0 %2141 }
 0x260   :  { %v1752_v26 = vadd.f32 %v1751_v50, %v1736_v17  ;;  %2973 = vlog2.f32 %v1843_v8  ;;  %v1869_v8 = vadd.f32 1.0, %v1868_v63  ;;  %v2148_v15 = vsub.f32 %v5028_v14, %v5025_v52 }
 0x261   :  { %2975 = vpow2.f32 %v1935_v5  ;;  %v1847_v5 = vadd.f32 1.0, %v1846_v28  ;;  %v5041_v63 = vrot.slane %v4908_v0, %v3545_v36 }
 0x262   :  { %2977 = vrcp.f32 %v133_v59  ;;  %v1753_v54 = vsel %vm1737_vm12, %v4885_v4, %v1752_v26  ;;  %v5013_v59 = vrot.slane %v4908_v0, %v3532_v21  ;;  %v1821_v4 = vand.u32 2147483647, %v4970_v29 }
 0x263   :  { %2979 = vlog2.f32 %v1610_v2  ;;  %v1754_v56 = vmax.f32 %v1753_v54, 1.1754944e-38  ;;  %v1820_v21 = vmul.f32 %v4970_v29, %v1819_v41  ;;  %v2007_v26 = vmul.f32 1.442695, %v2006_v12 }
 0x264   :  { %v2126_v17 = vsub.f32 %v5019_v1, %v5013_v59  ;;  %2981 = vlog2.f32 %v1682_v42  ;;  %vm1822_vm13 = vcmp.lt.f32.partialorder %v1821_v4, 0.0004427343  ;;  %v1915_v2 = vadd.f32 1.0, %v5015_v37  ;;  %v5045_v42 = vpop.permute.xlu1 %2191 }
 0x265   :  { %2983 = vpow2.f32 %v1985_v7  ;;  %v1848_v41 = vmul.f32 %v4956_v46, %v1847_v5  ;;  %v2198_v23 = vsub.f32 %v5045_v42, %v5041_v63  ;;  %v1870_v38 = vmul.f32 %v4949_v24, %v1869_v8  ;;  %v5069_v8 = vpop.permute.xlu0 %2263 }
 0x266   :  { %2985 = vlog2.f32 %v1754_v56  ;;  %v2127_v12 = vand.u32 2147483647, %v2126_v17  ;;  %v1876_v46 = vmax.f32 %v4883_v10, %v4880_v32 }
 0x267   :  { %2987 = vpow2.f32 %v2007_v26  ;;  %v2199_v40 = vand.u32 2147483647, %v2198_v23 }
 0x268   :  { %v2970_v16 = vpop.eup %2969  ;;  %2989 = vlog2.f32 %v1915_v2  ;;  %v2128_v22 = vsub.f32 0.0, %v2127_v12  ;;  %v5071_v32 = vpop.permute.xlu1 %2213 }
 0x269   :  { %v2972_v57 = vpop.eup %2971  ;;  %v1817_v50 = vmul.f32 0.6931472, %v2970_v16  ;;  %v2149_v16 = vand.u32 2147483647, %v2148_v15  ;;  %2991 = vpow2.f32 %v2079_v25  ;;  %v5080_v15 = vrot.slane %v4920_v53, %v3545_v36 }
 0x26a   :  { %v2974_v33 = vpop.eup %2973  ;;  %v1867_v54 = vmul.f32 0.6931472, %v2972_v57 }
 0x26b   :  { %v5036_v45 = vpop.eup %2975  ;;  %v1823_v11 = vsel %vm1822_vm13, %v1820_v21, %v1817_v50  ;;  %v1845_v7 = vmul.f32 0.6931472, %v2974_v33  ;;  %v2150_v24 = vsub.f32 0.0, %v2149_v16  ;;  %v1918_v33 = vmul.f32 -0.5, %v5015_v37 }
 0x26c   :  { %v5043_v29 = vpop.eup %2977  ;;  %v1824_v28 = vadd.f32 %v1823_v11, %v1808_v62  ;;  %v1937_v56 = vadd.f32 1.0, %v5036_v45  ;;  %v1873_v21 = vsel %vm5061_vm0, %v1870_v38, %v1867_v54  ;;  %v5076_v62 = vrot.slane %v4908_v0, %v3557_v61 }
 0x26d   :  { %v2980_v5 = vpop.eup %2979  ;;  %v1851_v26 = vsel %vm5052_vm15, %v1848_v41, %v1845_v7  ;;  %v1948_v54 = vmax.f32 %v4917_v31, %v4913_v39  ;;  %v2129_v41 = vmul.f32 1.442695, %v2128_v22  ;;  %v2220_v36 = vsub.f32 %v5071_v32, %v5080_v15 }
 0x26e   :  { %v1825_v4 = vsel %vm1809_vm14, %v4915_v58, %v1824_v28  ;;  %v2057_v58 = vmul.f32 1.442695, %v2056_v49  ;;  %v2982_v10 = vpop.eup %2981  ;;  %v1612_v2 = vmul.f32 0.6931472, %v2980_v5  ;;  %v1877_v28 = vsub.f32 %v1875_v44, %v1876_v46 }
 0x26f   :  { %v1826_v50 = vmax.f32 %v1825_v4, 1.1754944e-38  ;;  %v5082_v11 = vpop.eup %2983  ;;  %v1874_v49 = vadd.f32 %v1873_v21, %v1851_v26  ;;  %v2270_v12 = vsub.f32 %v5069_v8, %v5076_v62  ;;  %v1684_v4 = vmul.f32 0.6931472, %v2982_v10 }
 0x270   :  { %v2986_v25 = vpop.eup %2985  ;;  %v1947_v7 = vmin.f32 %v4929_v30, %v4926_v34  ;;  %v2151_v60 = vmul.f32 1.442695, %v2150_v24  ;;  %v1919_v39 = vadd.f32 1.0, %v1918_v33  ;;  %v1921_v31 = vand.u32 2147483647, %v5015_v37 }
 0x271   :  { %2993 = vlog2.f32 %v1826_v50  ;;  %v5097_v44 = vpop.eup %2987  ;;  %v2200_v16 = vsub.f32 0.0, %v2199_v40  ;;  %v1613_v50 = vadd.f32 %v1612_v2, %v4899_v3  ;;  %v1756_v57 = vmul.f32 0.6931472, %v2986_v25 }
 0x272   :  { %2995 = vlog2.f32 %v1937_v56  ;;  %v1940_v56 = vmul.f32 -0.5, %v5036_v45  ;;  %v1987_v23 = vadd.f32 1.0, %v5082_v11  ;;  %v2271_v38 = vand.u32 2147483647, %v2270_v12  ;;  %v2990_v46 = vpop.eup %2989 }
 0x273   :  { %2997 = vpow2.f32 %v2057_v58  ;;  %v1878_v34 = vsub.f32 %v1877_v28, %v1874_v49  ;;  %v2019_v30 = vmin.f32 %v4947_v18, %v4961_v48  ;;  %v2221_v55 = vand.u32 2147483647, %v2220_v36  ;;  %v5105_v13 = vpop.eup %2991  ;;  %v5114_v18 = vpop.permute.xlu0 %2357 }
 0x274   :  { %2999 = vpow2.f32 %v2129_v41  ;;  %v1685_v58 = vadd.f32 %v1684_v4, %v1613_v50  ;;  %v2009_v5 = vadd.f32 1.0, %v5097_v44  ;;  %v5110_v3 = vrot.slane %v4920_v53, %v3572_v6 }
 0x275   :  { %3001 = vpow2.f32 %v2151_v60  ;;  %v1920_v22 = vmul.f32 %v5015_v37, %v1919_v39  ;;  %v1941_v21 = vadd.f32 1.0, %v1940_v56  ;;  %v1943_v26 = vand.u32 2147483647, %v5036_v45 }
 0x276   :  { %v2201_v24 = vmul.f32 1.442695, %v2200_v16  ;;  %v1757_v10 = vadd.f32 %v1756_v57, %v1685_v58  ;;  %3003 = vlog2.f32 %v1987_v23  ;;  %v2272_v40 = vsub.f32 0.0, %v2271_v38 }
 0x277   :  { %v5116_v2 = vadd.f32 -1.2, %v1878_v34  ;;  %v1917_v28 = vmul.f32 0.6931472, %v2990_v46  ;;  %v2091_v25 = vmin.f32 %v4983_v27, %v4979_v43  ;;  %v2222_v49 = vsub.f32 0.0, %v2221_v55  ;;  %v5132_v43 = vpop.permute.xlu1 %2285 }
 0x278   :  { %3005 = vlog2.f32 %v2009_v5  ;;  %v2081_v12 = vadd.f32 1.0, %v5105_v13  ;;  %v2364_v36 = vsub.f32 %v5114_v18, %v5110_v3  ;;  %v1942_v60 = vmul.f32 %v5036_v45, %v1941_v21 }
 0x279   :  { %3007 = vpow2.f32 %v2201_v24  ;;  %v5130_v39 = vrot.slane %v4920_v53, %v3557_v61  ;;  %vm5134_vm1 = vcmp.lt.f32.partialorder %v1943_v26, 0.0004427343  ;;  %v1990_v56 = vmul.f32 -0.5, %v5082_v11 }
 0x27a   :  { %v2092_v16 = vmax.f32 %v5001_v9, %v4994_v51  ;;  %v2273_v50 = vmul.f32 1.442695, %v2272_v40  ;;  %vm5141_vm2 = vcmp.lt.f32.partialorder %v1921_v31, 0.0004427343  ;;  %v1949_v45 = vsub.f32 %v1947_v7, %v1948_v54 }
 0x27b   :  { %v2994_v17 = vpop.eup %2993  ;;  %v2223_v23 = vmul.f32 1.442695, %v2222_v49  ;;  %v1923_v38 = vsel %vm5141_vm2, %v1920_v22, %v1917_v28  ;;  %v5148_v46 = vsub.f32 %v2019_v30, %v2020_v20  ;;  %3009 = vlog2.f32 %v2081_v12  ;;  %v5167_v22 = vpop.permute.xlu1 %2335 }
 0x27c   :  { %v2996_v48 = vpop.eup %2995  ;;  %v1828_v33 = vmul.f32 0.6931472, %v2994_v17  ;;  %v2365_v34 = vand.u32 2147483647, %v2364_v36  ;;  %v1883_v51 = vand.u32 2147483647, %v5116_v2  ;;  %v2292_v54 = vsub.f32 %v5132_v43, %v5130_v39 }
 0x27d   :  { %v5120_v41 = vpop.eup %2997  ;;  %v1939_v4 = vmul.f32 0.6931472, %v2996_v48  ;;  %3011 = vpow2.f32 %v2223_v23  ;;  %v1991_v31 = vadd.f32 1.0, %v1990_v56  ;;  %v1993_v58 = vand.u32 2147483647, %v5082_v11 }
 0x27e   :  { %v5122_v37 = vadd.f32 %v1828_v33, %v1757_v10  ;;  %v2059_v61 = vadd.f32 1.0, %v5120_v41  ;;  %v5150_v55 = vpop.eup %2999  ;;  %v5160_v20 = vsub.f32 %v2091_v25, %v2092_v16  ;;  %3013 = vpow2.f32 %v2273_v50 }
 0x27f   :  { %v1945_v9 = vsel %vm5134_vm1, %v1942_v60, %v1939_v4  ;;  %v5157_v7 = vpop.eup %3001  ;;  %v2012_v30 = vmul.f32 -0.5, %v5097_v44  ;;  %v2293_v5 = vand.u32 2147483647, %v2292_v54  ;;  %v5165_v17 = vrot.slane %v4908_v0, %v3572_v6  ;;  %v5222_v12 = vpop.permute.xlu1 %2407 }
 0x280   :  { %3015 = vlog2.f32 %v2059_v61  ;;  %v3004_v21 = vpop.eup %3003  ;;  %v1946_v26 = vadd.f32 %v1945_v9, %v1923_v38  ;;  %v2164_v24 = vmax.f32 %v5019_v1, %v5013_v59  ;;  %v2131_v48 = vadd.f32 1.0, %v5150_v55 }
 0x281   :  { %v2366_v10 = vsub.f32 0.0, %v2365_v34  ;;  %v1884_v33 = vsub.f32 0.0, %v1883_v51  ;;  %v2153_v40 = vadd.f32 1.0, %v5157_v7  ;;  %v2163_v28 = vmin.f32 %v5028_v14, %v5025_v52 }
 0x282   :  { %v2294_v25 = vsub.f32 0.0, %v2293_v5  ;;  %v3006_v49 = vpop.eup %3005  ;;  %v1992_v6 = vmul.f32 %v5082_v11, %v1991_v31  ;;  %vm5176_vm3 = vcmp.lt.f32.partialorder %v1993_v58, 0.0004427343  ;;  %v2015_v36 = vand.u32 2147483647, %v5097_v44 }
 0x283   :  { %v2342_v59 = vsub.f32 %v5167_v22, %v5165_v17  ;;  %v5183_v1 = vpop.eup %3007  ;;  %v1989_v4 = vmul.f32 0.6931472, %v3004_v21  ;;  %v2013_v60 = vadd.f32 1.0, %v2012_v30  ;;  %v2084_v27 = vmul.f32 -0.5, %v5105_v13 }
 0x284   :  { %v2295_v52 = vmul.f32 1.442695, %v2294_v25  ;;  %v1950_v14 = vsub.f32 %v1949_v45, %v1946_v26  ;;  %v2062_v56 = vmul.f32 -0.5, %v5120_v41  ;;  %3017 = vlog2.f32 %v2131_v48 }
 0x285   :  { %v2367_v11 = vmul.f32 1.442695, %v2366_v10  ;;  %v5187_v16 = vmul.f32 1.442695, %v1884_v33  ;;  %v2011_v50 = vmul.f32 0.6931472, %v3006_v49  ;;  %3019 = vlog2.f32 %v2153_v40  ;;  %v3010_v61 = vpop.eup %3009 }
 0x286   :  { %v5189_v57 = vsub.f32 %v2163_v28, %v2164_v24  ;;  %vm5191_vm4 = vcmp.lt.f32.partialorder %v2015_v36, 0.0004427343  ;;  %v2203_v38 = vadd.f32 1.0, %v5183_v1  ;;  %3021 = vpow2.f32 %v2295_v52 }
 0x287   :  { %v2343_v34 = vand.u32 2147483647, %v2342_v59  ;;  %v5196_v45 = vpop.eup %3011  ;;  %v1995_v51 = vsel %vm5176_vm3, %v1992_v6, %v1989_v4  ;;  %v2014_v9 = vmul.f32 %v5097_v44, %v2013_v60  ;;  %v2085_v54 = vadd.f32 1.0, %v2084_v27 }
 0x288   :  { %v2087_v31 = vand.u32 2147483647, %v5105_v13  ;;  %v5202_v58 = vpop.eup %3013  ;;  %v5204_v30 = vadd.f32 -1.2, %v1950_v14  ;;  %v2063_v5 = vadd.f32 1.0, %v2062_v56  ;;  %v2225_v21 = vadd.f32 1.0, %v5196_v45 }
 0x289   :  { %3023 = vpow2.f32 %v2367_v11  ;;  %v2017_v24 = vsel %vm5191_vm4, %v2014_v9, %v2011_v50  ;;  %v2065_v48 = vand.u32 2147483647, %v5120_v41  ;;  %v2134_v10 = vmul.f32 -0.5, %v5150_v55 }
 0x28a   :  { %v3016_v26 = vpop.eup %3015  ;;  %v2137_v44 = vand.u32 2147483647, %v5150_v55  ;;  %v2156_v33 = vmul.f32 -0.5, %v5157_v7  ;;  %3025 = vlog2.f32 %v2203_v38  ;;  %v2344_v40 = vsub.f32 0.0, %v2343_v34 }
 0x28b   :  { %v5215_v28 = vrot.slane %v4908_v0, %v3589_v19  ;;  %v2083_v25 = vmul.f32 0.6931472, %v3010_v61  ;;  %vm5217_vm5 = vcmp.lt.f32.partialorder %v2087_v31, 0.0004427343  ;;  %3027 = vlog2.f32 %v2225_v21 }
 0x28c   :  { %v2275_v6 = vadd.f32 1.0, %v5202_v58  ;;  %v2018_v36 = vadd.f32 %v2017_v24, %v1995_v51  ;;  %v2061_v59 = vmul.f32 0.6931472, %v3016_v26  ;;  %v2064_v4 = vmul.f32 %v5120_v41, %v2063_v5 }
 0x28d   :  { %v2236_v60 = vmax.f32 %v5045_v42, %v5041_v63  ;;  %v1955_v0 = vand.u32 2147483647, %v5204_v30  ;;  %v2086_v27 = vmul.f32 %v5105_v13, %v2085_v54  ;;  %vm5229_vm6 = vcmp.lt.f32.partialorder %v2065_v48, 0.0004427343 }
 0x28e   :  { %v2135_v14 = vadd.f32 1.0, %v2134_v10  ;;  %v3018_v56 = vpop.eup %3017  ;;  %vm5233_vm7 = vcmp.lt.f32.partialorder %v2137_v44, 0.0004427343  ;;  %v2157_v50 = vadd.f32 1.0, %v2156_v33  ;;  %v2345_v61 = vmul.f32 1.442695, %v2344_v40 }
 0x28f   :  { %v2414_v41 = vsub.f32 %v5222_v12, %v5215_v28  ;;  %v3020_v63 = vpop.eup %3019  ;;  %v2089_v42 = vsel %vm5217_vm5, %v2086_v27, %v2083_v25  ;;  %v2159_v13 = vand.u32 2147483647, %v5157_v7  ;;  %v2228_v23 = vmul.f32 -0.5, %v5196_v45 }
 0x290   :  { %3029 = vlog2.f32 %v2275_v6  ;;  %v5243_v38 = vpop.eup %3021  ;;  %v2022_v34 = vsub.f32 %v5148_v46, %v2018_v36  ;;  %v2067_v51 = vsel %vm5229_vm6, %v2064_v4, %v2061_v59  ;;  %v2206_v9 = vmul.f32 -0.5, %v5183_v1 }
 0x291   :  { %3031 = vpow2.f32 %v2345_v61  ;;  %v2133_v54 = vmul.f32 0.6931472, %v3018_v56  ;;  %v2136_v31 = vmul.f32 %v5150_v55, %v2135_v14  ;;  %v2235_v5 = vmin.f32 %v5071_v32, %v5080_v15 }
 0x292   :  { %v2297_v21 = vadd.f32 1.0, %v5243_v38  ;;  %v2155_v24 = vmul.f32 0.6931472, %v3020_v63  ;;  %v2158_v48 = vmul.f32 %v5157_v7, %v2157_v50  ;;  %v2308_v46 = vmax.f32 %v5069_v8, %v5076_v62  ;;  %v5279_v63 = vpop.permute.xlu1 %2429 }
 0x293   :  { %v5253_v26 = vpop.eup %3023  ;;  %v2415_v10 = vand.u32 2147483647, %v2414_v41  ;;  %v2090_v44 = vadd.f32 %v2089_v42, %v2067_v51  ;;  %vm5258_vm8 = vcmp.lt.f32.partialorder %v2159_v13, 0.0004427343  ;;  %v2229_v55 = vadd.f32 1.0, %v2228_v23 }
 0x294   :  { %3033 = vlog2.f32 %v2297_v21  ;;  %v3026_v40 = vpop.eup %3025  ;;  %v5262_v32 = vadd.f32 -1.2, %v2022_v34  ;;  %v2207_v15 = vadd.f32 1.0, %v2206_v9  ;;  %v2231_v25 = vand.u32 2147483647, %v5196_v45 }
 0x295   :  { %v2278_v49 = vmul.f32 -0.5, %v5202_v58  ;;  %v3028_v7 = vpop.eup %3027  ;;  %v2139_v6 = vsel %vm5233_vm7, %v2136_v31, %v2133_v54  ;;  %v2209_v36 = vand.u32 2147483647, %v5183_v1  ;;  %v2237_v59 = vsub.f32 %v2235_v5, %v2236_v60 }
 0x296   :  { %v2369_v4 = vadd.f32 1.0, %v5253_v26  ;;  %v2161_v27 = vsel %vm5258_vm8, %v2158_v48, %v2155_v24  ;;  %v2227_v52 = vmul.f32 0.6931472, %v3028_v7  ;;  %v2300_v14 = vmul.f32 -0.5, %v5243_v38 }
 0x297   :  { %v2416_v56 = vsub.f32 0.0, %v2415_v10  ;;  %v2094_v50 = vsub.f32 %v5160_v20, %v2090_v44  ;;  %v2205_v61 = vmul.f32 0.6931472, %v3026_v40  ;;  %v2230_v41 = vmul.f32 %v5196_v45, %v2229_v55 }
 0x298   :  { %v5277_v11 = vrot.slane %v4920_v53, %v3589_v19  ;;  %v2208_v60 = vmul.f32 %v5183_v1, %v2207_v15  ;;  %vm5282_vm9 = vcmp.lt.f32.partialorder %v2231_v25, 0.0004427343  ;;  %v2279_v13 = vadd.f32 1.0, %v2278_v49 }
 0x299   :  { %v5288_v23 = vadd.f32 %v5043_v29, %v4996_v35  ;;  %v2162_v34 = vadd.f32 %v2161_v27, %v2139_v6  ;;  %v2233_v45 = vsel %vm5282_vm9, %v2230_v41, %v2227_v52  ;;  %v2281_v19 = vand.u32 2147483647, %v5202_v58 }
 0x29a   :  { %v3030_v20 = vpop.eup %3029  ;;  %3035 = vlog2.f32 %v2369_v4  ;;  %vm2210_vm10 = vcmp.lt.f32.partialorder %v2209_v36, 0.0004427343  ;;  %v2301_v1 = vadd.f32 1.0, %v2300_v14  ;;  %v2417_v51 = vmul.f32 1.442695, %v2416_v56 }
 0x29b   :  { %v3032_v53 = vpop.eup %3031  ;;  %v2436_v9 = vsub.f32 %v5279_v63, %v5277_v11  ;;  %v5295_v54 = vadd.f32 -1.2, %v2094_v50  ;;  %v2211_v31 = vsel %vm2210_vm10, %v2208_v60, %v2205_v61  ;;  %v2303_v35 = vand.u32 2147483647, %v5243_v38 }
 0x29c   :  { %v2347_v29 = vadd.f32 1.0, %v3032_v53  ;;  %v2234_v5 = vadd.f32 %v2233_v45, %v2211_v31  ;;  %v2277_v21 = vmul.f32 0.6931472, %v3030_v20  ;;  %v2280_v24 = vmul.f32 %v5202_v58, %v2279_v13 }
 0x29d   :  { %v2307_v48 = vmin.f32 %v5132_v43, %v5130_v39  ;;  %v2166_v44 = vsub.f32 %v5189_v57, %v2162_v34  ;;  %vm5302_vm11 = vcmp.lt.f32.partialorder %v2281_v19, 0.0004427343  ;;  %v2372_v55 = vmul.f32 -0.5, %v5253_v26 }
 0x29e   :  { %v3034_v10 = vpop.eup %3033  ;;  %3037 = vlog2.f32 %v2347_v29  ;;  %v2302_v15 = vmul.f32 %v5243_v38, %v2301_v1  ;;  %v2437_v25 = vand.u32 2147483647, %v2436_v9  ;;  %v1956_v58 = vsub.f32 0.0, %v1955_v0 }
 0x29f   :  { %v2299_v40 = vmul.f32 0.6931472, %v3034_v10  ;;  %3039 = vpow2.f32 %v2417_v51  ;;  %v2027_v39 = vand.u32 2147483647, %v5262_v32  ;;  %vm2304_vm12 = vcmp.lt.f32.partialorder %v2303_v35, 0.0004427343 }
 0x2a0   :  { %v2238_v43 = vsub.f32 %v2237_v59, %v2234_v5  ;;  %v2283_v57 = vsel %vm5302_vm11, %v2280_v24, %v2277_v21  ;;  %v2350_v7 = vmul.f32 -0.5, %v3032_v53  ;;  %v2099_v6 = vand.u32 2147483647, %v5295_v54 }
 0x2a1   :  { %v2305_v49 = vsel %vm2304_vm12, %v2302_v15, %v2299_v40  ;;  %v5314_v36 = vadd.f32 -1.2, %v2166_v44  ;;  %v2309_v38 = vsub.f32 %v2307_v48, %v2308_v46  ;;  %v2373_v27 = vadd.f32 1.0, %v2372_v55 }
 0x2a2   :  { %v2306_v4 = vadd.f32 %v2305_v49, %v2283_v57  ;;  %v2438_v0 = vsub.f32 0.0, %v2437_v25  ;;  %3041 = vpow2.f32 %v5187_v16  ;;  %v1957_v59 = vmul.f32 1.442695, %v1956_v58 }
 0x2a3   :  { %v2375_v56 = vand.u32 2147483647, %v5253_v26  ;;  %v2028_v50 = vsub.f32 0.0, %v2027_v39  ;;  %v5321_v61 = vadd.f32 -1.2, %v2238_v43  ;;  %v2351_v41 = vadd.f32 1.0, %v2350_v7 }
 0x2a4   :  { %v3036_v52 = vpop.eup %3035  ;;  %v2310_v14 = vsub.f32 %v2309_v38, %v2306_v4  ;;  %v2439_v60 = vmul.f32 1.442695, %v2438_v0  ;;  %v2100_v42 = vsub.f32 0.0, %v2099_v6  ;;  %v2171_v13 = vand.u32 2147483647, %v5314_v36 }
 0x2a5   :  { %v2353_v20 = vand.u32 2147483647, %v3032_v53  ;;  %v2371_v62 = vmul.f32 0.6931472, %v3036_v52  ;;  %v2374_v46 = vmul.f32 %v5253_v26, %v2373_v27  ;;  %v2379_v34 = vmin.f32 %v5114_v18, %v5110_v3 }
 0x2a6   :  { %v5324_v8 = vadd.f32 -1.2, %v2310_v14  ;;  %3043 = vpow2.f32 %v2439_v60  ;;  %vm2376_vm13 = vcmp.lt.f32.partialorder %v2375_v56, 0.0004427343  ;;  %v2380_v45 = vmax.f32 %v5167_v22, %v5165_v17 }
 0x2a7   :  { %v2029_v1 = vmul.f32 1.442695, %v2028_v50  ;;  %v2243_v51 = vand.u32 2147483647, %v5321_v61  ;;  %v2352_v31 = vmul.f32 %v3032_v53, %v2351_v41  ;;  %3045 = vpow2.f32 %v1957_v59 }
 0x2a8   :  { %v3038_v16 = vpop.eup %3037  ;;  %v2101_v35 = vmul.f32 1.442695, %v2100_v42  ;;  %vm2354_vm14 = vcmp.lt.f32.partialorder %v2353_v20, 0.0004427343  ;;  %v2172_v26 = vsub.f32 0.0, %v2171_v13  ;;  %v2377_v21 = vsel %vm2376_vm13, %v2374_v46, %v2371_v62 }
 0x2a9   :  { %v5331_v19 = vpop.eup %3039  ;;  %v2349_v9 = vmul.f32 0.6931472, %v3038_v16  ;;  %v2315_v29 = vand.u32 2147483647, %v5324_v8  ;;  %v2381_v18 = vsub.f32 %v2379_v34, %v2380_v45  ;;  %3047 = vpow2.f32 %v2029_v1 }
 0x2aa   :  { %v2419_v24 = vadd.f32 1.0, %v5331_v19  ;;  %v2244_v17 = vsub.f32 0.0, %v2243_v51  ;;  %3049 = vpow2.f32 %v2101_v35  ;;  %v2173_v10 = vmul.f32 1.442695, %v2172_v26 }
 0x2ab   :  { %v2355_v5 = vsel %vm2354_vm14, %v2352_v31, %v2349_v9  ;;  %v2316_v53 = vsub.f32 0.0, %v2315_v29  ;;  %v2422_v7 = vmul.f32 -0.5, %v5331_v19  ;;  %v2425_v56 = vand.u32 2147483647, %v5331_v19 }
 0x2ac   :  { %v2378_v3 = vadd.f32 %v2377_v21, %v2355_v5  ;;  %v5336_v22 = vpop.eup %3041  ;;  %3051 = vlog2.f32 %v2419_v24  ;;  %v2245_v55 = vmul.f32 1.442695, %v2244_v17  ;;  %v2451_v20 = vmin.f32 %v5279_v63, %v5277_v11 }
 0x2ad   :  { %v1887_v40 = vadd.f32 1.0, %v5336_v22  ;;  %3053 = vpow2.f32 %v2173_v10  ;;  %v2317_v58 = vmul.f32 1.442695, %v2316_v53  ;;  %v2423_v59 = vadd.f32 1.0, %v2422_v7 }
 0x2ae   :  { %v2382_v48 = vsub.f32 %v2381_v18, %v2378_v3  ;;  %v1890_v60 = vmul.f32 -0.5, %v5336_v22  ;;  %v2452_v51 = vmax.f32 %v5222_v12, %v5215_v28  ;;  %vm2426_vm15 = vcmp.lt.f32.partialorder %v2425_v56, 0.0004427343 }
 0x2af   :  { %v2424_v46 = vmul.f32 %v5331_v19, %v2423_v59  ;;  %v1893_v21 = vand.u32 2147483647, %v5336_v22  ;;  %vm1881_vm2 = vcmp.ne.f32.partialorder %v5116_v2, %v5116_v2  ;;  %vm1953_vm3 = vcmp.ne.f32.partialorder %v5204_v30, %v5204_v30 }
 0x2b0   :  { %v5338_v44 = vadd.f32 -1.2, %v2382_v48  ;;  %v3044_v33 = vpop.eup %3043  ;;  %v1891_v31 = vadd.f32 1.0, %v1890_v60  ;;  %v2453_v29 = vsub.f32 %v2451_v20, %v2452_v51  ;;  %vm2025_vm7 = vcmp.ne.f32.partialorder %v5262_v32, %v5262_v32 }
 0x2b1   :  { %v2441_v25 = vadd.f32 1.0, %v3044_v33  ;;  %v5342_v39 = vpop.eup %3045  ;;  %v2444_v6 = vmul.f32 -0.5, %v3044_v33  ;;  %v2447_v50 = vand.u32 2147483647, %v3044_v33  ;;  %vm5377_vm1 = vcmp.lt.f32.partialorder %v1893_v21, 0.0004427343 }
 0x2b2   :  { %v2387_v15 = vand.u32 2147483647, %v5338_v44  ;;  %v1959_v38 = vadd.f32 1.0, %v5342_v39  ;;  %v1962_v3 = vmul.f32 -0.5, %v5342_v39  ;;  %v1892_v18 = vmul.f32 %v5336_v22, %v1891_v31 }
 0x2b3   :  { %3055 = vlog2.f32 %v2441_v25  ;;  %v5344_v49 = vpop.eup %3047  ;;  %v2445_v14 = vadd.f32 1.0, %v2444_v6  ;;  %vm2448_vm0 = vcmp.lt.f32.partialorder %v2447_v50, 0.0004427343  ;;  %vm2097_vm10 = vcmp.ne.f32.partialorder %v5295_v54, %v5295_v54 }
 0x2b4   :  { %v2388_v43 = vsub.f32 0.0, %v2387_v15  ;;  %3057 = vpow2.f32 %v2245_v55  ;;  %v5347_v4 = vpop.eup %3049  ;;  %v2031_v0 = vadd.f32 1.0, %v5344_v49  ;;  %v2034_v17 = vmul.f32 -0.5, %v5344_v49 }
 0x2b5   :  { %3059 = vlog2.f32 %v1887_v40  ;;  %v2103_v52 = vadd.f32 1.0, %v5347_v4  ;;  %v2446_v34 = vmul.f32 %v3044_v33, %v2445_v14  ;;  %v2106_v33 = vmul.f32 -0.5, %v5347_v4 }
 0x2b6   :  { %v2389_v57 = vmul.f32 1.442695, %v2388_v43  ;;  %3061 = vpow2.f32 %v2317_v58  ;;  %v3052_v27 = vpop.eup %3051  ;;  %v1963_v15 = vadd.f32 1.0, %v1962_v3  ;;  %v1880_v58 = vmax.f32 %v5116_v2, 0.0 }
 0x2b7   :  { %v5353_v41 = vpop.eup %3053  ;;  %v2421_v42 = vmul.f32 0.6931472, %v3052_v27  ;;  %v2035_v7 = vadd.f32 1.0, %v2034_v17  ;;  %v2037_v6 = vand.u32 2147483647, %v5344_v49  ;;  %vm2169_vm13 = vcmp.ne.f32.partialorder %v5314_v36, %v5314_v36 }
 0x2b8   :  { %3063 = vpow2.f32 %v2389_v57  ;;  %v2175_v1 = vadd.f32 1.0, %v5353_v41  ;;  %v1965_v57 = vand.u32 2147483647, %v5342_v39  ;;  %v2178_v59 = vmul.f32 -0.5, %v5353_v41 }
 0x2b9   :  { %3065 = vlog2.f32 %v1959_v38  ;;  %v2427_v35 = vsel %vm2426_vm15, %v2424_v46, %v2421_v42  ;;  %v1964_v14 = vmul.f32 %v5342_v39, %v1963_v15  ;;  %v2109_v50 = vand.u32 2147483647, %v5347_v4 }
 0x2ba   :  { %3067 = vlog2.f32 %v2031_v0  ;;  %v1952_v0 = vmax.f32 %v5204_v30, 0.0  ;;  %vm5396_vm4 = vcmp.lt.f32.partialorder %v1965_v57, 0.0004427343  ;;  %v2024_v39 = vmax.f32 %v5262_v32, 0.0 }
 0x2bb   :  { %3069 = vlog2.f32 %v2103_v52  ;;  %v2107_v52 = vadd.f32 1.0, %v2106_v33  ;;  %vm5405_vm5 = vcmp.lt.f32.partialorder %v2037_v6, 0.0004427343  ;;  %v2179_v51 = vadd.f32 1.0, %v2178_v59 }
 0x2bc   :  { %3071 = vlog2.f32 %v2175_v1  ;;  %vm5417_vm6 = vcmp.lt.f32.partialorder %v2109_v50, 0.0004427343  ;;  %vm2241_vm14 = vcmp.ne.f32.partialorder %v5321_v61, %v5321_v61  ;;  %vm2313_vm15 = vcmp.ne.f32.partialorder %v5324_v8, %v5324_v8 }
 0x2bd   :  { %v3056_v13 = vpop.eup %3055  ;;  %v2108_v1 = vmul.f32 %v5347_v4, %v2107_v52 }
 0x2be   :  { %v5358_v62 = vpop.eup %3057  ;;  %v2443_v16 = vmul.f32 0.6931472, %v3056_v13 }
 0x2bf   :  { %v3060_v45 = vpop.eup %3059  ;;  %v2247_v63 = vadd.f32 1.0, %v5358_v62  ;;  %v2250_v20 = vmul.f32 -0.5, %v5358_v62 }
 0x2c0   :  { %v5364_v9 = vpop.eup %3061  ;;  %v2449_v11 = vsel %vm2448_vm0, %v2446_v34, %v2443_v16  ;;  %v1889_v5 = vmul.f32 0.6931472, %v3060_v45  ;;  %v2036_v34 = vmul.f32 %v5344_v49, %v2035_v7  ;;  %vm2385_vm0 = vcmp.ne.f32.partialorder %v5338_v44, %v5338_v44 }
 0x2c1   :  { %v2450_v26 = vadd.f32 %v2449_v11, %v2427_v35  ;;  %v2319_v28 = vadd.f32 1.0, %v5364_v9  ;;  %3073 = vlog2.f32 %v2247_v63  ;;  %v2322_v31 = vmul.f32 -0.5, %v5364_v9 }
 0x2c2   :  { %v5367_v19 = vpop.eup %3063  ;;  %v1895_v40 = vsel %vm5377_vm1, %v1892_v18, %v1889_v5  ;;  %v2251_v5 = vadd.f32 1.0, %v2250_v20 }
 0x2c3   :  { %v2454_v12 = vsub.f32 %v2453_v29, %v2450_v26  ;;  %v3066_v24 = vpop.eup %3065  ;;  %v2391_v48 = vadd.f32 1.0, %v5367_v19  ;;  %3075 = vlog2.f32 %v2319_v28  ;;  %v1896_v27 = vadd.f32 %v1895_v40, %v1880_v58 }
 0x2c4   :  { %v3068_v55 = vpop.eup %3067  ;;  %v1961_v43 = vmul.f32 0.6931472, %v3066_v24  ;;  %v2181_v26 = vand.u32 2147483647, %v5353_v41  ;;  %v2394_v21 = vmul.f32 -0.5, %v5367_v19  ;;  %v2180_v24 = vmul.f32 %v5353_v41, %v2179_v51 }
 0x2c5   :  { %v5375_v10 = vadd.f32 -1.2, %v2454_v12  ;;  %v3070_v25 = vpop.eup %3069  ;;  %3077 = vlog2.f32 %v2391_v48  ;;  %v2033_v56 = vmul.f32 0.6931472, %v3068_v55  ;;  %v1897_v11 = vsel %vm1881_vm2, %v5116_v2, %v1896_v27 }
 0x2c6   :  { %v2105_v13 = vmul.f32 0.6931472, %v3070_v25  ;;  %v3072_v46 = vpop.eup %3071  ;;  %v1967_v16 = vsel %vm5396_vm4, %v1964_v14, %v1961_v43  ;;  %v2096_v2 = vmax.f32 %v5295_v54, 0.0  ;;  %v2253_v12 = vand.u32 2147483647, %v5358_v62 }
 0x2c7   :  { %v2459_v22 = vand.u32 2147483647, %v5375_v10  ;;  %v2039_v63 = vsel %vm5405_vm5, %v2036_v34, %v2033_v56  ;;  %v2177_v29 = vmul.f32 0.6931472, %v3072_v46  ;;  %v1968_v28 = vadd.f32 %v1967_v16, %v1952_v0 }
 0x2c8   :  { %v2111_v4 = vsel %vm5417_vm6, %v2108_v1, %v2105_v13  ;;  %v1898_v18 = vmax.f32 %v1897_v11, 1.1754944e-38  ;;  %v2323_v48 = vadd.f32 1.0, %v2322_v31  ;;  %v2040_v33 = vadd.f32 %v2039_v63, %v2024_v39 }
 0x2c9   :  { %v2460_v38 = vsub.f32 0.0, %v2459_v22  ;;  %v2112_v55 = vadd.f32 %v2111_v4, %v2096_v2  ;;  %vm2182_vm8 = vcmp.lt.f32.partialorder %v2181_v26, 0.0004427343  ;;  %v2325_v40 = vand.u32 2147483647, %v5364_v9 }
 0x2ca   :  { %v2183_v15 = vsel %vm2182_vm8, %v2180_v24, %v2177_v29  ;;  %v2252_v22 = vmul.f32 %v5358_v62, %v2251_v5  ;;  %v2395_v58 = vadd.f32 1.0, %v2394_v21  ;;  %v1969_v43 = vsel %vm1953_vm3, %v5204_v30, %v1968_v28 }
 0x2cb   :  { %v2461_v60 = vmul.f32 1.442695, %v2460_v38  ;;  %v3074_v35 = vpop.eup %3073  ;;  %v2168_v41 = vmax.f32 %v5314_v36, 0.0  ;;  %vm2254_vm9 = vcmp.lt.f32.partialorder %v2253_v12, 0.0004427343  ;;  %v2324_v6 = vmul.f32 %v5364_v9, %v2323_v48 }
 0x2cc   :  { %v2249_v17 = vmul.f32 0.6931472, %v3074_v35  ;;  %v2397_v57 = vand.u32 2147483647, %v5367_v19  ;;  %v2041_v62 = vsel %vm2025_vm7, %v5262_v32, %v2040_v33  ;;  %v2240_v30 = vmax.f32 %v5321_v61, 0.0 }
 0x2cd   :  { %3079 = vpow2.f32 %v2461_v60  ;;  %v3076_v3 = vpop.eup %3075  ;;  %v2184_v27 = vadd.f32 %v2183_v15, %v2168_v41  ;;  %vm2326_vm11 = vcmp.lt.f32.partialorder %v2325_v40, 0.0004427343  ;;  %v1970_v52 = vmax.f32 %v1969_v43, 1.1754944e-38 }
 0x2ce   :  { %v2321_v25 = vmul.f32 0.6931472, %v3076_v3  ;;  %v2255_v7 = vsel %vm2254_vm9, %v2252_v22, %v2249_v17  ;;  %v2113_v59 = vsel %vm2097_vm10, %v5295_v54, %v2112_v55  ;;  %v2396_v56 = vmul.f32 %v5367_v19, %v2395_v58 }
 0x2cf   :  { %v3078_v53 = vpop.eup %3077  ;;  %v2256_v50 = vadd.f32 %v2255_v7, %v2240_v30  ;;  %v2312_v9 = vmax.f32 %v5324_v8, 0.0  ;;  %vm2398_vm12 = vcmp.lt.f32.partialorder %v2397_v57, 0.0004427343  ;;  %3081 = vlog2.f32 %v1898_v18 }
 0x2d0   :  { %v2393_v38 = vmul.f32 0.6931472, %v3078_v53  ;;  %v2327_v14 = vsel %vm2326_vm11, %v2324_v6, %v2321_v25  ;;  %v2042_v42 = vmax.f32 %v2041_v62, 1.1754944e-38  ;;  %v2185_v13 = vsel %vm2169_vm13, %v5314_v36, %v2184_v27  ;;  %v2545_v6 = vld [vmem:[#allocation11] ss:$0 sm:$0xff] }
 0x2d1   :  { %v2328_v20 = vadd.f32 %v2327_v14, %v2312_v9  ;;  %v2384_v46 = vmax.f32 %v5338_v44, 0.0  ;;  %v2114_v54 = vmax.f32 %v2113_v59, 1.1754944e-38  ;;  %v2257_v19 = vsel %vm2241_vm14, %v5321_v61, %v2256_v50 }
 0x2d2   :  { %v2399_v32 = vsel %vm2398_vm12, %v2396_v56, %v2393_v38  ;;  %v2186_v39 = vmax.f32 %v2185_v13, 1.1754944e-38  ;;  %v2258_v45 = vmax.f32 %v2257_v19, 1.1754944e-38  ;;  %v2456_v29 = vmax.f32 %v5375_v10, 0.0 }
 0x2d3   :  { %v2400_v16 = vadd.f32 %v2399_v32, %v2384_v46  ;;  %v2329_v36 = vsel %vm2313_vm15, %v5324_v8, %v2328_v20  ;;  %vm2457_vm2 = vcmp.ne.f32.partialorder %v5375_v10, %v5375_v10  ;;  %v137_v57 = vadd.f32 1.0, %v5288_v23 }
 0x2d4   :  { %v2330_v51 = vmax.f32 %v2329_v36, 1.1754944e-38 }
 0x2d5   :  { %v2401_v1 = vsel %vm2385_vm0, %v5338_v44, %v2400_v16  ;;  %v2486_v30 = vsub.f32 %v2545_v6, %v137_v57 }
 0x2d6   :  { %v2402_v11 = vmax.f32 %v2401_v1, 1.1754944e-38 }
 0x2d7   :  { %v3080_v0 = vpop.eup %3079  ;;  %v2487_v59 = vmul.f32 0.5, %v2486_v30 }
 0x2d8   :  { %v2463_v60 = vadd.f32 1.0, %v3080_v0  ;;  %v2466_v34 = vmul.f32 -0.5, %v3080_v0  ;;  %v2469_v61 = vand.u32 2147483647, %v3080_v0 }
 0x2d9   :  { %v3082_v35 = vpop.eup %3081 }
 0x2da   :  { %3083 = vlog2.f32 %v2463_v60  ;;  %v2467_v31 = vadd.f32 1.0, %v2466_v34  ;;  %v1900_v8 = vmul.f32 0.6931472, %v3082_v35  ;;  %vm2470_vm1 = vcmp.lt.f32.partialorder %v2469_v61, 0.0004427343 }
 0x2db   :  { %3085 = vlog2.f32 %v1970_v52 }
 0x2dc   :  { %3087 = vlog2.f32 %v2042_v42  ;;  %v2468_v4 = vmul.f32 %v3080_v0, %v2467_v31  ;;  %v1901_v2 = vadd.f32 %v1900_v8, %v5122_v37 }
 0x2dd   :  { %3089 = vlog2.f32 %v2114_v54 }
 0x2de   :  { %3091 = vlog2.f32 %v2186_v39 }
 0x2df   :  { %3093 = vlog2.f32 %v2258_v45 }
 0x2e0   :  { %3095 = vlog2.f32 %v2330_v51 }
 0x2e1   :  { %3097 = vlog2.f32 %v2402_v11 }
 0x2e4   :  { %v3084_v63 = vpop.eup %3083 }
 0x2e5   :  { %v3086_v49 = vpop.eup %3085  ;;  %v2465_v26 = vmul.f32 0.6931472, %v3084_v63 }
 0x2e6   :  { %v3088_v5 = vpop.eup %3087  ;;  %v1972_v44 = vmul.f32 0.6931472, %v3086_v49 }
 0x2e7   :  { %v2471_v21 = vsel %vm2470_vm1, %v2468_v4, %v2465_v26  ;;  %v3090_v28 = vpop.eup %3089  ;;  %v2044_v12 = vmul.f32 0.6931472, %v3088_v5 }
 0x2e8   :  { %v2472_v3 = vadd.f32 %v2471_v21, %v2456_v29  ;;  %v3092_v24 = vpop.eup %3091  ;;  %v1973_v48 = vadd.f32 %v1972_v44, %v1901_v2  ;;  %v2116_v53 = vmul.f32 0.6931472, %v3090_v28 }
 0x2e9   :  { %v3094_v33 = vpop.eup %3093  ;;  %v2188_v40 = vmul.f32 0.6931472, %v3092_v24 }
 0x2ea   :  { %v2473_v18 = vsel %vm2457_vm2, %v5375_v10, %v2472_v3  ;;  %v2045_v55 = vadd.f32 %v2044_v12, %v1973_v48  ;;  %v3096_v15 = vpop.eup %3095  ;;  %v2260_v25 = vmul.f32 0.6931472, %v3094_v33 }
 0x2eb   :  { %v2474_v17 = vmax.f32 %v2473_v18, 1.1754944e-38  ;;  %v3098_v58 = vpop.eup %3097  ;;  %v2332_v41 = vmul.f32 0.6931472, %v3096_v15 }
 0x2ec   :  { %v2117_v22 = vadd.f32 %v2116_v53, %v2045_v55  ;;  %v2404_v7 = vmul.f32 0.6931472, %v3098_v58 }
 0x2ed   :  { %3099 = vlog2.f32 %v2474_v17 }
 0x2ee   :  { %v2189_v43 = vadd.f32 %v2188_v40, %v2117_v22 }
 0x2f0   :  { %v2261_v37 = vadd.f32 %v2260_v25, %v2189_v43 }
 0x2f2   :  { %v2333_v10 = vadd.f32 %v2332_v41, %v2261_v37 }
 0x2f4   :  { %v2405_v62 = vadd.f32 %v2404_v7, %v2333_v10 }
 0x2f7   :  { %v3100_v38 = vpop.eup %3099 }
 0x2f8   :  { %v2476_v27 = vmul.f32 0.6931472, %v3100_v38 }
 0x2fa   :  { %v2477_v0 = vadd.f32 %v2476_v27, %v2405_v62 }
 0x2fc   :  { %v2479_v52 = vsub.f32 %v2477_v0, %v3962_v47 }
 0x2fe   :  { %v2488_v14 = vadd.f32 %v2487_v59, %v2479_v52 }
 0x300   :  { %v2489_v56 = vmin.f32 %v2488_v14, 0.0 }
 0x302   :  { %2490 = vst [vmem:[#allocation14] sm:$0x3] %v2489_v56 }
 0x303   :  { %3250 = shalt.err (!%p3247_p10)
}
 0x304   :  { %s3251_s29 = scalar_lea.hbm %s5488_s7, 32 }
 0x305   :  { %p3252_p11 = scmp.ne.s32.totalorder %s5488_s7, %s3251_s29  ;;  %p3255_p12 = scmp.lt.u32.totalorder %s3251_s29, %s5488_s7 }
 0x307   :  { %p3257_p13 = pnand %p3255_p12, %p3252_p11 }
 0x309   :  { %3260 = shalt.err (!%p3257_p13)
}
 0x30a   :  { %2500 = dma.vmem_to_hbm [thread:$0]  %s2498_s0, 32, %s5488_s7, [#allocation5]  }
 0x30b   :  { %3269 = dma.done.wait [#allocation5], 32  }
 0x30c   :  { %3270 = vsyncadd [#allocation5], 4294967264 }
 0x30d   :  { %2504 = vsyncpa [#allocation4], 1 }
 0x30e   :  { %2505 = vsyncpa [#allocation7], 1 }
 0x30f   :  { %2506 = vsyncpa [#allocation10], 1 }
 0x310   :  { %2507 = vsyncpa [#allocation13], 1 }
 0x311   :  { %2508 = vsyncpa [#allocation5], 1 }

</bundles_post_ra>
